<compile_context>
chip_gen: v5e
topology: v5e:2x2
jax: 0.10.0
libtpu: 0.0.40
codegen_flags: <defaults>
</compile_context>

<pallas_src>
import functools

import jax
import jax.numpy as jnp
from jax import lax
from jax.experimental import pallas as pl
from jax.experimental.pallas import tpu as pltpu


def _round_up(x, m):
    return (x + m - 1) // m * m


def _conv_block_kernel(x_ref, w_ref, b_ref, o_ref, *scratch,
                       bb, H, W, KH, KW, downsample):
    """One batch-block: in-kernel tap accumulation, bias + ReLU, optional fused 2x2 max pool.

    x_ref : (bb, H+KH-1, W+KW-1, Cin)  'same'-padded NHWC input block (compute dtype)
    w_ref : (KH*KW, Cin, CP)           per-tap filter slabs, Cout zero-padded to CP (lane-dense)
    b_ref : (1, CP)                    f32 bias, zero-padded
    o_ref : (bb*Ho*Wo, CP)             output block, compute dtype (lane-dense)
    """
    Cin = x_ref.shape[-1]
    CP = w_ref.shape[-1]
    M = bb * H * W

    # Accumulate the KH*KW taps with f32 MXU accumulation.  The HBM->VMEM DMA of the input block
    # happens once (via the BlockSpec); the shifted windows below are VMEM-local loads.
    acc = None
    for ky in range(KH):
        for kx in range(KW):
            t = ky * KW + kx
            xt = x_ref[:, ky:ky + H, kx:kx + W, :].reshape(M, Cin)
            d = jnp.dot(xt, w_ref[t], preferred_element_type=jnp.float32)
            acc = d if acc is None else acc + d

    # Bias + ReLU on the lane-dense (CP = multiple of 128) accumulator.
    y = jnp.maximum(acc + b_ref[...], 0.0)

    if not downsample:
        o_ref[...] = y.astype(o_ref.dtype)
        return

    Ho, Wo = H // 2, W // 2
    (pool,) = scratch                                # VMEM (bb*H, W, CP), compute dtype
    # Leading-dim-only split (layout-preserving when W % 8 == 0).  Single cast to compute dtype:
    # max pooling commutes with the monotonic cast, so this equals pool-then-cast exactly.
    pool[...] = y.reshape(bb * H, W, CP).astype(pool.dtype)
    # 2x2 / stride-2 max pool as ONE 4-way max of lane-dense strided reads (no intermediate
    # store + reload).  Row pairs (2h, 2h+1) never cross images because H is even.
    o_ref[...] = jnp.maximum(
        jnp.maximum(pool[pl.ds(0, bb * Ho, stride=2), pl.ds(0, Wo, stride=2)],
                    pool[pl.ds(0, bb * Ho, stride=2), pl.ds(1, Wo, stride=2)]),
        jnp.maximum(pool[pl.ds(1, bb * Ho, stride=2), pl.ds(0, Wo, stride=2)],
                    pool[pl.ds(1, bb * Ho, stride=2), pl.ds(1, Wo, stride=2)]),
    ).reshape(bb * Ho * Wo, CP).astype(o_ref.dtype)


def conv_block(x_nchw, w_oihw, bias, *, downsample=False, use_norm=False,
               compute_dtype=jnp.bfloat16):
    """ConvBlock forward: Conv2d(padding='same') + ReLU (+ MaxPool2d(2,2) if downsample)."""
    if use_norm:
        raise NotImplementedError(
            "TODO(synk): BatchNorm2d (use_norm=True) is not implemented in the Pallas kernel.")

    B, Cin, H, W = x_nchw.shape
    Cout, Cin_w, KH, KW = w_oihw.shape
    assert Cin_w == Cin, (Cin_w, Cin)
    assert KH % 2 == 1 and KW % 2 == 1, "padding='same' path implemented for odd kernel sizes"
    if downsample:
        assert H % 2 == 0 and W % 2 == 0, "MaxPool2d(2,2) path assumes even H and W"

    ph, pw = KH // 2, KW // 2
    Hp, Wp = H + 2 * ph, W + 2 * pw
    Ho, Wo = (H // 2, W // 2) if downsample else (H, W)
    CP = _round_up(Cout, 128)                       # lane-dense (padded) channel count
    itemsize = jnp.dtype(compute_dtype).itemsize

    # ---- wrapper-side prep: ONE padded NHWC copy of the input (no 9x im2col inflation) --------
    x = jnp.transpose(x_nchw, (0, 2, 3, 1)).astype(compute_dtype)       # NCHW -> NHWC
    x_pad = jnp.pad(x, ((0, 0), (ph, ph), (pw, pw), (0, 0)))            # 'same' zero pad

    # Filters OIHW -> (KH*KW, Cin, CP) per-tap slabs, Cout zero-padded up to CP (lane-dense).
    w = jnp.transpose(w_oihw, (2, 3, 1, 0)).astype(compute_dtype)       # (KH, KW, Cin, Cout)
    w = jnp.pad(w, ((0, 0), (0, 0), (0, 0), (0, CP - Cout))).reshape(KH * KW, Cin, CP)
    b2 = jnp.pad(bias.astype(jnp.float32).reshape(1, Cout), ((0, 0), (0, CP - Cout)))

    # ---- generation-aware VMEM budgeting -------------------------------------------------------
    try:
        vmem_phys = int(pltpu.get_tpu_info().vmem_capacity_bytes)
    except Exception:
        vmem_phys = 64 * 1024 * 1024                # conservative (v7x-sized) fallback
    vmem_cap = min(int(vmem_phys * 0.85), 56 * 1024 * 1024)   # never exceed v7x's 64 MiB physical
    step_budget = int(vmem_cap * 0.75)              # headroom for Mosaic internal scratch

    cin_p = _round_up(Cin, 128)                     # stored-tile lane padding

    def est_vmem(bb):
        m, mo = bb * H * W, bb * Ho * Wo
        in_b = 2 * bb * Hp * _round_up(Wp, 8) * cin_p * itemsize          # double-buffered input
        out_b = 2 * _round_up(mo, 8) * CP * itemsize                      # double-buffered output
        wgt_b = 2 * KH * KW * _round_up(Cin, 8) * CP * itemsize           # conservative: 2 bufs
        bias_b = 8 * CP * 4
        acc_b = 2 * _round_up(m, 8) * CP * 4                              # f32 acc + epilogue val
        tap_b = _round_up(m, 8) * cin_p * itemsize                        # shifted-tap temporary
        pool_b = bb * H * _round_up(W, 8) * CP * itemsize if downsample else 0
        return in_b + out_b + wgt_b + bias_b + acc_b + tap_b + pool_b

    # ---- batch-block size: biggest block that fits, preferring an even number (>=2) of steps ---
    divisors = [d for d in range(1, B + 1) if B % d == 0]
    feas = [d for d in divisors
            if est_vmem(d) <= step_budget and ((d * Ho * Wo) % 8 == 0 or d == B)]
    if not feas:
        feas = [d for d in divisors if (d * Ho * Wo) % 8 == 0 or d == B] or [B]

    def _score(d):
        steps = B // d
        return (steps >= 2 and steps % 2 == 0, steps >= 2, d)

    bb = max(feas, key=_score)
    TMo = bb * Ho * Wo
    grid = (B // bb,)
    vlim = min(vmem_cap, max(est_vmem(bb) * 5 // 4, 16 * 1024 * 1024))

    kernel = functools.partial(_conv_block_kernel, bb=bb, H=H, W=W, KH=KH, KW=KW,
                               downsample=downsample)
    scratch = [pltpu.VMEM((bb * H, W, CP), compute_dtype)] if downsample else []

    def _run(single_buffer_params):
        resident = dict(pipeline_mode=pl.Buffered(1)) if single_buffer_params else {}
        return pl.pallas_call(
            kernel,
            out_shape=jax.ShapeDtypeStruct((B * Ho * Wo, CP), compute_dtype),
            grid=grid,
            in_specs=[
                pl.BlockSpec((bb, Hp, Wp, Cin), lambda i: (i, 0, 0, 0)),    # padded input block
                pl.BlockSpec((KH * KW, Cin, CP), lambda i: (0, 0, 0), **resident),   # filters
                pl.BlockSpec((1, CP), lambda i: (0, 0), **resident),                 # bias
            ],
            out_specs=pl.BlockSpec((TMo, CP), lambda i: (i, 0)),
            scratch_shapes=scratch,
            compiler_params=pltpu.CompilerParams(
                dimension_semantics=("parallel",), vmem_limit_bytes=vlim),
        )(x_pad, w, b2)

    try:
        out_flat = _run(True)       # grid-invariant weights/bias: single-buffered (saves VMEM)
    except Exception:
        out_flat = _run(False)      # fallback if pipeline_mode=pl.Buffered(1) is not accepted

    out = out_flat.reshape(B, Ho, Wo, CP)[..., :Cout]                  # drop channel padding
    return jnp.transpose(out, (0, 3, 1, 2)).astype(x_nchw.dtype)       # NHWC -> NCHW


def _reference(x_nchw, w_oihw, bias, *, downsample=False):
    """Pure-JAX reference (matches PyTorch NCHW semantics)."""
    y = lax.conv_general_dilated(x_nchw, w_oihw, (1, 1), "SAME",
                                 dimension_numbers=("NCHW", "OIHW", "NCHW"))
    y = jax.nn.relu(y + bias[None, :, None, None])
    if downsample:
        y = lax.reduce_window(y, -jnp.inf, lax.max, (1, 1, 2, 2), (1, 1, 2, 2), "VALID")
    return y


if __name__ == "__main__":
    key = jax.random.PRNGKey(0)
    kx, kw, kb = jax.random.split(key, 3)

    # Small shapes implied by the module's forward (NCHW conv input).
    B, Cin, Cout, H, W, K = 2, 4, 8, 16, 16, 3
    x = jax.random.normal(kx, (B, Cin, H, W), jnp.float32)

    # Deterministic PyTorch-like init (Conv2d weight OIHW, per-out-channel bias).
    fan_in = Cin * K * K
    bound = 1.0 / (fan_in ** 0.5)
    w = jax.random.uniform(kw, (Cout, Cin, K, K), jnp.float32, -bound, bound)
    b = jax.random.uniform(kb, (Cout,), jnp.float32, -bound, bound)

    for ds in (False, True):   # default block, and downsample=True variant
        ref = _reference(x, w, b, downsample=ds)

        # Default bf16 MXU path (f32 accumulation, bf16 writeback) — bf16-level tolerance.
        out_bf16 = jax.block_until_ready(conv_block(x, w, b, downsample=ds))
        assert out_bf16.shape == ref.shape, (out_bf16.shape, ref.shape)
        assert jnp.allclose(out_bf16, ref, atol=3e-2, rtol=3e-2), f"bf16 mismatch (ds={ds})"

        # Full-f32 compute path — tight tolerance.
        out_f32 = jax.block_until_ready(
            conv_block(x, w, b, downsample=ds, compute_dtype=jnp.float32))
        assert out_f32.shape == ref.shape, (out_f32.shape, ref.shape)
        assert jnp.allclose(out_f32, ref, atol=5e-3, rtol=5e-3), f"f32 mismatch (ds={ds})"

    print("KERNEL_OK")
</pallas_src>

<mosaic_0001>
module attributes {stable_mosaic.version = 11 : i64} {
  func.func @_conv_block_kernel(%arg0: i32, %arg1: memref<1x18x18x4xbf16, #tpu.memory_space<vmem>>, %arg2: memref<9x4x128xbf16, #tpu.memory_space<vmem>>, %arg3: memref<1x128xf32, #tpu.memory_space<vmem>>, %arg4: memref<256x128xbf16, #tpu.memory_space<vmem>>) attributes {dimension_semantics = [#tpu.dimension_semantics<parallel>], iteration_bounds = array<i64: 2>, scalar_prefetch = 0 : i64, scratch_operands = 0 : i64, tpu.core_type = #tpu.core_type<tc>, window_params = [{transform_indices = @transform_0, window_bounds = array<i64: 1, 18, 18, 4>}, {pipeline_mode = #tpu.pipeline_mode<synchronous>, transform_indices = @transform_1, window_bounds = array<i64: 9, 4, 128>}, {pipeline_mode = #tpu.pipeline_mode<synchronous>, transform_indices = @transform_2, window_bounds = array<i64: 1, 128>}, {transform_indices = @transform_3, window_bounds = array<i64: 256, 128>}]} {
    %c0 = arith.constant 0 : index
    %c0_0 = arith.constant 0 : index
    %c0_1 = arith.constant 0 : index
    %c0_2 = arith.constant 0 : index
    %0 = vector.load %arg1[%c0, %c0_0, %c0_1, %c0_2] : memref<1x18x18x4xbf16, #tpu.memory_space<vmem>>, vector<1x16x16x4xbf16>
    %1 = vector.shape_cast %0 : vector<1x16x16x4xbf16> to vector<256x4xbf16>
    %c0_3 = arith.constant 0 : index
    %c0_4 = arith.constant 0 : index
    %c0_5 = arith.constant 0 : index
    %2 = vector.load %arg2[%c0_3, %c0_4, %c0_5] : memref<9x4x128xbf16, #tpu.memory_space<vmem>>, vector<1x4x128xbf16>
    %3 = vector.shape_cast %2 : vector<1x4x128xbf16> to vector<4x128xbf16>
    %cst = arith.constant dense<0.000000e+00> : vector<256x128xf32>
    %4 = tpu.matmul %1, %3, %cst {dimension_numbers = #tpu.dot_dimension_numbers<[1], [0], [0], [1], [0, 0, 1, 1], [], []>} : vector<256x4xbf16>, vector<4x128xbf16>, vector<256x128xf32> -> vector<256x128xf32>
    %c0_6 = arith.constant 0 : index
    %c0_7 = arith.constant 0 : index
    %c1 = arith.constant 1 : index
    %c0_8 = arith.constant 0 : index
    %5 = vector.load %arg1[%c0_6, %c0_7, %c1, %c0_8] : memref<1x18x18x4xbf16, #tpu.memory_space<vmem>>, vector<1x16x16x4xbf16>
    %6 = vector.shape_cast %5 : vector<1x16x16x4xbf16> to vector<256x4xbf16>
    %c1_9 = arith.constant 1 : index
    %c0_10 = arith.constant 0 : index
    %c0_11 = arith.constant 0 : index
    %7 = vector.load %arg2[%c1_9, %c0_10, %c0_11] : memref<9x4x128xbf16, #tpu.memory_space<vmem>>, vector<1x4x128xbf16>
    %8 = vector.shape_cast %7 : vector<1x4x128xbf16> to vector<4x128xbf16>
    %cst_12 = arith.constant dense<0.000000e+00> : vector<256x128xf32>
    %9 = tpu.matmul %6, %8, %cst_12 {dimension_numbers = #tpu.dot_dimension_numbers<[1], [0], [0], [1], [0, 0, 1, 1], [], []>} : vector<256x4xbf16>, vector<4x128xbf16>, vector<256x128xf32> -> vector<256x128xf32>
    %10 = arith.addf %4, %9 : vector<256x128xf32>
    %c0_13 = arith.constant 0 : index
    %c0_14 = arith.constant 0 : index
    %c2 = arith.constant 2 : index
    %c0_15 = arith.constant 0 : index
    %11 = vector.load %arg1[%c0_13, %c0_14, %c2, %c0_15] : memref<1x18x18x4xbf16, #tpu.memory_space<vmem>>, vector<1x16x16x4xbf16>
    %12 = vector.shape_cast %11 : vector<1x16x16x4xbf16> to vector<256x4xbf16>
    %c2_16 = arith.constant 2 : index
    %c0_17 = arith.constant 0 : index
    %c0_18 = arith.constant 0 : index
    %13 = vector.load %arg2[%c2_16, %c0_17, %c0_18] : memref<9x4x128xbf16, #tpu.memory_space<vmem>>, vector<1x4x128xbf16>
    %14 = vector.shape_cast %13 : vector<1x4x128xbf16> to vector<4x128xbf16>
    %cst_19 = arith.constant dense<0.000000e+00> : vector<256x128xf32>
    %15 = tpu.matmul %12, %14, %cst_19 {dimension_numbers = #tpu.dot_dimension_numbers<[1], [0], [0], [1], [0, 0, 1, 1], [], []>} : vector<256x4xbf16>, vector<4x128xbf16>, vector<256x128xf32> -> vector<256x128xf32>
    %16 = arith.addf %10, %15 : vector<256x128xf32>
    %c0_20 = arith.constant 0 : index
    %c1_21 = arith.constant 1 : index
    %c0_22 = arith.constant 0 : index
    %c0_23 = arith.constant 0 : index
    %17 = vector.load %arg1[%c0_20, %c1_21, %c0_22, %c0_23] : memref<1x18x18x4xbf16, #tpu.memory_space<vmem>>, vector<1x16x16x4xbf16>
    %18 = vector.shape_cast %17 : vector<1x16x16x4xbf16> to vector<256x4xbf16>
    %c3 = arith.constant 3 : index
    %c0_24 = arith.constant 0 : index
    %c0_25 = arith.constant 0 : index
    %19 = vector.load %arg2[%c3, %c0_24, %c0_25] : memref<9x4x128xbf16, #tpu.memory_space<vmem>>, vector<1x4x128xbf16>
    %20 = vector.shape_cast %19 : vector<1x4x128xbf16> to vector<4x128xbf16>
    %cst_26 = arith.constant dense<0.000000e+00> : vector<256x128xf32>
    %21 = tpu.matmul %18, %20, %cst_26 {dimension_numbers = #tpu.dot_dimension_numbers<[1], [0], [0], [1], [0, 0, 1, 1], [], []>} : vector<256x4xbf16>, vector<4x128xbf16>, vector<256x128xf32> -> vector<256x128xf32>
    %22 = arith.addf %16, %21 : vector<256x128xf32>
    %c0_27 = arith.constant 0 : index
    %c1_28 = arith.constant 1 : index
    %c1_29 = arith.constant 1 : index
    %c0_30 = arith.constant 0 : index
    %23 = vector.load %arg1[%c0_27, %c1_28, %c1_29, %c0_30] : memref<1x18x18x4xbf16, #tpu.memory_space<vmem>>, vector<1x16x16x4xbf16>
    %24 = vector.shape_cast %23 : vector<1x16x16x4xbf16> to vector<256x4xbf16>
    %c4 = arith.constant 4 : index
    %c0_31 = arith.constant 0 : index
    %c0_32 = arith.constant 0 : index
    %25 = vector.load %arg2[%c4, %c0_31, %c0_32] : memref<9x4x128xbf16, #tpu.memory_space<vmem>>, vector<1x4x128xbf16>
    %26 = vector.shape_cast %25 : vector<1x4x128xbf16> to vector<4x128xbf16>
    %cst_33 = arith.constant dense<0.000000e+00> : vector<256x128xf32>
    %27 = tpu.matmul %24, %26, %cst_33 {dimension_numbers = #tpu.dot_dimension_numbers<[1], [0], [0], [1], [0, 0, 1, 1], [], []>} : vector<256x4xbf16>, vector<4x128xbf16>, vector<256x128xf32> -> vector<256x128xf32>
    %28 = arith.addf %22, %27 : vector<256x128xf32>
    %c0_34 = arith.constant 0 : index
    %c1_35 = arith.constant 1 : index
    %c2_36 = arith.constant 2 : index
    %c0_37 = arith.constant 0 : index
    %29 = vector.load %arg1[%c0_34, %c1_35, %c2_36, %c0_37] : memref<1x18x18x4xbf16, #tpu.memory_space<vmem>>, vector<1x16x16x4xbf16>
    %30 = vector.shape_cast %29 : vector<1x16x16x4xbf16> to vector<256x4xbf16>
    %c5 = arith.constant 5 : index
    %c0_38 = arith.constant 0 : index
    %c0_39 = arith.constant 0 : index
    %31 = vector.load %arg2[%c5, %c0_38, %c0_39] : memref<9x4x128xbf16, #tpu.memory_space<vmem>>, vector<1x4x128xbf16>
    %32 = vector.shape_cast %31 : vector<1x4x128xbf16> to vector<4x128xbf16>
    %cst_40 = arith.constant dense<0.000000e+00> : vector<256x128xf32>
    %33 = tpu.matmul %30, %32, %cst_40 {dimension_numbers = #tpu.dot_dimension_numbers<[1], [0], [0], [1], [0, 0, 1, 1], [], []>} : vector<256x4xbf16>, vector<4x128xbf16>, vector<256x128xf32> -> vector<256x128xf32>
    %34 = arith.addf %28, %33 : vector<256x128xf32>
    %c0_41 = arith.constant 0 : index
    %c2_42 = arith.constant 2 : index
    %c0_43 = arith.constant 0 : index
    %c0_44 = arith.constant 0 : index
    %35 = vector.load %arg1[%c0_41, %c2_42, %c0_43, %c0_44] : memref<1x18x18x4xbf16, #tpu.memory_space<vmem>>, vector<1x16x16x4xbf16>
    %36 = vector.shape_cast %35 : vector<1x16x16x4xbf16> to vector<256x4xbf16>
    %c6 = arith.constant 6 : index
    %c0_45 = arith.constant 0 : index
    %c0_46 = arith.constant 0 : index
    %37 = vector.load %arg2[%c6, %c0_45, %c0_46] : memref<9x4x128xbf16, #tpu.memory_space<vmem>>, vector<1x4x128xbf16>
    %38 = vector.shape_cast %37 : vector<1x4x128xbf16> to vector<4x128xbf16>
    %cst_47 = arith.constant dense<0.000000e+00> : vector<256x128xf32>
    %39 = tpu.matmul %36, %38, %cst_47 {dimension_numbers = #tpu.dot_dimension_numbers<[1], [0], [0], [1], [0, 0, 1, 1], [], []>} : vector<256x4xbf16>, vector<4x128xbf16>, vector<256x128xf32> -> vector<256x128xf32>
    %40 = arith.addf %34, %39 : vector<256x128xf32>
    %c0_48 = arith.constant 0 : index
    %c2_49 = arith.constant 2 : index
    %c1_50 = arith.constant 1 : index
    %c0_51 = arith.constant 0 : index
    %41 = vector.load %arg1[%c0_48, %c2_49, %c1_50, %c0_51] : memref<1x18x18x4xbf16, #tpu.memory_space<vmem>>, vector<1x16x16x4xbf16>
    %42 = vector.shape_cast %41 : vector<1x16x16x4xbf16> to vector<256x4xbf16>
    %c7 = arith.constant 7 : index
    %c0_52 = arith.constant 0 : index
    %c0_53 = arith.constant 0 : index
    %43 = vector.load %arg2[%c7, %c0_52, %c0_53] : memref<9x4x128xbf16, #tpu.memory_space<vmem>>, vector<1x4x128xbf16>
    %44 = vector.shape_cast %43 : vector<1x4x128xbf16> to vector<4x128xbf16>
    %cst_54 = arith.constant dense<0.000000e+00> : vector<256x128xf32>
    %45 = tpu.matmul %42, %44, %cst_54 {dimension_numbers = #tpu.dot_dimension_numbers<[1], [0], [0], [1], [0, 0, 1, 1], [], []>} : vector<256x4xbf16>, vector<4x128xbf16>, vector<256x128xf32> -> vector<256x128xf32>
    %46 = arith.addf %40, %45 : vector<256x128xf32>
    %c0_55 = arith.constant 0 : index
    %c2_56 = arith.constant 2 : index
    %c2_57 = arith.constant 2 : index
    %c0_58 = arith.constant 0 : index
    %47 = vector.load %arg1[%c0_55, %c2_56, %c2_57, %c0_58] : memref<1x18x18x4xbf16, #tpu.memory_space<vmem>>, vector<1x16x16x4xbf16>
    %48 = vector.shape_cast %47 : vector<1x16x16x4xbf16> to vector<256x4xbf16>
    %c8 = arith.constant 8 : index
    %c0_59 = arith.constant 0 : index
    %c0_60 = arith.constant 0 : index
    %49 = vector.load %arg2[%c8, %c0_59, %c0_60] : memref<9x4x128xbf16, #tpu.memory_space<vmem>>, vector<1x4x128xbf16>
    %50 = vector.shape_cast %49 : vector<1x4x128xbf16> to vector<4x128xbf16>
    %cst_61 = arith.constant dense<0.000000e+00> : vector<256x128xf32>
    %51 = tpu.matmul %48, %50, %cst_61 {dimension_numbers = #tpu.dot_dimension_numbers<[1], [0], [0], [1], [0, 0, 1, 1], [], []>} : vector<256x4xbf16>, vector<4x128xbf16>, vector<256x128xf32> -> vector<256x128xf32>
    %52 = arith.addf %46, %51 : vector<256x128xf32>
    %c0_62 = arith.constant 0 : index
    %c0_63 = arith.constant 0 : index
    %53 = vector.load %arg3[%c0_62, %c0_63] : memref<1x128xf32, #tpu.memory_space<vmem>>, vector<1x128xf32>
    %54 = vector.broadcast %53 : vector<1x128xf32> to vector<256x128xf32>
    %55 = arith.addf %52, %54 : vector<256x128xf32>
    %cst_64 = arith.constant 0.000000e+00 : f32
    %56 = vector.broadcast %cst_64 : f32 to vector<256x128xf32>
    %57 = arith.maximumf %55, %56 : vector<256x128xf32>
    %58 = arith.truncf %57 : vector<256x128xf32> to vector<256x128xbf16>
    %c0_65 = arith.constant 0 : index
    %c0_66 = arith.constant 0 : index
    %59 = vector.load %arg4[%c0_65, %c0_66] : memref<256x128xbf16, #tpu.memory_space<vmem>>, vector<256x128xbf16>
    tpu.vector_store %arg4[%c0_65, %c0_66], %58 {strides = array<i32>} : memref<256x128xbf16, #tpu.memory_space<vmem>>, vector<256x128xbf16>,
    return
  }
  func.func @transform_0(%arg0: i32) -> (i32, i32, i32, i32) {
    %c0_i32 = arith.constant 0 : i32
    %c0_i32_0 = arith.constant 0 : i32
    %c0_i32_1 = arith.constant 0 : i32
    %c0_i32_2 = arith.constant 0 : i32
    return %arg0, %c0_i32, %c0_i32_0, %c0_i32_1 : i32, i32, i32, i32
  }
  func.func @transform_1(%arg0: i32) -> (i32, i32, i32) {
    %c0_i32 = arith.constant 0 : i32
    %c0_i32_0 = arith.constant 0 : i32
    %c0_i32_1 = arith.constant 0 : i32
    %c0_i32_2 = arith.constant 0 : i32
    return %c0_i32, %c0_i32_0, %c0_i32_1 : i32, i32, i32
  }
  func.func @transform_2(%arg0: i32) -> (i32, i32) {
    %c0_i32 = arith.constant 0 : i32
    %c0_i32_0 = arith.constant 0 : i32
    %c0_i32_1 = arith.constant 0 : i32
    return %c0_i32, %c0_i32_0 : i32, i32
  }
  func.func @transform_3(%arg0: i32) -> (i32, i32) {
    %c0_i32 = arith.constant 0 : i32
    %c0_i32_0 = arith.constant 0 : i32
    return %arg0, %c0_i32 : i32, i32
  }
}

module attributes {stable_mosaic.version = 11 : i64} {
  func.func @_conv_block_kernel(%arg0: i32, %arg1: memref<1x18x18x4xbf16, #tpu.memory_space<vmem>>, %arg2: memref<9x4x128xbf16, #tpu.memory_space<vmem>>, %arg3: memref<1x128xf32, #tpu.memory_space<vmem>>, %arg4: memref<256x128xbf16, #tpu.memory_space<vmem>>) attributes {dimension_semantics = [#tpu.dimension_semantics<parallel>], iteration_bounds = array<i64: 2>, scalar_prefetch = 0 : i64, scratch_operands = 0 : i64, tpu.core_type = #tpu.core_type<tc>, window_params = [{transform_indices = @transform_0, window_bounds = array<i64: 1, 18, 18, 4>}, {pipeline_mode = #tpu.pipeline_mode<synchronous>, transform_indices = @transform_1, window_bounds = array<i64: 9, 4, 128>}, {pipeline_mode = #tpu.pipeline_mode<synchronous>, transform_indices = @transform_2, window_bounds = array<i64: 1, 128>}, {transform_indices = @transform_3, window_bounds = array<i64: 256, 128>}]} {
    %c0 = arith.constant 0 : index
    %c0_0 = arith.constant 0 : index
    %c0_1 = arith.constant 0 : index
    %c0_2 = arith.constant 0 : index
    %0 = vector.load %arg1[%c0, %c0_0, %c0_1, %c0_2] : memref<1x18x18x4xbf16, #tpu.memory_space<vmem>>, vector<1x16x16x4xbf16>
    %1 = vector.shape_cast %0 : vector<1x16x16x4xbf16> to vector<256x4xbf16>
    %c0_3 = arith.constant 0 : index
    %c0_4 = arith.constant 0 : index
    %c0_5 = arith.constant 0 : index
    %2 = vector.load %arg2[%c0_3, %c0_4, %c0_5] : memref<9x4x128xbf16, #tpu.memory_space<vmem>>, vector<1x4x128xbf16>
    %3 = vector.shape_cast %2 : vector<1x4x128xbf16> to vector<4x128xbf16>
    %cst = arith.constant dense<0.000000e+00> : vector<256x128xf32>
    %4 = tpu.matmul %1, %3, %cst {dimension_numbers = #tpu.dot_dimension_numbers<[1], [0], [0], [1], [0, 0, 1, 1], [], []>} : vector<256x4xbf16>, vector<4x128xbf16>, vector<256x128xf32> -> vector<256x128xf32>
    %c0_6 = arith.constant 0 : index
    %c0_7 = arith.constant 0 : index
    %c1 = arith.constant 1 : index
    %c0_8 = arith.constant 0 : index
    %5 = vector.load %arg1[%c0_6, %c0_7, %c1, %c0_8] : memref<1x18x18x4xbf16, #tpu.memory_space<vmem>>, vector<1x16x16x4xbf16>
    %6 = vector.shape_cast %5 : vector<1x16x16x4xbf16> to vector<256x4xbf16>
    %c1_9 = arith.constant 1 : index
    %c0_10 = arith.constant 0 : index
    %c0_11 = arith.constant 0 : index
    %7 = vector.load %arg2[%c1_9, %c0_10, %c0_11] : memref<9x4x128xbf16, #tpu.memory_space<vmem>>, vector<1x4x128xbf16>
    %8 = vector.shape_cast %7 : vector<1x4x128xbf16> to vector<4x128xbf16>
    %cst_12 = arith.constant dense<0.000000e+00> : vector<256x128xf32>
    %9 = tpu.matmul %6, %8, %cst_12 {dimension_numbers = #tpu.dot_dimension_numbers<[1], [0], [0], [1], [0, 0, 1, 1], [], []>} : vector<256x4xbf16>, vector<4x128xbf16>, vector<256x128xf32> -> vector<256x128xf32>
    %10 = arith.addf %4, %9 : vector<256x128xf32>
    %c0_13 = arith.constant 0 : index
    %c0_14 = arith.constant 0 : index
    %c2 = arith.constant 2 : index
    %c0_15 = arith.constant 0 : index
    %11 = vector.load %arg1[%c0_13, %c0_14, %c2, %c0_15] : memref<1x18x18x4xbf16, #tpu.memory_space<vmem>>, vector<1x16x16x4xbf16>
    %12 = vector.shape_cast %11 : vector<1x16x16x4xbf16> to vector<256x4xbf16>
    %c2_16 = arith.constant 2 : index
    %c0_17 = arith.constant 0 : index
    %c0_18 = arith.constant 0 : index
    %13 = vector.load %arg2[%c2_16, %c0_17, %c0_18] : memref<9x4x128xbf16, #tpu.memory_space<vmem>>, vector<1x4x128xbf16>
    %14 = vector.shape_cast %13 : vector<1x4x128xbf16> to vector<4x128xbf16>
    %cst_19 = arith.constant dense<0.000000e+00> : vector<256x128xf32>
    %15 = tpu.matmul %12, %14, %cst_19 {dimension_numbers = #tpu.dot_dimension_numbers<[1], [0], [0], [1], [0, 0, 1, 1], [], []>} : vector<256x4xbf16>, vector<4x128xbf16>, vector<256x128xf32> -> vector<256x128xf32>
    %16 = arith.addf %10, %15 : vector<256x128xf32>
    %c0_20 = arith.constant 0 : index
    %c1_21 = arith.constant 1 : index
    %c0_22 = arith.constant 0 : index
    %c0_23 = arith.constant 0 : index
    %17 = vector.load %arg1[%c0_20, %c1_21, %c0_22, %c0_23] : memref<1x18x18x4xbf16, #tpu.memory_space<vmem>>, vector<1x16x16x4xbf16>
    %18 = vector.shape_cast %17 : vector<1x16x16x4xbf16> to vector<256x4xbf16>
    %c3 = arith.constant 3 : index
    %c0_24 = arith.constant 0 : index
    %c0_25 = arith.constant 0 : index
    %19 = vector.load %arg2[%c3, %c0_24, %c0_25] : memref<9x4x128xbf16, #tpu.memory_space<vmem>>, vector<1x4x128xbf16>
    %20 = vector.shape_cast %19 : vector<1x4x128xbf16> to vector<4x128xbf16>
    %cst_26 = arith.constant dense<0.000000e+00> : vector<256x128xf32>
    %21 = tpu.matmul %18, %20, %cst_26 {dimension_numbers = #tpu.dot_dimension_numbers<[1], [0], [0], [1], [0, 0, 1, 1], [], []>} : vector<256x4xbf16>, vector<4x128xbf16>, vector<256x128xf32> -> vector<256x128xf32>
    %22 = arith.addf %16, %21 : vector<256x128xf32>
    %c0_27 = arith.constant 0 : index
    %c1_28 = arith.constant 1 : index
    %c1_29 = arith.constant 1 : index
    %c0_30 = arith.constant 0 : index
    %23 = vector.load %arg1[%c0_27, %c1_28, %c1_29, %c0_30] : memref<1x18x18x4xbf16, #tpu.memory_space<vmem>>, vector<1x16x16x4xbf16>
    %24 = vector.shape_cast %23 : vector<1x16x16x4xbf16> to vector<256x4xbf16>
    %c4 = arith.constant 4 : index
    %c0_31 = arith.constant 0 : index
    %c0_32 = arith.constant 0 : index
    %25 = vector.load %arg2[%c4, %c0_31, %c0_32] : memref<9x4x128xbf16, #tpu.memory_space<vmem>>, vector<1x4x128xbf16>
    %26 = vector.shape_cast %25 : vector<1x4x128xbf16> to vector<4x128xbf16>
    %cst_33 = arith.constant dense<0.000000e+00> : vector<256x128xf32>
    %27 = tpu.matmul %24, %26, %cst_33 {dimension_numbers = #tpu.dot_dimension_numbers<[1], [0], [0], [1], [0, 0, 1, 1], [], []>} : vector<256x4xbf16>, vector<4x128xbf16>, vector<256x128xf32> -> vector<256x128xf32>
    %28 = arith.addf %22, %27 : vector<256x128xf32>
    %c0_34 = arith.constant 0 : index
    %c1_35 = arith.constant 1 : index
    %c2_36 = arith.constant 2 : index
    %c0_37 = arith.constant 0 : index
    %29 = vector.load %arg1[%c0_34, %c1_35, %c2_36, %c0_37] : memref<1x18x18x4xbf16, #tpu.memory_space<vmem>>, vector<1x16x16x4xbf16>
    %30 = vector.shape_cast %29 : vector<1x16x16x4xbf16> to vector<256x4xbf16>
    %c5 = arith.constant 5 : index
    %c0_38 = arith.constant 0 : index
    %c0_39 = arith.constant 0 : index
    %31 = vector.load %arg2[%c5, %c0_38, %c0_39] : memref<9x4x128xbf16, #tpu.memory_space<vmem>>, vector<1x4x128xbf16>
    %32 = vector.shape_cast %31 : vector<1x4x128xbf16> to vector<4x128xbf16>
    %cst_40 = arith.constant dense<0.000000e+00> : vector<256x128xf32>
    %33 = tpu.matmul %30, %32, %cst_40 {dimension_numbers = #tpu.dot_dimension_numbers<[1], [0], [0], [1], [0, 0, 1, 1], [], []>} : vector<256x4xbf16>, vector<4x128xbf16>, vector<256x128xf32> -> vector<256x128xf32>
    %34 = arith.addf %28, %33 : vector<256x128xf32>
    %c0_41 = arith.constant 0 : index
    %c2_42 = arith.constant 2 : index
    %c0_43 = arith.constant 0 : index
    %c0_44 = arith.constant 0 : index
    %35 = vector.load %arg1[%c0_41, %c2_42, %c0_43, %c0_44] : memref<1x18x18x4xbf16, #tpu.memory_space<vmem>>, vector<1x16x16x4xbf16>
    %36 = vector.shape_cast %35 : vector<1x16x16x4xbf16> to vector<256x4xbf16>
    %c6 = arith.constant 6 : index
    %c0_45 = arith.constant 0 : index
    %c0_46 = arith.constant 0 : index
    %37 = vector.load %arg2[%c6, %c0_45, %c0_46] : memref<9x4x128xbf16, #tpu.memory_space<vmem>>, vector<1x4x128xbf16>
    %38 = vector.shape_cast %37 : vector<1x4x128xbf16> to vector<4x128xbf16>
    %cst_47 = arith.constant dense<0.000000e+00> : vector<256x128xf32>
    %39 = tpu.matmul %36, %38, %cst_47 {dimension_numbers = #tpu.dot_dimension_numbers<[1], [0], [0], [1], [0, 0, 1, 1], [], []>} : vector<256x4xbf16>, vector<4x128xbf16>, vector<256x128xf32> -> vector<256x128xf32>
    %40 = arith.addf %34, %39 : vector<256x128xf32>
    %c0_48 = arith.constant 0 : index
    %c2_49 = arith.constant 2 : index
    %c1_50 = arith.constant 1 : index
    %c0_51 = arith.constant 0 : index
    %41 = vector.load %arg1[%c0_48, %c2_49, %c1_50, %c0_51] : memref<1x18x18x4xbf16, #tpu.memory_space<vmem>>, vector<1x16x16x4xbf16>
    %42 = vector.shape_cast %41 : vector<1x16x16x4xbf16> to vector<256x4xbf16>
    %c7 = arith.constant 7 : index
    %c0_52 = arith.constant 0 : index
    %c0_53 = arith.constant 0 : index
    %43 = vector.load %arg2[%c7, %c0_52, %c0_53] : memref<9x4x128xbf16, #tpu.memory_space<vmem>>, vector<1x4x128xbf16>
    %44 = vector.shape_cast %43 : vector<1x4x128xbf16> to vector<4x128xbf16>
    %cst_54 = arith.constant dense<0.000000e+00> : vector<256x128xf32>
    %45 = tpu.matmul %42, %44, %cst_54 {dimension_numbers = #tpu.dot_dimension_numbers<[1], [0], [0], [1], [0, 0, 1, 1], [], []>} : vector<256x4xbf16>, vector<4x128xbf16>, vector<256x128xf32> -> vector<256x128xf32>
    %46 = arith.addf %40, %45 : vector<256x128xf32>
    %c0_55 = arith.constant 0 : index
    %c2_56 = arith.constant 2 : index
    %c2_57 = arith.constant 2 : index
    %c0_58 = arith.constant 0 : index
    %47 = vector.load %arg1[%c0_55, %c2_56, %c2_57, %c0_58] : memref<1x18x18x4xbf16, #tpu.memory_space<vmem>>, vector<1x16x16x4xbf16>
    %48 = vector.shape_cast %47 : vector<1x16x16x4xbf16> to vector<256x4xbf16>
    %c8 = arith.constant 8 : index
    %c0_59 = arith.constant 0 : index
    %c0_60 = arith.constant 0 : index
    %49 = vector.load %arg2[%c8, %c0_59, %c0_60] : memref<9x4x128xbf16, #tpu.memory_space<vmem>>, vector<1x4x128xbf16>
    %50 = vector.shape_cast %49 : vector<1x4x128xbf16> to vector<4x128xbf16>
    %cst_61 = arith.constant dense<0.000000e+00> : vector<256x128xf32>
    %51 = tpu.matmul %48, %50, %cst_61 {dimension_numbers = #tpu.dot_dimension_numbers<[1], [0], [0], [1], [0, 0, 1, 1], [], []>} : vector<256x4xbf16>, vector<4x128xbf16>, vector<256x128xf32> -> vector<256x128xf32>
    %52 = arith.addf %46, %51 : vector<256x128xf32>
    %c0_62 = arith.constant 0 : index
    %c0_63 = arith.constant 0 : index
    %53 = vector.load %arg3[%c0_62, %c0_63] : memref<1x128xf32, #tpu.memory_space<vmem>>, vector<1x128xf32>
    %54 = vector.broadcast %53 : vector<1x128xf32> to vector<256x128xf32>
    %55 = arith.addf %52, %54 : vector<256x128xf32>
    %cst_64 = arith.constant 0.000000e+00 : f32
    %56 = vector.broadcast %cst_64 : f32 to vector<256x128xf32>
    %57 = arith.maximumf %55, %56 : vector<256x128xf32>
    %58 = arith.truncf %57 : vector<256x128xf32> to vector<256x128xbf16>
    %c0_65 = arith.constant 0 : index
    %c0_66 = arith.constant 0 : index
    %59 = vector.load %arg4[%c0_65, %c0_66] : memref<256x128xbf16, #tpu.memory_space<vmem>>, vector<256x128xbf16>
    tpu.vector_store %arg4[%c0_65, %c0_66], %58 {strides = array<i32>} : memref<256x128xbf16, #tpu.memory_space<vmem>>, vector<256x128xbf16>,
    return
  }
  func.func @transform_0(%arg0: i32) -> (i32, i32, i32, i32) {
    %c0_i32 = arith.constant 0 : i32
    %c0_i32_0 = arith.constant 0 : i32
    %c0_i32_1 = arith.constant 0 : i32
    %c0_i32_2 = arith.constant 0 : i32
    return %arg0, %c0_i32, %c0_i32_0, %c0_i32_1 : i32, i32, i32, i32
  }
  func.func @transform_1(%arg0: i32) -> (i32, i32, i32) {
    %c0_i32 = arith.constant 0 : i32
    %c0_i32_0 = arith.constant 0 : i32
    %c0_i32_1 = arith.constant 0 : i32
    %c0_i32_2 = arith.constant 0 : i32
    return %c0_i32, %c0_i32_0, %c0_i32_1 : i32, i32, i32
  }
  func.func @transform_2(%arg0: i32) -> (i32, i32) {
    %c0_i32 = arith.constant 0 : i32
    %c0_i32_0 = arith.constant 0 : i32
    %c0_i32_1 = arith.constant 0 : i32
    return %c0_i32, %c0_i32_0 : i32, i32
  }
  func.func @transform_3(%arg0: i32) -> (i32, i32) {
    %c0_i32 = arith.constant 0 : i32
    %c0_i32_0 = arith.constant 0 : i32
    return %arg0, %c0_i32 : i32, i32
  }
}

</mosaic_0001>

<bundles_post_ra>
// kernel: tpu_custom_call.1
= control target key start
LH: loop header
LB: loop body
LE: loop exit
PB: predicated region body
PF: predicated region fallthrough
CT: control target
= control target key end

     0   :  { %8 = vsyncpa [#allocation3], 0  ;;  %s6675_s0 = inlined_call_operand.vmem [shape: bf16[2,18,18,4], index: 0, kind: input, shape index: {}]   ;;  %s6676_s1 = inlined_call_operand.vmem [shape: bf16[9,4,128], index: 1, kind: input, shape index: {}]   ;;  %s6677_s2 = inlined_call_operand.vmem [shape: f32[1,128], index: 2, kind: input, shape index: {}]   ;;  %s6678_s3 = inlined_call_operand.hbm [shape: bf16[512,128], index: 3, kind: output, shape index: {}]  }
   0x1   :  { %10 = vsyncpa [#allocation3 + $0x1], 0  ;;  %s5214_s12 = smov 0   ;;  %s5216_s13 = smov 0  }
   0x2   :  { %s5218_s14 = smov 0   ;;  %s5220_s15 = smov 0  }
   0x3 LB: > { %s5235_s16 = sadd.s32 4294967295, %s5190_s15   ;;  %s4292_s17 = sadd.s32 4294967294, %s5190_s15   ;;  %s5190_s15 = sphi %s5220_s15, %s6692_s15   ;;  %s5186_s14 = sphi %s5218_s14, %s6691_s14   ;;  %s5182_s13 = sphi %s5216_s13, %s6690_s13   ;;  %s5178_s12 = sphi %s5214_s12, %s6689_s12  }
   0x4   : > { %s5239_s18 = sadd.s32 1, %s5190_s15   ;;  %s91_s19 = sadd.s32 1, %s5186_s14 }
   0x5   : > { %s88_s20 = ssub.s32 %s5190_s15, %s5239_s18  ;;  %p101_p0 = scmp.ne.s32.totalorder %s5186_s14, %s5182_s13 }
   0x6   : > { %p89_p1 = scmp.eq.s32.totalorder %s88_s20, 0  ;;  %p102_p2 = scmp.eq.s32.totalorder %s5235_s16, 1 }
   0x7   : > { %p107_p3 = scmp.ne.s32.totalorder %s5182_s13, %s5178_s12  ;;  %p108_p4 = scmp.eq.s32.totalorder %s4292_s17, 1 }
   0x8   : > { %s5250_s21 = scalar_select %p89_p1, %s5186_s14, %s91_s19  }
   0x9   : > { %p5252_p5 = por %p102_p2, %p101_p0  ;;  %p5256_p6 = por %p108_p4, %p107_p3 }
   0xa   : > { %p4295_p7 = scmp.ge.s32.totalorder %s5190_s15, 1  ;;  %p140_p8 = scmp.lt.s32.totalorder %s5190_s15, 3 }
   0xc   : > { %p141_p9 = pnand %p4295_p7, %p140_p8 }
   0xe   : > { %144 = sbr.rel (%p141_p9) target bundleno = 772 (0x304), region = 32 }
  0x13   : > { %v4298_v0 = vld [vmem:[%s6676_s1 + $0x2] sm:$0x3]  ;;  %vm706_vm0 = vcmask 1041408   ;;  %p164_p10 = scmp.lt.s32.totalorder %s5235_s16, 1  ;;  %v4411_v2 = vld [vmem:[%s6676_s1 + $0x4] sm:$0x3] }
  0x14   : > { %v708_v1 = vsel %vm706_vm0, %v4298_v0, 0  ;;  %v1281_v3 = vsel %vm706_vm0, %v4411_v2, 0  ;;  %v4460_v4 = vld [vmem:[%s6676_s1 + $0x6] sm:$0x3]  ;;  %v203_v5 = vld [vmem:[%s6676_s1] sm:$0x3] }
  0x15   : > { %5031 = vmatpush.bf16.msra.mxu1 %v708_v1  ;;  %5032 = vmatpush.bf16.msra.mxu2 %v708_v1  ;;  %s165_s28 = scalar_select %p164_p10, %s5235_s16, 1  ;;  %v4589_v6 = vld [vmem:[%s6676_s1 + $0x8] sm:$0x3]  ;;  %v1568_v7 = vsel %vm706_vm0, %v4460_v4, 0  ;;  %v928_v8 = vsel %vm706_vm0, %v203_v5, 0  ;;  %vm657_vm4 = vcmask 31744  }
  0x16   : > { %5033 = vmatpush.bf16.msra.mxu3 %v708_v1  ;;  %717 = vmatpush.bf16.msra.mxu0 %v708_v1  ;;  %v2222_v9 = vsel %vm706_vm0, %v4589_v6, 0  ;;  %vm220_vm1 = vsmask.f32 3328  ;;  %vm221_vm2 = vsmask.f32 7440  ;;  %vm1067_vm5 = vcmask 1042432  }
  0x17   : > { %s5034_s8 = smul.u32 216, %s165_s28  ;;  %vm5299_vm3 = vmor %vm220_vm1, %vm221_vm2  ;;  %vm1068_vm6 = vcmask 1046532   ;;  %s161_s4 = sand.u32 1, %s5182_s13  }
  0x18   : > { %vm5473_vm7 = vmor %vm1067_vm5, %vm1068_vm6  ;;  %s6362_s5 = sshll.u32 %s161_s4, 7  ;;  %s4935_s9 = sshll.u32 %s5235_s16, 7 }
  0x19   : > { %1290 = vmatpush.bf16.msrb.mxu2 %v1281_v3  ;;  %937 = vmatpush.bf16.msrb.mxu1 %v928_v8  ;;  %s5287_s11 = scalar_lea.vmem %s6675_s0, %s5034_s8  ;;  %s6386_s6 = scalar_lea.vmem [#allocation2], %s6362_s5 }
  0x1a   : > { %1577 = vmatpush.bf16.msrb.mxu3 %v1568_v7  ;;  %2231 = vmatpush.bf16.msrb.mxu0 %v2222_v9  ;;  %v179_v10 = vld [vmem:[%s5287_s11 + $0x30] sm:$0xf]  ;;  %v180_v11 = vld [vmem:[%s5287_s11 + $0x34] sm:$0xf]  ;;  %v208_v12 = vld [vmem:[%s5287_s11 + $0x38] sm:$0x1]  ;;  %s4226_s17 = scalar_lea.hbm %s6678_s3, %s4935_s9 }
  0x1b   : > { %v320_v13 = vshrl.u32 %v179_v10, 16  ;;  %v323_v14 = vshll.u32 %v179_v10, 16  ;;  %v329_v15 = vshll.u32 %v180_v11, 16  ;;  %v333_v16 = vshrl.u32 %v180_v11, 16  ;;  %v187_v17 = vld [vmem:[%s5287_s11 + $0x60] sm:$0xf] }
  0x1c   : > { %v339_v18 = vshll.u32 %v208_v12, 16  ;;  %v188_v19 = vld [vmem:[%s5287_s11 + $0x64] sm:$0xf]  ;;  %v212_v20 = vld [vmem:[%s5287_s11 + $0x68] sm:$0x1]  ;;  %v416_v21 = vshrl.u32 %v187_v17, 16 }
  0x1d   : > { %v322_v22 = vrot.slane %v320_v13, 4  ;;  %v325_v23 = vrot.slane %v323_v14, 5  ;;  %v331_v24 = vrot.slane %v329_v15, 5  ;;  %v335_v25 = vrot.slane %v333_v16, 4  ;;  %v195_v26 = vld [vmem:[%s5287_s11 + $0x90] sm:$0xf] }
  0x1e   : > { %v341_v27 = vrot.slane %v339_v18, 5  ;;  %v418_v28 = vrot.slane %v416_v21, 4  ;;  %v419_v29 = vshll.u32 %v187_v17, 16  ;;  %v425_v30 = vshll.u32 %v188_v19, 16  ;;  %v196_v35 = vld [vmem:[%s5287_s11 + $0x94] sm:$0xf] }
  0x1f   : > { %v326_v31 = vor.u32 %v325_v23, %v322_v22  ;;  %v336_v32 = vor.u32 %v335_v25, %v331_v24  ;;  %v429_v33 = vshrl.u32 %v188_v19, 16  ;;  %v435_v34 = vshll.u32 %v212_v20, 16  ;;  %v216_v45 = vld [vmem:[%s5287_s11 + $0x98] sm:$0x1]  ;;  %v171_v61 = vld [vmem:[%s5287_s11] sm:$0xf] }
  0x20   : > { %v421_v37 = vrot.slane %v419_v29, 5  ;;  %v427_v38 = vrot.slane %v425_v30, 5  ;;  %v512_v39 = vshrl.u32 %v195_v26, 16  ;;  %v515_v47 = vshll.u32 %v195_v26, 16  ;;  %v5312_v1 = vld [vmem:[%s5287_s11 + $0x4] sm:$0xf] }
  0x21   : > { %v327_v40 = vrot.slane %v326_v31, 4  ;;  %v337_v41 = vrot.slane %v336_v32, 4  ;;  %v431_v42 = vrot.slane %v429_v33, 4  ;;  %v437_v43 = vrot.slane %v435_v34, 5  ;;  %v5315_v2 = vld [vmem:[%s5287_s11 + $0x8] sm:$0x1] }
  0x22   : > { %v422_v44 = vor.u32 %v421_v37, %v418_v28  ;;  %v514_v46 = vrot.slane %v512_v39, 4  ;;  %v521_v48 = vshll.u32 %v196_v35, 16  ;;  %v525_v52 = vshrl.u32 %v196_v35, 16  ;;  %v181_v19 = vld [vmem:[%s5287_s11 + $0x3c] sm:$0xf]  ;;  %s4227_s19 = sshll.u32 %s6386_s6, 4  ;;  %s4228_s19 = int_to_ptr.vmem [resolvable:$true] %s4227_s19 }
  0x23   : > { %v332_v49 = vsel %vm5299_vm3, %v327_v40, %v331_v24  ;;  %v342_v50 = vsel %vm5299_vm3, %v337_v41, %v341_v27  ;;  %v432_v51 = vor.u32 %v431_v42, %v427_v38  ;;  %v517_v56 = vrot.slane %v515_v47, 5  ;;  %v5327_v20 = vld [vmem:[%s5287_s11 + $0x40] sm:$0xf]  ;;  %v5332_v25 = vld [vmem:[%s5287_s11 + $0x44] sm:$0x1]  ;;  %s4229_s20 = sshll.u32 %s4226_s17, 4  ;;  %s4230_s20 = int_to_ptr.hbm [resolvable:$true] %s4229_s20 }
  0x24   : > { %v617_v53 = vunpack.c.l.b16 %v332_v49  ;;  %v618_v54 = vunpack.c.l.b16 %v342_v50  ;;  %v423_v55 = vrot.slane %v422_v44, 4  ;;  %v523_v58 = vrot.slane %v521_v48, 5  ;;  %v189_v33 = vld [vmem:[%s5287_s11 + $0x6c] sm:$0xf]  ;;  %v213_v47 = vld [vmem:[%s5287_s11 + $0x74] sm:$0x1] }
  0x25   : > { %v433_v57 = vrot.slane %v432_v51, 4  ;;  %v527_v59 = vrot.slane %v525_v52, 4  ;;  %v531_v60 = vshll.u32 %v216_v45, 16  ;;  %v518_v0 = vor.u32 %v517_v56, %v514_v46  ;;  %s4215_s16 = scalar_lea.sflag [#allocation3], %s161_s4  ;;  %s5142_s24 = sshra.s32 %s4230_s20, 4  ;;  %s5143_s24 = int_to_ptr.hbm [resolvable:$true] %s5142_s24 }
  0x26   : > { %v645_v62 = vpack.c.b16 %v618_v54, %v617_v53  ;;  %v428_v63 = vsel %vm5299_vm3, %v423_v55, %v427_v38  ;;  %v224_v9 = vshrl.u32 %v171_v61, 16  ;;  %v227_v10 = vshll.u32 %v171_v61, 16  ;;  %v197_v61 = vld [vmem:[%s5287_s11 + $0x9c] sm:$0xf]  ;;  %s5144_s25 = scalar_lea.hbm %s5143_s24, 128  ;;  %s5148_s28 = scalar_lea.hbm %s6678_s3, 256 }
  0x27   : > { %v438_v3 = vsel %vm5299_vm3, %v433_v57, %v437_v43  ;;  %v625_v4 = vunpack.c.l.b16 %v428_v63  ;;  %v528_v5 = vor.u32 %v527_v59, %v523_v58  ;;  %v533_v6 = vrot.slane %v531_v60, 5  ;;  %v190_v43 = vld [vmem:[%s5287_s11 + $0x70] sm:$0xf]  ;;  %p5145_p11 = scmp.ne.s32.totalorder %s5143_s24, %s5144_s25  ;;  %p5149_p0 = scmp.lt.s32.totalorder %s5143_s24, %s6678_s3 }
  0x28   : > { %4303 = vmatmul.msk.bf16.vlgmr.msra.gmra.mxu1 %vm657_vm4, %v645_v62  ;;  %v626_v7 = vunpack.c.l.b16 %v438_v3  ;;  %v519_v8 = vrot.slane %v518_v0, 4  ;;  %v233_v12 = vshll.u32 %v5312_v1, 16  ;;  %v237_v13 = vshrl.u32 %v5312_v1, 16  ;;  %v198_v3 = vld [vmem:[%s5287_s11 + $0xa0] sm:$0xf]  ;;  %p5150_p1 = scmp.lt.s32.totalorder %s5148_s28, %s5144_s25 }
  0x29   : > { %v529_v11 = vrot.slane %v528_v5, 4  ;;  %v243_v14 = vshll.u32 %v5315_v2, 16  ;;  %v226_v17 = vrot.slane %v224_v9, 4  ;;  %v229_v18 = vrot.slane %v227_v10, 5  ;;  %p5146_p12 = pnand %p5145_p11, %p5252_p5 }
  0x2a   : > { %v649_v15 = vpack.c.b16 %v626_v7, %v625_v4  ;;  %v524_v16 = vsel %vm5299_vm3, %v519_v8, %v523_v58  ;;  %v235_v23 = vrot.slane %v233_v12, 5  ;;  %v239_v24 = vrot.slane %v237_v13, 4  ;;  %v217_v8 = vld [vmem:[%s5287_s11 + $0xa4] sm:$0x1]  ;;  %p5151_p2 = por %p5150_p1, %p5149_p0 }
  0x2b   : > { %v534_v21 = vsel %vm5299_vm3, %v529_v11, %v533_v6  ;;  %v633_v22 = vunpack.c.l.b16 %v524_v16  ;;  %v230_v27 = vor.u32 %v229_v18, %v226_v17  ;;  %v245_v28 = vrot.slane %v243_v14, 5  ;;  %p5147_p13 = pneg %p5146_p12 }
  0x2c   : > { %4307 = vmatmul.msk.bf16.vlgmr.msra.gmra.mxu2 %vm657_vm4, %v649_v15  ;;  %v634_v26 = vunpack.c.l.b16 %v534_v21  ;;  %v240_v29 = vor.u32 %v239_v24, %v235_v23  ;;  %v344_v30 = vshrl.u32 %v181_v19, 16  ;;  %v347_v31 = vshll.u32 %v181_v19, 16 }
  0x2d   : > { %v353_v32 = vshll.u32 %v5327_v20, 16  ;;  %v231_v35 = vrot.slane %v230_v27, 4  ;;  %v357_v37 = vshrl.u32 %v5327_v20, 16  ;;  %v363_v38 = vshll.u32 %v5332_v25, 16  ;;  %p5152_p3 = pnand %p5151_p2, %p5147_p13 }
  0x2e   : > { %v653_v34 = vpack.c.b16 %v634_v26, %v633_v22  ;;  %v241_v39 = vrot.slane %v240_v29, 4  ;;  %v346_v40 = vrot.slane %v344_v30, 4  ;;  %v349_v41 = vrot.slane %v347_v31, 5  ;;  %v173_v22 = vld [vmem:[%s5287_s11 + $0xc] sm:$0xf] }
  0x2f   : > { %v355_v42 = vrot.slane %v353_v32, 5  ;;  %v236_v44 = vsel %vm5299_vm3, %v231_v35, %v235_v23  ;;  %v359_v45 = vrot.slane %v357_v37, 4  ;;  %v365_v46 = vrot.slane %v363_v38, 5  ;;  %v5361_v32 = vld [vmem:[%s5287_s11 + $0x14] sm:$0x1] }
  0x30   : > { %4311 = vmatmul.msk.bf16.vlgmr.msra.gmra.mxu3 %vm657_vm4, %v653_v34  ;;  %v440_v48 = vshrl.u32 %v189_v33, 16  ;;  %v246_v49 = vsel %vm5299_vm3, %v241_v39, %v245_v28  ;;  %v609_v50 = vunpack.c.l.b16 %v236_v44  ;;  %v350_v51 = vor.u32 %v349_v41, %v346_v40  ;;  %v5358_v28 = vld [vmem:[%s5287_s11 + $0x10] sm:$0xf] }
  0x31   : > { %v443_v52 = vshll.u32 %v189_v33, 16  ;;  %v610_v53 = vunpack.c.l.b16 %v246_v49  ;;  %v360_v54 = vor.u32 %v359_v45, %v355_v42  ;;  %v449_v56 = vshll.u32 %v190_v43, 16 }
  0x32   : > { %v442_v55 = vrot.slane %v440_v48, 4  ;;  %v351_v57 = vrot.slane %v350_v51, 4  ;;  %v453_v59 = vshrl.u32 %v190_v43, 16  ;;  %v459_v60 = vshll.u32 %v213_v47, 16  ;;  %v5371_v47 = vld [vmem:[%s5287_s11 + $0x4c] sm:$0xf] }
  0x33   : > { %v445_v58 = vrot.slane %v443_v52, 5  ;;  %v641_v62 = vpack.c.b16 %v610_v53, %v609_v50  ;;  %v361_v63 = vrot.slane %v360_v54, 4  ;;  %v451_v0 = vrot.slane %v449_v56, 5  ;;  %v5376_v56 = vld [vmem:[%s5287_s11 + $0x50] sm:$0x1] }
  0x34   : > { %v356_v4 = vsel %vm5299_vm3, %v351_v57, %v355_v42  ;;  %v455_v6 = vrot.slane %v453_v59, 4  ;;  %v461_v7 = vrot.slane %v459_v60, 5  ;;  %v536_v11 = vshrl.u32 %v197_v61, 16  ;;  %v183_v42 = vld [vmem:[%s5287_s11 + $0x48] sm:$0xf] }
  0x35   : > { %v446_v5 = vor.u32 %v445_v58, %v442_v55  ;;  %4299 = vmatmul.msk.bf16.vlgmr.msra.gmra.mxu0 %vm657_vm4, %v641_v62  ;;  %v366_v9 = vsel %vm5299_vm3, %v361_v63, %v365_v46  ;;  %v619_v10 = vunpack.c.l.b16 %v356_v4  ;;  %v539_v12 = vshll.u32 %v197_v61, 16 }
  0x36   : > { %v620_v13 = vunpack.c.l.b16 %v366_v9  ;;  %v456_v15 = vor.u32 %v455_v6, %v451_v0  ;;  %v545_v16 = vshll.u32 %v198_v3, 16  ;;  %v538_v17 = vrot.slane %v536_v11, 4 }
  0x37   : > { %v447_v14 = vrot.slane %v446_v5, 4  ;;  %v541_v18 = vrot.slane %v539_v12, 5  ;;  %v549_v19 = vshrl.u32 %v198_v3, 16  ;;  %v555_v21 = vshll.u32 %v217_v8, 16  ;;  %v191_v3 = vld [vmem:[%s5287_s11 + $0x78] sm:$0xf] }
  0x38   : > { %v646_v23 = vpack.c.b16 %v620_v13, %v619_v10  ;;  %v457_v26 = vrot.slane %v456_v15, 4  ;;  %v547_v27 = vrot.slane %v545_v16, 5  ;;  %v248_v35 = vshrl.u32 %v173_v22, 16  ;;  %v192_v8 = vld [vmem:[%s5287_s11 + $0x7c] sm:$0xf] }
  0x39   : > { %v452_v24 = vsel %vm5299_vm3, %v447_v14, %v451_v0  ;;  %v542_v30 = vor.u32 %v541_v18, %v538_v17  ;;  %v551_v31 = vrot.slane %v549_v19, 4  ;;  %v557_v34 = vrot.slane %v555_v21, 5  ;;  %v214_v16 = vld [vmem:[%s5287_s11 + $0x80] sm:$0x1] }
  0x3a   : > { %v627_v29 = vunpack.c.l.b16 %v452_v24  ;;  %4304 = vmatmul.msk.bf16.gmra.mxu1 %vm657_vm4, %v646_v23  ;;  %v462_v33 = vsel %vm5299_vm3, %v457_v26, %v461_v7  ;;  %v251_v37 = vshll.u32 %v173_v22, 16  ;;  %v257_v41 = vshll.u32 %v5358_v28, 16 }
  0x3b   : > { %v628_v38 = vunpack.c.l.b16 %v462_v33  ;;  %v543_v39 = vrot.slane %v542_v30, 4  ;;  %v552_v40 = vor.u32 %v551_v31, %v547_v27  ;;  %v250_v43 = vrot.slane %v248_v35, 4 }
  0x3c   : > { %v253_v44 = vrot.slane %v251_v37, 5  ;;  %v261_v45 = vshrl.u32 %v5358_v28, 16  ;;  %v267_v46 = vshll.u32 %v5361_v32, 16  ;;  %v259_v51 = vrot.slane %v257_v41, 5 }
  0x3d   : > { %v650_v48 = vpack.c.b16 %v628_v38, %v627_v29  ;;  %v548_v49 = vsel %vm5299_vm3, %v543_v39, %v547_v27  ;;  %v553_v50 = vrot.slane %v552_v40, 4  ;;  %v368_v58 = vshrl.u32 %v183_v42, 16  ;;  %v200_v39 = vld [vmem:[%s5287_s11 + $0xac] sm:$0xf]  ;;  %v218_v40 = vld [vmem:[%s5287_s11 + $0xb0] sm:$0x1] }
  0x3e   : > { %v635_v52 = vunpack.c.l.b16 %v548_v49  ;;  %v254_v53 = vor.u32 %v253_v44, %v250_v43  ;;  %v263_v54 = vrot.slane %v261_v45, 4  ;;  %v269_v55 = vrot.slane %v267_v46, 5 }
  0x3f   : > { %4308 = vmatmul.msk.bf16.gmra.mxu2 %vm657_vm4, %v650_v48  ;;  %v558_v57 = vsel %vm5299_vm3, %v553_v50, %v557_v34  ;;  %v371_v59 = vshll.u32 %v183_v42, 16  ;;  %v377_v60 = vshll.u32 %v5371_v47, 16  ;;  %v381_v0 = vshrl.u32 %v5371_v47, 16  ;;  %v199_v34 = vld [vmem:[%s5287_s11 + $0xa8] sm:$0xf] }
  0x40   : > { %v636_v61 = vunpack.c.l.b16 %v558_v57  ;;  %v255_v62 = vrot.slane %v254_v53, 4  ;;  %v264_v63 = vor.u32 %v263_v54, %v259_v51  ;;  %v370_v4 = vrot.slane %v368_v58, 4 }
  0x41   : > { %v373_v5 = vrot.slane %v371_v59, 5  ;;  %v379_v6 = vrot.slane %v377_v60, 5  ;;  %v387_v7 = vshll.u32 %v5376_v56, 16  ;;  %v383_v12 = vrot.slane %v381_v0, 4  ;;  %v175_v59 = vld [vmem:[%s5287_s11 + $0x18] sm:$0xf] }
  0x42   : > { %v654_v9 = vpack.c.b16 %v636_v61, %v635_v52  ;;  %v260_v10 = vsel %vm5299_vm3, %v255_v62, %v259_v51  ;;  %v265_v11 = vrot.slane %v264_v63, 4  ;;  %v464_v17 = vshrl.u32 %v191_v3, 16  ;;  %v5404_v63 = vld [vmem:[%s5287_s11 + $0x1c] sm:$0xf]  ;;  %v5407_v0 = vld [vmem:[%s5287_s11 + $0x20] sm:$0x1] }
  0x43   : > { %v611_v13 = vunpack.c.l.b16 %v260_v10  ;;  %v374_v14 = vor.u32 %v373_v5, %v370_v4  ;;  %v389_v15 = vrot.slane %v387_v7, 5  ;;  %v384_v19 = vor.u32 %v383_v12, %v379_v6 }
  0x44   : > { %4312 = vmatmul.msk.bf16.gmra.mxu3 %vm657_vm4, %v654_v9  ;;  %v270_v18 = vsel %vm5299_vm3, %v265_v11, %v269_v55  ;;  %v467_v21 = vshll.u32 %v191_v3, 16  ;;  %v473_v22 = vshll.u32 %v192_v8, 16  ;;  %v466_v26 = vrot.slane %v464_v17, 4 }
  0x45   : > { %v612_v23 = vunpack.c.l.b16 %v270_v18  ;;  %v375_v24 = vrot.slane %v374_v14, 4  ;;  %v477_v27 = vshrl.u32 %v192_v8, 16  ;;  %v385_v29 = vrot.slane %v384_v19, 4 }
  0x46   : > { %v469_v30 = vrot.slane %v467_v21, 5  ;;  %v475_v31 = vrot.slane %v473_v22, 5  ;;  %v483_v33 = vshll.u32 %v214_v16, 16  ;;  %v560_v48 = vshrl.u32 %v199_v34, 16  ;;  %v5417_v21 = vld [vmem:[%s5287_s11 + $0x58] sm:$0xf] }
  0x47   : > { %v642_v35 = vpack.c.b16 %v612_v23, %v611_v13  ;;  %v380_v37 = vsel %vm5299_vm3, %v375_v24, %v379_v6  ;;  %v479_v38 = vrot.slane %v477_v27, 4  ;;  %v390_v41 = vsel %vm5299_vm3, %v385_v29, %v389_v15  ;;  %v185_v15 = vld [vmem:[%s5287_s11 + $0x54] sm:$0xf]  ;;  %v5422_v27 = vld [vmem:[%s5287_s11 + $0x5c] sm:$0x1] }
  0x48   : > { %v621_v42 = vunpack.c.l.b16 %v380_v37  ;;  %v470_v43 = vor.u32 %v469_v30, %v466_v26  ;;  %v485_v44 = vrot.slane %v483_v33, 5  ;;  %v622_v45 = vunpack.c.l.b16 %v390_v41 }
  0x49   : > { %4300 = vmatmul.msk.bf16.gmra.mxu0 %vm657_vm4, %v642_v35  ;;  %v480_v46 = vor.u32 %v479_v38, %v475_v31  ;;  %v563_v49 = vshll.u32 %v199_v34, 16  ;;  %v569_v51 = vshll.u32 %v200_v39, 16  ;;  %v573_v52 = vshrl.u32 %v200_v39, 16  ;;  %v193_v39 = vld [vmem:[%s5287_s11 + $0x84] sm:$0xf] }
  0x4a   : > { %v471_v50 = vrot.slane %v470_v43, 4  ;;  %v579_v53 = vshll.u32 %v218_v40, 16  ;;  %v647_v54 = vpack.c.b16 %v622_v45, %v621_v42  ;;  %v562_v57 = vrot.slane %v560_v48, 4 }
  0x4b   : > { %v481_v55 = vrot.slane %v480_v46, 4  ;;  %v565_v58 = vrot.slane %v563_v49, 5  ;;  %v571_v61 = vrot.slane %v569_v51, 5  ;;  %v575_v62 = vrot.slane %v573_v52, 4  ;;  %v194_v49 = vld [vmem:[%s5287_s11 + $0x88] sm:$0xf] }
  0x4c   : > { %v476_v60 = vsel %vm5299_vm3, %v471_v50, %v475_v31  ;;  %4305 = vmatmul.msk.bf16.gmra.mxu1 %vm657_vm4, %v647_v54  ;;  %v581_v6 = vrot.slane %v579_v53, 5  ;;  %v272_v9 = vshrl.u32 %v175_v59, 16  ;;  %v275_v10 = vshll.u32 %v175_v59, 16  ;;  %v215_v53 = vld [vmem:[%s5287_s11 + $0x8c] sm:$0x1] }
  0x4d   : > { %v486_v3 = vsel %vm5299_vm3, %v481_v55, %v485_v44  ;;  %v629_v4 = vunpack.c.l.b16 %v476_v60  ;;  %v566_v5 = vor.u32 %v565_v58, %v562_v57  ;;  %v576_v8 = vor.u32 %v575_v62, %v571_v61 }
  0x4e   : > { %v630_v7 = vunpack.c.l.b16 %v486_v3  ;;  %v281_v12 = vshll.u32 %v5404_v63, 16  ;;  %v285_v13 = vshrl.u32 %v5404_v63, 16  ;;  %v291_v14 = vshll.u32 %v5407_v0, 16 }
  0x4f   : > { %v567_v11 = vrot.slane %v566_v5, 4  ;;  %v577_v17 = vrot.slane %v576_v8, 4  ;;  %v274_v18 = vrot.slane %v272_v9, 4  ;;  %v277_v19 = vrot.slane %v275_v10, 5  ;;  %v201_v8 = vld [vmem:[%s5287_s11 + $0xb4] sm:$0xf] }
  0x50   : > { %v651_v16 = vpack.c.b16 %v630_v7, %v629_v4  ;;  %v283_v23 = vrot.slane %v281_v12, 5  ;;  %v287_v24 = vrot.slane %v285_v13, 4  ;;  %v293_v26 = vrot.slane %v291_v14, 5  ;;  %v202_v12 = vld [vmem:[%s5287_s11 + $0xb8] sm:$0xf] }
  0x51   : > { %v572_v22 = vsel %vm5299_vm3, %v567_v11, %v571_v61  ;;  %v582_v29 = vsel %vm5299_vm3, %v577_v17, %v581_v6  ;;  %v278_v31 = vor.u32 %v277_v19, %v274_v18  ;;  %v392_v33 = vshrl.u32 %v185_v15, 16  ;;  %v219_v17 = vld [vmem:[%s5287_s11 + $0xbc] sm:$0x1] }
  0x52   : > { %4309 = vmatmul.msk.bf16.gmra.mxu2 %vm657_vm4, %v651_v16  ;;  %v637_v30 = vunpack.c.l.b16 %v572_v22  ;;  %v638_v34 = vunpack.c.l.b16 %v582_v29  ;;  %v288_v35 = vor.u32 %v287_v24, %v283_v23  ;;  %v395_v37 = vshll.u32 %v185_v15, 16 }
  0x53   : > { %v401_v38 = vshll.u32 %v5417_v21, 16  ;;  %v279_v40 = vrot.slane %v278_v31, 4  ;;  %v394_v41 = vrot.slane %v392_v33, 4  ;;  %v405_v42 = vshrl.u32 %v5417_v21, 16 }
  0x54   : > { %v411_v43 = vshll.u32 %v5422_v27, 16  ;;  %v655_v44 = vpack.c.b16 %v638_v34, %v637_v30  ;;  %v289_v45 = vrot.slane %v288_v35, 4  ;;  %v397_v46 = vrot.slane %v395_v37, 5  ;;  %v177_v37 = vld [vmem:[%s5287_s11 + $0x24] sm:$0xf] }
  0x55   : > { %v403_v48 = vrot.slane %v401_v38, 5  ;;  %v284_v50 = vsel %vm5299_vm3, %v279_v40, %v283_v23  ;;  %v407_v51 = vrot.slane %v405_v42, 4  ;;  %v488_v54 = vshrl.u32 %v193_v39, 16  ;;  %v5450_v42 = vld [vmem:[%s5287_s11 + $0x28] sm:$0xf] }
  0x56   : > { %v413_v52 = vrot.slane %v411_v43, 5  ;;  %4313 = vmatmul.msk.bf16.gmra.mxu3 %vm657_vm4, %v655_v44  ;;  %v294_v55 = vsel %vm5299_vm3, %v289_v45, %v293_v26  ;;  %v613_v57 = vunpack.c.l.b16 %v284_v50  ;;  %v398_v58 = vor.u32 %v397_v46, %v394_v41 }
  0x57   : > { %v491_v59 = vshll.u32 %v193_v39, 16  ;;  %v614_v60 = vunpack.c.l.b16 %v294_v55  ;;  %v408_v61 = vor.u32 %v407_v51, %v403_v48  ;;  %v490_v62 = vrot.slane %v488_v54, 4 }
  0x58   : > { %v497_v3 = vshll.u32 %v194_v49, 16  ;;  %v399_v4 = vrot.slane %v398_v58, 4  ;;  %v501_v6 = vshrl.u32 %v194_v49, 16  ;;  %v507_v7 = vshll.u32 %v215_v53, 16 }
  0x59   : > { %v493_v5 = vrot.slane %v491_v59, 5  ;;  %v643_v9 = vpack.c.b16 %v614_v60, %v613_v57  ;;  %v409_v10 = vrot.slane %v408_v61, 4  ;;  %v584_v22 = vshrl.u32 %v201_v8, 16  ;;  %v1019_v61 = vld [vmem:[%s5287_s11] sm:$0xe] }
  0x5a   : > { %v499_v11 = vrot.slane %v497_v3, 5  ;;  %v404_v13 = vsel %vm5299_vm3, %v399_v4, %v403_v48  ;;  %v503_v15 = vrot.slane %v501_v6, 4  ;;  %v509_v16 = vrot.slane %v507_v7, 5  ;;  %v5454_v48 = vld [vmem:[%s5287_s11 + $0x2c] sm:$0x1] }
  0x5b   : > { %v494_v14 = vor.u32 %v493_v5, %v490_v62  ;;  %4301 = vmatmul.msk.bf16.gmra.mxu0 %vm657_vm4, %v643_v9  ;;  %v414_v18 = vsel %vm5299_vm3, %v409_v10, %v413_v52  ;;  %v623_v19 = vunpack.c.l.b16 %v404_v13  ;;  %v587_v23 = vshll.u32 %v201_v8, 16  ;;  %v4541_v6 = vld [vmem:[%s5287_s11 + $0xc] sm:$0xf] }
  0x5c   : > { %v624_v24 = vunpack.c.l.b16 %v414_v18  ;;  %v504_v29 = vor.u32 %v503_v15, %v499_v11  ;;  %v593_v30 = vshll.u32 %v202_v12, 16  ;;  %v586_v31 = vrot.slane %v584_v22, 4 }
  0x5d   : > { %v495_v26 = vrot.slane %v494_v14, 4  ;;  %v589_v33 = vrot.slane %v587_v23, 5  ;;  %v597_v34 = vshrl.u32 %v202_v12, 16  ;;  %v603_v35 = vshll.u32 %v219_v17, 16  ;;  %v4542_v12 = vld [vmem:[%s5287_s11 + $0x10] sm:$0xf] }
  0x5e   : > { %v648_v38 = vpack.c.b16 %v624_v24, %v623_v19  ;;  %v505_v40 = vrot.slane %v504_v29, 4  ;;  %v595_v41 = vrot.slane %v593_v30, 5  ;;  %v1075_v43 = vrot.slane %v5315_v2, 5 }
  0x5f   : > { %v500_v39 = vsel %vm5299_vm3, %v495_v26, %v499_v11  ;;  %v590_v45 = vor.u32 %v589_v33, %v586_v31  ;;  %v599_v46 = vrot.slane %v597_v34, 4  ;;  %v605_v50 = vrot.slane %v603_v35, 5  ;;  %v4687_v11 = vld [vmem:[%s6676_s1 + $0xc] sm:$0x3] }
  0x60   : > { %v631_v44 = vunpack.c.l.b16 %v500_v39  ;;  %4306 = vmatmul.msk.bf16.gmra.mxu1 %vm657_vm4, %v648_v38  ;;  %v510_v49 = vsel %vm5299_vm3, %v505_v40, %v509_v16  ;;  %v296_v51 = vshrl.u32 %v177_v37, 16  ;;  %v299_v52 = vshll.u32 %v177_v37, 16  ;;  %v4543_v38 = vld [vmem:[%s5287_s11 + $0x14] sm:$0x1] }
  0x61   : > { %v632_v53 = vunpack.c.l.b16 %v510_v49  ;;  %v591_v54 = vrot.slane %v590_v45, 4  ;;  %v600_v55 = vor.u32 %v599_v46, %v595_v41  ;;  %v305_v2 = vshll.u32 %v5450_v42, 16  ;;  %v4816_v45 = vld [vmem:[%s6676_s1 + $0xe] sm:$0x3] }
  0x62   : > { %v298_v57 = vrot.slane %v296_v51, 4  ;;  %v301_v58 = vrot.slane %v299_v52, 5  ;;  %v309_v59 = vshrl.u32 %v5450_v42, 16  ;;  %v315_v60 = vshll.u32 %v5454_v48, 16  ;;  %v4887_v51 = vld [vmem:[%s5287_s11] sm:$0xff] }
  0x63   : > { %v652_v62 = vpack.c.b16 %v632_v53, %v631_v44  ;;  %v596_v3 = vsel %vm5299_vm3, %v591_v54, %v595_v41  ;;  %v601_v4 = vrot.slane %v600_v55, 4  ;;  %v307_v5 = vrot.slane %v305_v2, 5  ;;  %v4865_v2 = vld [vmem:[%s6676_s1 + $0x10] sm:$0x3] }
  0x64   : > { %v639_v7 = vunpack.c.l.b16 %v596_v3  ;;  %v302_v8 = vor.u32 %v301_v58, %v298_v57  ;;  %v311_v9 = vrot.slane %v309_v59, 4  ;;  %v317_v10 = vrot.slane %v315_v60, 5 }
  0x65   : > { %4310 = vmatmul.msk.bf16.gmra.mxu2 %vm657_vm4, %v652_v62  ;;  %v606_v13 = vsel %vm5299_vm3, %v601_v4, %v605_v50  ;;  %v4395_v14 = vrot.slane %v1019_v61, 9  ;;  %v1072_v19 = vrot.slane %v5312_v1, 5  ;;  %v2907_v22 = vsel %vm706_vm0, %v4687_v11, 0  ;;  %v4638_v50 = vld [vmem:[%s6676_s1 + $0xa] sm:$0x3] }
  0x66   : > { %v640_v15 = vunpack.c.l.b16 %v606_v13  ;;  %v303_v16 = vrot.slane %v302_v8, 4  ;;  %v312_v17 = vor.u32 %v311_v9, %v307_v5  ;;  %v1740_v23 = vshrl.u32 %v4541_v6, 16  ;;  %2916 = vmatpush.bf16.msra.mxu2 %v2907_v22  ;;  %v1020_v8 = vld [vmem:[%s5287_s11 + $0xc] sm:$0xe] }
  0x67   : > { %v1743_v24 = vshll.u32 %v4541_v6, 16  ;;  %v1749_v26 = vshll.u32 %v4542_v12, 16  ;;  %v1073_v33 = vsel %vm5473_vm7, %v4395_v14, %v1072_v19  ;;  %v1074_v35 = vrot.slane %v1072_v19, 4  ;;  %v4545_v6 = vld [vmem:[%s5287_s11 + $0x1c] sm:$0xf] }
  0x68   : > { %v656_v29 = vpack.c.b16 %v640_v15, %v639_v7  ;;  %v308_v30 = vsel %vm5299_vm3, %v303_v16, %v307_v5  ;;  %v313_v31 = vrot.slane %v312_v17, 4  ;;  %v1184_v37 = vunpack.c.l.b16 %v1073_v33  ;;  %v4544_v5 = vld [vmem:[%s5287_s11 + $0x18] sm:$0xf]  ;;  %v4903_v15 = vld [vmem:[%s5287_s11 + $0xc] sm:$0xff] }
  0x69   : > { %v615_v34 = vunpack.c.l.b16 %v308_v30  ;;  %v1742_v1 = vrot.slane %v1740_v23, 4  ;;  %v1745_v40 = vrot.slane %v1743_v24, 5  ;;  %v1751_v41 = vrot.slane %v1749_v26, 5  ;;  %v4546_v30 = vld [vmem:[%s5287_s11 + $0x20] sm:$0x1] }
  0x6a   : > { %4314 = vmatmul.msk.bf16.gmra.mxu3 %vm657_vm4, %v656_v29  ;;  %v318_v39 = vsel %vm5299_vm3, %v313_v31, %v317_v10  ;;  %v1753_v44 = vshrl.u32 %v4542_v12, 16  ;;  %v1076_v49 = vsel %vm5473_vm7, %v1074_v35, %v1075_v43  ;;  %v1759_v55 = vshll.u32 %v4543_v38, 16  ;;  %v4888_v35 = vld [vmem:[%s5287_s11 + $0xc] sm:$0xff] }
  0x6b   : > { %v616_v46 = vunpack.c.l.b16 %v318_v39  ;;  %v1185_v52 = vunpack.c.l.b16 %v1076_v49  ;;  %v1746_v53 = vor.u32 %v1745_v40, %v1742_v1  ;;  %v3561_v58 = vsel %vm706_vm0, %v4816_v45, 0 }
  0x6c   : > { %v1755_v54 = vrot.slane %v1753_v44, 4  ;;  %3570 = vmatpush.bf16.msra.mxu3 %v3561_v58  ;;  %v2620_v60 = vsel %vm706_vm0, %v4638_v50, 0  ;;  %v3959_v61 = vsel %vm706_vm0, %v4865_v2, 0  ;;  %v1761_v4 = vrot.slane %v1759_v55, 5  ;;  %v1021_v50 = vld [vmem:[%s5287_s11 + $0x18] sm:$0xe] }
  0x6d   : > { %v644_v57 = vpack.c.b16 %v616_v46, %v615_v34  ;;  %v1216_v43 = vpack.c.b16 %v1185_v52, %v1184_v37  ;;  %2629 = vmatpush.bf16.msra.mxu1 %v2620_v60  ;;  %v1747_v62 = vrot.slane %v1746_v53, 4  ;;  %3968 = vmatpush.bf16.msra.mxu0 %v3959_v61  ;;  %v1079_v7 = vrot.slane %v5358_v28, 5  ;;  %v4548_v46 = vld [vmem:[%s5287_s11 + $0x28] sm:$0xf] }
  0x6e   : > { %v1756_v59 = vor.u32 %v1755_v54, %v1751_v41  ;;  %v1764_v9 = vshrl.u32 %v4544_v5, 16  ;;  %v1767_v10 = vshll.u32 %v4544_v5, 16  ;;  %v1773_v13 = vshll.u32 %v4545_v6, 16 }
  0x6f   : > { %4302 = vmatmul.msk.bf16.gmra.mxu0 %vm657_vm4, %v644_v57  ;;  %v1752_v11 = vsel %vm5299_vm3, %v1747_v62, %v1751_v41  ;;  %v1777_v14 = vshrl.u32 %v4545_v6, 16  ;;  %v4396_v16 = vrot.slane %v1020_v8, 9  ;;  %v1081_v17 = vrot.slane %v1079_v7, 4  ;;  %v4547_v41 = vld [vmem:[%s5287_s11 + $0x24] sm:$0xf] }
  0x70   : > { %4379 = vmatmul.msk.bf16.vlgmr.msrb.gmra.mxu1 %vm657_vm4, %v4887_v51  ;;  %v1757_v3 = vrot.slane %v1756_v59, 4  ;;  %v1082_v28 = vrot.slane %v5361_v32, 5  ;;  %v2125_v19 = vunpack.c.l.b16 %v1752_v11  ;;  %v1766_v23 = vrot.slane %v1764_v9, 4  ;;  %v4549_v6 = vld [vmem:[%s5287_s11 + $0x2c] sm:$0x1] }
  0x71   : > { %v1769_v24 = vrot.slane %v1767_v10, 5  ;;  %v1775_v26 = vrot.slane %v1773_v13, 5  ;;  %v1779_v29 = vrot.slane %v1777_v14, 4  ;;  %v1080_v31 = vsel %vm5473_vm7, %v4396_v16, %v1079_v7 }
  0x72   : > { %v1762_v12 = vsel %vm5299_vm3, %v1757_v3, %v1761_v4  ;;  %v1083_v33 = vsel %vm5473_vm7, %v1081_v17, %v1082_v28  ;;  %v1783_v38 = vshll.u32 %v4546_v30, 16  ;;  %v1186_v1 = vunpack.c.l.b16 %v1080_v31 }
  0x73   : > { %v2126_v22 = vunpack.c.l.b16 %v1762_v12  ;;  %v1770_v32 = vor.u32 %v1769_v24, %v1766_v23  ;;  %v1780_v37 = vor.u32 %v1779_v29, %v1775_v26  ;;  %v1187_v39 = vunpack.c.l.b16 %v1083_v33  ;;  %v4889_v12 = vld [vmem:[%s5287_s11 + $0x18] sm:$0xff]  ;;  %v1022_v29 = vld [vmem:[%s5287_s11 + $0x24] sm:$0xe] }
  0x74   : > { %v1785_v45 = vrot.slane %v1783_v38, 5  ;;  %v1086_v51 = vrot.slane %v5404_v63, 5  ;;  %v1788_v52 = vshrl.u32 %v4547_v41, 16  ;;  %v1791_v54 = vshll.u32 %v4547_v41, 16 }
  0x75   : > { %4412 = vmatmul.msk.bf16.vlgmr.msrb.gmra.mxu2 %vm657_vm4, %v1216_v43  ;;  %v2157_v34 = vpack.c.b16 %v2126_v22, %v2125_v19  ;;  %v1771_v40 = vrot.slane %v1770_v32, 4  ;;  %v1781_v44 = vrot.slane %v1780_v37, 4  ;;  %v1217_v49 = vpack.c.b16 %v1187_v39, %v1186_v1  ;;  %v4904_v43 = vld [vmem:[%s5287_s11 + $0x18] sm:$0xff]  ;;  %v4550_v19 = vld [vmem:[%s5287_s11 + $0x30] sm:$0xf]  ;;  %v4905_v32 = vld [vmem:[%s5287_s11 + $0x24] sm:$0xff] }
  0x76   : > { %v1797_v55 = vshll.u32 %v4548_v46, 16  ;;  %v1801_v2 = vshrl.u32 %v4548_v46, 16  ;;  %v4397_v58 = vrot.slane %v1021_v50, 9  ;;  %v1088_v60 = vrot.slane %v1086_v51, 4  ;;  %v4551_v22 = vld [vmem:[%s5287_s11 + $0x34] sm:$0xf] }
  0x77   : > { %v1776_v53 = vsel %vm5299_vm3, %v1771_v40, %v1775_v26  ;;  %v1786_v57 = vsel %vm5299_vm3, %v1781_v44, %v1785_v45  ;;  %v1089_v63 = vrot.slane %v5407_v0, 5  ;;  %v1790_v61 = vrot.slane %v1788_v52, 4  ;;  %v4552_v45 = vld [vmem:[%s5287_s11 + $0x38] sm:$0x1] }
  0x78   : > { %v2127_v59 = vunpack.c.l.b16 %v1776_v53  ;;  %v2128_v62 = vunpack.c.l.b16 %v1786_v57  ;;  %v1793_v3 = vrot.slane %v1791_v54, 5  ;;  %v1799_v4 = vrot.slane %v1797_v55, 5  ;;  %v4554_v57 = vld [vmem:[%s5287_s11 + $0x40] sm:$0xf] }
  0x79   : > { %v1803_v5 = vrot.slane %v1801_v2, 4  ;;  %v1087_v7 = vsel %vm5473_vm7, %v4397_v58, %v1086_v51  ;;  %v1090_v8 = vsel %vm5473_vm7, %v1088_v60, %v1089_v63  ;;  %v1807_v0 = vshll.u32 %v4549_v6, 16  ;;  %v4553_v2 = vld [vmem:[%s5287_s11 + $0x3c] sm:$0xf]  ;;  %v5077_v63 = vld [vmem:[%s5287_s11 + $0x34] sm:$0xf] }
  0x7a   : > { %4525 = vmatmul.msk.bf16.vlgmr.msrb.gmra.mxu3 %vm657_vm4, %v4903_v15  ;;  %v2158_v9 = vpack.c.b16 %v2128_v62, %v2127_v59  ;;  %v1794_v10 = vor.u32 %v1793_v3, %v1790_v61  ;;  %v1188_v13 = vunpack.c.l.b16 %v1087_v7  ;;  %v1189_v14 = vunpack.c.l.b16 %v1090_v8  ;;  %v1023_v62 = vld [vmem:[%s5287_s11 + $0x30] sm:$0xe] }
  0x7b   : > { %v1804_v11 = vor.u32 %v1803_v5, %v1799_v4  ;;  %v1809_v17 = vrot.slane %v1807_v0, 5  ;;  %v1093_v23 = vrot.slane %v5450_v42, 5  ;;  %v1812_v30 = vshrl.u32 %v4550_v19, 16  ;;  %v5078_v0 = vld [vmem:[%s5287_s11 + $0x38] sm:$0x1] }
  0x7c   : > { %v1795_v15 = vrot.slane %v1794_v10, 4  ;;  %v1218_v28 = vpack.c.b16 %v1189_v14, %v1188_v13  ;;  %v1815_v31 = vshll.u32 %v4550_v19, 16  ;;  %v1821_v33 = vshll.u32 %v4551_v22, 16  ;;  %v4906_v13 = vld [vmem:[%s5287_s11 + $0x30] sm:$0xff] }
  0x7d   : > { %v1805_v16 = vrot.slane %v1804_v11, 4  ;;  %v1095_v37 = vrot.slane %v1093_v23, 4  ;;  %v1096_v42 = vrot.slane %v5454_v48, 5  ;;  %v1814_v39 = vrot.slane %v1812_v30, 4  ;;  %v4890_v48 = vld [vmem:[%s5287_s11 + $0x24] sm:$0xff] }
  0x7e   : > { %v1800_v24 = vsel %vm5299_vm3, %v1795_v15, %v1799_v4  ;;  %v1817_v40 = vrot.slane %v1815_v31, 5  ;;  %v1823_v41 = vrot.slane %v1821_v33, 5  ;;  %v1831_v53 = vshll.u32 %v4552_v45, 16  ;;  %v4891_v33 = vld [vmem:[%s5287_s11 + $0x30] sm:$0xff] }
  0x7f   : > { %4590 = vmatmul.msk.bf16.vlgmr.msrb.gmra.mxu0 %vm657_vm4, %v2157_v34  ;;  %v1810_v26 = vsel %vm5299_vm3, %v1805_v16, %v1809_v17  ;;  %v1825_v34 = vshrl.u32 %v4551_v22, 16  ;;  %v2129_v38 = vunpack.c.l.b16 %v1800_v24  ;;  %v1100_v61 = vrot.slane %v5077_v63, 5  ;;  %v4555_v22 = vld [vmem:[%s5287_s11 + $0x44] sm:$0x1] }
  0x80   : > { %4380 = vmatmul.msk.bf16.gmra.mxu1 %vm657_vm4, %v4888_v35  ;;  %v4398_v35 = vrot.slane %v1022_v29, 9  ;;  %v2130_v1 = vunpack.c.l.b16 %v1810_v26  ;;  %v1818_v51 = vor.u32 %v1817_v40, %v1814_v39  ;;  %v1833_v59 = vrot.slane %v1831_v53, 5  ;;  %v4556_v39 = vld [vmem:[%s5287_s11 + $0x48] sm:$0xf]  ;;  %v4557_v40 = vld [vmem:[%s5287_s11 + $0x4c] sm:$0xf] }
  0x81   : > { %v1827_v44 = vrot.slane %v1825_v34, 4  ;;  %v1836_v3 = vshrl.u32 %v4553_v2, 16  ;;  %v1839_v4 = vshll.u32 %v4553_v2, 16  ;;  %v1845_v5 = vshll.u32 %v4554_v57, 16  ;;  %v4907_v2 = vld [vmem:[%s5287_s11 + $0x3c] sm:$0xff] }
  0x82   : > { %v1094_v46 = vsel %vm5473_vm7, %v4398_v35, %v1093_v23  ;;  %v2159_v50 = vpack.c.b16 %v2130_v1, %v2129_v38  ;;  %v1819_v58 = vrot.slane %v1818_v51, 4  ;;  %v1849_v6 = vshrl.u32 %v4554_v57, 16 }
  0x83   : > { %v1828_v52 = vor.u32 %v1827_v44, %v1823_v41  ;;  %v1190_v54 = vunpack.c.l.b16 %v1094_v46  ;;  %v4399_v10 = vrot.slane %v1023_v62, 9  ;;  %v1102_v11 = vrot.slane %v1100_v61, 4 }
  0x84   : > { %v1824_v8 = vsel %vm5299_vm3, %v1819_v58, %v1823_v41  ;;  %v1838_v14 = vrot.slane %v1836_v3, 4  ;;  %v1841_v15 = vrot.slane %v1839_v4, 5  ;;  %v1847_v16 = vrot.slane %v1845_v5, 5  ;;  %v4558_v4 = vld [vmem:[%s5287_s11 + $0x50] sm:$0x1] }
  0x85   : > { %4413 = vmatmul.msk.bf16.gmra.mxu2 %vm657_vm4, %v1217_v49  ;;  %v1097_v49 = vsel %vm5473_vm7, %v1095_v37, %v1096_v42  ;;  %v1851_v17 = vrot.slane %v1849_v6, 4  ;;  %v1101_v23 = vsel %vm5473_vm7, %v4399_v10, %v1100_v61  ;;  %v1855_v30 = vshll.u32 %v4555_v22, 16 }
  0x86   : > { %v1191_v55 = vunpack.c.l.b16 %v1097_v49  ;;  %v1842_v26 = vor.u32 %v1841_v15, %v1838_v14  ;;  %v1860_v51 = vshrl.u32 %v4556_v39, 16  ;;  %v1869_v53 = vshll.u32 %v4557_v40, 16 }
  0x87   : > { %v1852_v29 = vor.u32 %v1851_v17, %v1847_v16  ;;  %v1857_v1 = vrot.slane %v1855_v30, 5 }
  0x88   : > { %v1219_v60 = vpack.c.b16 %v1191_v55, %v1190_v54  ;;  %v1843_v42 = vrot.slane %v1842_v26, 4  ;;  %v1873_v54 = vshrl.u32 %v4557_v40, 16  ;;  %v1871_v62 = vrot.slane %v1869_v53, 5 }
  0x89   : > { %v1853_v38 = vrot.slane %v1852_v29, 4  ;;  %v1114_v26 = vrot.slane %v5371_v47, 5 }
  0x8a   : > { %4526 = vmatmul.msk.bf16.gmra.mxu3 %vm657_vm4, %v4904_v43  ;;  %v1829_v43 = vrot.slane %v1828_v52, 4  ;;  %v1848_v45 = vsel %vm5299_vm3, %v1843_v42, %v1847_v16  ;;  %v1863_v52 = vshll.u32 %v4556_v39, 16  ;;  %v1875_v3 = vrot.slane %v1873_v54, 4  ;;  %v4561_v54 = vld [vmem:[%s5287_s11 + $0x5c] sm:$0x1] }
  0x8b   : > { %v1858_v46 = vsel %vm5299_vm3, %v1853_v38, %v1857_v1  ;;  %v2133_v55 = vunpack.c.l.b16 %v1848_v45  ;;  %v4908_v1 = vld [vmem:[%s5287_s11 + $0x48] sm:$0xff]  ;;  %v1116_v40 = vrot.slane %v1114_v26, 4 }
  0x8c   : > { %v2134_v57 = vunpack.c.l.b16 %v1858_v46  ;;  %v1865_v61 = vrot.slane %v1863_v52, 5  ;;  %v1876_v10 = vor.u32 %v1875_v3, %v1871_v62 }
  0x8e   : > { %v1877_v16 = vrot.slane %v1876_v10, 4 }
  0x8f   : > { %4591 = vmatmul.msk.bf16.gmra.mxu0 %vm657_vm4, %v2158_v9  ;;  %v1834_v9 = vsel %vm5299_vm3, %v1829_v43, %v1833_v59 }
  0x90   : > { %4381 = vmatmul.msk.bf16.gmra.mxu1 %vm657_vm4, %v4889_v12  ;;  %v1103_v12 = vrot.slane %v5078_v0, 5  ;;  %v2132_v19 = vunpack.c.l.b16 %v1834_v9 }
  0x92   : > { %v1104_v24 = vsel %vm5473_vm7, %v1102_v11, %v1103_v12  ;;  %v1879_v11 = vshll.u32 %v4558_v4, 16  ;;  %v4892_v12 = vld [vmem:[%s5287_s11 + $0x3c] sm:$0xff] }
  0x93   : > { %v1193_v35 = vunpack.c.l.b16 %v1104_v24  ;;  %v4560_v24 = vld [vmem:[%s5287_s11 + $0x58] sm:$0xf]  ;;  %v4562_v4 = vld [vmem:[%s5287_s11 + $0x60] sm:$0xf] }
  0x94   : > { %v1881_v17 = vrot.slane %v1879_v11, 5  ;;  %v1897_v42 = vshrl.u32 %v4560_v24, 16 }
  0x95   : > { %4414 = vmatmul.msk.bf16.gmra.mxu2 %vm657_vm4, %v1218_v28  ;;  %v2131_v28 = vunpack.c.l.b16 %v1824_v8  ;;  %v2161_v8 = vpack.c.b16 %v2134_v57, %v2133_v55 }
  0x96   : > { %v1882_v30 = vsel %vm5299_vm3, %v1877_v16, %v1881_v17  ;;  %v1899_v52 = vrot.slane %v1897_v42, 4 }
  0x97   : > { %v2160_v31 = vpack.c.b16 %v2132_v19, %v2131_v28  ;;  %v2136_v46 = vunpack.c.l.b16 %v1882_v30 }
  0x9a   : > { %4527 = vmatmul.msk.bf16.gmra.mxu3 %vm657_vm4, %v4905_v32  ;;  %v1192_v32 = vunpack.c.l.b16 %v1101_v23  ;;  %v4559_v23 = vld [vmem:[%s5287_s11 + $0x54] sm:$0xf] }
  0x9c   : > { %v1220_v44 = vpack.c.b16 %v1193_v35, %v1192_v32  ;;  %v1887_v32 = vshll.u32 %v4559_v23, 16  ;;  %v1893_v35 = vshll.u32 %v4560_v24, 16 }
  0x9f   : > { %4592 = vmatmul.msk.bf16.gmra.mxu0 %vm657_vm4, %v2159_v50  ;;  %v1107_v50 = vrot.slane %v5327_v20, 5  ;;  %v1862_v20 = vrot.slane %v1860_v51, 4  ;;  %v1895_v51 = vrot.slane %v1893_v35, 5  ;;  %v1124_v35 = vrot.slane %v5422_v27, 5 }
  0xa0   : > { %4382 = vmatmul.msk.bf16.gmra.mxu1 %vm657_vm4, %v4890_v48  ;;  %v1024_v48 = vld [vmem:[%s5287_s11 + $0x3c] sm:$0xe] }
  0xa1   : > { %v4400_v43 = vrot.slane %v1024_v48, 9  ;;  %v1109_v59 = vrot.slane %v1107_v50, 4  ;;  %v1889_v48 = vrot.slane %v1887_v32, 5 }
  0xa3   : > { %v1108_v5 = vsel %vm5473_vm7, %v4400_v43, %v1107_v50  ;;  %v4893_v43 = vld [vmem:[%s5287_s11 + $0x48] sm:$0xff] }
  0xa5   : > { %v5568_v7 = vpop.f32.mrf.mxu1  ;;  %4415 = vmatmul.msk.bf16.gmra.mxu2 %vm657_vm4, %v1219_v60  ;;  %v1110_v60 = vrot.slane %v5332_v25, 5  ;;  %v1866_v25 = vor.u32 %v1865_v61, %v1862_v20  ;;  %v1903_v20 = vshll.u32 %v4561_v54, 16  ;;  %v4894_v54 = vld [vmem:[%s5287_s11 + $0x54] sm:$0xff] }
  0xa7   : > { %v1111_v6 = vsel %vm5473_vm7, %v1109_v59, %v1110_v60  ;;  %v1867_v15 = vrot.slane %v1866_v25, 4  ;;  %v1900_v60 = vor.u32 %v1899_v52, %v1895_v51  ;;  %v1905_v10 = vrot.slane %v1903_v20, 5 }
  0xa8   : > { %v1195_v14 = vunpack.c.l.b16 %v1111_v6 }
  0xa9   : > { %v1872_v29 = vsel %vm5299_vm3, %v1867_v15, %v1871_v62  ;;  %v1901_v25 = vrot.slane %v1900_v60, 4  ;;  %v1121_v15 = vrot.slane %v5417_v21, 5 }
  0xaa   : > { %4528 = vmatmul.msk.bf16.gmra.mxu3 %vm657_vm4, %v4906_v13  ;;  %v1194_v13 = vunpack.c.l.b16 %v1108_v5  ;;  %v2135_v45 = vunpack.c.l.b16 %v1872_v29  ;;  %v4563_v5 = vld [vmem:[%s5287_s11 + $0x64] sm:$0xf] }
  0xab   : > { %v1921_v16 = vshrl.u32 %v4563_v5, 16  ;;  %v1906_v24 = vsel %vm5299_vm3, %v1901_v25, %v1905_v10  ;;  %v1123_v32 = vrot.slane %v1121_v15, 4  ;;  %v5079_v10 = vld [vmem:[%s5287_s11 + $0x64] sm:$0xf] }
  0xac   : > { %v1221_v19 = vpack.c.b16 %v1195_v14, %v1194_v13  ;;  %v2162_v57 = vpack.c.b16 %v2136_v46, %v2135_v45  ;;  %v1911_v13 = vshll.u32 %v4562_v4, 16  ;;  %v1917_v14 = vshll.u32 %v4563_v5, 16 }
  0xad   : > { %v5584_v34 = vpop.f32.mrf.mxu1  ;;  %v1923_v42 = vrot.slane %v1921_v16, 4 }
  0xae   : > { %v1913_v30 = vrot.slane %v1911_v13, 5  ;;  %v1027_v13 = vld [vmem:[%s5287_s11 + $0x60] sm:$0xe] }
  0xaf   : > { %v5586_v37 = vpop.f32.mrf.mxu2  ;;  %4593 = vmatmul.msk.bf16.gmra.mxu0 %vm657_vm4, %v2160_v31  ;;  %v1025_v31 = vld [vmem:[%s5287_s11 + $0x48] sm:$0xe] }
  0xb0   : > { %4383 = vmatmul.msk.bf16.gmra.mxu1 %vm657_vm4, %v4891_v33  ;;  %v1884_v33 = vshrl.u32 %v4559_v23, 16  ;;  %v4401_v47 = vrot.slane %v1025_v31, 9  ;;  %v1919_v31 = vrot.slane %v1917_v14, 5 }
  0xb2   : > { %v5592_v41 = vpop.f32.mrf.mxu0  ;;  %v1886_v50 = vrot.slane %v1884_v33, 4  ;;  %v4909_v33 = vld [vmem:[%s5287_s11 + $0x54] sm:$0xff]  ;;  %v1924_v27 = vor.u32 %v1923_v42, %v1919_v31 }
  0xb3   : > { %v5598_v49 = vpop.f32.mrf.mxu3 }
  0xb4   : > { %v1890_v59 = vor.u32 %v1889_v48, %v1886_v50  ;;  %v1125_v48 = vsel %vm5473_vm7, %v1123_v32, %v1124_v35  ;;  %v1925_v60 = vrot.slane %v1924_v27, 4 }
  0xb5   : > { %4416 = vmatmul.msk.bf16.gmra.mxu2 %vm657_vm4, %v1220_v44  ;;  %v1117_v44 = vrot.slane %v5376_v56, 5 }
  0xb7   : > { %v5604_v58 = vpop.f32.mrf.mxu1  ;;  %v5607_v63 = vpop.f32.mrf.mxu2  ;;  %v1118_v56 = vsel %vm5473_vm7, %v1116_v40, %v1117_v44  ;;  %v4564_v40 = vld [vmem:[%s5287_s11 + $0x68] sm:$0x1] }
  0xb8   : > { %v1197_v62 = vunpack.c.l.b16 %v1118_v56 }
  0xba   : > { %4529 = vmatmul.msk.bf16.gmra.mxu3 %vm657_vm4, %v4907_v2  ;;  %v5615_v9 = vpop.f32.mrf.mxu0  ;;  %v1115_v2 = vsel %vm5473_vm7, %v4401_v47, %v1114_v26  ;;  %v2138_v47 = vunpack.c.l.b16 %v1906_v24 }
  0xbb   : > { %v5617_v0 = vpop.f32.mrf.mxu3  ;;  %v1196_v61 = vunpack.c.l.b16 %v1115_v2 }
  0xbd   : > { %v1222_v11 = vpack.c.b16 %v1197_v62, %v1196_v61  ;;  %v4565_v61 = vld [vmem:[%s5287_s11 + $0x6c] sm:$0xf]  ;;  %v4566_v62 = vld [vmem:[%s5287_s11 + $0x70] sm:$0xf] }
  0xbe   : > { %v1932_v14 = vshrl.u32 %v4565_v61, 16  ;;  %v1941_v16 = vshll.u32 %v4566_v62, 16 }
  0xbf   : > { %4594 = vmatmul.msk.bf16.gmra.mxu0 %vm657_vm4, %v2161_v8  ;;  %v5621_v28 = vpop.f32.mrf.mxu1  ;;  %v1891_v8 = vrot.slane %v1890_v59, 4 }
  0xc0   : > { %4384 = vmatmul.msk.bf16.gmra.mxu1 %vm657_vm4, %v4892_v12  ;;  %v1908_v12 = vshrl.u32 %v4562_v4, 16  ;;  %v1934_v35 = vrot.slane %v1932_v14, 4  ;;  %v4569_v14 = vld [vmem:[%s5287_s11 + $0x7c] sm:$0xf] }
  0xc1   : > { %v1896_v23 = vsel %vm5299_vm3, %v1891_v8, %v1895_v51  ;;  %v1927_v51 = vshll.u32 %v4564_v40, 16 }
  0xc2   : > { %v5624_v22 = vpop.f32.mrf.mxu2  ;;  %v1910_v29 = vrot.slane %v1908_v12, 4 }
  0xc3   : > { %v1929_v20 = vrot.slane %v1927_v51, 5 }
  0xc4   : > { %v1914_v46 = vor.u32 %v1913_v30, %v1910_v29  ;;  %v4910_v30 = vld [vmem:[%s5287_s11 + $0x60] sm:$0xff] }
  0xc5   : > { %4417 = vmatmul.msk.bf16.gmra.mxu2 %vm657_vm4, %v1221_v19  ;;  %v1026_v19 = vld [vmem:[%s5287_s11 + $0x54] sm:$0xe]  ;;  %v1930_v25 = vsel %vm5299_vm3, %v1925_v60, %v1929_v20 }
  0xc6   : > { %v5634_v38 = vpop.f32.mrf.mxu0  ;;  %v4402_v21 = vrot.slane %v1026_v19, 9  ;;  %v1915_v59 = vrot.slane %v1914_v46, 4  ;;  %v1945_v19 = vshrl.u32 %v4566_v62, 16  ;;  %v4567_v46 = vld [vmem:[%s5287_s11 + $0x74] sm:$0x1] }
  0xc7   : > { %v5638_v39 = vpop.f32.mrf.mxu3 }
  0xc8   : > { %v1122_v50 = vsel %vm5473_vm7, %v4402_v21, %v1121_v15  ;;  %v1920_v8 = vsel %vm5299_vm3, %v1915_v59, %v1919_v31  ;;  %v1935_v15 = vshll.u32 %v4565_v61, 16  ;;  %v4403_v21 = vrot.slane %v1027_v13, 9  ;;  %v4568_v13 = vld [vmem:[%s5287_s11 + $0x78] sm:$0xf] }
  0xc9   : > { %v5641_v53 = vpop.f32.mrf.mxu1  ;;  %v1198_v56 = vunpack.c.l.b16 %v1122_v50  ;;  %v2139_v31 = vunpack.c.l.b16 %v1920_v8 }
  0xca   : > { %4530 = vmatmul.msk.bf16.gmra.mxu3 %vm657_vm4, %v4908_v1  ;;  %v5645_v55 = vpop.f32.mrf.mxu2  ;;  %v2137_v1 = vunpack.c.l.b16 %v1896_v23  ;;  %v5080_v23 = vld [vmem:[%s5287_s11 + $0x68] sm:$0x1]  ;;  %v1937_v42 = vrot.slane %v1935_v15, 5  ;;  %v5081_v15 = vld [vmem:[%s5287_s11 + $0x70] sm:$0xf] }
  0xcb   : > { %v1131_v24 = vrot.slane %v5080_v23, 5  ;;  %v1028_v23 = vld [vmem:[%s5287_s11 + $0x6c] sm:$0xe] }
  0xcc   : > { %v2163_v52 = vpack.c.b16 %v2138_v47, %v2137_v1  ;;  %v1943_v1 = vrot.slane %v1941_v16, 5  ;;  %v1947_v47 = vrot.slane %v1945_v19, 4  ;;  %v1938_v51 = vor.u32 %v1937_v42, %v1934_v35  ;;  %v5082_v42 = vld [vmem:[%s5287_s11 + $0x74] sm:$0x1] }
  0xcd   : > { %v1135_v16 = vrot.slane %v5081_v15, 5 }
  0xce   : > { %v5652_v3 = vpop.f32.mrf.mxu0 }
  0xcf   : > { %4595 = vmatmul.msk.bf16.gmra.mxu0 %vm657_vm4, %v2162_v57  ;;  %v5657_v6 = vpop.f32.mrf.mxu3  ;;  %v1199_v57 = vunpack.c.l.b16 %v1125_v48 }
  0xd0   : > { %4385 = vmatmul.msk.bf16.gmra.mxu1 %vm657_vm4, %v4893_v43 }
  0xd1   : > { %v5661_v17 = vpop.f32.mrf.mxu1  ;;  %v1223_v4 = vpack.c.b16 %v1199_v57, %v1198_v56  ;;  %v4895_v57 = vld [vmem:[%s5287_s11 + $0x60] sm:$0xff] }
  0xd5   : > { %v5668_v26 = vpop.f32.mrf.mxu2  ;;  %4418 = vmatmul.msk.bf16.gmra.mxu2 %vm657_vm4, %v1222_v11  ;;  %v1128_v11 = vrot.slane %v5079_v10, 5 }
  0xd7   : > { %v1130_v32 = vrot.slane %v1128_v11, 4  ;;  %v1129_v50 = vsel %vm5473_vm7, %v4403_v21, %v1128_v11  ;;  %v1969_v21 = vshrl.u32 %v4569_v14, 16 }
  0xd8   : > { %v5674_v44 = vpop.f32.mrf.mxu0  ;;  %v1200_v20 = vunpack.c.l.b16 %v1129_v50  ;;  %v4404_v50 = vrot.slane %v1028_v23, 9 }
  0xd9   : > { %v5676_v45 = vpop.f32.mrf.mxu3  ;;  %v1132_v48 = vsel %vm5473_vm7, %v1130_v32, %v1131_v24 }
  0xda   : > { %4531 = vmatmul.msk.bf16.gmra.mxu3 %vm657_vm4, %v4909_v33  ;;  %v2140_v33 = vunpack.c.l.b16 %v1930_v25  ;;  %v1201_v61 = vunpack.c.l.b16 %v1132_v48  ;;  %v1137_v48 = vrot.slane %v1135_v16, 4 }
  0xdc   : > { %v2164_v27 = vpack.c.b16 %v2140_v33, %v2139_v31  ;;  %v1224_v11 = vpack.c.b16 %v1201_v61, %v1200_v20  ;;  %v1959_v31 = vshll.u32 %v4568_v13, 16  ;;  %v1965_v33 = vshll.u32 %v4569_v14, 16 }
  0xdd   : > { %v5684_v2 = vpop.f32.mrf.mxu1  ;;  %v5686_v43 = vpop.f32.mrf.mxu2  ;;  %v1971_v20 = vrot.slane %v1969_v21, 4 }
  0xdf   : > { %4596 = vmatmul.msk.bf16.gmra.mxu0 %vm657_vm4, %v2163_v52  ;;  %v1948_v52 = vor.u32 %v1947_v47, %v1943_v1  ;;  %v1138_v47 = vrot.slane %v5082_v42, 5 }
  0xe0   : > { %4386 = vmatmul.msk.bf16.gmra.mxu1 %vm657_vm4, %v4894_v54  ;;  %v5692_v5 = vpop.f32.mrf.mxu0  ;;  %v1951_v54 = vshll.u32 %v4567_v46, 16  ;;  %v4911_v46 = vld [vmem:[%s5287_s11 + $0x6c] sm:$0xff] }
  0xe1   : > { %v5699_v12 = vpop.f32.mrf.mxu3  ;;  %v1949_v8 = vrot.slane %v1948_v52, 4 }
  0xe2   : > { %v1953_v25 = vrot.slane %v1951_v54, 5 }
  0xe5   : > { %4419 = vmatmul.msk.bf16.gmra.mxu2 %vm657_vm4, %v1223_v4  ;;  %v5704_v29 = vpop.f32.mrf.mxu1  ;;  %v1939_v4 = vrot.slane %v1938_v51, 4 }
  0xe7   : > { %v1944_v19 = vsel %vm5299_vm3, %v1939_v4, %v1943_v1  ;;  %v4570_v4 = vld [vmem:[%s5287_s11 + $0x80] sm:$0x1] }
  0xe8   : > { %v5707_v40 = vpop.f32.mrf.mxu2 }
  0xea   : > { %4532 = vmatmul.msk.bf16.gmra.mxu3 %vm657_vm4, %v4910_v30  ;;  %v1956_v30 = vshrl.u32 %v4568_v13, 16  ;;  %v4896_v13 = vld [vmem:[%s5287_s11 + $0x6c] sm:$0xff] }
  0xec   : > { %v5715_v56 = vpop.f32.mrf.mxu0  ;;  %v1958_v54 = vrot.slane %v1956_v30, 4 }
  0xed   : > { %v5718_v59 = vpop.f32.mrf.mxu3  ;;  %v939_v60 = vpop.f32.mrf.mxu1 }
  0xee   : > { %v940_v62 = vadd.f32 %v939_v60, %v5592_v41  ;;  %v1954_v41 = vsel %vm5299_vm3, %v1949_v8, %v1953_v25  ;;  %v1967_v60 = vrot.slane %v1965_v33, 5  ;;  %v1136_v8 = vsel %vm5473_vm7, %v4404_v50, %v1135_v16 }
  0xef   : > { %4597 = vmatmul.msk.bf16.gmra.mxu0 %vm657_vm4, %v2164_v27  ;;  %v2141_v27 = vunpack.c.l.b16 %v1944_v19  ;;  %v2142_v51 = vunpack.c.l.b16 %v1954_v41  ;;  %v1975_v19 = vshll.u32 %v4570_v4, 16 }
  0xf0   : > { %v5722_v10 = vpop.f32.mrf.mxu2  ;;  %4387 = vmatmul.msk.bf16.gmra.mxu1 %vm657_vm4, %v4895_v57  ;;  %v1961_v57 = vrot.slane %v1959_v31, 5  ;;  %v1972_v15 = vor.u32 %v1971_v20, %v1967_v60 }
  0xf1   : > { %v2165_v25 = vpack.c.b16 %v2142_v51, %v2141_v27  ;;  %v1977_v42 = vrot.slane %v1975_v19, 5  ;;  %v4572_v27 = vld [vmem:[%s5287_s11 + $0x88] sm:$0xf]  ;;  %v5083_v51 = vld [vmem:[%s5287_s11 + $0x7c] sm:$0xf] }
  0xf2   : > { %v1962_v14 = vor.u32 %v1961_v57, %v1958_v54  ;;  %v1029_v54 = vld [vmem:[%s5287_s11 + $0x78] sm:$0xe] }
  0xf4   : > { %v5733_v24 = vpop.f32.mrf.mxu0  ;;  %v1963_v21 = vrot.slane %v1962_v14, 4 }
  0xf5   : > { %v5735_v32 = vpop.f32.mrf.mxu3  ;;  %4420 = vmatmul.msk.bf16.gmra.mxu2 %vm657_vm4, %v1224_v11  ;;  %v941_v35 = vpop.f32.mrf.mxu1 }
  0xf6   : > { %v942_v1 = vadd.f32 %v941_v35, %v5615_v9  ;;  %v1139_v9 = vsel %vm5473_vm7, %v1137_v48, %v1138_v47  ;;  %v1973_v35 = vrot.slane %v1972_v15, 4  ;;  %v4571_v47 = vld [vmem:[%s5287_s11 + $0x84] sm:$0xf]  ;;  %v4912_v15 = vld [vmem:[%s5287_s11 + $0x78] sm:$0xff] }
  0xf7   : > { %v1203_v30 = vunpack.c.l.b16 %v1139_v9  ;;  %v1983_v57 = vshll.u32 %v4571_v47, 16  ;;  %v1993_v9 = vshrl.u32 %v4572_v27, 16 }
  0xf8   : > { %v1292_v52 = vpop.f32.mrf.mxu2  ;;  %v1978_v4 = vsel %vm5299_vm3, %v1973_v35, %v1977_v42 }
  0xf9   : > { %v1372_v61 = vadd.f32 %v1292_v52, %v940_v62  ;;  %v1202_v62 = vunpack.c.l.b16 %v1136_v8  ;;  %v1142_v52 = vrot.slane %v5083_v51, 5  ;;  %v1989_v8 = vshll.u32 %v4572_v27, 16 }
  0xfa   : > { %4533 = vmatmul.msk.bf16.gmra.mxu3 %vm657_vm4, %v4911_v46  ;;  %v1995_v35 = vrot.slane %v1993_v9, 4 }
  0xfb   : > { %v1225_v48 = vpack.c.b16 %v1203_v30, %v1202_v62 }
  0xfc   : > { %v2233_v11 = vpop.f32.mrf.mxu0 }
  0xfd   : > { %v1579_v41 = vpop.f32.mrf.mxu3  ;;  %v944_v23 = vpop.f32.mrf.mxu1 }
  0xfe   : > { %v1659_v31 = vadd.f32 %v1579_v41, %v1372_v61  ;;  %v945_v16 = vadd.f32 %v944_v23, %v5634_v38  ;;  %v1980_v38 = vshrl.u32 %v4571_v47, 16  ;;  %v1968_v61 = vsel %vm5299_vm3, %v1963_v21, %v1967_v60 }
  0xff   : > { %4598 = vmatmul.msk.bf16.gmra.mxu0 %vm657_vm4, %v2165_v25  ;;  %v5084_v25 = vld [vmem:[%s5287_s11 + $0x80] sm:$0x1]  ;;  %v4405_v41 = vrot.slane %v1029_v54, 9  ;;  %v1144_v23 = vrot.slane %v1142_v52, 4  ;;  %v2143_v62 = vunpack.c.l.b16 %v1968_v61  ;;  %v2144_v60 = vunpack.c.l.b16 %v1978_v4 }
 0x100   : > { %v1294_v33 = vpop.f32.mrf.mxu2  ;;  %4388 = vmatmul.msk.bf16.gmra.mxu1 %vm657_vm4, %v4896_v13  ;;  %v5752_v46 = vadd.f32 %v2233_v11, %v1659_v31  ;;  %v1145_v11 = vrot.slane %v5084_v25, 5  ;;  %v1982_v30 = vrot.slane %v1980_v38, 4  ;;  %v1985_v31 = vrot.slane %v1983_v57, 5  ;;  %v4897_v38 = vld [vmem:[%s5287_s11 + $0x78] sm:$0xff] }
 0x101   : > { %v1373_v50 = vadd.f32 %v1294_v33, %v942_v1  ;;  %v1991_v21 = vrot.slane %v1989_v8, 5  ;;  %v2166_v27 = vpack.c.b16 %v2144_v60, %v2143_v62  ;;  %v4575_v62 = vld [vmem:[%s5287_s11 + $0x94] sm:$0xf]  ;;  %v5085_v60 = vld [vmem:[%s5287_s11 + $0x88] sm:$0xf] }
 0x102   : > { %v1986_v51 = vor.u32 %v1985_v31, %v1982_v30  ;;  %v1149_v30 = vrot.slane %v5085_v60, 5  ;;  %v1030_v31 = vld [vmem:[%s5287_s11 + $0x84] sm:$0xe] }
 0x103   : > { %v1996_v57 = vor.u32 %v1995_v35, %v1991_v21 }
 0x104   : > { %v2235_v20 = vpop.f32.mrf.mxu0  ;;  %v1987_v25 = vrot.slane %v1986_v51, 4 }
 0x105   : > { %v1581_v1 = vpop.f32.mrf.mxu3  ;;  %4421 = vmatmul.msk.bf16.gmra.mxu2 %vm657_vm4, %v1225_v48  ;;  %v946_v13 = vpop.f32.mrf.mxu1  ;;  %v4573_v48 = vld [vmem:[%s5287_s11 + $0x8c] sm:$0x1] }
 0x106   : > { %v1660_v14 = vadd.f32 %v1581_v1, %v1373_v50  ;;  %v947_v19 = vadd.f32 %v946_v13, %v5652_v3  ;;  %v1143_v50 = vsel %vm5473_vm7, %v4405_v41, %v1142_v52  ;;  %v1146_v3 = vsel %vm5473_vm7, %v1144_v23, %v1145_v11 }
 0x107   : > { %v1999_v61 = vshll.u32 %v4573_v48, 16  ;;  %v1205_v8 = vunpack.c.l.b16 %v1146_v3  ;;  %v1997_v1 = vrot.slane %v1996_v57, 4  ;;  %v2017_v3 = vshrl.u32 %v4575_v62, 16  ;;  %v4913_v57 = vld [vmem:[%s5287_s11 + $0x84] sm:$0xff] }
 0x108   : > { %v1297_v33 = vpop.f32.mrf.mxu2  ;;  %v5765_v42 = vadd.f32 %v2235_v20, %v1660_v14  ;;  %v4574_v14 = vld [vmem:[%s5287_s11 + $0x90] sm:$0xf] }
 0x109   : > { %v1374_v47 = vadd.f32 %v1297_v33, %v945_v16  ;;  %v1204_v16 = vunpack.c.l.b16 %v1143_v50  ;;  %v2001_v13 = vrot.slane %v1999_v61, 5  ;;  %v2004_v33 = vshrl.u32 %v4574_v14, 16 }
 0x10a   : > { %4534 = vmatmul.msk.bf16.gmra.mxu3 %vm657_vm4, %v4912_v15  ;;  %v2007_v48 = vshll.u32 %v4574_v14, 16  ;;  %v2013_v50 = vshll.u32 %v4575_v62, 16  ;;  %v4406_v61 = vrot.slane %v1030_v31, 9 }
 0x10b   : > { %v1226_v23 = vpack.c.b16 %v1205_v8, %v1204_v16  ;;  %v2006_v8 = vrot.slane %v2004_v33, 4 }
 0x10c   : > { %v2238_v54 = vpop.f32.mrf.mxu0 }
 0x10d   : > { %v1584_v4 = vpop.f32.mrf.mxu3  ;;  %v949_v20 = vpop.f32.mrf.mxu1 }
 0x10e   : > { %v1661_v9 = vadd.f32 %v1584_v4, %v1374_v47  ;;  %v950_v52 = vadd.f32 %v949_v20, %v5674_v44  ;;  %v1992_v44 = vsel %vm5299_vm3, %v1987_v25, %v1991_v21  ;;  %v2002_v47 = vsel %vm5299_vm3, %v1997_v1, %v2001_v13 }
 0x10f   : > { %4599 = vmatmul.msk.bf16.gmra.mxu0 %vm657_vm4, %v2166_v27  ;;  %v5086_v27 = vld [vmem:[%s5287_s11 + $0x8c] sm:$0x1]  ;;  %v1151_v4 = vrot.slane %v1149_v30, 4  ;;  %v2145_v20 = vunpack.c.l.b16 %v1992_v44  ;;  %v2146_v16 = vunpack.c.l.b16 %v2002_v47  ;;  %v2009_v25 = vrot.slane %v2007_v48, 5  ;;  %v4898_v44 = vld [vmem:[%s5287_s11 + $0x84] sm:$0xff] }
 0x110   : > { %v1299_v11 = vpop.f32.mrf.mxu2  ;;  %4389 = vmatmul.msk.bf16.gmra.mxu1 %vm657_vm4, %v4897_v38  ;;  %v5778_v15 = vadd.f32 %v2238_v54, %v1661_v9  ;;  %v1152_v51 = vrot.slane %v5086_v27, 5  ;;  %v2019_v1 = vrot.slane %v2017_v3, 4 }
 0x111   : > { %v1375_v41 = vadd.f32 %v1299_v11, %v947_v19  ;;  %v2015_v11 = vrot.slane %v2013_v50, 5  ;;  %v2167_v62 = vpack.c.b16 %v2146_v16, %v2145_v20  ;;  %v2010_v31 = vor.u32 %v2009_v25, %v2006_v8  ;;  %v4578_v20 = vld [vmem:[%s5287_s11 + $0xa0] sm:$0xf]  ;;  %v5087_v16 = vld [vmem:[%s5287_s11 + $0x94] sm:$0xf] }
 0x112   : > { %v1156_v8 = vrot.slane %v5087_v16, 5 }
 0x113   : > { %v2020_v33 = vor.u32 %v2019_v1, %v2015_v11 }
 0x114   : > { %v2240_v35 = vpop.f32.mrf.mxu0 }
 0x115   : > { %v1586_v19 = vpop.f32.mrf.mxu3  ;;  %4422 = vmatmul.msk.bf16.gmra.mxu2 %vm657_vm4, %v1226_v23  ;;  %v951_v54 = vpop.f32.mrf.mxu1  ;;  %v4576_v23 = vld [vmem:[%s5287_s11 + $0x98] sm:$0x1] }
 0x116   : > { %v1662_v38 = vadd.f32 %v1586_v19, %v1375_v41  ;;  %v952_v21 = vadd.f32 %v951_v54, %v5692_v5  ;;  %v1150_v41 = vsel %vm5473_vm7, %v4406_v61, %v1149_v30  ;;  %v1153_v5 = vsel %vm5473_vm7, %v1151_v4, %v1152_v51 }
 0x117   : > { %v2023_v47 = vshll.u32 %v4576_v23, 16  ;;  %v1207_v50 = vunpack.c.l.b16 %v1153_v5  ;;  %v2011_v51 = vrot.slane %v2010_v31, 4  ;;  %v2021_v19 = vrot.slane %v2020_v33, 4  ;;  %v4914_v33 = vld [vmem:[%s5287_s11 + $0x90] sm:$0xff] }
 0x118   : > { %v1302_v9 = vpop.f32.mrf.mxu2  ;;  %v5791_v13 = vadd.f32 %v2240_v35, %v1662_v38  ;;  %v4577_v38 = vld [vmem:[%s5287_s11 + $0x9c] sm:$0xf]  ;;  %v2041_v5 = vshrl.u32 %v4578_v20, 16 }
 0x119   : > { %v1376_v14 = vadd.f32 %v1302_v9, %v950_v52  ;;  %v1206_v52 = vunpack.c.l.b16 %v1150_v41  ;;  %v2025_v54 = vrot.slane %v2023_v47, 5  ;;  %v1031_v9 = vld [vmem:[%s5287_s11 + $0x90] sm:$0xe]  ;;  %v2031_v25 = vshll.u32 %v4577_v38, 16 }
 0x11a   : > { %4535 = vmatmul.msk.bf16.gmra.mxu3 %vm657_vm4, %v4913_v57  ;;  %v2037_v41 = vshll.u32 %v4578_v20, 16 }
 0x11b   : > { %v1227_v4 = vpack.c.b16 %v1207_v50, %v1206_v52  ;;  %v2026_v23 = vsel %vm5299_vm3, %v2021_v19, %v2025_v54  ;;  %v2043_v19 = vrot.slane %v2041_v5, 4 }
 0x11c   : > { %v2243_v60 = vpop.f32.mrf.mxu0 }
 0x11d   : > { %v1589_v48 = vpop.f32.mrf.mxu3  ;;  %v954_v35 = vpop.f32.mrf.mxu1 }
 0x11e   : > { %v1663_v3 = vadd.f32 %v1589_v48, %v1376_v14  ;;  %v955_v30 = vadd.f32 %v954_v35, %v5715_v56  ;;  %v2028_v56 = vshrl.u32 %v4577_v38, 16  ;;  %v2016_v14 = vsel %vm5299_vm3, %v2011_v51, %v2015_v11 }
 0x11f   : > { %4600 = vmatmul.msk.bf16.gmra.mxu0 %vm657_vm4, %v2167_v62  ;;  %v5088_v62 = vld [vmem:[%s5287_s11 + $0x98] sm:$0x1]  ;;  %v4407_v48 = vrot.slane %v1031_v9, 9  ;;  %v1158_v35 = vrot.slane %v1156_v8, 4  ;;  %v2147_v52 = vunpack.c.l.b16 %v2016_v14  ;;  %v2148_v11 = vunpack.c.l.b16 %v2026_v23 }
 0x120   : > { %v1304_v27 = vpop.f32.mrf.mxu2  ;;  %4390 = vmatmul.msk.bf16.gmra.mxu1 %vm657_vm4, %v4898_v44  ;;  %v5804_v57 = vadd.f32 %v2243_v60, %v1663_v3  ;;  %v1159_v60 = vrot.slane %v5088_v62, 5  ;;  %v2030_v50 = vrot.slane %v2028_v56, 4  ;;  %v2033_v3 = vrot.slane %v2031_v25, 5  ;;  %v4899_v56 = vld [vmem:[%s5287_s11 + $0x90] sm:$0xff] }
 0x121   : > { %v1377_v61 = vadd.f32 %v1304_v27, %v952_v21  ;;  %v2039_v51 = vrot.slane %v2037_v41, 5  ;;  %v2168_v20 = vpack.c.b16 %v2148_v11, %v2147_v52  ;;  %v4581_v11 = vld [vmem:[%s5287_s11 + $0xac] sm:$0xf] }
 0x122   : > { %v2034_v16 = vor.u32 %v2033_v3, %v2030_v50  ;;  %v1032_v50 = vld [vmem:[%s5287_s11 + $0x9c] sm:$0xe] }
 0x123   : > { %v2044_v25 = vor.u32 %v2043_v19, %v2039_v51 }
 0x124   : > { %v2245_v1 = vpop.f32.mrf.mxu0 }
 0x125   : > { %v1591_v21 = vpop.f32.mrf.mxu3  ;;  %4423 = vmatmul.msk.bf16.gmra.mxu2 %vm657_vm4, %v1227_v4  ;;  %v956_v44 = vpop.f32.mrf.mxu1  ;;  %v4579_v4 = vld [vmem:[%s5287_s11 + $0xa4] sm:$0x1] }
 0x126   : > { %v1664_v31 = vadd.f32 %v1591_v21, %v1377_v61  ;;  %v957_v47 = vadd.f32 %v956_v44, %v5733_v24  ;;  %v1157_v61 = vsel %vm5473_vm7, %v4407_v48, %v1156_v8  ;;  %v1160_v24 = vsel %vm5473_vm7, %v1158_v35, %v1159_v60  ;;  %v4580_v44 = vld [vmem:[%s5287_s11 + $0xa8] sm:$0xf]  ;;  %v5089_v35 = vld [vmem:[%s5287_s11 + $0xa0] sm:$0xf] }
 0x127   : > { %v2047_v14 = vshll.u32 %v4579_v4, 16  ;;  %v1209_v41 = vunpack.c.l.b16 %v1160_v24  ;;  %v2035_v8 = vrot.slane %v2034_v16, 4  ;;  %v2045_v60 = vrot.slane %v2044_v25, 4 }
 0x128   : > { %v1307_v27 = vpop.f32.mrf.mxu2  ;;  %v5817_v54 = vadd.f32 %v2245_v1, %v1664_v31  ;;  %v1163_v52 = vrot.slane %v5089_v35, 5  ;;  %v2055_v19 = vshll.u32 %v4580_v44, 16  ;;  %v2065_v24 = vshrl.u32 %v4581_v11, 16 }
 0x129   : > { %v1378_v38 = vadd.f32 %v1307_v27, %v955_v30  ;;  %v1208_v30 = vunpack.c.l.b16 %v1157_v61  ;;  %v2049_v21 = vrot.slane %v2047_v14, 5  ;;  %v2040_v3 = vsel %vm5299_vm3, %v2035_v8, %v2039_v51 }
 0x12a   : > { %4536 = vmatmul.msk.bf16.gmra.mxu3 %vm657_vm4, %v4914_v33  ;;  %v2052_v27 = vshrl.u32 %v4580_v44, 16  ;;  %v2061_v61 = vshll.u32 %v4581_v11, 16  ;;  %v1165_v25 = vrot.slane %v1163_v52, 4  ;;  %v2149_v51 = vunpack.c.l.b16 %v2040_v3  ;;  %v4582_v11 = vld [vmem:[%s5287_s11 + $0xb0] sm:$0x1]  ;;  %v4900_v3 = vld [vmem:[%s5287_s11 + $0x9c] sm:$0xff] }
 0x12b   : > { %v1228_v48 = vpack.c.b16 %v1209_v41, %v1208_v30  ;;  %v2050_v4 = vsel %vm5299_vm3, %v2045_v60, %v2049_v21  ;;  %v2057_v8 = vrot.slane %v2055_v19, 5  ;;  %v2067_v21 = vrot.slane %v2065_v24, 4 }
 0x12c   : > { %v2248_v9 = vpop.f32.mrf.mxu0  ;;  %v2150_v41 = vunpack.c.l.b16 %v2050_v4  ;;  %v2063_v60 = vrot.slane %v2061_v61, 5  ;;  %v2071_v4 = vshll.u32 %v4582_v11, 16 }
 0x12d   : > { %v1594_v1 = vpop.f32.mrf.mxu3  ;;  %v959_v23 = vpop.f32.mrf.mxu1 }
 0x12e   : > { %v1665_v5 = vadd.f32 %v1594_v1, %v1378_v38  ;;  %v4915_v1 = vld [vmem:[%s5287_s11 + $0x9c] sm:$0xff]  ;;  %v960_v30 = vadd.f32 %v959_v23, %v5568_v7  ;;  %v2169_v7 = vpack.c.b16 %v2150_v41, %v2149_v51  ;;  %v2073_v51 = vrot.slane %v2071_v4, 5 }
 0x12f   : > { %4601 = vmatmul.msk.bf16.gmra.mxu0 %vm657_vm4, %v2168_v20  ;;  %v5090_v20 = vld [vmem:[%s5287_s11 + $0xa4] sm:$0x1] }
 0x130   : > { %v1309_v62 = vpop.f32.mrf.mxu2  ;;  %4391 = vmatmul.msk.bf16.gmra.mxu1 %vm657_vm4, %v4899_v56  ;;  %v5829_v31 = vadd.f32 %v2248_v9, %v1665_v5  ;;  %v1166_v16 = vrot.slane %v5090_v20, 5  ;;  %v4408_v56 = vrot.slane %v1032_v50, 9  ;;  %v2054_v5 = vrot.slane %v2052_v27, 4 }
 0x131   : > { %v1379_v33 = vadd.f32 %v1309_v62, %v957_v47 }
 0x132   : > { %v2058_v23 = vor.u32 %v2057_v8, %v2054_v5 }
 0x134   : > { %v2250_v38 = vpop.f32.mrf.mxu0 }
 0x135   : > { %v1596_v47 = vpop.f32.mrf.mxu3  ;;  %4424 = vmatmul.msk.bf16.gmra.mxu2 %vm657_vm4, %v1228_v48  ;;  %v961_v9 = vpop.f32.mrf.mxu1  ;;  %v1164_v48 = vsel %vm5473_vm7, %v4408_v56, %v1163_v52  ;;  %v4583_v52 = vld [vmem:[%s5287_s11 + $0xb4] sm:$0xf]  ;;  %v2059_v56 = vrot.slane %v2058_v23, 4 }
 0x136   : > { %v1666_v14 = vadd.f32 %v1596_v47, %v1379_v33  ;;  %v1167_v33 = vsel %vm5473_vm7, %v1165_v25, %v1166_v16  ;;  %v1210_v27 = vunpack.c.l.b16 %v1164_v48  ;;  %v4584_v47 = vld [vmem:[%s5287_s11 + $0xb8] sm:$0xf]  ;;  %v962_v16 = vadd.f32 %v961_v9, %v5584_v34 }
 0x137   : > { %v1211_v19 = vunpack.c.l.b16 %v1167_v33  ;;  %v2076_v5 = vshrl.u32 %v4583_v52, 16  ;;  %v2079_v8 = vshll.u32 %v4583_v52, 16  ;;  %v2089_v48 = vshrl.u32 %v4584_v47, 16  ;;  %v1033_v33 = vld [vmem:[%s5287_s11 + $0xa8] sm:$0xe] }
 0x138   : > { %v1312_v62 = vpop.f32.mrf.mxu2  ;;  %v5842_v44 = vadd.f32 %v2250_v38, %v1666_v14  ;;  %v2068_v38 = vor.u32 %v2067_v21, %v2063_v60  ;;  %v5091_v21 = vld [vmem:[%s5287_s11 + $0xac] sm:$0xf]  ;;  %v2064_v9 = vsel %vm5299_vm3, %v2059_v56, %v2063_v60 }
 0x139   : > { %v1380_v35 = vadd.f32 %v1312_v62, %v960_v30  ;;  %v1229_v14 = vpack.c.b16 %v1211_v19, %v1210_v27  ;;  %v2085_v62 = vshll.u32 %v4584_v47, 16  ;;  %v2078_v27 = vrot.slane %v2076_v5, 4 }
 0x13a   : > { %4537 = vmatmul.msk.bf16.gmra.mxu3 %vm657_vm4, %v4915_v1  ;;  %v2069_v1 = vrot.slane %v2068_v38, 4  ;;  %v2081_v19 = vrot.slane %v2079_v8, 5  ;;  %v2091_v47 = vrot.slane %v2089_v48, 4  ;;  %v4901_v48 = vld [vmem:[%s5287_s11 + $0xa8] sm:$0xff] }
 0x13b   : > { %v2087_v38 = vrot.slane %v2085_v62, 5 }
 0x13c   : > { %v2253_v50 = vpop.f32.mrf.mxu0  ;;  %v2074_v11 = vsel %vm5299_vm3, %v2069_v1, %v2073_v51 }
 0x13d   : > { %v1599_v61 = vpop.f32.mrf.mxu3  ;;  %v964_v24 = vpop.f32.mrf.mxu1  ;;  %v2152_v56 = vunpack.c.l.b16 %v2074_v11  ;;  %v2092_v8 = vor.u32 %v2091_v47, %v2087_v38 }
 0x13e   : > { %v1667_v20 = vadd.f32 %v1599_v61, %v1380_v35  ;;  %v1170_v35 = vrot.slane %v5091_v21, 5  ;;  %v4916_v61 = vld [vmem:[%s5287_s11 + $0xa8] sm:$0xff]  ;;  %v965_v60 = vadd.f32 %v964_v24, %v5604_v58 }
 0x13f   : > { %4602 = vmatmul.msk.bf16.gmra.mxu0 %vm657_vm4, %v2169_v7  ;;  %v5092_v7 = vld [vmem:[%s5287_s11 + $0xb0] sm:$0x1] }
 0x140   : > { %v1314_v25 = vpop.f32.mrf.mxu2  ;;  %4392 = vmatmul.msk.bf16.gmra.mxu1 %vm657_vm4, %v4900_v3  ;;  %v5856_v30 = vadd.f32 %v2253_v50, %v1667_v20  ;;  %v1173_v23 = vrot.slane %v5092_v7, 5  ;;  %v4409_v20 = vrot.slane %v1033_v33, 9  ;;  %v1172_v52 = vrot.slane %v1170_v35, 4 }
 0x141   : > { %v1381_v41 = vadd.f32 %v1314_v25, %v962_v16  ;;  %v2151_v16 = vunpack.c.l.b16 %v2064_v9  ;;  %v4585_v25 = vld [vmem:[%s5287_s11 + $0xbc] sm:$0x1] }
 0x142   : > { %v1174_v5 = vsel %vm5473_vm7, %v1172_v52, %v1173_v23  ;;  %v2095_v58 = vshll.u32 %v4585_v25, 16  ;;  %v4587_v52 = vld [vmem:[%s5287_s11 + $0xc4] sm:$0xf] }
 0x143   : > { %v2170_v24 = vpack.c.b16 %v2152_v56, %v2151_v16  ;;  %v1213_v11 = vunpack.c.l.b16 %v1174_v5  ;;  %v1034_v16 = vld [vmem:[%s5287_s11 + $0xb4] sm:$0xe]  ;;  %v5094_v56 = vld [vmem:[%s5287_s11 + $0xb8] sm:$0xf]  ;;  %v2113_v5 = vshrl.u32 %v4587_v52, 16 }
 0x144   : > { %v2255_v34 = vpop.f32.mrf.mxu0  ;;  %v1177_v25 = vrot.slane %v5094_v56, 5 }
 0x145   : > { %v1601_v50 = vpop.f32.mrf.mxu3  ;;  %4425 = vmatmul.msk.bf16.gmra.mxu2 %vm657_vm4, %v1229_v14  ;;  %v966_v3 = vpop.f32.mrf.mxu1  ;;  %v2082_v14 = vor.u32 %v2081_v19, %v2078_v27  ;;  %v2097_v27 = vrot.slane %v2095_v58, 5  ;;  %v4586_v19 = vld [vmem:[%s5287_s11 + $0xc0] sm:$0xf]  ;;  %v5095_v58 = vld [vmem:[%s5287_s11 + $0x14] sm:$0x1] }
 0x146   : > { %v1668_v4 = vadd.f32 %v1601_v50, %v1381_v41  ;;  %v1171_v41 = vsel %vm5473_vm7, %v4409_v20, %v1170_v35  ;;  %v2093_v35 = vrot.slane %v2092_v8, 4  ;;  %v967_v23 = vadd.f32 %v966_v3, %v5621_v28 }
 0x147   : > { %v1212_v9 = vunpack.c.l.b16 %v1171_v41  ;;  %v2083_v50 = vrot.slane %v2082_v14, 4  ;;  %v2100_v3 = vshrl.u32 %v4586_v19, 16  ;;  %v2103_v14 = vshll.u32 %v4586_v19, 16  ;;  %v4917_v19 = vld [vmem:[%s5287_s11 + $0xb4] sm:$0xff] }
 0x148   : > { %v1317_v1 = vpop.f32.mrf.mxu2  ;;  %v5869_v51 = vadd.f32 %v2255_v34, %v1668_v4  ;;  %v5093_v4 = vld [vmem:[%s5287_s11 + $0x10] sm:$0xf]  ;;  %v2098_v28 = vsel %vm5299_vm3, %v2093_v35, %v2097_v27  ;;  %v2109_v41 = vshll.u32 %v4587_v52, 16  ;;  %v1179_v35 = vrot.slane %v1177_v25, 4  ;;  %v4606_v27 = vld [vmem:[%s5287_s11 + $0xc] sm:$0xe] }
 0x149   : > { %v1382_v21 = vadd.f32 %v1317_v1, %v965_v60  ;;  %v1230_v60 = vpack.c.b16 %v1213_v11, %v1212_v9  ;;  %v5096_v9 = vld [vmem:[%s5287_s11 + $0xbc] sm:$0x1]  ;;  %v4622_v52 = vrot.slane %v4606_v27, 9 }
 0x14a   : > { %4538 = vmatmul.msk.bf16.gmra.mxu3 %vm657_vm4, %v4916_v61  ;;  %v2411_v61 = vrot.slane %v5093_v4, 5  ;;  %v2102_v4 = vrot.slane %v2100_v3, 4 }
 0x14c   : > { %v2258_v62 = vpop.f32.mrf.mxu0  ;;  %v2413_v8 = vrot.slane %v2411_v61, 4 }
 0x14d   : > { %v1604_v33 = vpop.f32.mrf.mxu3  ;;  %v969_v34 = vpop.f32.mrf.mxu1 }
 0x14e   : > { %v1669_v7 = vadd.f32 %v1604_v33, %v1382_v21  ;;  %v2088_v21 = vsel %vm5299_vm3, %v2083_v50, %v2087_v38  ;;  %v4410_v33 = vrot.slane %v1034_v16, 9  ;;  %v970_v56 = vadd.f32 %v969_v34, %v5641_v53 }
 0x14f   : > { %4603 = vmatmul.msk.bf16.gmra.mxu0 %vm657_vm4, %v2170_v24  ;;  %v2414_v24 = vrot.slane %v5095_v58, 5  ;;  %v2153_v38 = vunpack.c.l.b16 %v2088_v21  ;;  %v2111_v16 = vrot.slane %v2109_v41, 5  ;;  %v2115_v58 = vrot.slane %v2113_v5, 4  ;;  %v4588_v21 = vld [vmem:[%s5287_s11 + $0xc8] sm:$0x1] }
 0x150   : > { %v1319_v20 = vpop.f32.mrf.mxu2  ;;  %4393 = vmatmul.msk.bf16.gmra.mxu1 %vm657_vm4, %v4901_v48  ;;  %v5885_v1 = vadd.f32 %v2258_v62, %v1669_v7  ;;  %v1180_v62 = vrot.slane %v5096_v9, 5  ;;  %v2154_v7 = vunpack.c.l.b16 %v2098_v28  ;;  %v2412_v28 = vsel %vm5473_vm7, %v4622_v52, %v2411_v61  ;;  %v4768_v41 = vld [vmem:[%s5287_s11 + $0x18] sm:$0xf] }
 0x151   : > { %v1383_v47 = vadd.f32 %v1319_v20, %v967_v23  ;;  %v2105_v20 = vrot.slane %v2103_v14, 5  ;;  %v2523_v53 = vunpack.c.l.b16 %v2412_v28  ;;  %v2119_v27 = vshll.u32 %v4588_v21, 16 }
 0x152   : > { %v1181_v14 = vsel %vm5473_vm7, %v1179_v35, %v1180_v62  ;;  %v2171_v5 = vpack.c.b16 %v2154_v7, %v2153_v38  ;;  %v3079_v62 = vshrl.u32 %v4768_v41, 16  ;;  %v3082_v35 = vshll.u32 %v4768_v41, 16 }
 0x154   : > { %v2260_v48 = vpop.f32.mrf.mxu0  ;;  %v3081_v21 = vrot.slane %v3079_v62, 4 }
 0x155   : > { %v1606_v11 = vpop.f32.mrf.mxu3  ;;  %4426 = vmatmul.msk.bf16.gmra.mxu2 %vm657_vm4, %v1230_v60  ;;  %v971_v50 = vpop.f32.mrf.mxu1  ;;  %v1178_v60 = vsel %vm5473_vm7, %v4410_v33, %v1177_v25  ;;  %v5909_v25 = vld [vmem:[%s5287_s11 + $0x1c] sm:$0xf]  ;;  %v2116_v33 = vor.u32 %v2115_v58, %v2111_v16 }
 0x156   : > { %v1670_v23 = vadd.f32 %v1606_v11, %v1383_v47  ;;  %v2415_v47 = vsel %vm5473_vm7, %v2413_v8, %v2414_v24  ;;  %v2106_v11 = vor.u32 %v2105_v20, %v2102_v4  ;;  %v4902_v24 = vld [vmem:[%s5287_s11 + $0xb4] sm:$0xff]  ;;  %v3092_v38 = vshrl.u32 %v5909_v25, 16 }
 0x157   : > { %v2524_v34 = vunpack.c.l.b16 %v2415_v47  ;;  %v972_v4 = vadd.f32 %v971_v50, %v5661_v17 }
 0x158   : > { %v1322_v9 = vpop.f32.mrf.mxu2  ;;  %v5913_v52 = vadd.f32 %v2260_v48, %v1670_v23  ;;  %v2107_v48 = vrot.slane %v2106_v11, 4  ;;  %v2117_v23 = vrot.slane %v2116_v33, 4  ;;  %v3094_v41 = vrot.slane %v3092_v38, 4 }
 0x159   : > { %v1384_v3 = vadd.f32 %v1322_v9, %v970_v56  ;;  %v5911_v61 = vpack.c.b16 %v2524_v34, %v2523_v53  ;;  %v1214_v56 = vunpack.c.l.b16 %v1178_v60  ;;  %v1215_v9 = vunpack.c.l.b16 %v1181_v14 }
 0x15a   : > { %4539 = vmatmul.msk.bf16.gmra.mxu3 %vm657_vm4, %v4917_v19  ;;  %6685 = vst [vmem:[#allocation5_spill] sm:$0xff] %v5913_v52  ;;  %v3088_v19 = vshll.u32 %v5909_v25, 16  ;;  %v2121_v60 = vrot.slane %v2119_v27, 5  ;;  %v3084_v14 = vrot.slane %v3082_v35, 5  ;;  %v2112_v17 = vsel %vm5299_vm3, %v2107_v48, %v2111_v16  ;;  %v4833_v48 = vld [vmem:[%s5287_s11 + $0x18] sm:$0xe] }
 0x15b   : > { %v1231_v58 = vpack.c.b16 %v1215_v9, %v1214_v56  ;;  %v4918_v9 = vld [vmem:[%s5287_s11 + $0xc0] sm:$0xff]  ;;  %v2155_v16 = vunpack.c.l.b16 %v2112_v17 }
 0x15c   : > { %v2263_v8 = vpop.f32.mrf.mxu0  ;;  %v3090_v34 = vrot.slane %v3088_v19, 5  ;;  %v2122_v50 = vsel %vm5299_vm3, %v2117_v23, %v2121_v60  ;;  %v3085_v27 = vor.u32 %v3084_v14, %v3081_v21  ;;  %v4771_v23 = vld [vmem:[%s5287_s11 + $0x24] sm:$0xf]  ;;  %v5939_v60 = vld [vmem:[%s5287_s11 + $0x28] sm:$0xf] }
 0x15d   : > { %v1609_v28 = vpop.f32.mrf.mxu3  ;;  %v974_v47 = vpop.f32.mrf.mxu1  ;;  %v2156_v35 = vunpack.c.l.b16 %v2122_v50 }
 0x15e   : > { %v1671_v7 = vadd.f32 %v1609_v28, %v1384_v3  ;;  %v5924_v3 = vld [vmem:[%s5287_s11 + $0x20] sm:$0x1]  ;;  %v975_v62 = vadd.f32 %v974_v47, %v5684_v2  ;;  %v3086_v38 = vrot.slane %v3085_v27, 4  ;;  %v5097_v47 = vld [vmem:[%s5287_s11 + $0x1c] sm:$0xf] }
 0x15f   : > { %4604 = vmatmul.msk.bf16.gmra.mxu0 %vm657_vm4, %v2171_v5  ;;  %v2418_v14 = vrot.slane %v5097_v47, 5  ;;  %v4607_v27 = vld [vmem:[%s5287_s11 + $0x18] sm:$0xe] }
 0x160   : > { %v1324_v20 = vpop.f32.mrf.mxu2  ;;  %4394 = vmatmul.msk.bf16.gmra.mxu1 %vm657_vm4, %v4902_v24  ;;  %v5921_v52 = vadd.f32 %v2263_v8, %v1671_v7  ;;  %v3095_v24 = vor.u32 %v3094_v41, %v3090_v34  ;;  %v3098_v8 = vshll.u32 %v5924_v3, 16  ;;  %v3091_v17 = vsel %vm5299_vm3, %v3086_v38, %v3090_v34 }
 0x161   : > { %v1385_v53 = vadd.f32 %v1324_v20, %v972_v4  ;;  %v2172_v20 = vpack.c.b16 %v2156_v35, %v2155_v16  ;;  %v3753_v34 = vrot.slane %v5924_v3, 5  ;;  %v5098_v16 = vld [vmem:[%s5287_s11 + $0x20] sm:$0x1]  ;;  %v4623_v38 = vrot.slane %v4607_v27, 9 }
 0x162   : > { %v3096_v7 = vrot.slane %v3095_v24, 4  ;;  %v3100_v4 = vrot.slane %v3098_v8, 5  ;;  %v3103_v24 = vshrl.u32 %v4771_v23, 16  ;;  %v3106_v8 = vshll.u32 %v4771_v23, 16 }
 0x163   : > { %v2421_v35 = vrot.slane %v5098_v16, 5  ;;  %v2419_v27 = vsel %vm5473_vm7, %v4623_v38, %v2418_v14  ;;  %v4774_v38 = vld [vmem:[%s5287_s11 + $0x30] sm:$0xf] }
 0x164   : > { %v2265_v5 = vpop.f32.mrf.mxu0  ;;  %v3101_v50 = vsel %vm5299_vm3, %v3096_v7, %v3100_v4  ;;  %v2420_v7 = vrot.slane %v2418_v14, 4  ;;  %v3108_v3 = vrot.slane %v3106_v8, 5 }
 0x165   : > { %v1611_v11 = vpop.f32.mrf.mxu3  ;;  %4427 = vmatmul.msk.bf16.gmra.mxu2 %vm657_vm4, %v1231_v58  ;;  %v976_v33 = vpop.f32.mrf.mxu1  ;;  %v3750_v58 = vrot.slane %v5909_v25, 5  ;;  %v3465_v23 = vunpack.c.l.b16 %v3101_v50 }
 0x166   : > { %v1672_v56 = vadd.f32 %v1611_v11, %v1385_v53  ;;  %v4849_v11 = vrot.slane %v4833_v48, 9  ;;  %v4919_v48 = vld [vmem:[%s5287_s11 + $0x18] sm:$0xff]  ;;  %v2422_v50 = vsel %vm5473_vm7, %v2420_v7, %v2421_v35  ;;  %v5979_v7 = vld [vmem:[%s5287_s11 + $0x34] sm:$0xf] }
 0x168   : > { %v1327_v28 = vpop.f32.mrf.mxu2  ;;  %v5941_v21 = vadd.f32 %v2265_v5, %v1672_v56  ;;  %v3112_v5 = vshll.u32 %v5939_v60, 16  ;;  %v3116_v56 = vshrl.u32 %v5939_v60, 16 }
 0x169   : > { %v1386_v19 = vadd.f32 %v1327_v28, %v975_v62  ;;  %v3752_v62 = vrot.slane %v3750_v58, 4 }
 0x16a   : > { %4540 = vmatmul.msk.bf16.gmra.mxu3 %vm657_vm4, %v4918_v9  ;;  %v977_v9 = vadd.f32 %v976_v33, %v5704_v29  ;;  %v3105_v33 = vrot.slane %v3103_v24, 4  ;;  %v5962_v47 = vrot.slane %v3112_v5, 5 }
 0x16c   : > { %v2268_v2 = vpop.f32.mrf.mxu0  ;;  %v3109_v5 = vor.u32 %v3108_v3, %v3105_v33  ;;  %v4834_v33 = vld [vmem:[%s5287_s11 + $0x24] sm:$0xe] }
 0x16d   : > { %v1614_v53 = vpop.f32.mrf.mxu3  ;;  %v979_v41 = vpop.f32.mrf.mxu1 }
 0x16e   : > { %v1673_v25 = vadd.f32 %v1614_v53, %v1386_v19  ;;  %v3464_v19 = vunpack.c.l.b16 %v3091_v17  ;;  %v3118_v53 = vrot.slane %v3116_v56, 4  ;;  %v980_v14 = vadd.f32 %v979_v41, %v5586_v37 }
 0x16f   : > { %4605 = vmatmul.msk.bf16.gmra.mxu0 %vm657_vm4, %v2172_v20  ;;  %v3751_v20 = vsel %vm5473_vm7, %v4849_v11, %v3750_v58  ;;  %v3757_v37 = vrot.slane %v5939_v60, 5 }
 0x170   : > { %v1329_v28 = vpop.f32.mrf.mxu2  ;;  %4639 = vmatmul.msk.bf16.vlgmr.msra.gmra.mxu1 %vm657_vm4, %v5911_v61  ;;  %v5960_v29 = vadd.f32 %v2268_v2, %v1673_v25  ;;  %v3754_v61 = vsel %vm5473_vm7, %v3752_v62, %v3753_v34  ;;  %v3496_v2 = vpack.c.b16 %v3465_v23, %v3464_v19  ;;  %v3862_v11 = vunpack.c.l.b16 %v3751_v20 }
 0x171   : > { %v1387_v4 = vadd.f32 %v1329_v28, %v977_v9  ;;  %v5971_v9 = vld [vmem:[%s5287_s11 + $0x2c] sm:$0x1]  ;;  %v3863_v8 = vunpack.c.l.b16 %v3754_v61  ;;  %v3119_v56 = vor.u32 %v3118_v53, %v5962_v47  ;;  %v2525_v62 = vunpack.c.l.b16 %v2419_v27 }
 0x172   : > { %v2526_v34 = vunpack.c.l.b16 %v2422_v50  ;;  %v3122_v16 = vshll.u32 %v5971_v9, 16  ;;  %v3127_v53 = vshrl.u32 %v4774_v38, 16  ;;  %v3130_v61 = vshll.u32 %v4774_v38, 16 }
 0x173   : > { %v3894_v19 = vpack.c.b16 %v3863_v8, %v3862_v11  ;;  %v3136_v27 = vshll.u32 %v5979_v7, 16  ;;  %v3140_v50 = vshrl.u32 %v5979_v7, 16  ;;  %v5099_v11 = vld [vmem:[%s5287_s11 + $0x28] sm:$0xf]  ;;  %v3760_v60 = vrot.slane %v5971_v9, 5 }
 0x174   : > { %v2270_v17 = vpop.f32.mrf.mxu0  ;;  %v2556_v23 = vpack.c.b16 %v2526_v34, %v2525_v62  ;;  %v3124_v20 = vrot.slane %v3122_v16, 5  ;;  %v2425_v8 = vrot.slane %v5099_v11, 5  ;;  %v4850_v62 = vrot.slane %v4834_v33, 9  ;;  %v4920_v11 = vld [vmem:[%s5287_s11 + $0x24] sm:$0xff] }
 0x175   : > { %v1616_v58 = vpop.f32.mrf.mxu3  ;;  %4752 = vmatmul.msk.bf16.vlgmr.msra.gmra.mxu2 %vm657_vm4, %v4919_v48  ;;  %v981_v24 = vpop.f32.mrf.mxu1  ;;  %v3120_v48 = vrot.slane %v3119_v56, 4  ;;  %v3132_v33 = vrot.slane %v3130_v61, 5  ;;  %v6000_v9 = vrot.slane %v3136_v27, 5 }
 0x176   : > { %v1674_v25 = vadd.f32 %v1616_v58, %v1387_v4  ;;  %v3110_v4 = vrot.slane %v3109_v5, 4  ;;  %v5100_v5 = vld [vmem:[%s5287_s11 + $0x2c] sm:$0x1] }
 0x177   : > { %v2428_v56 = vrot.slane %v5100_v5, 5  ;;  %v3125_v16 = vsel %vm5299_vm3, %v3120_v48, %v3124_v20  ;;  %v3758_v20 = vsel %vm5473_vm7, %v4850_v62, %v3757_v37 }
 0x178   : > { %v1332_v35 = vpop.f32.mrf.mxu2  ;;  %v5984_v41 = vadd.f32 %v2270_v17, %v1674_v25  ;;  %v4608_v17 = vld [vmem:[%s5287_s11 + $0x24] sm:$0xe]  ;;  %v982_v25 = vadd.f32 %v981_v24, %v5607_v63  ;;  %v3115_v34 = vsel %vm5299_vm3, %v3110_v4, %v5962_v47  ;;  %v2427_v24 = vrot.slane %v2425_v8, 4 }
 0x179   : > { %v1388_v28 = vadd.f32 %v1332_v35, %v980_v14  ;;  %v3759_v35 = vrot.slane %v3757_v37, 4  ;;  %v4624_v63 = vrot.slane %v4608_v17, 9  ;;  %v3466_v47 = vunpack.c.l.b16 %v3115_v34 }
 0x17a   : > { %4817 = vmatmul.msk.bf16.vlgmr.msra.gmra.mxu3 %vm657_vm4, %v3496_v2  ;;  %6686 = vst [vmem:[#allocation6_spill] sm:$0xff] %v5984_v41  ;;  %v3467_v4 = vunpack.c.l.b16 %v3125_v16  ;;  %v6006_v41 = vld [vmem:[%s5287_s11 + $0x38] sm:$0x1] }
 0x17b   : > { %v3146_v37 = vshll.u32 %v6006_v41, 16 }
 0x17c   : > { %v2273_v3 = vpop.f32.mrf.mxu0  ;;  %v3497_v17 = vpack.c.b16 %v3467_v4, %v3466_v47  ;;  %v5101_v4 = vld [vmem:[%s5287_s11 + $0x34] sm:$0xf] }
 0x17d   : > { %v1619_v58 = vpop.f32.mrf.mxu3  ;;  %v984_v2 = vpop.f32.mrf.mxu1 }
 0x17e   : > { %v1675_v14 = vadd.f32 %v1619_v58, %v1388_v28  ;;  %v3129_v28 = vrot.slane %v3127_v53, 4  ;;  %v3142_v58 = vrot.slane %v3140_v50, 4  ;;  %v2429_v50 = vsel %vm5473_vm7, %v2427_v24, %v2428_v56  ;;  %v6025_v24 = vld [vmem:[%s5287_s11 + $0x40] sm:$0xf] }
 0x17f   : > { %4866 = vmatmul.msk.bf16.vlgmr.msra.gmra.mxu0 %vm657_vm4, %v3894_v19 }
 0x180   : > { %v1334_v38 = vpop.f32.mrf.mxu2  ;;  %4640 = vmatmul.msk.bf16.gmra.mxu1 %vm657_vm4, %v2556_v23  ;;  %v6003_v5 = vadd.f32 %v2273_v3, %v1675_v14  ;;  %v3761_v23 = vsel %vm5473_vm7, %v3759_v35, %v3760_v60  ;;  %v3133_v53 = vor.u32 %v3132_v33, %v3129_v28  ;;  %v2426_v3 = vsel %vm5473_vm7, %v4624_v63, %v2425_v8 }
 0x181   : > { %v1389_v19 = vadd.f32 %v1334_v38, %v982_v25  ;;  %v3143_v14 = vor.u32 %v3142_v58, %v6000_v9  ;;  %v985_v60 = vadd.f32 %v984_v2, %v5624_v22  ;;  %v3864_v25 = vunpack.c.l.b16 %v3758_v20  ;;  %v4835_v58 = vld [vmem:[%s5287_s11 + $0x30] sm:$0xe] }
 0x182   : > { %v3865_v34 = vunpack.c.l.b16 %v3761_v23  ;;  %v2527_v35 = vunpack.c.l.b16 %v2426_v3  ;;  %v2528_v8 = vunpack.c.l.b16 %v2429_v50  ;;  %v3134_v28 = vrot.slane %v3133_v53, 4 }
 0x183   : > { %v3144_v56 = vrot.slane %v3143_v14, 4  ;;  %v3148_v33 = vrot.slane %v3146_v37, 5  ;;  %v3764_v63 = vrot.slane %v5979_v7, 5  ;;  %v2432_v20 = vrot.slane %v5101_v4, 5  ;;  %v4609_v7 = vld [vmem:[%s5287_s11 + $0x30] sm:$0xe] }
 0x184   : > { %v2275_v48 = vpop.f32.mrf.mxu0  ;;  %v2557_v47 = vpack.c.b16 %v2528_v8, %v2527_v35  ;;  %v4851_v50 = vrot.slane %v4835_v58, 9 }
 0x185   : > { %v1621_v61 = vpop.f32.mrf.mxu3  ;;  %4753 = vmatmul.msk.bf16.gmra.mxu2 %vm657_vm4, %v4920_v11  ;;  %v986_v27 = vpop.f32.mrf.mxu1  ;;  %v4777_v11 = vld [vmem:[%s5287_s11 + $0x3c] sm:$0xf]  ;;  %v3149_v3 = vsel %vm5299_vm3, %v3144_v56, %v3148_v33  ;;  %v4921_v33 = vld [vmem:[%s5287_s11 + $0x30] sm:$0xff] }
 0x186   : > { %v1676_v62 = vadd.f32 %v1621_v61, %v1389_v19  ;;  %v3895_v19 = vpack.c.b16 %v3865_v34, %v3864_v25  ;;  %v3139_v61 = vsel %vm5299_vm3, %v3134_v28, %v6000_v9  ;;  %v3151_v14 = vshrl.u32 %v4777_v11, 16  ;;  %v5102_v34 = vld [vmem:[%s5287_s11 + $0x38] sm:$0x1] }
 0x187   : > { %v3766_v25 = vrot.slane %v3764_v63, 4  ;;  %v3767_v9 = vrot.slane %v6006_v41, 5  ;;  %v3468_v8 = vunpack.c.l.b16 %v3139_v61  ;;  %v2434_v28 = vrot.slane %v2432_v20, 4 }
 0x188   : > { %v1337_v16 = vpop.f32.mrf.mxu2  ;;  %v6027_v22 = vadd.f32 %v2275_v48, %v1676_v62  ;;  %v3154_v48 = vshll.u32 %v4777_v11, 16  ;;  %v3160_v62 = vshll.u32 %v6025_v24, 16  ;;  %v3469_v58 = vunpack.c.l.b16 %v3149_v3 }
 0x189   : > { %v1390_v38 = vadd.f32 %v1337_v16, %v985_v60  ;;  %v987_v60 = vadd.f32 %v986_v27, %v5645_v55  ;;  %v2435_v16 = vrot.slane %v5102_v34, 5  ;;  %v3765_v11 = vsel %vm5473_vm7, %v4851_v50, %v3764_v63 }
 0x18a   : > { %4818 = vmatmul.msk.bf16.gmra.mxu3 %vm657_vm4, %v3497_v17  ;;  %v3164_v17 = vshrl.u32 %v6025_v24, 16  ;;  %v3153_v55 = vrot.slane %v3151_v14, 4  ;;  %v3156_v27 = vrot.slane %v3154_v48, 5  ;;  %v6048_v41 = vrot.slane %v3160_v62, 5 }
 0x18b   : > { %v2436_v3 = vsel %vm5473_vm7, %v2434_v28, %v2435_v16  ;;  %v3866_v50 = vunpack.c.l.b16 %v3765_v11  ;;  %v4836_v11 = vld [vmem:[%s5287_s11 + $0x3c] sm:$0xe] }
 0x18c   : > { %v2278_v2 = vpop.f32.mrf.mxu0  ;;  %v3166_v4 = vrot.slane %v3164_v17, 4  ;;  %v3157_v62 = vor.u32 %v3156_v27, %v3153_v55 }
 0x18d   : > { %v1624_v23 = vpop.f32.mrf.mxu3  ;;  %v989_v53 = vpop.f32.mrf.mxu1 }
 0x18e   : > { %v1677_v37 = vadd.f32 %v1624_v23, %v1390_v38  ;;  %v4625_v38 = vrot.slane %v4609_v7, 9  ;;  %v6057_v7 = vld [vmem:[%s5287_s11 + $0x44] sm:$0x1]  ;;  %v3167_v17 = vor.u32 %v3166_v4, %v6048_v41  ;;  %v3158_v28 = vrot.slane %v3157_v62, 4 }
 0x18f   : > { %4867 = vmatmul.msk.bf16.gmra.mxu0 %vm657_vm4, %v3895_v19 }
 0x190   : > { %v1339_v35 = vpop.f32.mrf.mxu2  ;;  %4641 = vmatmul.msk.bf16.gmra.mxu1 %vm657_vm4, %v2557_v47  ;;  %v6046_v19 = vadd.f32 %v2278_v2, %v1677_v37  ;;  %v3768_v47 = vsel %vm5473_vm7, %v3766_v25, %v3767_v9  ;;  %v2433_v61 = vsel %vm5473_vm7, %v4625_v38, %v2432_v20  ;;  %v3498_v2 = vpack.c.b16 %v3469_v58, %v3468_v8  ;;  %v6065_v38 = vld [vmem:[%s5287_s11 + $0x4c] sm:$0xf] }
 0x191   : > { %v1391_v56 = vadd.f32 %v1339_v35, %v987_v60  ;;  %v3867_v48 = vunpack.c.l.b16 %v3768_v47  ;;  %v990_v20 = vadd.f32 %v989_v53, %v5668_v26  ;;  %v2529_v60 = vunpack.c.l.b16 %v2433_v61  ;;  %v4780_v35 = vld [vmem:[%s5287_s11 + $0x48] sm:$0xf] }
 0x192   : > { %v2530_v25 = vunpack.c.l.b16 %v2436_v3  ;;  %v3170_v9 = vshll.u32 %v6057_v7, 16  ;;  %v3771_v26 = vrot.slane %v6025_v24, 5  ;;  %v3175_v27 = vshrl.u32 %v4780_v35, 16 }
 0x193   : > { %v3896_v8 = vpack.c.b16 %v3867_v48, %v3866_v50  ;;  %v3178_v4 = vshll.u32 %v4780_v35, 16  ;;  %v3184_v47 = vshll.u32 %v6065_v38, 16  ;;  %v3188_v61 = vshrl.u32 %v6065_v38, 16  ;;  %v5104_v48 = vld [vmem:[%s5287_s11 + $0x44] sm:$0x1] }
 0x194   : > { %v2280_v23 = vpop.f32.mrf.mxu0  ;;  %v3172_v58 = vrot.slane %v3170_v9, 5  ;;  %v2442_v62 = vrot.slane %v5104_v48, 5  ;;  %v3774_v24 = vrot.slane %v6057_v7, 5  ;;  %v3773_v9 = vrot.slane %v3771_v26, 4  ;;  %v6092_v48 = vld [vmem:[%s5287_s11 + $0x50] sm:$0x1] }
 0x195   : > { %v1626_v63 = vpop.f32.mrf.mxu3  ;;  %4754 = vmatmul.msk.bf16.gmra.mxu2 %vm657_vm4, %v4921_v33  ;;  %v991_v14 = vpop.f32.mrf.mxu1  ;;  %v2558_v33 = vpack.c.b16 %v2530_v25, %v2529_v60  ;;  %v3163_v60 = vsel %vm5299_vm3, %v3158_v28, %v6048_v41  ;;  %v3180_v35 = vrot.slane %v3178_v4, 5  ;;  %v6086_v7 = vrot.slane %v3184_v47, 5 }
 0x196   : > { %v1678_v37 = vadd.f32 %v1626_v63, %v1391_v56  ;;  %v3168_v56 = vrot.slane %v3167_v17, 4  ;;  %v3470_v41 = vunpack.c.l.b16 %v3163_v60 }
 0x198   : > { %v1342_v34 = vpop.f32.mrf.mxu2  ;;  %v6070_v53 = vadd.f32 %v2280_v23, %v1678_v37  ;;  %v4610_v23 = vld [vmem:[%s5287_s11 + $0x3c] sm:$0xe]  ;;  %v992_v37 = vadd.f32 %v991_v14, %v5686_v43  ;;  %v3173_v25 = vsel %vm5299_vm3, %v3168_v56, %v3172_v58 }
 0x199   : > { %v1392_v16 = vadd.f32 %v1342_v34, %v990_v20  ;;  %v4852_v20 = vrot.slane %v4836_v11, 9  ;;  %v3190_v11 = vrot.slane %v3188_v61, 4  ;;  %v4626_v43 = vrot.slane %v4610_v23, 9 }
 0x19a   : > { %4819 = vmatmul.msk.bf16.gmra.mxu3 %vm657_vm4, %v3498_v2  ;;  %v5103_v2 = vld [vmem:[%s5287_s11 + $0x40] sm:$0xf]  ;;  %v3471_v28 = vunpack.c.l.b16 %v3173_v25 }
 0x19b   : > { %v2439_v50 = vrot.slane %v5103_v2, 5  ;;  %v3772_v58 = vsel %vm5473_vm7, %v4852_v20, %v3771_v26  ;;  %v3194_v26 = vshll.u32 %v6092_v48, 16 }
 0x19c   : > { %v2283_v55 = vpop.f32.mrf.mxu0  ;;  %v3499_v23 = vpack.c.b16 %v3471_v28, %v3470_v41  ;;  %v5105_v28 = vld [vmem:[%s5287_s11 + $0x4c] sm:$0xf] }
 0x19d   : > { %v1629_v3 = vpop.f32.mrf.mxu3  ;;  %v994_v63 = vpop.f32.mrf.mxu1  ;;  %v2441_v14 = vrot.slane %v2439_v50, 4 }
 0x19e   : > { %v1679_v17 = vadd.f32 %v1629_v3, %v1392_v16  ;;  %v3177_v16 = vrot.slane %v3175_v27, 4  ;;  %v4922_v3 = vld [vmem:[%s5287_s11 + $0x3c] sm:$0xff] }
 0x19f   : > { %4868 = vmatmul.msk.bf16.gmra.mxu0 %vm657_vm4, %v3896_v8  ;;  %v2443_v61 = vsel %vm5473_vm7, %v2441_v14, %v2442_v62  ;;  %v6111_v14 = vld [vmem:[%s5287_s11 + $0x58] sm:$0xf] }
 0x1a0   : > { %v1344_v34 = vpop.f32.mrf.mxu2  ;;  %4642 = vmatmul.msk.bf16.gmra.mxu1 %vm657_vm4, %v2558_v33  ;;  %v6089_v2 = vadd.f32 %v2283_v55, %v1679_v17  ;;  %v3775_v33 = vsel %vm5473_vm7, %v3773_v9, %v3774_v24  ;;  %v3181_v27 = vor.u32 %v3180_v35, %v3177_v16  ;;  %v2440_v55 = vsel %vm5473_vm7, %v4626_v43, %v2439_v50 }
 0x1a1   : > { %v1393_v8 = vadd.f32 %v1344_v34, %v992_v37  ;;  %v3191_v17 = vor.u32 %v3190_v11, %v6086_v7  ;;  %v995_v24 = vadd.f32 %v994_v63, %v5707_v40  ;;  %v3868_v37 = vunpack.c.l.b16 %v3772_v58  ;;  %v4837_v11 = vld [vmem:[%s5287_s11 + $0x48] sm:$0xe] }
 0x1a2   : > { %v3869_v60 = vunpack.c.l.b16 %v3775_v33  ;;  %v2531_v9 = vunpack.c.l.b16 %v2440_v55  ;;  %v2532_v50 = vunpack.c.l.b16 %v2443_v61  ;;  %v3182_v16 = vrot.slane %v3181_v27, 4 }
 0x1a3   : > { %v3192_v62 = vrot.slane %v3191_v17, 4  ;;  %v3196_v35 = vrot.slane %v3194_v26, 5  ;;  %v3778_v43 = vrot.slane %v6065_v38, 5  ;;  %v2446_v58 = vrot.slane %v5105_v28, 5  ;;  %v4611_v38 = vld [vmem:[%s5287_s11 + $0x48] sm:$0xe] }
 0x1a4   : > { %v2285_v56 = vpop.f32.mrf.mxu0  ;;  %v2559_v41 = vpack.c.b16 %v2532_v50, %v2531_v9  ;;  %v4853_v61 = vrot.slane %v4837_v11, 9 }
 0x1a5   : > { %v1631_v4 = vpop.f32.mrf.mxu3  ;;  %4755 = vmatmul.msk.bf16.gmra.mxu2 %vm657_vm4, %v4922_v3  ;;  %v996_v47 = vpop.f32.mrf.mxu1  ;;  %v4783_v3 = vld [vmem:[%s5287_s11 + $0x54] sm:$0xf]  ;;  %v3197_v55 = vsel %vm5299_vm3, %v3192_v62, %v3196_v35  ;;  %v4923_v35 = vld [vmem:[%s5287_s11 + $0x48] sm:$0xff] }
 0x1a6   : > { %v1680_v20 = vadd.f32 %v1631_v4, %v1393_v8  ;;  %v3897_v8 = vpack.c.b16 %v3869_v60, %v3868_v37  ;;  %v3187_v4 = vsel %vm5299_vm3, %v3182_v16, %v6086_v7  ;;  %v3199_v17 = vshrl.u32 %v4783_v3, 16  ;;  %v5106_v60 = vld [vmem:[%s5287_s11 + $0x50] sm:$0x1] }
 0x1a7   : > { %v3780_v37 = vrot.slane %v3778_v43, 4  ;;  %v3781_v7 = vrot.slane %v6092_v48, 5  ;;  %v3472_v50 = vunpack.c.l.b16 %v3187_v4  ;;  %v2448_v16 = vrot.slane %v2446_v58, 4 }
 0x1a8   : > { %v1347_v25 = vpop.f32.mrf.mxu2  ;;  %v6113_v40 = vadd.f32 %v2285_v56, %v1680_v20  ;;  %v3202_v56 = vshll.u32 %v4783_v3, 16  ;;  %v3208_v20 = vshll.u32 %v6111_v14, 16  ;;  %v3473_v11 = vunpack.c.l.b16 %v3197_v55 }
 0x1a9   : > { %v1394_v34 = vadd.f32 %v1347_v25, %v995_v24  ;;  %v997_v24 = vadd.f32 %v996_v47, %v5722_v10  ;;  %v2449_v25 = vrot.slane %v5106_v60, 5  ;;  %v3779_v3 = vsel %vm5473_vm7, %v4853_v61, %v3778_v43 }
 0x1aa   : > { %4820 = vmatmul.msk.bf16.gmra.mxu3 %vm657_vm4, %v3499_v23  ;;  %v3212_v23 = vshrl.u32 %v6111_v14, 16  ;;  %v3201_v10 = vrot.slane %v3199_v17, 4  ;;  %v3204_v47 = vrot.slane %v3202_v56, 5  ;;  %v6134_v48 = vrot.slane %v3208_v20, 5 }
 0x1ab   : > { %v2450_v55 = vsel %vm5473_vm7, %v2448_v16, %v2449_v25  ;;  %v3870_v61 = vunpack.c.l.b16 %v3779_v3  ;;  %v4838_v3 = vld [vmem:[%s5287_s11 + $0x54] sm:$0xe] }
 0x1ac   : > { %v2288_v63 = vpop.f32.mrf.mxu0  ;;  %v3214_v28 = vrot.slane %v3212_v23, 4  ;;  %v3205_v20 = vor.u32 %v3204_v47, %v3201_v10 }
 0x1ad   : > { %v1634_v33 = vpop.f32.mrf.mxu3  ;;  %v999_v27 = vpop.f32.mrf.mxu1 }
 0x1ae   : > { %v1681_v26 = vadd.f32 %v1634_v33, %v1394_v34  ;;  %v4627_v34 = vrot.slane %v4611_v38, 9  ;;  %v6143_v38 = vld [vmem:[%s5287_s11 + $0x5c] sm:$0x1]  ;;  %v3215_v23 = vor.u32 %v3214_v28, %v6134_v48  ;;  %v3206_v16 = vrot.slane %v3205_v20, 4 }
 0x1af   : > { %4869 = vmatmul.msk.bf16.gmra.mxu0 %vm657_vm4, %v3897_v8 }
 0x1b0   : > { %v1349_v9 = vpop.f32.mrf.mxu2  ;;  %4643 = vmatmul.msk.bf16.gmra.mxu1 %vm657_vm4, %v2559_v41  ;;  %v6132_v8 = vadd.f32 %v2288_v63, %v1681_v26  ;;  %v3782_v41 = vsel %vm5473_vm7, %v3780_v37, %v3781_v7  ;;  %v2447_v4 = vsel %vm5473_vm7, %v4627_v34, %v2446_v58  ;;  %v3500_v63 = vpack.c.b16 %v3473_v11, %v3472_v50  ;;  %v6151_v34 = vld [vmem:[%s5287_s11 + $0x64] sm:$0xf] }
 0x1b1   : > { %v1395_v62 = vadd.f32 %v1349_v9, %v997_v24  ;;  %v3871_v56 = vunpack.c.l.b16 %v3782_v41  ;;  %v1000_v58 = vadd.f32 %v999_v27, %v5598_v49  ;;  %v2533_v24 = vunpack.c.l.b16 %v2447_v4  ;;  %v4786_v9 = vld [vmem:[%s5287_s11 + $0x60] sm:$0xf] }
 0x1b2   : > { %v2534_v37 = vunpack.c.l.b16 %v2450_v55  ;;  %v3218_v7 = vshll.u32 %v6143_v38, 16  ;;  %v3785_v49 = vrot.slane %v6111_v14, 5  ;;  %v3223_v47 = vshrl.u32 %v4786_v9, 16 }
 0x1b3   : > { %v3898_v50 = vpack.c.b16 %v3871_v56, %v3870_v61  ;;  %v3226_v28 = vshll.u32 %v4786_v9, 16  ;;  %v3232_v41 = vshll.u32 %v6151_v34, 16  ;;  %v3236_v4 = vshrl.u32 %v6151_v34, 16  ;;  %v5108_v56 = vld [vmem:[%s5287_s11 + $0x5c] sm:$0x1] }
 0x1b4   : > { %v2290_v33 = vpop.f32.mrf.mxu0  ;;  %v3220_v11 = vrot.slane %v3218_v7, 5  ;;  %v2456_v20 = vrot.slane %v5108_v56, 5  ;;  %v3788_v14 = vrot.slane %v6143_v38, 5  ;;  %v3787_v7 = vrot.slane %v3785_v49, 4  ;;  %v6178_v56 = vld [vmem:[%s5287_s11 + $0x68] sm:$0x1] }
 0x1b5   : > { %v1636_v43 = vpop.f32.mrf.mxu3  ;;  %4756 = vmatmul.msk.bf16.gmra.mxu2 %vm657_vm4, %v4923_v35  ;;  %v1001_v17 = vpop.f32.mrf.mxu1  ;;  %v2560_v35 = vpack.c.b16 %v2534_v37, %v2533_v24  ;;  %v3211_v24 = vsel %vm5299_vm3, %v3206_v16, %v6134_v48  ;;  %v3228_v9 = vrot.slane %v3226_v28, 5  ;;  %v6172_v38 = vrot.slane %v3232_v41, 5 }
 0x1b6   : > { %v1682_v26 = vadd.f32 %v1636_v43, %v1395_v62  ;;  %v3216_v62 = vrot.slane %v3215_v23, 4  ;;  %v3474_v48 = vunpack.c.l.b16 %v3211_v24 }
 0x1b8   : > { %v1352_v60 = vpop.f32.mrf.mxu2  ;;  %v6156_v27 = vadd.f32 %v2290_v33, %v1682_v26  ;;  %v4612_v33 = vld [vmem:[%s5287_s11 + $0x54] sm:$0xe]  ;;  %v1002_v26 = vadd.f32 %v1001_v17, %v5617_v0  ;;  %v3221_v37 = vsel %vm5299_vm3, %v3216_v62, %v3220_v11 }
 0x1b9   : > { %v1396_v25 = vadd.f32 %v1352_v60, %v1000_v58  ;;  %v4854_v58 = vrot.slane %v4838_v3, 9  ;;  %v3238_v3 = vrot.slane %v3236_v4, 4  ;;  %v4628_v0 = vrot.slane %v4612_v33, 9 }
 0x1ba   : > { %4821 = vmatmul.msk.bf16.gmra.mxu3 %vm657_vm4, %v3500_v63  ;;  %v5107_v63 = vld [vmem:[%s5287_s11 + $0x58] sm:$0xf]  ;;  %v3475_v16 = vunpack.c.l.b16 %v3221_v37 }
 0x1bb   : > { %v2453_v61 = vrot.slane %v5107_v63, 5  ;;  %v3786_v11 = vsel %vm5473_vm7, %v4854_v58, %v3785_v49  ;;  %v3242_v49 = vshll.u32 %v6178_v56, 16 }
 0x1bc   : > { %v2293_v10 = vpop.f32.mrf.mxu0  ;;  %v3501_v33 = vpack.c.b16 %v3475_v16, %v3474_v48 }
 0x1bd   : > { %v1639_v55 = vpop.f32.mrf.mxu3  ;;  %v1004_v43 = vpop.f32.mrf.mxu1  ;;  %v2455_v17 = vrot.slane %v2453_v61, 4 }
 0x1be   : > { %v1683_v23 = vadd.f32 %v1639_v55, %v1396_v25  ;;  %v3225_v25 = vrot.slane %v3223_v47, 4  ;;  %v4924_v55 = vld [vmem:[%s5287_s11 + $0x54] sm:$0xff] }
 0x1bf   : > { %4870 = vmatmul.msk.bf16.gmra.mxu0 %vm657_vm4, %v3898_v50  ;;  %v2457_v4 = vsel %vm5473_vm7, %v2455_v17, %v2456_v20  ;;  %v3244_v20 = vrot.slane %v3242_v49, 5  ;;  %v6197_v17 = vld [vmem:[%s5287_s11 + $0x70] sm:$0xf]  ;;  %v4613_v49 = vld [vmem:[%s5287_s11 + $0x60] sm:$0xe] }
 0x1c0   : > { %v1354_v60 = vpop.f32.mrf.mxu2  ;;  %4644 = vmatmul.msk.bf16.gmra.mxu1 %vm657_vm4, %v2560_v35  ;;  %v6175_v63 = vadd.f32 %v2293_v10, %v1683_v23  ;;  %v3789_v35 = vsel %vm5473_vm7, %v3787_v7, %v3788_v14  ;;  %v3229_v47 = vor.u32 %v3228_v9, %v3225_v25  ;;  %v2454_v10 = vsel %vm5473_vm7, %v4628_v0, %v2453_v61 }
 0x1c1   : > { %v1397_v50 = vadd.f32 %v1354_v60, %v1002_v26  ;;  %v3239_v23 = vor.u32 %v3238_v3, %v6172_v38  ;;  %v1005_v14 = vadd.f32 %v1004_v43, %v5638_v39  ;;  %v3872_v26 = vunpack.c.l.b16 %v3786_v11  ;;  %v4789_v3 = vld [vmem:[%s5287_s11 + $0x6c] sm:$0xf] }
 0x1c2   : > { %v3873_v24 = vunpack.c.l.b16 %v3789_v35  ;;  %v2535_v7 = vunpack.c.l.b16 %v2454_v10  ;;  %v2536_v60 = vunpack.c.l.b16 %v2457_v4  ;;  %v3230_v25 = vrot.slane %v3229_v47, 4  ;;  %v5109_v10 = vld [vmem:[%s5287_s11 + $0x64] sm:$0xf] }
 0x1c3   : > { %v3240_v9 = vrot.slane %v3239_v23, 4  ;;  %v3792_v0 = vrot.slane %v6151_v34, 5  ;;  %v2460_v4 = vrot.slane %v5109_v10, 5  ;;  %v3247_v34 = vshrl.u32 %v4789_v3, 16 }
 0x1c4   : > { %v2295_v62 = vpop.f32.mrf.mxu0  ;;  %v2561_v48 = vpack.c.b16 %v2536_v60, %v2535_v7  ;;  %v3235_v47 = vsel %vm5299_vm3, %v3230_v25, %v6172_v38  ;;  %v3795_v38 = vrot.slane %v6178_v56, 5 }
 0x1c5   : > { %v1641_v28 = vpop.f32.mrf.mxu3  ;;  %4757 = vmatmul.msk.bf16.gmra.mxu2 %vm657_vm4, %v4924_v55  ;;  %v1006_v41 = vpop.f32.mrf.mxu1  ;;  %v4839_v55 = vld [vmem:[%s5287_s11 + $0x60] sm:$0xe]  ;;  %v3476_v60 = vunpack.c.l.b16 %v3235_v47  ;;  %v6225_v47 = vld [vmem:[%s5287_s11 + $0x74] sm:$0x1] }
 0x1c6   : > { %v1684_v58 = vadd.f32 %v1641_v28, %v1397_v50  ;;  %v3899_v50 = vpack.c.b16 %v3873_v24, %v3872_v26  ;;  %v4855_v16 = vrot.slane %v4839_v55, 9  ;;  %v3245_v28 = vsel %vm5299_vm3, %v3240_v9, %v3244_v20  ;;  %v5110_v24 = vld [vmem:[%s5287_s11 + $0x68] sm:$0x1]  ;;  %v4925_v20 = vld [vmem:[%s5287_s11 + $0x60] sm:$0xff] }
 0x1c7   : > { %v3794_v26 = vrot.slane %v3792_v0, 4  ;;  %v4629_v55 = vrot.slane %v4613_v49, 9 }
 0x1c8   : > { %v1357_v37 = vpop.f32.mrf.mxu2  ;;  %v6199_v39 = vadd.f32 %v2295_v62, %v1684_v58  ;;  %v3250_v62 = vshll.u32 %v4789_v3, 16  ;;  %v3256_v58 = vshll.u32 %v6197_v17, 16  ;;  %v3793_v25 = vsel %vm5473_vm7, %v4855_v16, %v3792_v0 }
 0x1c9   : > { %v1398_v61 = vadd.f32 %v1357_v37, %v1005_v14  ;;  %v1007_v14 = vadd.f32 %v1006_v41, %v5657_v6  ;;  %v2463_v37 = vrot.slane %v5110_v24, 5  ;;  %v2462_v3 = vrot.slane %v2460_v4, 4 }
 0x1ca   : > { %4822 = vmatmul.msk.bf16.gmra.mxu3 %vm657_vm4, %v3501_v33  ;;  %v3260_v33 = vshrl.u32 %v6197_v17, 16  ;;  %v3249_v6 = vrot.slane %v3247_v34, 4  ;;  %v3252_v41 = vrot.slane %v3250_v62, 5  ;;  %v6220_v56 = vrot.slane %v3256_v58, 5 }
 0x1cb   : > { %v3796_v10 = vsel %vm5473_vm7, %v3794_v26, %v3795_v38  ;;  %v3874_v16 = vunpack.c.l.b16 %v3793_v25  ;;  %v2461_v34 = vsel %vm5473_vm7, %v4629_v55, %v2460_v4  ;;  %v3266_v26 = vshll.u32 %v6225_v47, 16  ;;  %v6237_v25 = vld [vmem:[%s5287_s11 + $0x7c] sm:$0xf]  ;;  %v4840_v55 = vld [vmem:[%s5287_s11 + $0x6c] sm:$0xe] }
 0x1cc   : > { %v2298_v43 = vpop.f32.mrf.mxu0  ;;  %v3875_v62 = vunpack.c.l.b16 %v3796_v10  ;;  %v3253_v58 = vor.u32 %v3252_v41, %v3249_v6  ;;  %v2537_v24 = vunpack.c.l.b16 %v2461_v34  ;;  %v3280_v10 = vshll.u32 %v6237_v25, 16 }
 0x1cd   : > { %v1644_v11 = vpop.f32.mrf.mxu3  ;;  %v1009_v35 = vpop.f32.mrf.mxu1 }
 0x1ce   : > { %v1685_v23 = vadd.f32 %v1644_v11, %v1398_v61  ;;  %v3477_v61 = vunpack.c.l.b16 %v3245_v28  ;;  %v3262_v11 = vrot.slane %v3260_v33, 4  ;;  %v3900_v4 = vpack.c.b16 %v3875_v62, %v3874_v16  ;;  %v4614_v16 = vld [vmem:[%s5287_s11 + $0x6c] sm:$0xe] }
 0x1cf   : > { %4871 = vmatmul.msk.bf16.gmra.mxu0 %vm657_vm4, %v3899_v50 }
 0x1d0   : > { %v1359_v7 = vpop.f32.mrf.mxu2  ;;  %4645 = vmatmul.msk.bf16.gmra.mxu1 %vm657_vm4, %v2561_v48  ;;  %v6218_v50 = vadd.f32 %v2298_v43, %v1685_v23  ;;  %v3502_v0 = vpack.c.b16 %v3477_v61, %v3476_v60  ;;  %v2464_v23 = vsel %vm5473_vm7, %v2462_v3, %v2463_v37  ;;  %v3263_v33 = vor.u32 %v3262_v11, %v6220_v56  ;;  %v4792_v60 = vld [vmem:[%s5287_s11 + $0x78] sm:$0xf] }
 0x1d1   : > { %v1399_v9 = vadd.f32 %v1359_v7, %v1007_v14  ;;  %v1010_v14 = vadd.f32 %v1009_v35, %v5676_v45  ;;  %v2538_v7 = vunpack.c.l.b16 %v2464_v23  ;;  %v3254_v37 = vrot.slane %v3253_v58, 4  ;;  %v5111_v23 = vld [vmem:[%s5287_s11 + $0x70] sm:$0xf] }
 0x1d2   : > { %v3799_v45 = vrot.slane %v6197_v17, 5  ;;  %v3271_v35 = vshrl.u32 %v4792_v60, 16  ;;  %v3274_v11 = vshll.u32 %v4792_v60, 16  ;;  %v2467_v62 = vrot.slane %v5111_v23, 5 }
 0x1d3   : > { %v2562_v41 = vpack.c.b16 %v2538_v7, %v2537_v24  ;;  %v3259_v17 = vsel %vm5299_vm3, %v3254_v37, %v6220_v56  ;;  %v4630_v7 = vrot.slane %v4614_v16, 9  ;;  %v3282_v56 = vrot.slane %v3280_v10, 5 }
 0x1d4   : > { %v2300_v48 = vpop.f32.mrf.mxu0  ;;  %v3276_v60 = vrot.slane %v3274_v11, 5 }
 0x1d5   : > { %v1646_v28 = vpop.f32.mrf.mxu3  ;;  %4758 = vmatmul.msk.bf16.gmra.mxu2 %vm657_vm4, %v4925_v20  ;;  %v1011_v43 = vpop.f32.mrf.mxu1  ;;  %v3268_v20 = vrot.slane %v3266_v26, 5  ;;  %v3801_v26 = vrot.slane %v3799_v45, 4 }
 0x1d6   : > { %v1686_v49 = vadd.f32 %v1646_v28, %v1399_v9  ;;  %v3264_v9 = vrot.slane %v3263_v33, 4  ;;  %v3284_v28 = vshrl.u32 %v6237_v25, 16  ;;  %v1012_v33 = vadd.f32 %v1011_v43, %v5699_v12 }
 0x1d7   : > { %v3478_v12 = vunpack.c.l.b16 %v3259_v17 }
 0x1d8   : > { %v1362_v38 = vpop.f32.mrf.mxu2  ;;  %v6242_v3 = vadd.f32 %v2300_v48, %v1686_v49  ;;  %v4856_v48 = vrot.slane %v4840_v55, 9  ;;  %v3802_v49 = vrot.slane %v6225_v47, 5  ;;  %v4926_v55 = vld [vmem:[%s5287_s11 + $0x6c] sm:$0xff]  ;;  %v2469_v47 = vrot.slane %v2467_v62, 4 }
 0x1d9   : > { %v1400_v61 = vadd.f32 %v1362_v38, %v1010_v14  ;;  %v3269_v14 = vsel %vm5299_vm3, %v3264_v9, %v3268_v20  ;;  %v3273_v38 = vrot.slane %v3271_v35, 4  ;;  %v6262_v9 = vld [vmem:[%s5287_s11 + $0x80] sm:$0x1] }
 0x1da   : > { %4823 = vmatmul.msk.bf16.gmra.mxu3 %vm657_vm4, %v3502_v0  ;;  %v3479_v43 = vunpack.c.l.b16 %v3269_v14  ;;  %v3800_v35 = vsel %vm5473_vm7, %v4856_v48, %v3799_v45  ;;  %v3290_v17 = vshll.u32 %v6262_v9, 16 }
 0x1db   : > { %v3277_v11 = vor.u32 %v3276_v60, %v3273_v38 }
 0x1dc   : > { %v2303_v6 = vpop.f32.mrf.mxu0  ;;  %v3503_v48 = vpack.c.b16 %v3479_v43, %v3478_v12  ;;  %v3806_v12 = vrot.slane %v6237_v25, 5 }
 0x1dd   : > { %v1649_v0 = vpop.f32.mrf.mxu3  ;;  %v1014_v34 = vpop.f32.mrf.mxu1 }
 0x1de   : > { %v1687_v58 = vadd.f32 %v1649_v0, %v1400_v61  ;;  %v3286_v61 = vrot.slane %v3284_v28, 4  ;;  %v5112_v0 = vld [vmem:[%s5287_s11 + $0x74] sm:$0x1] }
 0x1df   : > { %4872 = vmatmul.msk.bf16.gmra.mxu0 %vm657_vm4, %v3900_v4  ;;  %v2470_v4 = vrot.slane %v5112_v0, 5 }
 0x1e0   : > { %v1364_v24 = vpop.f32.mrf.mxu2  ;;  %4646 = vmatmul.msk.bf16.gmra.mxu1 %vm657_vm4, %v2562_v41  ;;  %v6259_v23 = vadd.f32 %v2303_v6, %v1687_v58  ;;  %v3803_v41 = vsel %vm5473_vm7, %v3801_v26, %v3802_v49  ;;  %v2468_v6 = vsel %vm5473_vm7, %v4630_v7, %v2467_v62  ;;  %v3287_v58 = vor.u32 %v3286_v61, %v3282_v56  ;;  %v4795_v61 = vld [vmem:[%s5287_s11 + $0x84] sm:$0xf] }
 0x1e1   : > { %v1401_v37 = vadd.f32 %v1364_v24, %v1012_v33  ;;  %v2471_v16 = vsel %vm5473_vm7, %v2469_v47, %v2470_v4  ;;  %v1015_v49 = vadd.f32 %v1014_v34, %v5718_v59  ;;  %v3876_v33 = vunpack.c.l.b16 %v3800_v35  ;;  %v4841_v4 = vld [vmem:[%s5287_s11 + $0x78] sm:$0xe] }
 0x1e2   : > { %v3877_v14 = vunpack.c.l.b16 %v3803_v41  ;;  %v2539_v38 = vunpack.c.l.b16 %v2468_v6  ;;  %v2540_v24 = vunpack.c.l.b16 %v2471_v16  ;;  %v3278_v62 = vrot.slane %v3277_v11, 4  ;;  %v5113_v6 = vld [vmem:[%s5287_s11 + $0x7c] sm:$0xf] }
 0x1e3   : > { %v3288_v7 = vrot.slane %v3287_v58, 4  ;;  %v2474_v16 = vrot.slane %v5113_v6, 5  ;;  %v3295_v58 = vshrl.u32 %v4795_v61, 16 }
 0x1e4   : > { %v2305_v20 = vpop.f32.mrf.mxu0  ;;  %v3901_v47 = vpack.c.b16 %v3877_v14, %v3876_v33  ;;  %v2563_v34 = vpack.c.b16 %v2540_v24, %v2539_v38  ;;  %v3283_v41 = vsel %vm5299_vm3, %v3278_v62, %v3282_v56  ;;  %v4857_v56 = vrot.slane %v4841_v4, 9  ;;  %v4927_v62 = vld [vmem:[%s5287_s11 + $0x78] sm:$0xff] }
 0x1e5   : > { %v1651_v10 = vpop.f32.mrf.mxu3  ;;  %4759 = vmatmul.msk.bf16.gmra.mxu2 %vm657_vm4, %v4926_v55  ;;  %v1016_v28 = vpop.f32.mrf.mxu1  ;;  %v3292_v55 = vrot.slane %v3290_v17, 5  ;;  %v3298_v17 = vshll.u32 %v4795_v61, 16  ;;  %v3480_v14 = vunpack.c.l.b16 %v3283_v41  ;;  %v3808_v38 = vrot.slane %v3806_v12, 4 }
 0x1e6   : > { %v1688_v45 = vadd.f32 %v1651_v10, %v1401_v37  ;;  %v6278_v37 = vld [vmem:[%s5287_s11 + $0x88] sm:$0xf]  ;;  %v4615_v10 = vld [vmem:[%s5287_s11 + $0x78] sm:$0xe] }
 0x1e7   : > { %v3293_v11 = vsel %vm5299_vm3, %v3288_v7, %v3292_v55  ;;  %v3308_v25 = vshrl.u32 %v6278_v37, 16  ;;  %v4631_v24 = vrot.slane %v4615_v10, 9  ;;  %v2476_v7 = vrot.slane %v2474_v16, 4  ;;  %v5114_v55 = vld [vmem:[%s5287_s11 + $0x80] sm:$0x1] }
 0x1e8   : > { %v1367_v26 = vpop.f32.mrf.mxu2  ;;  %v6280_v0 = vadd.f32 %v2305_v20, %v1688_v45  ;;  %v3304_v45 = vshll.u32 %v6278_v37, 16  ;;  %v2477_v61 = vrot.slane %v5114_v55, 5  ;;  %v4798_v55 = vld [vmem:[%s5287_s11 + $0x90] sm:$0xf] }
 0x1e9   : > { %v1402_v60 = vadd.f32 %v1367_v26, %v1015_v49  ;;  %v3809_v49 = vrot.slane %v6262_v9, 5  ;;  %v3481_v26 = vunpack.c.l.b16 %v3293_v11  ;;  %v3310_v4 = vrot.slane %v3308_v25, 4  ;;  %v6301_v9 = vld [vmem:[%s5287_s11 + $0x8c] sm:$0x1] }
 0x1ea   : > { %4824 = vmatmul.msk.bf16.gmra.mxu3 %vm657_vm4, %v3503_v48  ;;  %v1017_v48 = vadd.f32 %v1016_v28, %v5735_v32  ;;  %v3300_v32 = vrot.slane %v3298_v17, 5  ;;  %v3306_v28 = vrot.slane %v3304_v45, 5 }
 0x1eb   : > { %v3810_v41 = vsel %vm5473_vm7, %v3808_v38, %v3809_v49  ;;  %v3504_v10 = vpack.c.b16 %v3481_v26, %v3480_v14 }
 0x1ec   : > { %v2308_v59 = vpop.f32.mrf.mxu0  ;;  %v3311_v45 = vor.u32 %v3310_v4, %v3306_v28 }
 0x1ed   : > { %v1654_v43 = vpop.f32.mrf.mxu3  ;;  %v2631_v35 = vpop.f32.mrf.mxu1 }
 0x1ee   : > { %v1689_v20 = vadd.f32 %v1654_v43, %v1402_v60  ;;  %v2711_v26 = vadd.f32 %v2631_v35, %v5752_v46  ;;  %v3312_v38 = vrot.slane %v3311_v45, 4 }
 0x1ef   : > { %4873 = vmatmul.msk.bf16.gmra.mxu0 %vm657_vm4, %v3901_v47  ;;  %v3297_v47 = vrot.slane %v3295_v58, 4  ;;  %v2478_v58 = vsel %vm5473_vm7, %v2476_v7, %v2477_v61  ;;  %v3813_v7 = vrot.slane %v6278_v37, 5 }
 0x1f0   : > { %v1369_v33 = vpop.f32.mrf.mxu2  ;;  %4647 = vmatmul.msk.bf16.gmra.mxu1 %vm657_vm4, %v2563_v34  ;;  %v6298_v43 = vadd.f32 %v2308_v59, %v1689_v20  ;;  %v3807_v34 = vsel %vm5473_vm7, %v4857_v56, %v3806_v12  ;;  %v2475_v59 = vsel %vm5473_vm7, %v4631_v24, %v2474_v16  ;;  %v3314_v12 = vshll.u32 %v6301_v9, 16 }
 0x1f1   : > { %v1403_v60 = vadd.f32 %v1369_v33, %v1017_v48  ;;  %v3301_v17 = vor.u32 %v3300_v32, %v3297_v47  ;;  %v3878_v25 = vunpack.c.l.b16 %v3807_v34  ;;  %v3879_v56 = vunpack.c.l.b16 %v3810_v41  ;;  %v5115_v34 = vld [vmem:[%s5287_s11 + $0x88] sm:$0xf] }
 0x1f2   : > { %v2541_v33 = vunpack.c.l.b16 %v2475_v59  ;;  %v2542_v14 = vunpack.c.l.b16 %v2478_v58  ;;  %v3316_v24 = vrot.slane %v3314_v12, 5  ;;  %v2481_v41 = vrot.slane %v5115_v34, 5  ;;  %v4616_v58 = vld [vmem:[%s5287_s11 + $0x84] sm:$0xe] }
 0x1f3   : > { %v3302_v16 = vrot.slane %v3301_v17, 4  ;;  %v3816_v59 = vrot.slane %v6301_v9, 5  ;;  %v3322_v17 = vshll.u32 %v4798_v55, 16  ;;  %v3815_v12 = vrot.slane %v3813_v7, 4 }
 0x1f4   : > { %v2310_v6 = vpop.f32.mrf.mxu0  ;;  %v2564_v4 = vpack.c.b16 %v2542_v14, %v2541_v33  ;;  %v2483_v33 = vrot.slane %v2481_v41, 4  ;;  %v5116_v14 = vld [vmem:[%s5287_s11 + $0x8c] sm:$0x1] }
 0x1f5   : > { %v1656_v11 = vpop.f32.mrf.mxu3  ;;  %4760 = vmatmul.msk.bf16.gmra.mxu2 %vm657_vm4, %v4927_v62  ;;  %v2633_v48 = vpop.f32.mrf.mxu1  ;;  %v3902_v62 = vpack.c.b16 %v3879_v56, %v3878_v25  ;;  %v3307_v37 = vsel %vm5299_vm3, %v3302_v16, %v3306_v28  ;;  %v4632_v28 = vrot.slane %v4616_v58, 9  ;;  %v4928_v16 = vld [vmem:[%s5287_s11 + $0x84] sm:$0xff] }
 0x1f6   : > { %v1690_v20 = vadd.f32 %v1656_v11, %v1403_v60  ;;  %v4842_v60 = vld [vmem:[%s5287_s11 + $0x84] sm:$0xe]  ;;  %v6322_v11 = vld [vmem:[%s5287_s11 + $0x94] sm:$0xf]  ;;  %v2712_v45 = vadd.f32 %v2633_v48, %v5765_v42 }
 0x1f7   : > { %v3328_v25 = vshll.u32 %v6322_v11, 16  ;;  %v3332_v9 = vshrl.u32 %v6322_v11, 16 }
 0x1f8   : > { %v2918_v49 = vpop.f32.mrf.mxu2  ;;  %v6318_v61 = vadd.f32 %v2310_v6, %v1690_v20  ;;  %v3317_v6 = vsel %vm5299_vm3, %v3312_v38, %v3316_v24  ;;  %v3319_v20 = vshrl.u32 %v4798_v55, 16  ;;  %v3482_v38 = vunpack.c.l.b16 %v3307_v37  ;;  %v6353_v37 = vld [vmem:[%s5287_s11 + $0x98] sm:$0x1] }
 0x1f9   : > { %v2998_v32 = vadd.f32 %v2918_v49, %v2711_v26  ;;  %v2484_v26 = vrot.slane %v5116_v14, 5  ;;  %v3483_v48 = vunpack.c.l.b16 %v3317_v6  ;;  %v3817_v55 = vsel %vm5473_vm7, %v3815_v12, %v3816_v59 }
 0x1fa   : > { %4825 = vmatmul.msk.bf16.gmra.mxu3 %vm657_vm4, %v3504_v10  ;;  %v4858_v10 = vrot.slane %v4842_v60, 9  ;;  %v3321_v60 = vrot.slane %v3319_v20, 4 }
 0x1fc   : > { %v3970_v47 = vpop.f32.mrf.mxu0  ;;  %v3814_v24 = vsel %vm5473_vm7, %v4858_v10, %v3813_v7  ;;  %v2482_v7 = vsel %vm5473_vm7, %v4632_v28, %v2481_v41  ;;  %v2485_v10 = vsel %vm5473_vm7, %v2483_v33, %v2484_v26 }
 0x1fd   : > { %v3572_v46 = vpop.f32.mrf.mxu3  ;;  %v2636_v35 = vpop.f32.mrf.mxu1  ;;  %v3880_v59 = vunpack.c.l.b16 %v3814_v24  ;;  %v2544_v41 = vunpack.c.l.b16 %v2485_v10  ;;  %v4801_v24 = vld [vmem:[%s5287_s11 + $0x9c] sm:$0xf] }
 0x1fe   : > { %v3652_v56 = vadd.f32 %v3572_v46, %v2998_v32  ;;  %v6341_v32 = vrot.slane %v3328_v25, 5  ;;  %v6346_v46 = vld [vmem:[%s6677_s2] ss:$0 sm:$0xff]  ;;  %v2543_v25 = vunpack.c.l.b16 %v2482_v7  ;;  %v2713_v26 = vadd.f32 %v2636_v35, %v5778_v15 }
 0x1ff   : > { %4874 = vmatmul.msk.bf16.gmra.mxu0 %vm657_vm4, %v3902_v62  ;;  %v3324_v62 = vrot.slane %v3322_v17, 5  ;;  %v3505_v17 = vpack.c.b16 %v3483_v48, %v3482_v38 }
 0x200   : > { %v2920_v49 = vpop.f32.mrf.mxu2  ;;  %4648 = vmatmul.msk.bf16.gmra.mxu1 %vm657_vm4, %v2564_v4  ;;  %v3334_v4 = vrot.slane %v3332_v9, 4  ;;  %v4050_v34 = vadd.f32 %v3970_v47, %v3652_v56  ;;  %v3338_v56 = vshll.u32 %v6353_v37, 16  ;;  %v2565_v48 = vpack.c.b16 %v2544_v41, %v2543_v25 }
 0x201   : > { %v2999_v42 = vadd.f32 %v2920_v49, %v2712_v45  ;;  %v3881_v45 = vunpack.c.l.b16 %v3817_v55  ;;  %v3325_v12 = vor.u32 %v3324_v62, %v3321_v60  ;;  %v4843_v55 = vld [vmem:[%s5287_s11 + $0x90] sm:$0xe] }
 0x202   : > { %v3335_v9 = vor.u32 %v3334_v4, %v6341_v32  ;;  %v4086_v49 = vadd.f32 %v6346_v46, %v4050_v34  ;;  %v3340_v62 = vrot.slane %v3338_v56, 5  ;;  %v3820_v4 = vrot.slane %v6322_v11, 5 }
 0x203   : > { %v3326_v38 = vrot.slane %v3325_v12, 4  ;;  %v3823_v11 = vrot.slane %v6353_v37, 5 }
 0x204   : > { %v3972_v58 = vpop.f32.mrf.mxu0  ;;  %v3336_v60 = vrot.slane %v3335_v9, 4  ;;  %v4118_v34 = vmax.f32 %v4086_v49, 0.0  ;;  %v4859_v9 = vrot.slane %v4843_v55, 9 }
 0x205   : > { %v3574_v6 = vpop.f32.mrf.mxu3  ;;  %4761 = vmatmul.msk.bf16.gmra.mxu2 %vm657_vm4, %v4928_v16  ;;  %v2638_v47 = vpop.f32.mrf.mxu1  ;;  %v3903_v16 = vpack.c.b16 %v3881_v45, %v3880_v59  ;;  %v3346_v45 = vshll.u32 %v4801_v24, 16  ;;  %v3331_v49 = vsel %vm5299_vm3, %v3326_v38, %v6341_v32 }
 0x206   : > { %v3653_v20 = vadd.f32 %v3574_v6, %v2999_v42  ;;  %v6369_v42 = vld [vmem:[%s5287_s11 + $0xa0] sm:$0xf]  ;;  %v5117_v6 = vld [vmem:[%s5287_s11 + $0x94] sm:$0xf]  ;;  %v2714_v56 = vadd.f32 %v2638_v47, %v5791_v13  ;;  %v5118_v13 = vld [vmem:[%s5287_s11 + $0x98] sm:$0x1] }
 0x207   : > { %v2488_v15 = vrot.slane %v5117_v6, 5  ;;  %v3352_v12 = vshll.u32 %v6369_v42, 16  ;;  %v3356_v25 = vshrl.u32 %v6369_v42, 16  ;;  %v2491_v47 = vrot.slane %v5118_v13, 5  ;;  %v6397_v6 = vld [vmem:[%s5287_s11 + $0xa4] sm:$0x1] }
 0x208   : > { %v4051_v28 = vadd.f32 %v3972_v58, %v3653_v20  ;;  %v2923_v33 = vpop.f32.mrf.mxu2  ;;  %v4617_v20 = vld [vmem:[%s5287_s11 + $0x90] sm:$0xe]  ;;  %v3348_v32 = vrot.slane %v3346_v45, 5 }
 0x209   : > { %v3000_v10 = vadd.f32 %v2923_v33, %v2713_v26  ;;  %v3822_v33 = vrot.slane %v3820_v4, 4  ;;  %v4633_v37 = vrot.slane %v4617_v20, 9  ;;  %v6392_v38 = vrot.slane %v3352_v12, 5 }
 0x20a   : > { %v4087_v14 = vadd.f32 %v6346_v46, %v4051_v28  ;;  %4826 = vmatmul.msk.bf16.gmra.mxu3 %vm657_vm4, %v3505_v17  ;;  %v3343_v17 = vshrl.u32 %v4801_v24, 16  ;;  %v3341_v28 = vsel %vm5299_vm3, %v3336_v60, %v3340_v62  ;;  %v4929_v24 = vld [vmem:[%s5287_s11 + $0x90] sm:$0xff]  ;;  %v3358_v60 = vrot.slane %v3356_v25, 4 }
 0x20b   : > { %v3824_v20 = vsel %vm5473_vm7, %v3822_v33, %v3823_v11 }
 0x20c   : > { %v4119_v58 = vmax.f32 %v4087_v14, 0.0  ;;  %v3975_v7 = vpop.f32.mrf.mxu0  ;;  %v3345_v55 = vrot.slane %v3343_v17, 4  ;;  %v2489_v17 = vsel %vm5473_vm7, %v4633_v37, %v2488_v15  ;;  %v4804_v37 = vld [vmem:[%s5287_s11 + $0xa8] sm:$0xf] }
 0x20d   : > { %v3577_v35 = vpop.f32.mrf.mxu3  ;;  %v2641_v59 = vpop.f32.mrf.mxu1 }
 0x20e   : > { %v4939_v41 = vpack.c.bf16 %v4119_v58, %v4118_v34  ;;  %v3654_v14 = vadd.f32 %v3577_v35, %v3000_v10  ;;  %v3484_v34 = vunpack.c.l.b16 %v3331_v49  ;;  %v3485_v58 = vunpack.c.l.b16 %v3341_v28 }
 0x20f   : > { %4875 = vmatmul.msk.bf16.gmra.mxu0 %vm657_vm4, %v3903_v16  ;;  %v2490_v16 = vrot.slane %v2488_v15, 4  ;;  %v3821_v10 = vsel %vm5473_vm7, %v4859_v9, %v3820_v4  ;;  %v3359_v4 = vor.u32 %v3358_v60, %v6392_v38  ;;  %v3883_v49 = vunpack.c.l.b16 %v3824_v20 }
 0x210   : > { %4940 = vst [vmem:[%s6386_s6] sm:$0xff] %v4939_v41   ;;  %v2925_v26 = vpop.f32.mrf.mxu2  ;;  %4649 = vmatmul.msk.bf16.gmra.mxu1 %vm657_vm4, %v2565_v48  ;;  %v4052_v35 = vadd.f32 %v3975_v7, %v3654_v14  ;;  %v3349_v41 = vor.u32 %v3348_v32, %v3345_v55  ;;  %v3506_v7 = vpack.c.b16 %v3485_v58, %v3484_v34  ;;  %v3882_v11 = vunpack.c.l.b16 %v3821_v10  ;;  %v4844_v32 = vld [vmem:[%s5287_s11 + $0x9c] sm:$0xe] }
 0x211   : > { %v3001_v62 = vadd.f32 %v2925_v26, %v2714_v56  ;;  %v2492_v45 = vsel %vm5473_vm7, %v2490_v16, %v2491_v47  ;;  %v3362_v56 = vshll.u32 %v6397_v6, 16  ;;  %v2545_v15 = vunpack.c.l.b16 %v2489_v17 }
 0x212   : > { %v2546_v28 = vunpack.c.l.b16 %v2492_v45  ;;  %v4088_v33 = vadd.f32 %v6346_v46, %v4052_v35  ;;  %v3350_v16 = vrot.slane %v3349_v41, 4  ;;  %v3360_v13 = vrot.slane %v3359_v4, 4 }
 0x213   : > { %v3364_v55 = vrot.slane %v3362_v56, 5  ;;  %v3827_v60 = vrot.slane %v6369_v42, 5  ;;  %v3904_v34 = vpack.c.b16 %v3883_v49, %v3882_v11  ;;  %v3367_v10 = vshrl.u32 %v4804_v37, 16 }
 0x214   : > { %v3977_v48 = vpop.f32.mrf.mxu0  ;;  %v2566_v58 = vpack.c.b16 %v2546_v28, %v2545_v15  ;;  %v3370_v35 = vshll.u32 %v4804_v37, 16  ;;  %v4860_v4 = vrot.slane %v4844_v32, 9  ;;  %v3355_v11 = vsel %vm5299_vm3, %v3350_v16, %v6392_v38 }
 0x215   : > { %v3579_v12 = vpop.f32.mrf.mxu3  ;;  %4762 = vmatmul.msk.bf16.gmra.mxu2 %vm657_vm4, %v4929_v24  ;;  %v2643_v25 = vpop.f32.mrf.mxu1  ;;  %v2715_v24 = vadd.f32 %v2641_v59, %v5804_v57  ;;  %v3365_v49 = vsel %vm5299_vm3, %v3360_v13, %v3364_v55  ;;  %v3829_v15 = vrot.slane %v3827_v60, 4  ;;  %v4930_v13 = vld [vmem:[%s5287_s11 + $0x9c] sm:$0xff] }
 0x216   : > { %v3655_v9 = vadd.f32 %v3579_v12, %v3001_v62  ;;  %v6416_v62 = vld [vmem:[%s5287_s11 + $0xac] sm:$0xf]  ;;  %v5119_v12 = vld [vmem:[%s5287_s11 + $0xa0] sm:$0xf]  ;;  %v2716_v28 = vadd.f32 %v2643_v25, %v5817_v54  ;;  %v3487_v54 = vunpack.c.l.b16 %v3365_v49  ;;  %v6435_v25 = vld [vmem:[%s5287_s11 + $0xb0] sm:$0x1] }
 0x217   : > { %v2495_v41 = vrot.slane %v5119_v12, 5  ;;  %v3380_v42 = vshrl.u32 %v6416_v62, 16 }
 0x218   : > { %v4053_v14 = vadd.f32 %v3977_v48, %v3655_v9  ;;  %v2928_v26 = vpop.f32.mrf.mxu2  ;;  %v4120_v48 = vmax.f32 %v4088_v33, 0.0  ;;  %v4618_v9 = vld [vmem:[%s5287_s11 + $0x9c] sm:$0xe]  ;;  %v3830_v33 = vrot.slane %v6397_v6, 5  ;;  %v3828_v6 = vsel %vm5473_vm7, %v4860_v4, %v3827_v60 }
 0x219   : > { %v3002_v45 = vadd.f32 %v2928_v26, %v2715_v24  ;;  %v3372_v26 = vrot.slane %v3370_v35, 5  ;;  %v4634_v38 = vrot.slane %v4618_v9, 9  ;;  %v2497_v16 = vrot.slane %v2495_v41, 4  ;;  %v5120_v24 = vld [vmem:[%s5287_s11 + $0xa4] sm:$0x1] }
 0x21a   : > { %v4089_v47 = vadd.f32 %v6346_v46, %v4053_v14  ;;  %4827 = vmatmul.msk.bf16.gmra.mxu3 %vm657_vm4, %v3506_v7  ;;  %v3376_v7 = vshll.u32 %v6416_v62, 16  ;;  %v3369_v14 = vrot.slane %v3367_v10, 4  ;;  %v2498_v32 = vrot.slane %v5120_v24, 5 }
 0x21b   : > { %v2496_v12 = vsel %vm5473_vm7, %v4634_v38, %v2495_v41  ;;  %v3386_v60 = vshll.u32 %v6435_v25, 16  ;;  %v3834_v38 = vrot.slane %v6416_v62, 5 }
 0x21c   : > { %v4121_v20 = vmax.f32 %v4089_v47, 0.0  ;;  %v3980_v17 = vpop.f32.mrf.mxu0  ;;  %v3378_v55 = vrot.slane %v3376_v7, 5  ;;  %v3373_v10 = vor.u32 %v3372_v26, %v3369_v14  ;;  %v2547_v49 = vunpack.c.l.b16 %v2496_v12  ;;  %v4845_v26 = vld [vmem:[%s5287_s11 + $0xa8] sm:$0xe] }
 0x21d   : > { %v3582_v57 = vpop.f32.mrf.mxu3  ;;  %v2646_v59 = vpop.f32.mrf.mxu1 }
 0x21e   : > { %v4944_v56 = vpack.c.bf16 %v4121_v20, %v4120_v48  ;;  %v3656_v37 = vadd.f32 %v3582_v57, %v3002_v45  ;;  %v3382_v48 = vrot.slane %v3380_v42, 4  ;;  %v3486_v20 = vunpack.c.l.b16 %v3355_v11 }
 0x21f   : > { %4876 = vmatmul.msk.bf16.gmra.mxu0 %vm657_vm4, %v3904_v34  ;;  %v2499_v57 = vsel %vm5473_vm7, %v2497_v16, %v2498_v32  ;;  %v2717_v24 = vadd.f32 %v2646_v59, %v5829_v31  ;;  %v4807_v32 = vld [vmem:[%s5287_s11 + $0xb4] sm:$0xf] }
 0x220   : > { %5016 = vst [vmem:[%s6386_s6 + $0x8] sm:$0xff] %v4944_v56   ;;  %v2930_v47 = vpop.f32.mrf.mxu2  ;;  %4650 = vmatmul.msk.bf16.gmra.mxu1 %vm657_vm4, %v2566_v58  ;;  %v4054_v35 = vadd.f32 %v3980_v17, %v3656_v37  ;;  %v3831_v58 = vsel %vm5473_vm7, %v3829_v15, %v3830_v33  ;;  %v3383_v42 = vor.u32 %v3382_v48, %v3378_v55  ;;  %v3884_v56 = vunpack.c.l.b16 %v3828_v6 }
 0x221   : > { %v3003_v34 = vadd.f32 %v2930_v47, %v2716_v28  ;;  %v3507_v17 = vpack.c.b16 %v3487_v54, %v3486_v20  ;;  %v3885_v11 = vunpack.c.l.b16 %v3831_v58  ;;  %v2548_v15 = vunpack.c.l.b16 %v2499_v57  ;;  %v6457_v54 = vld [vmem:[%s5287_s11 + $0xb8] sm:$0xf] }
 0x222   : > { %v3374_v28 = vrot.slane %v3373_v10, 4  ;;  %v4090_v41 = vadd.f32 %v6346_v46, %v4054_v35  ;;  %v3384_v37 = vrot.slane %v3383_v42, 4  ;;  %v3388_v47 = vrot.slane %v3386_v60, 5 }
 0x223   : > { %v2567_v48 = vpack.c.b16 %v2548_v15, %v2547_v49  ;;  %v4861_v20 = vrot.slane %v4845_v26, 9  ;;  %v3836_v57 = vrot.slane %v3834_v38, 4  ;;  %v3391_v42 = vshrl.u32 %v4807_v32, 16 }
 0x224   : > { %v3982_v45 = vpop.f32.mrf.mxu0  ;;  %v4122_v6 = vmax.f32 %v4090_v41, 0.0  ;;  %v3389_v12 = vsel %vm5299_vm3, %v3384_v37, %v3388_v47 }
 0x225   : > { %v3584_v9 = vpop.f32.mrf.mxu3  ;;  %4763 = vmatmul.msk.bf16.gmra.mxu2 %vm657_vm4, %v4930_v13  ;;  %v2648_v7 = vpop.f32.mrf.mxu1  ;;  %v3905_v13 = vpack.c.b16 %v3885_v11, %v3884_v56  ;;  %v3404_v56 = vshrl.u32 %v6457_v54, 16  ;;  %v3489_v37 = vunpack.c.l.b16 %v3389_v12  ;;  %v3835_v47 = vsel %vm5473_vm7, %v4861_v20, %v3834_v38 }
 0x226   : > { %v3657_v4 = vadd.f32 %v3584_v9, %v3003_v34  ;;  %v3379_v34 = vsel %vm5299_vm3, %v3374_v28, %v3378_v55  ;;  %v4619_v9 = vld [vmem:[%s5287_s11 + $0xa8] sm:$0xe]  ;;  %v3394_v55 = vshll.u32 %v4807_v32, 16  ;;  %v2718_v11 = vadd.f32 %v2648_v7, %v5842_v44 }
 0x227   : > { %v3488_v49 = vunpack.c.l.b16 %v3379_v34  ;;  %v4635_v41 = vrot.slane %v4619_v9, 9  ;;  %v6479_v34 = vld [vmem:[%s5287_s11 + $0xbc] sm:$0x1]  ;;  %v3886_v20 = vunpack.c.l.b16 %v3835_v47 }
 0x228   : > { %v4055_v33 = vadd.f32 %v3982_v45, %v3657_v4  ;;  %v2933_v14 = vpop.f32.mrf.mxu2  ;;  %v5121_v45 = vld [vmem:[%s5287_s11 + $0xac] sm:$0xf]  ;;  %v3837_v4 = vrot.slane %v6435_v25, 5 }
 0x229   : > { %v3004_v62 = vadd.f32 %v2933_v14, %v2717_v24  ;;  %v2502_v58 = vrot.slane %v5121_v45, 5  ;;  %v5122_v14 = vld [vmem:[%s5287_s11 + $0xb0] sm:$0x1]  ;;  %v4931_v25 = vld [vmem:[%s5287_s11 + $0xa8] sm:$0xff]  ;;  %v3396_v24 = vrot.slane %v3394_v55, 5  ;;  %v3508_v9 = vpack.c.b16 %v3489_v37, %v3488_v49 }
 0x22a   : > { %v4091_v16 = vadd.f32 %v6346_v46, %v4055_v33  ;;  %4828 = vmatmul.msk.bf16.gmra.mxu3 %vm657_vm4, %v3507_v17  ;;  %v3400_v17 = vshll.u32 %v6457_v54, 16  ;;  %v2505_v26 = vrot.slane %v5122_v14, 5  ;;  %v3838_v44 = vsel %vm5473_vm7, %v3836_v57, %v3837_v4 }
 0x22b   : > { %v2504_v33 = vrot.slane %v2502_v58, 4  ;;  %v3887_v45 = vunpack.c.l.b16 %v3838_v44  ;;  %v3841_v37 = vrot.slane %v6457_v54, 5 }
 0x22c   : > { %v4123_v10 = vmax.f32 %v4091_v16, 0.0  ;;  %v3985_v35 = vpop.f32.mrf.mxu0  ;;  %v3393_v16 = vrot.slane %v3391_v42, 4  ;;  %v6476_v7 = vrot.slane %v3400_v17, 5  ;;  %v3410_v42 = vshll.u32 %v6479_v34, 16 }
 0x22d   : > { %v3587_v31 = vpop.f32.mrf.mxu3  ;;  %v2651_v59 = vpop.f32.mrf.mxu1 }
 0x22e   : > { %v4949_v60 = vpack.c.bf16 %v4123_v10, %v4122_v6  ;;  %v3658_v15 = vadd.f32 %v3587_v31, %v3004_v62  ;;  %v2503_v10 = vsel %vm5473_vm7, %v4635_v41, %v2502_v58  ;;  %v2506_v62 = vsel %vm5473_vm7, %v2504_v33, %v2505_v26 }
 0x22f   : > { %4877 = vmatmul.msk.bf16.gmra.mxu0 %vm657_vm4, %v3905_v13  ;;  %v3406_v13 = vrot.slane %v3404_v56, 4  ;;  %v3397_v12 = vor.u32 %v3396_v24, %v3393_v16  ;;  %v2549_v58 = vunpack.c.l.b16 %v2503_v10  ;;  %v2550_v55 = vunpack.c.l.b16 %v2506_v62  ;;  %v4810_v56 = vld [vmem:[%s5287_s11 + $0xc0] sm:$0xf] }
 0x230   : > { %5017 = vst [vmem:[%s6386_s6 + $0x10] sm:$0xff] %v4949_v60   ;;  %v2935_v28 = vpop.f32.mrf.mxu2  ;;  %4651 = vmatmul.msk.bf16.gmra.mxu1 %vm657_vm4, %v2567_v48  ;;  %v4056_v48 = vadd.f32 %v3985_v35, %v3658_v15  ;;  %v2719_v49 = vadd.f32 %v2651_v59, %v5856_v30  ;;  %v3412_v14 = vrot.slane %v3410_v42, 5  ;;  %v3415_v47 = vshrl.u32 %v4810_v56, 16 }
 0x231   : > { %v3005_v32 = vadd.f32 %v2935_v28, %v2718_v11  ;;  %v3407_v35 = vor.u32 %v3406_v13, %v6476_v7  ;;  %v3906_v11 = vpack.c.b16 %v3887_v45, %v3886_v20  ;;  %v3398_v15 = vrot.slane %v3397_v12, 4  ;;  %v6491_v28 = vld [vmem:[%s5287_s11 + $0xc4] sm:$0xf]  ;;  %v4620_v45 = vld [vmem:[%s5287_s11 + $0xb4] sm:$0xe] }
 0x232   : > { %v4092_v60 = vadd.f32 %v6346_v46, %v4056_v48  ;;  %v2568_v26 = vpack.c.b16 %v2550_v55, %v2549_v58  ;;  %v3418_v16 = vshll.u32 %v4810_v56, 16  ;;  %v3424_v48 = vshll.u32 %v6491_v28, 16 }
 0x233   : > { %v3408_v33 = vrot.slane %v3407_v35, 4  ;;  %v3428_v62 = vshrl.u32 %v6491_v28, 16  ;;  %v3403_v54 = vsel %vm5299_vm3, %v3398_v15, %v6476_v7  ;;  %v3417_v35 = vrot.slane %v3415_v47, 4 }
 0x234   : > { %v3987_v6 = vpop.f32.mrf.mxu0  ;;  %v4124_v24 = vmax.f32 %v4092_v60, 0.0  ;;  %v3420_v7 = vrot.slane %v3418_v16, 5  ;;  %v6512_v60 = vrot.slane %v3424_v48, 5 }
 0x235   : > { %v3589_v38 = vpop.f32.mrf.mxu3  ;;  %4764 = vmatmul.msk.bf16.gmra.mxu2 %vm657_vm4, %v4931_v25  ;;  %v2653_v31 = vpop.f32.mrf.mxu1  ;;  %v4846_v25 = vld [vmem:[%s5287_s11 + $0xb4] sm:$0xe]  ;;  %v3413_v12 = vsel %vm5299_vm3, %v3408_v33, %v3412_v14  ;;  %v6517_v14 = vld [vmem:[%s5287_s11 + $0xc8] sm:$0x1] }
 0x236   : > { %v3659_v57 = vadd.f32 %v3589_v38, %v3005_v32  ;;  %v4862_v20 = vrot.slane %v4846_v25, 9  ;;  %v2720_v58 = vadd.f32 %v2653_v31, %v5869_v51  ;;  %v3491_v33 = vunpack.c.l.b16 %v3413_v12 }
 0x238   : > { %v4057_v4 = vadd.f32 %v3987_v6, %v3659_v57  ;;  %v2938_v17 = vpop.f32.mrf.mxu2  ;;  %v5123_v6 = vld [vmem:[%s5287_s11 + $0xb8] sm:$0xf]  ;;  %v3843_v57 = vrot.slane %v3841_v37, 4  ;;  %v3842_v51 = vsel %vm5473_vm7, %v4862_v20, %v3841_v37  ;;  %v3434_v37 = vshll.u32 %v6517_v14, 16 }
 0x239   : > { %v3006_v13 = vadd.f32 %v2938_v17, %v2719_v49  ;;  %v2509_v10 = vrot.slane %v5123_v6, 5  ;;  %v4636_v17 = vrot.slane %v4620_v45, 9  ;;  %v3888_v6 = vunpack.c.l.b16 %v3842_v51 }
 0x23a   : > { %v4093_v41 = vadd.f32 %v6346_v46, %v4057_v4  ;;  %4829 = vmatmul.msk.bf16.gmra.mxu3 %vm657_vm4, %v3508_v9  ;;  %v3844_v9 = vrot.slane %v6479_v34, 5  ;;  %v4932_v4 = vld [vmem:[%s5287_s11 + $0xb4] sm:$0xff]  ;;  %v3490_v34 = vunpack.c.l.b16 %v3403_v54 }
 0x23b   : > { %v2511_v56 = vrot.slane %v2509_v10, 4 }
 0x23c   : > { %v4125_v32 = vmax.f32 %v4093_v41, 0.0  ;;  %v3990_v44 = vpop.f32.mrf.mxu0  ;;  %v3430_v41 = vrot.slane %v3428_v62, 4  ;;  %v3845_v31 = vsel %vm5473_vm7, %v3843_v57, %v3844_v9 }
 0x23d   : > { %v3592_v30 = vpop.f32.mrf.mxu3  ;;  %v2656_v59 = vpop.f32.mrf.mxu1  ;;  %v3889_v62 = vunpack.c.l.b16 %v3845_v31 }
 0x23e   : > { %v4954_v38 = vpack.c.bf16 %v4125_v32, %v4124_v24  ;;  %v3660_v42 = vadd.f32 %v3592_v30, %v3006_v13  ;;  %v2510_v24 = vsel %vm5473_vm7, %v4636_v17, %v2509_v10  ;;  %v3421_v13 = vor.u32 %v3420_v7, %v3417_v35 }
 0x23f   : > { %4878 = vmatmul.msk.bf16.gmra.mxu0 %vm657_vm4, %v3906_v11  ;;  %v5124_v11 = vld [vmem:[%s5287_s11 + $0xbc] sm:$0x1]  ;;  %v3509_v30 = vpack.c.b16 %v3491_v33, %v3490_v34  ;;  %v2551_v45 = vunpack.c.l.b16 %v2510_v24  ;;  %v2721_v35 = vadd.f32 %v2656_v59, %v5885_v1  ;;  %v3907_v7 = vpack.c.b16 %v3889_v62, %v3888_v6  ;;  %v4621_v24 = vld [vmem:[%s5287_s11 + $0xc0] sm:$0xe] }
 0x240   : > { %5018 = vst [vmem:[%s6386_s6 + $0x18] sm:$0xff] %v4954_v38   ;;  %v2940_v55 = vpop.f32.mrf.mxu2  ;;  %4652 = vmatmul.msk.bf16.gmra.mxu1 %vm657_vm4, %v2568_v26  ;;  %v2512_v15 = vrot.slane %v5124_v11, 5  ;;  %v4058_v25 = vadd.f32 %v3990_v44, %v3660_v42  ;;  %v3431_v44 = vor.u32 %v3430_v41, %v6512_v60  ;;  %v3422_v12 = vrot.slane %v3421_v13, 4  ;;  %v4813_v41 = vld [vmem:[%s5287_s11 + $0xcc] sm:$0xf]  ;;  %v4933_v62 = vld [vmem:[%s5287_s11 + $0xc0] sm:$0xff] }
 0x241   : > { %v3007_v49 = vadd.f32 %v2940_v55, %v2720_v58  ;;  %v3436_v42 = vrot.slane %v3434_v37, 5  ;;  %v4847_v58 = vld [vmem:[%s5287_s11 + $0xc0] sm:$0xe]  ;;  %v3848_v55 = vrot.slane %v6491_v28, 5  ;;  %v3442_v13 = vshll.u32 %v4813_v41, 16 }
 0x242   : > { %v2513_v32 = vsel %vm5473_vm7, %v2511_v56, %v2512_v15  ;;  %v4094_v38 = vadd.f32 %v6346_v46, %v4058_v25  ;;  %v3432_v57 = vrot.slane %v3431_v44, 4  ;;  %v3427_v59 = vsel %vm5299_vm3, %v3422_v12, %v6512_v60  ;;  %v5125_v25 = vld [vmem:[%s5287_s11 + $0xc4] sm:$0xf] }
 0x243   : > { %v2552_v10 = vunpack.c.l.b16 %v2513_v32  ;;  %v4863_v33 = vrot.slane %v4847_v58, 9  ;;  %v2516_v28 = vrot.slane %v5125_v25, 5  ;;  %v3850_v31 = vrot.slane %v3848_v55, 4 }
 0x244   : > { %v3992_v47 = vpop.f32.mrf.mxu0  ;;  %v3437_v51 = vsel %vm5299_vm3, %v3432_v57, %v3436_v42  ;;  %v3439_v32 = vshrl.u32 %v4813_v41, 16 }
 0x245   : > { %v3594_v26 = vpop.f32.mrf.mxu3  ;;  %4765 = vmatmul.msk.bf16.gmra.mxu2 %vm657_vm4, %v4932_v4  ;;  %v2658_v16 = vpop.f32.mrf.mxu1  ;;  %v4126_v4 = vmax.f32 %v4094_v38, 0.0  ;;  %v2569_v15 = vpack.c.b16 %v2552_v10, %v2551_v45  ;;  %v4637_v38 = vrot.slane %v4621_v24, 9  ;;  %v3493_v12 = vunpack.c.l.b16 %v3437_v51 }
 0x246   : > { %v3661_v48 = vadd.f32 %v3594_v26, %v3007_v49  ;;  %v6538_v49 = vld [vmem:[%s5287_s11 + $0xd0] sm:$0xf]  ;;  %v3851_v26 = vrot.slane %v6517_v14, 5  ;;  %v3492_v14 = vunpack.c.l.b16 %v3427_v59  ;;  %v3849_v57 = vsel %vm5473_vm7, %v4863_v33, %v3848_v55 }
 0x247   : > { %v3448_v44 = vshll.u32 %v6538_v49, 16  ;;  %v3452_v60 = vshrl.u32 %v6538_v49, 16  ;;  %v2517_v41 = vsel %vm5473_vm7, %v4637_v38, %v2516_v28  ;;  %v3890_v33 = vunpack.c.l.b16 %v3849_v57 }
 0x248   : > { %v4059_v54 = vadd.f32 %v3992_v47, %v3661_v48  ;;  %v2943_v20 = vpop.f32.mrf.mxu2  ;;  %v3510_v59 = vpack.c.b16 %v3493_v12, %v3492_v14 }
 0x249   : > { %v3008_v11 = vadd.f32 %v2943_v20, %v2721_v35  ;;  %v5126_v20 = vld [vmem:[%s5287_s11 + $0xc8] sm:$0x1]  ;;  %v3441_v35 = vrot.slane %v3439_v32, 4  ;;  %v3450_v42 = vrot.slane %v3448_v44, 5  ;;  %v3454_v58 = vrot.slane %v3452_v60, 4 }
 0x24a   : > { %v4095_v9 = vadd.f32 %v6346_v46, %v4059_v54  ;;  %4830 = vmatmul.msk.bf16.gmra.mxu3 %vm657_vm4, %v3509_v30  ;;  %v6687_v30 = vld [vmem:[#allocation5_spill] sm:$0xff]  ;;  %v2518_v54 = vrot.slane %v2516_v28, 4  ;;  %v2519_v45 = vrot.slane %v5126_v20, 5  ;;  %v2553_v32 = vunpack.c.l.b16 %v2517_v41 }
 0x24b   : > { %v2722_v37 = vadd.f32 %v2658_v16, %v6687_v30  ;;  %v3444_v16 = vrot.slane %v3442_v13, 5  ;;  %v3455_v51 = vor.u32 %v3454_v58, %v3450_v42 }
 0x24c   : > { %v4127_v17 = vmax.f32 %v4095_v9, 0.0  ;;  %v3995_v56 = vpop.f32.mrf.mxu0  ;;  %v3852_v9 = vsel %vm5473_vm7, %v3850_v31, %v3851_v26  ;;  %v2520_v55 = vsel %vm5473_vm7, %v2518_v54, %v2519_v45  ;;  %v4848_v45 = vld [vmem:[%s5287_s11 + $0xcc] sm:$0xe] }
 0x24d   : > { %v3597_v34 = vpop.f32.mrf.mxu3  ;;  %v2661_v1 = vpop.f32.mrf.mxu1  ;;  %v3891_v25 = vunpack.c.l.b16 %v3852_v9  ;;  %v2554_v13 = vunpack.c.l.b16 %v2520_v55  ;;  %v3456_v30 = vrot.slane %v3455_v51, 4  ;;  %v4864_v9 = vrot.slane %v4848_v45, 9 }
 0x24e   : > { %v4959_v47 = vpack.c.bf16 %v4127_v17, %v4126_v4  ;;  %v3662_v48 = vadd.f32 %v3597_v34, %v3008_v11  ;;  %v4815_v17 = vld [vmem:[%s5287_s11 + $0xd4] sm:$0x1]  ;;  %v2723_v28 = vadd.f32 %v2661_v1, %v5921_v52 }
 0x24f   : > { %4879 = vmatmul.msk.bf16.gmra.mxu0 %vm657_vm4, %v3907_v7  ;;  %v3458_v31 = vshll.u32 %v4815_v17, 16  ;;  %v3908_v60 = vpack.c.b16 %v3891_v25, %v3890_v33  ;;  %v2570_v20 = vpack.c.b16 %v2554_v13, %v2553_v32 }
 0x250   : > { %5019 = vst [vmem:[%s6386_s6 + $0x20] sm:$0xff] %v4959_v47   ;;  %v2945_v6 = vpop.f32.mrf.mxu2  ;;  %4653 = vmatmul.msk.bf16.gmra.mxu1 %vm657_vm4, %v2569_v15  ;;  %v4060_v7 = vadd.f32 %v3995_v56, %v3662_v48  ;;  %v3445_v47 = vor.u32 %v3444_v16, %v3441_v35 }
 0x251   : > { %v3009_v10 = vadd.f32 %v2945_v6, %v2722_v37  ;;  %v3460_v37 = vrot.slane %v3458_v31, 5  ;;  %v3855_v6 = vrot.slane %v6538_v49, 5 }
 0x252   : > { %v4096_v56 = vadd.f32 %v6346_v46, %v4060_v7  ;;  %v3446_v48 = vrot.slane %v3445_v47, 4  ;;  %v3858_v7 = vrot.slane %v4815_v17, 5 }
 0x253   : > { %v3461_v1 = vsel %vm5299_vm3, %v3456_v30, %v3460_v37  ;;  %v3857_v58 = vrot.slane %v3855_v6, 4  ;;  %v3856_v36 = vsel %vm5473_vm7, %v4864_v9, %v3855_v6  ;;  %v6688_v6 = vld [vmem:[#allocation6_spill] sm:$0xff] }
 0x254   : > { %v3997_v4 = vpop.f32.mrf.mxu0  ;;  %v3451_v52 = vsel %vm5299_vm3, %v3446_v48, %v3450_v42  ;;  %v3495_v55 = vunpack.c.l.b16 %v3461_v1  ;;  %v3892_v47 = vunpack.c.l.b16 %v3856_v36 }
 0x255   : > { %v3599_v11 = vpop.f32.mrf.mxu3  ;;  %4766 = vmatmul.msk.bf16.gmra.mxu2 %vm657_vm4, %v4933_v62  ;;  %v2663_v15 = vpop.f32.mrf.mxu1  ;;  %v4128_v62 = vmax.f32 %v4096_v56, 0.0  ;;  %v3494_v41 = vunpack.c.l.b16 %v3451_v52  ;;  %v3859_v42 = vsel %vm5473_vm7, %v3857_v58, %v3858_v7 }
 0x256   : > { %v3663_v34 = vadd.f32 %v3599_v11, %v3009_v10  ;;  %v2724_v35 = vadd.f32 %v2663_v15, %v5941_v21  ;;  %v3893_v17 = vunpack.c.l.b16 %v3859_v42 }
 0x257   : > { %v3511_v25 = vpack.c.b16 %v3495_v55, %v3494_v41 }
 0x258   : > { %v4061_v26 = vadd.f32 %v3997_v4, %v3663_v34  ;;  %v2948_v24 = vpop.f32.mrf.mxu2  ;;  %v4934_v4 = vld [vmem:[%s5287_s11 + $0xcc] sm:$0xff]  ;;  %v3909_v18 = vpack.c.b16 %v3893_v17, %v3892_v47 }
 0x259   : > { %v3010_v54 = vadd.f32 %v2948_v24, %v2723_v28 }
 0x25a   : > { %v4097_v44 = vadd.f32 %v6346_v46, %v4061_v26  ;;  %4831 = vmatmul.msk.bf16.gmra.mxu3 %vm657_vm4, %v3510_v59 }
 0x25c   : > { %v4129_v14 = vmax.f32 %v4097_v44, 0.0  ;;  %v4000_v38 = vpop.f32.mrf.mxu0 }
 0x25d   : > { %v3602_v10 = vpop.f32.mrf.mxu3  ;;  %v2666_v12 = vpop.f32.mrf.mxu1 }
 0x25e   : > { %v4964_v57 = vpack.c.bf16 %v4129_v14, %v4128_v62  ;;  %v3664_v49 = vadd.f32 %v3602_v10, %v3010_v54  ;;  %v2725_v24 = vadd.f32 %v2666_v12, %v5960_v29 }
 0x25f   : > { %4880 = vmatmul.msk.bf16.gmra.mxu0 %vm657_vm4, %v3908_v60 }
 0x260   : > { %5020 = vst [vmem:[%s6386_s6 + $0x28] sm:$0xff] %v4964_v57   ;;  %v2950_v16 = vpop.f32.mrf.mxu2  ;;  %4654 = vmatmul.msk.bf16.gmra.mxu1 %vm657_vm4, %v2570_v20  ;;  %v4062_v34 = vadd.f32 %v4000_v38, %v3664_v49 }
 0x261   : > { %v3011_v11 = vadd.f32 %v2950_v16, %v2724_v35 }
 0x262   : > { %v4098_v51 = vadd.f32 %v6346_v46, %v4062_v34 }
 0x264   : > { %v4002_v59 = vpop.f32.mrf.mxu0  ;;  %v4130_v32 = vmax.f32 %v4098_v51, 0.0 }
 0x265   : > { %v3604_v33 = vpop.f32.mrf.mxu3  ;;  %4767 = vmatmul.msk.bf16.gmra.mxu2 %vm657_vm4, %v4934_v4  ;;  %v2668_v21 = vpop.f32.mrf.mxu1 }
 0x266   : > { %v3665_v15 = vadd.f32 %v3604_v33, %v3011_v11  ;;  %v2726_v62 = vadd.f32 %v2668_v21, %v6688_v6 }
 0x268   : > { %v4063_v31 = vadd.f32 %v4002_v59, %v3665_v15  ;;  %v2953_v56 = vpop.f32.mrf.mxu2 }
 0x269   : > { %v3012_v28 = vadd.f32 %v2953_v56, %v2725_v24 }
 0x26a   : > { %v4099_v26 = vadd.f32 %v6346_v46, %v4063_v31  ;;  %4832 = vmatmul.msk.bf16.gmra.mxu3 %vm657_vm4, %v3511_v25 }
 0x26c   : > { %v4131_v13 = vmax.f32 %v4099_v26, 0.0  ;;  %v4005_v44 = vpop.f32.mrf.mxu0 }
 0x26d   : > { %v3607_v60 = vpop.f32.mrf.mxu3  ;;  %v2671_v48 = vpop.f32.mrf.mxu1 }
 0x26e   : > { %v4969_v30 = vpack.c.bf16 %v4131_v13, %v4130_v32  ;;  %v3666_v37 = vadd.f32 %v3607_v60, %v3012_v28  ;;  %v2727_v9 = vadd.f32 %v2671_v48, %v6003_v5 }
 0x26f   : > { %4881 = vmatmul.msk.bf16.gmra.mxu0 %vm657_vm4, %v3909_v18 }
 0x270   : > { %5021 = vst [vmem:[%s6386_s6 + $0x30] sm:$0xff] %v4969_v30   ;;  %v2955_v14 = vpop.f32.mrf.mxu2  ;;  %v4064_v54 = vadd.f32 %v4005_v44, %v3666_v37 }
 0x271   : > { %v3013_v38 = vadd.f32 %v2955_v14, %v2726_v62 }
 0x272   : > { %v4100_v12 = vadd.f32 %v6346_v46, %v4064_v54 }
 0x274   : > { %v4007_v29 = vpop.f32.mrf.mxu0  ;;  %v4132_v49 = vmax.f32 %v4100_v12, 0.0 }
 0x275   : > { %v3609_v20 = vpop.f32.mrf.mxu3  ;;  %v2673_v45 = vpop.f32.mrf.mxu1 }
 0x276   : > { %v3667_v10 = vadd.f32 %v3609_v20, %v3013_v38  ;;  %v2728_v55 = vadd.f32 %v2673_v45, %v6027_v22 }
 0x278   : > { %v4065_v57 = vadd.f32 %v4007_v29, %v3667_v10  ;;  %v2958_v52 = vpop.f32.mrf.mxu2 }
 0x279   : > { %v3014_v58 = vadd.f32 %v2958_v52, %v2727_v9 }
 0x27a   : > { %v4101_v1 = vadd.f32 %v6346_v46, %v4065_v57 }
 0x27c   : > { %v4133_v35 = vmax.f32 %v4101_v1, 0.0  ;;  %v4010_v16 = vpop.f32.mrf.mxu0 }
 0x27d   : > { %v3612_v7 = vpop.f32.mrf.mxu3  ;;  %v2676_v4 = vpop.f32.mrf.mxu1 }
 0x27e   : > { %v4974_v11 = vpack.c.bf16 %v4133_v35, %v4132_v49  ;;  %v3668_v41 = vadd.f32 %v3612_v7, %v3014_v58  ;;  %v2729_v51 = vadd.f32 %v2676_v4, %v6046_v19 }
 0x280   : > { %5022 = vst [vmem:[%s6386_s6 + $0x38] sm:$0xff] %v4974_v11   ;;  %v2960_v34 = vpop.f32.mrf.mxu2  ;;  %v4066_v36 = vadd.f32 %v4010_v16, %v3668_v41 }
 0x281   : > { %v3015_v59 = vadd.f32 %v2960_v34, %v2728_v55 }
 0x282   : > { %v4102_v5 = vadd.f32 %v6346_v46, %v4066_v36 }
 0x284   : > { %v4012_v42 = vpop.f32.mrf.mxu0  ;;  %v4134_v31 = vmax.f32 %v4102_v5, 0.0 }
 0x285   : > { %v3614_v33 = vpop.f32.mrf.mxu3  ;;  %v2678_v21 = vpop.f32.mrf.mxu1 }
 0x286   : > { %v3669_v15 = vadd.f32 %v3614_v33, %v3015_v59  ;;  %v2730_v44 = vadd.f32 %v2678_v21, %v6070_v53 }
 0x288   : > { %v4067_v25 = vadd.f32 %v4012_v42, %v3669_v15  ;;  %v2963_v47 = vpop.f32.mrf.mxu2 }
 0x289   : > { %v3016_v22 = vadd.f32 %v2963_v47, %v2729_v51 }
 0x28a   : > { %v4103_v17 = vadd.f32 %v6346_v46, %v4067_v25 }
 0x28c   : > { %v4135_v56 = vmax.f32 %v4103_v17, 0.0  ;;  %v4015_v26 = vpop.f32.mrf.mxu0 }
 0x28d   : > { %v3617_v24 = vpop.f32.mrf.mxu3  ;;  %v2681_v18 = vpop.f32.mrf.mxu1 }
 0x28e   : > { %v4979_v32 = vpack.c.bf16 %v4135_v56, %v4134_v31  ;;  %v3670_v13 = vadd.f32 %v3617_v24, %v3016_v22  ;;  %v2731_v29 = vadd.f32 %v2681_v18, %v6089_v2 }
 0x290   : > { %5023 = vst [vmem:[%s6386_s6 + $0x40] sm:$0xff] %v4979_v32   ;;  %v2965_v28 = vpop.f32.mrf.mxu2  ;;  %v4068_v48 = vadd.f32 %v4015_v26, %v3670_v13 }
 0x291   : > { %v3017_v60 = vadd.f32 %v2965_v28, %v2730_v44 }
 0x292   : > { %v4104_v19 = vadd.f32 %v6346_v46, %v4068_v48 }
 0x294   : > { %v4017_v30 = vpop.f32.mrf.mxu0  ;;  %v4136_v20 = vmax.f32 %v4104_v19, 0.0 }
 0x295   : > { %v3619_v37 = vpop.f32.mrf.mxu3  ;;  %v2683_v6 = vpop.f32.mrf.mxu1 }
 0x296   : > { %v3671_v62 = vadd.f32 %v3619_v37, %v3017_v60  ;;  %v2732_v9 = vadd.f32 %v2683_v6, %v6113_v40 }
 0x298   : > { %v4069_v14 = vadd.f32 %v4017_v30, %v3671_v62  ;;  %v2968_v38 = vpop.f32.mrf.mxu2 }
 0x299   : > { %v3018_v53 = vadd.f32 %v2968_v38, %v2731_v29 }
 0x29a   : > { %v4105_v54 = vadd.f32 %v6346_v46, %v4069_v14 }
 0x29c   : > { %v4137_v45 = vmax.f32 %v4105_v54, 0.0  ;;  %v4020_v10 = vpop.f32.mrf.mxu0 }
 0x29d   : > { %v3622_v12 = vpop.f32.mrf.mxu3  ;;  %v2686_v57 = vpop.f32.mrf.mxu1 }
 0x29e   : > { %v4984_v52 = vpack.c.bf16 %v4137_v45, %v4136_v20  ;;  %v3672_v1 = vadd.f32 %v3622_v12, %v3018_v53  ;;  %v2733_v59 = vadd.f32 %v2686_v57, %v6132_v8  ;;  %v6616_v8 = vld [vmem:[%s6677_s2] ss:$0 sm:$0xff] }
 0x2a0   : > { %5024 = vst [vmem:[%s6386_s6 + $0x48] sm:$0xff] %v4984_v52   ;;  %v2970_v49 = vpop.f32.mrf.mxu2  ;;  %v4070_v16 = vadd.f32 %v4020_v10, %v3672_v1 }
 0x2a1   : > { %v3019_v35 = vadd.f32 %v2970_v49, %v2732_v9 }
 0x2a2   : > { %v4106_v2 = vadd.f32 %v6346_v46, %v4070_v16 }
 0x2a4   : > { %v4022_v58 = vpop.f32.mrf.mxu0  ;;  %v4138_v36 = vmax.f32 %v4106_v2, 0.0 }
 0x2a5   : > { %v3624_v7 = vpop.f32.mrf.mxu3  ;;  %v2688_v4 = vpop.f32.mrf.mxu1 }
 0x2a6   : > { %v3673_v11 = vadd.f32 %v3624_v7, %v3019_v35  ;;  %v2734_v47 = vadd.f32 %v2688_v4, %v6156_v27 }
 0x2a8   : > { %v4071_v41 = vadd.f32 %v4022_v58, %v3673_v11  ;;  %v2973_v55 = vpop.f32.mrf.mxu2 }
 0x2a9   : > { %v3020_v40 = vadd.f32 %v2973_v55, %v2733_v59 }
 0x2aa   : > { %v4107_v34 = vadd.f32 %v6346_v46, %v4071_v41 }
 0x2ac   : > { %v4139_v42 = vmax.f32 %v4107_v34, 0.0  ;;  %v4025_v33 = vpop.f32.mrf.mxu0 }
 0x2ad   : > { %v3627_v21 = vpop.f32.mrf.mxu3  ;;  %v2691_v15 = vpop.f32.mrf.mxu1 }
 0x2ae   : > { %v4989_v5 = vpack.c.bf16 %v4139_v42, %v4138_v36  ;;  %v3674_v25 = vadd.f32 %v3627_v21, %v3020_v40  ;;  %v2735_v27 = vadd.f32 %v2691_v15, %v6175_v63 }
 0x2b0   : > { %5025 = vst [vmem:[%s6386_s6 + $0x50] sm:$0xff] %v4989_v5   ;;  %v2975_v17 = vpop.f32.mrf.mxu2  ;;  %v4072_v31 = vadd.f32 %v4025_v33, %v3674_v25 }
 0x2b1   : > { %v3021_v51 = vadd.f32 %v2975_v17, %v2734_v47 }
 0x2b2   : > { %v4108_v24 = vadd.f32 %v6616_v8, %v4072_v31 }
 0x2b4   : > { %v4027_v56 = vpop.f32.mrf.mxu0  ;;  %v4140_v44 = vmax.f32 %v4108_v24, 0.0 }
 0x2b5   : > { %v3629_v26 = vpop.f32.mrf.mxu3  ;;  %v2693_v46 = vpop.f32.mrf.mxu1 }
 0x2b6   : > { %v3675_v22 = vadd.f32 %v3629_v26, %v3021_v51  ;;  %v2736_v19 = vadd.f32 %v2693_v46, %v6199_v39 }
 0x2b8   : > { %v4073_v18 = vadd.f32 %v4027_v56, %v3675_v22  ;;  %v2978_v32 = vpop.f32.mrf.mxu2 }
 0x2b9   : > { %v3022_v48 = vadd.f32 %v2978_v32, %v2735_v27 }
 0x2ba   : > { %v4109_v13 = vadd.f32 %v6616_v8, %v4073_v18 }
 0x2bc   : > { %v4141_v28 = vmax.f32 %v4109_v13, 0.0  ;;  %v4030_v60 = vpop.f32.mrf.mxu0 }
 0x2bd   : > { %v3632_v30 = vpop.f32.mrf.mxu3  ;;  %v2696_v37 = vpop.f32.mrf.mxu1 }
 0x2be   : > { %v4994_v6 = vpack.c.bf16 %v4141_v28, %v4140_v44  ;;  %v3676_v62 = vadd.f32 %v3632_v30, %v3022_v48  ;;  %v2737_v52 = vadd.f32 %v2696_v37, %v6218_v50 }
 0x2c0   : > { %5026 = vst [vmem:[%s6386_s6 + $0x58] sm:$0xff] %v4994_v6   ;;  %v2980_v14 = vpop.f32.mrf.mxu2  ;;  %v4074_v54 = vadd.f32 %v4030_v60, %v3676_v62 }
 0x2c1   : > { %v3023_v38 = vadd.f32 %v2980_v14, %v2736_v19 }
 0x2c2   : > { %v4110_v63 = vadd.f32 %v6616_v8, %v4074_v54 }
 0x2c4   : > { %v4032_v29 = vpop.f32.mrf.mxu0  ;;  %v4142_v1 = vmax.f32 %v4110_v63, 0.0 }
 0x2c5   : > { %v3634_v20 = vpop.f32.mrf.mxu3  ;;  %v2698_v45 = vpop.f32.mrf.mxu1 }
 0x2c6   : > { %v3677_v10 = vadd.f32 %v3634_v20, %v3023_v38  ;;  %v2738_v4 = vadd.f32 %v2698_v45, %v6242_v3 }
 0x2c8   : > { %v4075_v53 = vadd.f32 %v4032_v29, %v3677_v10  ;;  %v2983_v12 = vpop.f32.mrf.mxu2 }
 0x2c9   : > { %v3024_v39 = vadd.f32 %v2983_v12, %v2737_v52 }
 0x2ca   : > { %v4111_v57 = vadd.f32 %v6616_v8, %v4075_v53 }
 0x2cc   : > { %v4143_v9 = vmax.f32 %v4111_v57, 0.0  ;;  %v4035_v49 = vpop.f32.mrf.mxu0 }
 0x2cd   : > { %v3637_v35 = vpop.f32.mrf.mxu3  ;;  %v2701_v58 = vpop.f32.mrf.mxu1 }
 0x2ce   : > { %v4999_v16 = vpack.c.bf16 %v4143_v9, %v4142_v1  ;;  %v3678_v7 = vadd.f32 %v3637_v35, %v3024_v39  ;;  %v2739_v21 = vadd.f32 %v2701_v58, %v6259_v23 }
 0x2d0   : > { %5027 = vst [vmem:[%s6386_s6 + $0x60] sm:$0xff] %v4999_v16   ;;  %v2985_v11 = vpop.f32.mrf.mxu2  ;;  %v4076_v41 = vadd.f32 %v4035_v49, %v3678_v7 }
 0x2d1   : > { %v3025_v2 = vadd.f32 %v2985_v11, %v2738_v4 }
 0x2d2   : > { %v4112_v50 = vadd.f32 %v6616_v8, %v4076_v41 }
 0x2d4   : > { %v4037_v55 = vpop.f32.mrf.mxu0  ;;  %v4144_v15 = vmax.f32 %v4112_v50, 0.0 }
 0x2d5   : > { %v3639_v34 = vpop.f32.mrf.mxu3  ;;  %v2703_v33 = vpop.f32.mrf.mxu1 }
 0x2d6   : > { %v3679_v59 = vadd.f32 %v3639_v34, %v3025_v2  ;;  %v2740_v31 = vadd.f32 %v2703_v33, %v6280_v0 }
 0x2d8   : > { %v4077_v36 = vadd.f32 %v4037_v55, %v3679_v59  ;;  %v2988_v42 = vpop.f32.mrf.mxu2 }
 0x2d9   : > { %v3026_v3 = vadd.f32 %v2988_v42, %v2739_v21 }
 0x2da   : > { %v4113_v40 = vadd.f32 %v6616_v8, %v4077_v36 }
 0x2dc   : > { %v4145_v5 = vmax.f32 %v4113_v40, 0.0  ;;  %v4040_v25 = vpop.f32.mrf.mxu0 }
 0x2dd   : > { %v3642_v47 = vpop.f32.mrf.mxu3  ;;  %v2706_v46 = vpop.f32.mrf.mxu1 }
 0x2de   : > { %v5004_v17 = vpack.c.bf16 %v4145_v5, %v4144_v15  ;;  %v3680_v51 = vadd.f32 %v3642_v47, %v3026_v3  ;;  %v2741_v28 = vadd.f32 %v2706_v46, %v6298_v43 }
 0x2e0   : > { %5028 = vst [vmem:[%s6386_s6 + $0x68] sm:$0xff] %v5004_v17   ;;  %v2990_v56 = vpop.f32.mrf.mxu2  ;;  %v4078_v22 = vadd.f32 %v4040_v25, %v3680_v51 }
 0x2e1   : > { %v3027_v26 = vadd.f32 %v2990_v56, %v2740_v31 }
 0x2e2   : > { %v4114_v23 = vadd.f32 %v6616_v8, %v4078_v22 }
 0x2e4   : > { %v4042_v24 = vpop.f32.mrf.mxu0  ;;  %v4146_v60 = vmax.f32 %v4114_v23, 0.0 }
 0x2e5   : > { %v3644_v18 = vpop.f32.mrf.mxu3  ;;  %v2708_v30 = vpop.f32.mrf.mxu1 }
 0x2e6   : > { %v3681_v32 = vadd.f32 %v3644_v18, %v3027_v26  ;;  %v2742_v14 = vadd.f32 %v2708_v30, %v6318_v61 }
 0x2e8   : > { %v4079_v13 = vadd.f32 %v4042_v24, %v3681_v32  ;;  %v2993_v27 = vpop.f32.mrf.mxu2 }
 0x2e9   : > { %v3028_v0 = vadd.f32 %v2993_v27, %v2741_v28 }
 0x2ea   : > { %v4115_v44 = vadd.f32 %v6616_v8, %v4079_v13 }
 0x2ec   : > { %v4147_v48 = vmax.f32 %v4115_v44, 0.0  ;;  %v4045_v37 = vpop.f32.mrf.mxu0 }
 0x2ed   : > { %v3647_v6 = vpop.f32.mrf.mxu3 }
 0x2ee   : > { %v5009_v62 = vpack.c.bf16 %v4147_v48, %v4146_v60  ;;  %v3682_v19 = vadd.f32 %v3647_v6, %v3028_v0 }
 0x2f0   : > { %5029 = vst [vmem:[%s6386_s6 + $0x70] sm:$0xff] %v5009_v62   ;;  %v2995_v38 = vpop.f32.mrf.mxu2  ;;  %v4080_v29 = vadd.f32 %v4045_v37, %v3682_v19 }
 0x2f1   : > { %v3029_v54 = vadd.f32 %v2995_v38, %v2742_v14 }
 0x2f2   : > { %v4116_v10 = vadd.f32 %v6616_v8, %v4080_v29 }
 0x2f4   : > { %v4047_v45 = vpop.f32.mrf.mxu0  ;;  %v4148_v61 = vmax.f32 %v4116_v10, 0.0 }
 0x2f5   : > { %v3649_v20 = vpop.f32.mrf.mxu3 }
 0x2f6   : > { %v3683_v43 = vadd.f32 %v3649_v20, %v3029_v54 }
 0x2f8   : > { %v4081_v63 = vadd.f32 %v4047_v45, %v3683_v43 }
 0x2fa   : > { %v4117_v53 = vadd.f32 %v6616_v8, %v4081_v63 }
 0x2fc   : > { %v4149_v12 = vmax.f32 %v4117_v53, 0.0 }
 0x2fe   : > { %v5014_v57 = vpack.c.bf16 %v4149_v12, %v4148_v61 }
 0x300   : > { %5030 = vst [vmem:[%s6386_s6 + $0x78] sm:$0xff] %v5014_v57  }
 0x301   : > { %5155 = shalt.err (!%p5152_p3)
}
 0x302   : > { %s5192_s4 = smov 64   ;;  %s5193_s5 = smov 4  }
 0x303   : > { %5035 = dma.vmem_to_hbm [thread:$0]  (%p5252_p5), %s4228_s19, 2048, %s4230_s20, %s4215_s16, %s5192_s4, %s5192_s4, %s5193_s5  }
 0x304 PF: > { %p5041_p4 = scmp.ge.s32.totalorder %s5190_s15, 2  ;;  %s4244_s6 = sand.u32 1, %s5178_s12  }
 0x305   : > { %s4245_s7 = scalar_lea.sflag [#allocation3], %s4244_s6 }
 0x306   : > { %p5038_p7 = pnand %p5041_p4, %p5256_p6 }
 0x308   : > { %p5039_p8 = pneg %p5038_p7 }
 0x30a   : > { %5173 = dma.done.wait (%p5039_p8), %s4245_s7, 2048  }
 0x30b   : > { %5175 = vsyncadd (%p5039_p8), %s4245_s7, 4294965248  ;;  %p13_p9 = scmp.ge.s32.totalorder %s5239_s18, 4   ;;  %s6689_s12 = smov %s5182_s13 }
 0x30c   : > { %s6690_s13 = smov %s5186_s14  ;;  %s6691_s14 = smov %s5250_s21 }
 0x30d   : > { %s6692_s15 = smov %s5239_s18  ;;  %15 = sbr.rel (!%p13_p9) target bundleno = 3 (0x3), region = 77 }
 0x312   :  { %4251 = vsyncpa [#allocation3], 1 }
 0x313   :  { %4253 = vsyncpa [#allocation3 + $0x1], 1 }

// kernel: tpu_custom_call.1
= control target key start
LH: loop header
LB: loop body
LE: loop exit
PB: predicated region body
PF: predicated region fallthrough
CT: control target
= control target key end

     0   :  { %8 = vsyncpa [#allocation3], 0  ;;  %s6675_s0 = inlined_call_operand.vmem [shape: bf16[2,18,18,4], index: 0, kind: input, shape index: {}]   ;;  %s6676_s1 = inlined_call_operand.vmem [shape: bf16[9,4,128], index: 1, kind: input, shape index: {}]   ;;  %s6677_s2 = inlined_call_operand.vmem [shape: f32[1,128], index: 2, kind: input, shape index: {}]   ;;  %s6678_s3 = inlined_call_operand.hbm [shape: bf16[512,128], index: 3, kind: output, shape index: {}]  }
   0x1   :  { %10 = vsyncpa [#allocation3 + $0x1], 0  ;;  %s5214_s12 = smov 0   ;;  %s5216_s13 = smov 0  }
   0x2   :  { %s5218_s14 = smov 0   ;;  %s5220_s15 = smov 0  }
   0x3 LB: > { %s5235_s16 = sadd.s32 4294967295, %s5190_s15   ;;  %s4292_s17 = sadd.s32 4294967294, %s5190_s15   ;;  %s5190_s15 = sphi %s5220_s15, %s6692_s15   ;;  %s5186_s14 = sphi %s5218_s14, %s6691_s14   ;;  %s5182_s13 = sphi %s5216_s13, %s6690_s13   ;;  %s5178_s12 = sphi %s5214_s12, %s6689_s12  }
   0x4   : > { %s5239_s18 = sadd.s32 1, %s5190_s15   ;;  %s91_s19 = sadd.s32 1, %s5186_s14 }
   0x5   : > { %s88_s20 = ssub.s32 %s5190_s15, %s5239_s18  ;;  %p101_p0 = scmp.ne.s32.totalorder %s5186_s14, %s5182_s13 }
   0x6   : > { %p89_p1 = scmp.eq.s32.totalorder %s88_s20, 0  ;;  %p102_p2 = scmp.eq.s32.totalorder %s5235_s16, 1 }
   0x7   : > { %p107_p3 = scmp.ne.s32.totalorder %s5182_s13, %s5178_s12  ;;  %p108_p4 = scmp.eq.s32.totalorder %s4292_s17, 1 }
   0x8   : > { %s5250_s21 = scalar_select %p89_p1, %s5186_s14, %s91_s19  }
   0x9   : > { %p5252_p5 = por %p102_p2, %p101_p0  ;;  %p5256_p6 = por %p108_p4, %p107_p3 }
   0xa   : > { %p4295_p7 = scmp.ge.s32.totalorder %s5190_s15, 1  ;;  %p140_p8 = scmp.lt.s32.totalorder %s5190_s15, 3 }
   0xc   : > { %p141_p9 = pnand %p4295_p7, %p140_p8 }
   0xe   : > { %144 = sbr.rel (%p141_p9) target bundleno = 772 (0x304), region = 32 }
  0x13   : > { %v4298_v0 = vld [vmem:[%s6676_s1 + $0x2] sm:$0x3]  ;;  %vm706_vm0 = vcmask 1041408   ;;  %p164_p10 = scmp.lt.s32.totalorder %s5235_s16, 1  ;;  %v4411_v2 = vld [vmem:[%s6676_s1 + $0x4] sm:$0x3] }
  0x14   : > { %v708_v1 = vsel %vm706_vm0, %v4298_v0, 0  ;;  %v1281_v3 = vsel %vm706_vm0, %v4411_v2, 0  ;;  %v4460_v4 = vld [vmem:[%s6676_s1 + $0x6] sm:$0x3]  ;;  %v203_v5 = vld [vmem:[%s6676_s1] sm:$0x3] }
  0x15   : > { %5031 = vmatpush.bf16.msra.mxu1 %v708_v1  ;;  %5032 = vmatpush.bf16.msra.mxu2 %v708_v1  ;;  %s165_s28 = scalar_select %p164_p10, %s5235_s16, 1  ;;  %v4589_v6 = vld [vmem:[%s6676_s1 + $0x8] sm:$0x3]  ;;  %v1568_v7 = vsel %vm706_vm0, %v4460_v4, 0  ;;  %v928_v8 = vsel %vm706_vm0, %v203_v5, 0  ;;  %vm657_vm4 = vcmask 31744  }
  0x16   : > { %5033 = vmatpush.bf16.msra.mxu3 %v708_v1  ;;  %717 = vmatpush.bf16.msra.mxu0 %v708_v1  ;;  %v2222_v9 = vsel %vm706_vm0, %v4589_v6, 0  ;;  %vm220_vm1 = vsmask.f32 3328  ;;  %vm221_vm2 = vsmask.f32 7440  ;;  %vm1067_vm5 = vcmask 1042432  }
  0x17   : > { %s5034_s8 = smul.u32 216, %s165_s28  ;;  %vm5299_vm3 = vmor %vm220_vm1, %vm221_vm2  ;;  %vm1068_vm6 = vcmask 1046532   ;;  %s161_s4 = sand.u32 1, %s5182_s13  }
  0x18   : > { %vm5473_vm7 = vmor %vm1067_vm5, %vm1068_vm6  ;;  %s6362_s5 = sshll.u32 %s161_s4, 7  ;;  %s4935_s9 = sshll.u32 %s5235_s16, 7 }
  0x19   : > { %1290 = vmatpush.bf16.msrb.mxu2 %v1281_v3  ;;  %937 = vmatpush.bf16.msrb.mxu1 %v928_v8  ;;  %s5287_s11 = scalar_lea.vmem %s6675_s0, %s5034_s8  ;;  %s6386_s6 = scalar_lea.vmem [#allocation2], %s6362_s5 }
  0x1a   : > { %1577 = vmatpush.bf16.msrb.mxu3 %v1568_v7  ;;  %2231 = vmatpush.bf16.msrb.mxu0 %v2222_v9  ;;  %v179_v10 = vld [vmem:[%s5287_s11 + $0x30] sm:$0xf]  ;;  %v180_v11 = vld [vmem:[%s5287_s11 + $0x34] sm:$0xf]  ;;  %v208_v12 = vld [vmem:[%s5287_s11 + $0x38] sm:$0x1]  ;;  %s4226_s17 = scalar_lea.hbm %s6678_s3, %s4935_s9 }
  0x1b   : > { %v320_v13 = vshrl.u32 %v179_v10, 16  ;;  %v323_v14 = vshll.u32 %v179_v10, 16  ;;  %v329_v15 = vshll.u32 %v180_v11, 16  ;;  %v333_v16 = vshrl.u32 %v180_v11, 16  ;;  %v187_v17 = vld [vmem:[%s5287_s11 + $0x60] sm:$0xf] }
  0x1c   : > { %v339_v18 = vshll.u32 %v208_v12, 16  ;;  %v188_v19 = vld [vmem:[%s5287_s11 + $0x64] sm:$0xf]  ;;  %v212_v20 = vld [vmem:[%s5287_s11 + $0x68] sm:$0x1]  ;;  %v416_v21 = vshrl.u32 %v187_v17, 16 }
  0x1d   : > { %v322_v22 = vrot.slane %v320_v13, 4  ;;  %v325_v23 = vrot.slane %v323_v14, 5  ;;  %v331_v24 = vrot.slane %v329_v15, 5  ;;  %v335_v25 = vrot.slane %v333_v16, 4  ;;  %v195_v26 = vld [vmem:[%s5287_s11 + $0x90] sm:$0xf] }
  0x1e   : > { %v341_v27 = vrot.slane %v339_v18, 5  ;;  %v418_v28 = vrot.slane %v416_v21, 4  ;;  %v419_v29 = vshll.u32 %v187_v17, 16  ;;  %v425_v30 = vshll.u32 %v188_v19, 16  ;;  %v196_v35 = vld [vmem:[%s5287_s11 + $0x94] sm:$0xf] }
  0x1f   : > { %v326_v31 = vor.u32 %v325_v23, %v322_v22  ;;  %v336_v32 = vor.u32 %v335_v25, %v331_v24  ;;  %v429_v33 = vshrl.u32 %v188_v19, 16  ;;  %v435_v34 = vshll.u32 %v212_v20, 16  ;;  %v216_v45 = vld [vmem:[%s5287_s11 + $0x98] sm:$0x1]  ;;  %v171_v61 = vld [vmem:[%s5287_s11] sm:$0xf] }
  0x20   : > { %v421_v37 = vrot.slane %v419_v29, 5  ;;  %v427_v38 = vrot.slane %v425_v30, 5  ;;  %v512_v39 = vshrl.u32 %v195_v26, 16  ;;  %v515_v47 = vshll.u32 %v195_v26, 16  ;;  %v5312_v1 = vld [vmem:[%s5287_s11 + $0x4] sm:$0xf] }
  0x21   : > { %v327_v40 = vrot.slane %v326_v31, 4  ;;  %v337_v41 = vrot.slane %v336_v32, 4  ;;  %v431_v42 = vrot.slane %v429_v33, 4  ;;  %v437_v43 = vrot.slane %v435_v34, 5  ;;  %v5315_v2 = vld [vmem:[%s5287_s11 + $0x8] sm:$0x1] }
  0x22   : > { %v422_v44 = vor.u32 %v421_v37, %v418_v28  ;;  %v514_v46 = vrot.slane %v512_v39, 4  ;;  %v521_v48 = vshll.u32 %v196_v35, 16  ;;  %v525_v52 = vshrl.u32 %v196_v35, 16  ;;  %v181_v19 = vld [vmem:[%s5287_s11 + $0x3c] sm:$0xf]  ;;  %s4227_s19 = sshll.u32 %s6386_s6, 4  ;;  %s4228_s19 = int_to_ptr.vmem [resolvable:$true] %s4227_s19 }
  0x23   : > { %v332_v49 = vsel %vm5299_vm3, %v327_v40, %v331_v24  ;;  %v342_v50 = vsel %vm5299_vm3, %v337_v41, %v341_v27  ;;  %v432_v51 = vor.u32 %v431_v42, %v427_v38  ;;  %v517_v56 = vrot.slane %v515_v47, 5  ;;  %v5327_v20 = vld [vmem:[%s5287_s11 + $0x40] sm:$0xf]  ;;  %v5332_v25 = vld [vmem:[%s5287_s11 + $0x44] sm:$0x1]  ;;  %s4229_s20 = sshll.u32 %s4226_s17, 4  ;;  %s4230_s20 = int_to_ptr.hbm [resolvable:$true] %s4229_s20 }
  0x24   : > { %v617_v53 = vunpack.c.l.b16 %v332_v49  ;;  %v618_v54 = vunpack.c.l.b16 %v342_v50  ;;  %v423_v55 = vrot.slane %v422_v44, 4  ;;  %v523_v58 = vrot.slane %v521_v48, 5  ;;  %v189_v33 = vld [vmem:[%s5287_s11 + $0x6c] sm:$0xf]  ;;  %v213_v47 = vld [vmem:[%s5287_s11 + $0x74] sm:$0x1] }
  0x25   : > { %v433_v57 = vrot.slane %v432_v51, 4  ;;  %v527_v59 = vrot.slane %v525_v52, 4  ;;  %v531_v60 = vshll.u32 %v216_v45, 16  ;;  %v518_v0 = vor.u32 %v517_v56, %v514_v46  ;;  %s4215_s16 = scalar_lea.sflag [#allocation3], %s161_s4  ;;  %s5142_s24 = sshra.s32 %s4230_s20, 4  ;;  %s5143_s24 = int_to_ptr.hbm [resolvable:$true] %s5142_s24 }
  0x26   : > { %v645_v62 = vpack.c.b16 %v618_v54, %v617_v53  ;;  %v428_v63 = vsel %vm5299_vm3, %v423_v55, %v427_v38  ;;  %v224_v9 = vshrl.u32 %v171_v61, 16  ;;  %v227_v10 = vshll.u32 %v171_v61, 16  ;;  %v197_v61 = vld [vmem:[%s5287_s11 + $0x9c] sm:$0xf]  ;;  %s5144_s25 = scalar_lea.hbm %s5143_s24, 128  ;;  %s5148_s28 = scalar_lea.hbm %s6678_s3, 256 }
  0x27   : > { %v438_v3 = vsel %vm5299_vm3, %v433_v57, %v437_v43  ;;  %v625_v4 = vunpack.c.l.b16 %v428_v63  ;;  %v528_v5 = vor.u32 %v527_v59, %v523_v58  ;;  %v533_v6 = vrot.slane %v531_v60, 5  ;;  %v190_v43 = vld [vmem:[%s5287_s11 + $0x70] sm:$0xf]  ;;  %p5145_p11 = scmp.ne.s32.totalorder %s5143_s24, %s5144_s25  ;;  %p5149_p0 = scmp.lt.s32.totalorder %s5143_s24, %s6678_s3 }
  0x28   : > { %4303 = vmatmul.msk.bf16.vlgmr.msra.gmra.mxu1 %vm657_vm4, %v645_v62  ;;  %v626_v7 = vunpack.c.l.b16 %v438_v3  ;;  %v519_v8 = vrot.slane %v518_v0, 4  ;;  %v233_v12 = vshll.u32 %v5312_v1, 16  ;;  %v237_v13 = vshrl.u32 %v5312_v1, 16  ;;  %v198_v3 = vld [vmem:[%s5287_s11 + $0xa0] sm:$0xf]  ;;  %p5150_p1 = scmp.lt.s32.totalorder %s5148_s28, %s5144_s25 }
  0x29   : > { %v529_v11 = vrot.slane %v528_v5, 4  ;;  %v243_v14 = vshll.u32 %v5315_v2, 16  ;;  %v226_v17 = vrot.slane %v224_v9, 4  ;;  %v229_v18 = vrot.slane %v227_v10, 5  ;;  %p5146_p12 = pnand %p5145_p11, %p5252_p5 }
  0x2a   : > { %v649_v15 = vpack.c.b16 %v626_v7, %v625_v4  ;;  %v524_v16 = vsel %vm5299_vm3, %v519_v8, %v523_v58  ;;  %v235_v23 = vrot.slane %v233_v12, 5  ;;  %v239_v24 = vrot.slane %v237_v13, 4  ;;  %v217_v8 = vld [vmem:[%s5287_s11 + $0xa4] sm:$0x1]  ;;  %p5151_p2 = por %p5150_p1, %p5149_p0 }
  0x2b   : > { %v534_v21 = vsel %vm5299_vm3, %v529_v11, %v533_v6  ;;  %v633_v22 = vunpack.c.l.b16 %v524_v16  ;;  %v230_v27 = vor.u32 %v229_v18, %v226_v17  ;;  %v245_v28 = vrot.slane %v243_v14, 5  ;;  %p5147_p13 = pneg %p5146_p12 }
  0x2c   : > { %4307 = vmatmul.msk.bf16.vlgmr.msra.gmra.mxu2 %vm657_vm4, %v649_v15  ;;  %v634_v26 = vunpack.c.l.b16 %v534_v21  ;;  %v240_v29 = vor.u32 %v239_v24, %v235_v23  ;;  %v344_v30 = vshrl.u32 %v181_v19, 16  ;;  %v347_v31 = vshll.u32 %v181_v19, 16 }
  0x2d   : > { %v353_v32 = vshll.u32 %v5327_v20, 16  ;;  %v231_v35 = vrot.slane %v230_v27, 4  ;;  %v357_v37 = vshrl.u32 %v5327_v20, 16  ;;  %v363_v38 = vshll.u32 %v5332_v25, 16  ;;  %p5152_p3 = pnand %p5151_p2, %p5147_p13 }
  0x2e   : > { %v653_v34 = vpack.c.b16 %v634_v26, %v633_v22  ;;  %v241_v39 = vrot.slane %v240_v29, 4  ;;  %v346_v40 = vrot.slane %v344_v30, 4  ;;  %v349_v41 = vrot.slane %v347_v31, 5  ;;  %v173_v22 = vld [vmem:[%s5287_s11 + $0xc] sm:$0xf] }
  0x2f   : > { %v355_v42 = vrot.slane %v353_v32, 5  ;;  %v236_v44 = vsel %vm5299_vm3, %v231_v35, %v235_v23  ;;  %v359_v45 = vrot.slane %v357_v37, 4  ;;  %v365_v46 = vrot.slane %v363_v38, 5  ;;  %v5361_v32 = vld [vmem:[%s5287_s11 + $0x14] sm:$0x1] }
  0x30   : > { %4311 = vmatmul.msk.bf16.vlgmr.msra.gmra.mxu3 %vm657_vm4, %v653_v34  ;;  %v440_v48 = vshrl.u32 %v189_v33, 16  ;;  %v246_v49 = vsel %vm5299_vm3, %v241_v39, %v245_v28  ;;  %v609_v50 = vunpack.c.l.b16 %v236_v44  ;;  %v350_v51 = vor.u32 %v349_v41, %v346_v40  ;;  %v5358_v28 = vld [vmem:[%s5287_s11 + $0x10] sm:$0xf] }
  0x31   : > { %v443_v52 = vshll.u32 %v189_v33, 16  ;;  %v610_v53 = vunpack.c.l.b16 %v246_v49  ;;  %v360_v54 = vor.u32 %v359_v45, %v355_v42  ;;  %v449_v56 = vshll.u32 %v190_v43, 16 }
  0x32   : > { %v442_v55 = vrot.slane %v440_v48, 4  ;;  %v351_v57 = vrot.slane %v350_v51, 4  ;;  %v453_v59 = vshrl.u32 %v190_v43, 16  ;;  %v459_v60 = vshll.u32 %v213_v47, 16  ;;  %v5371_v47 = vld [vmem:[%s5287_s11 + $0x4c] sm:$0xf] }
  0x33   : > { %v445_v58 = vrot.slane %v443_v52, 5  ;;  %v641_v62 = vpack.c.b16 %v610_v53, %v609_v50  ;;  %v361_v63 = vrot.slane %v360_v54, 4  ;;  %v451_v0 = vrot.slane %v449_v56, 5  ;;  %v5376_v56 = vld [vmem:[%s5287_s11 + $0x50] sm:$0x1] }
  0x34   : > { %v356_v4 = vsel %vm5299_vm3, %v351_v57, %v355_v42  ;;  %v455_v6 = vrot.slane %v453_v59, 4  ;;  %v461_v7 = vrot.slane %v459_v60, 5  ;;  %v536_v11 = vshrl.u32 %v197_v61, 16  ;;  %v183_v42 = vld [vmem:[%s5287_s11 + $0x48] sm:$0xf] }
  0x35   : > { %v446_v5 = vor.u32 %v445_v58, %v442_v55  ;;  %4299 = vmatmul.msk.bf16.vlgmr.msra.gmra.mxu0 %vm657_vm4, %v641_v62  ;;  %v366_v9 = vsel %vm5299_vm3, %v361_v63, %v365_v46  ;;  %v619_v10 = vunpack.c.l.b16 %v356_v4  ;;  %v539_v12 = vshll.u32 %v197_v61, 16 }
  0x36   : > { %v620_v13 = vunpack.c.l.b16 %v366_v9  ;;  %v456_v15 = vor.u32 %v455_v6, %v451_v0  ;;  %v545_v16 = vshll.u32 %v198_v3, 16  ;;  %v538_v17 = vrot.slane %v536_v11, 4 }
  0x37   : > { %v447_v14 = vrot.slane %v446_v5, 4  ;;  %v541_v18 = vrot.slane %v539_v12, 5  ;;  %v549_v19 = vshrl.u32 %v198_v3, 16  ;;  %v555_v21 = vshll.u32 %v217_v8, 16  ;;  %v191_v3 = vld [vmem:[%s5287_s11 + $0x78] sm:$0xf] }
  0x38   : > { %v646_v23 = vpack.c.b16 %v620_v13, %v619_v10  ;;  %v457_v26 = vrot.slane %v456_v15, 4  ;;  %v547_v27 = vrot.slane %v545_v16, 5  ;;  %v248_v35 = vshrl.u32 %v173_v22, 16  ;;  %v192_v8 = vld [vmem:[%s5287_s11 + $0x7c] sm:$0xf] }
  0x39   : > { %v452_v24 = vsel %vm5299_vm3, %v447_v14, %v451_v0  ;;  %v542_v30 = vor.u32 %v541_v18, %v538_v17  ;;  %v551_v31 = vrot.slane %v549_v19, 4  ;;  %v557_v34 = vrot.slane %v555_v21, 5  ;;  %v214_v16 = vld [vmem:[%s5287_s11 + $0x80] sm:$0x1] }
  0x3a   : > { %v627_v29 = vunpack.c.l.b16 %v452_v24  ;;  %4304 = vmatmul.msk.bf16.gmra.mxu1 %vm657_vm4, %v646_v23  ;;  %v462_v33 = vsel %vm5299_vm3, %v457_v26, %v461_v7  ;;  %v251_v37 = vshll.u32 %v173_v22, 16  ;;  %v257_v41 = vshll.u32 %v5358_v28, 16 }
  0x3b   : > { %v628_v38 = vunpack.c.l.b16 %v462_v33  ;;  %v543_v39 = vrot.slane %v542_v30, 4  ;;  %v552_v40 = vor.u32 %v551_v31, %v547_v27  ;;  %v250_v43 = vrot.slane %v248_v35, 4 }
  0x3c   : > { %v253_v44 = vrot.slane %v251_v37, 5  ;;  %v261_v45 = vshrl.u32 %v5358_v28, 16  ;;  %v267_v46 = vshll.u32 %v5361_v32, 16  ;;  %v259_v51 = vrot.slane %v257_v41, 5 }
  0x3d   : > { %v650_v48 = vpack.c.b16 %v628_v38, %v627_v29  ;;  %v548_v49 = vsel %vm5299_vm3, %v543_v39, %v547_v27  ;;  %v553_v50 = vrot.slane %v552_v40, 4  ;;  %v368_v58 = vshrl.u32 %v183_v42, 16  ;;  %v200_v39 = vld [vmem:[%s5287_s11 + $0xac] sm:$0xf]  ;;  %v218_v40 = vld [vmem:[%s5287_s11 + $0xb0] sm:$0x1] }
  0x3e   : > { %v635_v52 = vunpack.c.l.b16 %v548_v49  ;;  %v254_v53 = vor.u32 %v253_v44, %v250_v43  ;;  %v263_v54 = vrot.slane %v261_v45, 4  ;;  %v269_v55 = vrot.slane %v267_v46, 5 }
  0x3f   : > { %4308 = vmatmul.msk.bf16.gmra.mxu2 %vm657_vm4, %v650_v48  ;;  %v558_v57 = vsel %vm5299_vm3, %v553_v50, %v557_v34  ;;  %v371_v59 = vshll.u32 %v183_v42, 16  ;;  %v377_v60 = vshll.u32 %v5371_v47, 16  ;;  %v381_v0 = vshrl.u32 %v5371_v47, 16  ;;  %v199_v34 = vld [vmem:[%s5287_s11 + $0xa8] sm:$0xf] }
  0x40   : > { %v636_v61 = vunpack.c.l.b16 %v558_v57  ;;  %v255_v62 = vrot.slane %v254_v53, 4  ;;  %v264_v63 = vor.u32 %v263_v54, %v259_v51  ;;  %v370_v4 = vrot.slane %v368_v58, 4 }
  0x41   : > { %v373_v5 = vrot.slane %v371_v59, 5  ;;  %v379_v6 = vrot.slane %v377_v60, 5  ;;  %v387_v7 = vshll.u32 %v5376_v56, 16  ;;  %v383_v12 = vrot.slane %v381_v0, 4  ;;  %v175_v59 = vld [vmem:[%s5287_s11 + $0x18] sm:$0xf] }
  0x42   : > { %v654_v9 = vpack.c.b16 %v636_v61, %v635_v52  ;;  %v260_v10 = vsel %vm5299_vm3, %v255_v62, %v259_v51  ;;  %v265_v11 = vrot.slane %v264_v63, 4  ;;  %v464_v17 = vshrl.u32 %v191_v3, 16  ;;  %v5404_v63 = vld [vmem:[%s5287_s11 + $0x1c] sm:$0xf]  ;;  %v5407_v0 = vld [vmem:[%s5287_s11 + $0x20] sm:$0x1] }
  0x43   : > { %v611_v13 = vunpack.c.l.b16 %v260_v10  ;;  %v374_v14 = vor.u32 %v373_v5, %v370_v4  ;;  %v389_v15 = vrot.slane %v387_v7, 5  ;;  %v384_v19 = vor.u32 %v383_v12, %v379_v6 }
  0x44   : > { %4312 = vmatmul.msk.bf16.gmra.mxu3 %vm657_vm4, %v654_v9  ;;  %v270_v18 = vsel %vm5299_vm3, %v265_v11, %v269_v55  ;;  %v467_v21 = vshll.u32 %v191_v3, 16  ;;  %v473_v22 = vshll.u32 %v192_v8, 16  ;;  %v466_v26 = vrot.slane %v464_v17, 4 }
  0x45   : > { %v612_v23 = vunpack.c.l.b16 %v270_v18  ;;  %v375_v24 = vrot.slane %v374_v14, 4  ;;  %v477_v27 = vshrl.u32 %v192_v8, 16  ;;  %v385_v29 = vrot.slane %v384_v19, 4 }
  0x46   : > { %v469_v30 = vrot.slane %v467_v21, 5  ;;  %v475_v31 = vrot.slane %v473_v22, 5  ;;  %v483_v33 = vshll.u32 %v214_v16, 16  ;;  %v560_v48 = vshrl.u32 %v199_v34, 16  ;;  %v5417_v21 = vld [vmem:[%s5287_s11 + $0x58] sm:$0xf] }
  0x47   : > { %v642_v35 = vpack.c.b16 %v612_v23, %v611_v13  ;;  %v380_v37 = vsel %vm5299_vm3, %v375_v24, %v379_v6  ;;  %v479_v38 = vrot.slane %v477_v27, 4  ;;  %v390_v41 = vsel %vm5299_vm3, %v385_v29, %v389_v15  ;;  %v185_v15 = vld [vmem:[%s5287_s11 + $0x54] sm:$0xf]  ;;  %v5422_v27 = vld [vmem:[%s5287_s11 + $0x5c] sm:$0x1] }
  0x48   : > { %v621_v42 = vunpack.c.l.b16 %v380_v37  ;;  %v470_v43 = vor.u32 %v469_v30, %v466_v26  ;;  %v485_v44 = vrot.slane %v483_v33, 5  ;;  %v622_v45 = vunpack.c.l.b16 %v390_v41 }
  0x49   : > { %4300 = vmatmul.msk.bf16.gmra.mxu0 %vm657_vm4, %v642_v35  ;;  %v480_v46 = vor.u32 %v479_v38, %v475_v31  ;;  %v563_v49 = vshll.u32 %v199_v34, 16  ;;  %v569_v51 = vshll.u32 %v200_v39, 16  ;;  %v573_v52 = vshrl.u32 %v200_v39, 16  ;;  %v193_v39 = vld [vmem:[%s5287_s11 + $0x84] sm:$0xf] }
  0x4a   : > { %v471_v50 = vrot.slane %v470_v43, 4  ;;  %v579_v53 = vshll.u32 %v218_v40, 16  ;;  %v647_v54 = vpack.c.b16 %v622_v45, %v621_v42  ;;  %v562_v57 = vrot.slane %v560_v48, 4 }
  0x4b   : > { %v481_v55 = vrot.slane %v480_v46, 4  ;;  %v565_v58 = vrot.slane %v563_v49, 5  ;;  %v571_v61 = vrot.slane %v569_v51, 5  ;;  %v575_v62 = vrot.slane %v573_v52, 4  ;;  %v194_v49 = vld [vmem:[%s5287_s11 + $0x88] sm:$0xf] }
  0x4c   : > { %v476_v60 = vsel %vm5299_vm3, %v471_v50, %v475_v31  ;;  %4305 = vmatmul.msk.bf16.gmra.mxu1 %vm657_vm4, %v647_v54  ;;  %v581_v6 = vrot.slane %v579_v53, 5  ;;  %v272_v9 = vshrl.u32 %v175_v59, 16  ;;  %v275_v10 = vshll.u32 %v175_v59, 16  ;;  %v215_v53 = vld [vmem:[%s5287_s11 + $0x8c] sm:$0x1] }
  0x4d   : > { %v486_v3 = vsel %vm5299_vm3, %v481_v55, %v485_v44  ;;  %v629_v4 = vunpack.c.l.b16 %v476_v60  ;;  %v566_v5 = vor.u32 %v565_v58, %v562_v57  ;;  %v576_v8 = vor.u32 %v575_v62, %v571_v61 }
  0x4e   : > { %v630_v7 = vunpack.c.l.b16 %v486_v3  ;;  %v281_v12 = vshll.u32 %v5404_v63, 16  ;;  %v285_v13 = vshrl.u32 %v5404_v63, 16  ;;  %v291_v14 = vshll.u32 %v5407_v0, 16 }
  0x4f   : > { %v567_v11 = vrot.slane %v566_v5, 4  ;;  %v577_v17 = vrot.slane %v576_v8, 4  ;;  %v274_v18 = vrot.slane %v272_v9, 4  ;;  %v277_v19 = vrot.slane %v275_v10, 5  ;;  %v201_v8 = vld [vmem:[%s5287_s11 + $0xb4] sm:$0xf] }
  0x50   : > { %v651_v16 = vpack.c.b16 %v630_v7, %v629_v4  ;;  %v283_v23 = vrot.slane %v281_v12, 5  ;;  %v287_v24 = vrot.slane %v285_v13, 4  ;;  %v293_v26 = vrot.slane %v291_v14, 5  ;;  %v202_v12 = vld [vmem:[%s5287_s11 + $0xb8] sm:$0xf] }
  0x51   : > { %v572_v22 = vsel %vm5299_vm3, %v567_v11, %v571_v61  ;;  %v582_v29 = vsel %vm5299_vm3, %v577_v17, %v581_v6  ;;  %v278_v31 = vor.u32 %v277_v19, %v274_v18  ;;  %v392_v33 = vshrl.u32 %v185_v15, 16  ;;  %v219_v17 = vld [vmem:[%s5287_s11 + $0xbc] sm:$0x1] }
  0x52   : > { %4309 = vmatmul.msk.bf16.gmra.mxu2 %vm657_vm4, %v651_v16  ;;  %v637_v30 = vunpack.c.l.b16 %v572_v22  ;;  %v638_v34 = vunpack.c.l.b16 %v582_v29  ;;  %v288_v35 = vor.u32 %v287_v24, %v283_v23  ;;  %v395_v37 = vshll.u32 %v185_v15, 16 }
  0x53   : > { %v401_v38 = vshll.u32 %v5417_v21, 16  ;;  %v279_v40 = vrot.slane %v278_v31, 4  ;;  %v394_v41 = vrot.slane %v392_v33, 4  ;;  %v405_v42 = vshrl.u32 %v5417_v21, 16 }
  0x54   : > { %v411_v43 = vshll.u32 %v5422_v27, 16  ;;  %v655_v44 = vpack.c.b16 %v638_v34, %v637_v30  ;;  %v289_v45 = vrot.slane %v288_v35, 4  ;;  %v397_v46 = vrot.slane %v395_v37, 5  ;;  %v177_v37 = vld [vmem:[%s5287_s11 + $0x24] sm:$0xf] }
  0x55   : > { %v403_v48 = vrot.slane %v401_v38, 5  ;;  %v284_v50 = vsel %vm5299_vm3, %v279_v40, %v283_v23  ;;  %v407_v51 = vrot.slane %v405_v42, 4  ;;  %v488_v54 = vshrl.u32 %v193_v39, 16  ;;  %v5450_v42 = vld [vmem:[%s5287_s11 + $0x28] sm:$0xf] }
  0x56   : > { %v413_v52 = vrot.slane %v411_v43, 5  ;;  %4313 = vmatmul.msk.bf16.gmra.mxu3 %vm657_vm4, %v655_v44  ;;  %v294_v55 = vsel %vm5299_vm3, %v289_v45, %v293_v26  ;;  %v613_v57 = vunpack.c.l.b16 %v284_v50  ;;  %v398_v58 = vor.u32 %v397_v46, %v394_v41 }
  0x57   : > { %v491_v59 = vshll.u32 %v193_v39, 16  ;;  %v614_v60 = vunpack.c.l.b16 %v294_v55  ;;  %v408_v61 = vor.u32 %v407_v51, %v403_v48  ;;  %v490_v62 = vrot.slane %v488_v54, 4 }
  0x58   : > { %v497_v3 = vshll.u32 %v194_v49, 16  ;;  %v399_v4 = vrot.slane %v398_v58, 4  ;;  %v501_v6 = vshrl.u32 %v194_v49, 16  ;;  %v507_v7 = vshll.u32 %v215_v53, 16 }
  0x59   : > { %v493_v5 = vrot.slane %v491_v59, 5  ;;  %v643_v9 = vpack.c.b16 %v614_v60, %v613_v57  ;;  %v409_v10 = vrot.slane %v408_v61, 4  ;;  %v584_v22 = vshrl.u32 %v201_v8, 16  ;;  %v1019_v61 = vld [vmem:[%s5287_s11] sm:$0xe] }
  0x5a   : > { %v499_v11 = vrot.slane %v497_v3, 5  ;;  %v404_v13 = vsel %vm5299_vm3, %v399_v4, %v403_v48  ;;  %v503_v15 = vrot.slane %v501_v6, 4  ;;  %v509_v16 = vrot.slane %v507_v7, 5  ;;  %v5454_v48 = vld [vmem:[%s5287_s11 + $0x2c] sm:$0x1] }
  0x5b   : > { %v494_v14 = vor.u32 %v493_v5, %v490_v62  ;;  %4301 = vmatmul.msk.bf16.gmra.mxu0 %vm657_vm4, %v643_v9  ;;  %v414_v18 = vsel %vm5299_vm3, %v409_v10, %v413_v52  ;;  %v623_v19 = vunpack.c.l.b16 %v404_v13  ;;  %v587_v23 = vshll.u32 %v201_v8, 16  ;;  %v4541_v6 = vld [vmem:[%s5287_s11 + $0xc] sm:$0xf] }
  0x5c   : > { %v624_v24 = vunpack.c.l.b16 %v414_v18  ;;  %v504_v29 = vor.u32 %v503_v15, %v499_v11  ;;  %v593_v30 = vshll.u32 %v202_v12, 16  ;;  %v586_v31 = vrot.slane %v584_v22, 4 }
  0x5d   : > { %v495_v26 = vrot.slane %v494_v14, 4  ;;  %v589_v33 = vrot.slane %v587_v23, 5  ;;  %v597_v34 = vshrl.u32 %v202_v12, 16  ;;  %v603_v35 = vshll.u32 %v219_v17, 16  ;;  %v4542_v12 = vld [vmem:[%s5287_s11 + $0x10] sm:$0xf] }
  0x5e   : > { %v648_v38 = vpack.c.b16 %v624_v24, %v623_v19  ;;  %v505_v40 = vrot.slane %v504_v29, 4  ;;  %v595_v41 = vrot.slane %v593_v30, 5  ;;  %v1075_v43 = vrot.slane %v5315_v2, 5 }
  0x5f   : > { %v500_v39 = vsel %vm5299_vm3, %v495_v26, %v499_v11  ;;  %v590_v45 = vor.u32 %v589_v33, %v586_v31  ;;  %v599_v46 = vrot.slane %v597_v34, 4  ;;  %v605_v50 = vrot.slane %v603_v35, 5  ;;  %v4687_v11 = vld [vmem:[%s6676_s1 + $0xc] sm:$0x3] }
  0x60   : > { %v631_v44 = vunpack.c.l.b16 %v500_v39  ;;  %4306 = vmatmul.msk.bf16.gmra.mxu1 %vm657_vm4, %v648_v38  ;;  %v510_v49 = vsel %vm5299_vm3, %v505_v40, %v509_v16  ;;  %v296_v51 = vshrl.u32 %v177_v37, 16  ;;  %v299_v52 = vshll.u32 %v177_v37, 16  ;;  %v4543_v38 = vld [vmem:[%s5287_s11 + $0x14] sm:$0x1] }
  0x61   : > { %v632_v53 = vunpack.c.l.b16 %v510_v49  ;;  %v591_v54 = vrot.slane %v590_v45, 4  ;;  %v600_v55 = vor.u32 %v599_v46, %v595_v41  ;;  %v305_v2 = vshll.u32 %v5450_v42, 16  ;;  %v4816_v45 = vld [vmem:[%s6676_s1 + $0xe] sm:$0x3] }
  0x62   : > { %v298_v57 = vrot.slane %v296_v51, 4  ;;  %v301_v58 = vrot.slane %v299_v52, 5  ;;  %v309_v59 = vshrl.u32 %v5450_v42, 16  ;;  %v315_v60 = vshll.u32 %v5454_v48, 16  ;;  %v4887_v51 = vld [vmem:[%s5287_s11] sm:$0xff] }
  0x63   : > { %v652_v62 = vpack.c.b16 %v632_v53, %v631_v44  ;;  %v596_v3 = vsel %vm5299_vm3, %v591_v54, %v595_v41  ;;  %v601_v4 = vrot.slane %v600_v55, 4  ;;  %v307_v5 = vrot.slane %v305_v2, 5  ;;  %v4865_v2 = vld [vmem:[%s6676_s1 + $0x10] sm:$0x3] }
  0x64   : > { %v639_v7 = vunpack.c.l.b16 %v596_v3  ;;  %v302_v8 = vor.u32 %v301_v58, %v298_v57  ;;  %v311_v9 = vrot.slane %v309_v59, 4  ;;  %v317_v10 = vrot.slane %v315_v60, 5 }
  0x65   : > { %4310 = vmatmul.msk.bf16.gmra.mxu2 %vm657_vm4, %v652_v62  ;;  %v606_v13 = vsel %vm5299_vm3, %v601_v4, %v605_v50  ;;  %v4395_v14 = vrot.slane %v1019_v61, 9  ;;  %v1072_v19 = vrot.slane %v5312_v1, 5  ;;  %v2907_v22 = vsel %vm706_vm0, %v4687_v11, 0  ;;  %v4638_v50 = vld [vmem:[%s6676_s1 + $0xa] sm:$0x3] }
  0x66   : > { %v640_v15 = vunpack.c.l.b16 %v606_v13  ;;  %v303_v16 = vrot.slane %v302_v8, 4  ;;  %v312_v17 = vor.u32 %v311_v9, %v307_v5  ;;  %v1740_v23 = vshrl.u32 %v4541_v6, 16  ;;  %2916 = vmatpush.bf16.msra.mxu2 %v2907_v22  ;;  %v1020_v8 = vld [vmem:[%s5287_s11 + $0xc] sm:$0xe] }
  0x67   : > { %v1743_v24 = vshll.u32 %v4541_v6, 16  ;;  %v1749_v26 = vshll.u32 %v4542_v12, 16  ;;  %v1073_v33 = vsel %vm5473_vm7, %v4395_v14, %v1072_v19  ;;  %v1074_v35 = vrot.slane %v1072_v19, 4  ;;  %v4545_v6 = vld [vmem:[%s5287_s11 + $0x1c] sm:$0xf] }
  0x68   : > { %v656_v29 = vpack.c.b16 %v640_v15, %v639_v7  ;;  %v308_v30 = vsel %vm5299_vm3, %v303_v16, %v307_v5  ;;  %v313_v31 = vrot.slane %v312_v17, 4  ;;  %v1184_v37 = vunpack.c.l.b16 %v1073_v33  ;;  %v4544_v5 = vld [vmem:[%s5287_s11 + $0x18] sm:$0xf]  ;;  %v4903_v15 = vld [vmem:[%s5287_s11 + $0xc] sm:$0xff] }
  0x69   : > { %v615_v34 = vunpack.c.l.b16 %v308_v30  ;;  %v1742_v1 = vrot.slane %v1740_v23, 4  ;;  %v1745_v40 = vrot.slane %v1743_v24, 5  ;;  %v1751_v41 = vrot.slane %v1749_v26, 5  ;;  %v4546_v30 = vld [vmem:[%s5287_s11 + $0x20] sm:$0x1] }
  0x6a   : > { %4314 = vmatmul.msk.bf16.gmra.mxu3 %vm657_vm4, %v656_v29  ;;  %v318_v39 = vsel %vm5299_vm3, %v313_v31, %v317_v10  ;;  %v1753_v44 = vshrl.u32 %v4542_v12, 16  ;;  %v1076_v49 = vsel %vm5473_vm7, %v1074_v35, %v1075_v43  ;;  %v1759_v55 = vshll.u32 %v4543_v38, 16  ;;  %v4888_v35 = vld [vmem:[%s5287_s11 + $0xc] sm:$0xff] }
  0x6b   : > { %v616_v46 = vunpack.c.l.b16 %v318_v39  ;;  %v1185_v52 = vunpack.c.l.b16 %v1076_v49  ;;  %v1746_v53 = vor.u32 %v1745_v40, %v1742_v1  ;;  %v3561_v58 = vsel %vm706_vm0, %v4816_v45, 0 }
  0x6c   : > { %v1755_v54 = vrot.slane %v1753_v44, 4  ;;  %3570 = vmatpush.bf16.msra.mxu3 %v3561_v58  ;;  %v2620_v60 = vsel %vm706_vm0, %v4638_v50, 0  ;;  %v3959_v61 = vsel %vm706_vm0, %v4865_v2, 0  ;;  %v1761_v4 = vrot.slane %v1759_v55, 5  ;;  %v1021_v50 = vld [vmem:[%s5287_s11 + $0x18] sm:$0xe] }
  0x6d   : > { %v644_v57 = vpack.c.b16 %v616_v46, %v615_v34  ;;  %v1216_v43 = vpack.c.b16 %v1185_v52, %v1184_v37  ;;  %2629 = vmatpush.bf16.msra.mxu1 %v2620_v60  ;;  %v1747_v62 = vrot.slane %v1746_v53, 4  ;;  %3968 = vmatpush.bf16.msra.mxu0 %v3959_v61  ;;  %v1079_v7 = vrot.slane %v5358_v28, 5  ;;  %v4548_v46 = vld [vmem:[%s5287_s11 + $0x28] sm:$0xf] }
  0x6e   : > { %v1756_v59 = vor.u32 %v1755_v54, %v1751_v41  ;;  %v1764_v9 = vshrl.u32 %v4544_v5, 16  ;;  %v1767_v10 = vshll.u32 %v4544_v5, 16  ;;  %v1773_v13 = vshll.u32 %v4545_v6, 16 }
  0x6f   : > { %4302 = vmatmul.msk.bf16.gmra.mxu0 %vm657_vm4, %v644_v57  ;;  %v1752_v11 = vsel %vm5299_vm3, %v1747_v62, %v1751_v41  ;;  %v1777_v14 = vshrl.u32 %v4545_v6, 16  ;;  %v4396_v16 = vrot.slane %v1020_v8, 9  ;;  %v1081_v17 = vrot.slane %v1079_v7, 4  ;;  %v4547_v41 = vld [vmem:[%s5287_s11 + $0x24] sm:$0xf] }
  0x70   : > { %4379 = vmatmul.msk.bf16.vlgmr.msrb.gmra.mxu1 %vm657_vm4, %v4887_v51  ;;  %v1757_v3 = vrot.slane %v1756_v59, 4  ;;  %v1082_v28 = vrot.slane %v5361_v32, 5  ;;  %v2125_v19 = vunpack.c.l.b16 %v1752_v11  ;;  %v1766_v23 = vrot.slane %v1764_v9, 4  ;;  %v4549_v6 = vld [vmem:[%s5287_s11 + $0x2c] sm:$0x1] }
  0x71   : > { %v1769_v24 = vrot.slane %v1767_v10, 5  ;;  %v1775_v26 = vrot.slane %v1773_v13, 5  ;;  %v1779_v29 = vrot.slane %v1777_v14, 4  ;;  %v1080_v31 = vsel %vm5473_vm7, %v4396_v16, %v1079_v7 }
  0x72   : > { %v1762_v12 = vsel %vm5299_vm3, %v1757_v3, %v1761_v4  ;;  %v1083_v33 = vsel %vm5473_vm7, %v1081_v17, %v1082_v28  ;;  %v1783_v38 = vshll.u32 %v4546_v30, 16  ;;  %v1186_v1 = vunpack.c.l.b16 %v1080_v31 }
  0x73   : > { %v2126_v22 = vunpack.c.l.b16 %v1762_v12  ;;  %v1770_v32 = vor.u32 %v1769_v24, %v1766_v23  ;;  %v1780_v37 = vor.u32 %v1779_v29, %v1775_v26  ;;  %v1187_v39 = vunpack.c.l.b16 %v1083_v33  ;;  %v4889_v12 = vld [vmem:[%s5287_s11 + $0x18] sm:$0xff]  ;;  %v1022_v29 = vld [vmem:[%s5287_s11 + $0x24] sm:$0xe] }
  0x74   : > { %v1785_v45 = vrot.slane %v1783_v38, 5  ;;  %v1086_v51 = vrot.slane %v5404_v63, 5  ;;  %v1788_v52 = vshrl.u32 %v4547_v41, 16  ;;  %v1791_v54 = vshll.u32 %v4547_v41, 16 }
  0x75   : > { %4412 = vmatmul.msk.bf16.vlgmr.msrb.gmra.mxu2 %vm657_vm4, %v1216_v43  ;;  %v2157_v34 = vpack.c.b16 %v2126_v22, %v2125_v19  ;;  %v1771_v40 = vrot.slane %v1770_v32, 4  ;;  %v1781_v44 = vrot.slane %v1780_v37, 4  ;;  %v1217_v49 = vpack.c.b16 %v1187_v39, %v1186_v1  ;;  %v4904_v43 = vld [vmem:[%s5287_s11 + $0x18] sm:$0xff]  ;;  %v4550_v19 = vld [vmem:[%s5287_s11 + $0x30] sm:$0xf]  ;;  %v4905_v32 = vld [vmem:[%s5287_s11 + $0x24] sm:$0xff] }
  0x76   : > { %v1797_v55 = vshll.u32 %v4548_v46, 16  ;;  %v1801_v2 = vshrl.u32 %v4548_v46, 16  ;;  %v4397_v58 = vrot.slane %v1021_v50, 9  ;;  %v1088_v60 = vrot.slane %v1086_v51, 4  ;;  %v4551_v22 = vld [vmem:[%s5287_s11 + $0x34] sm:$0xf] }
  0x77   : > { %v1776_v53 = vsel %vm5299_vm3, %v1771_v40, %v1775_v26  ;;  %v1786_v57 = vsel %vm5299_vm3, %v1781_v44, %v1785_v45  ;;  %v1089_v63 = vrot.slane %v5407_v0, 5  ;;  %v1790_v61 = vrot.slane %v1788_v52, 4  ;;  %v4552_v45 = vld [vmem:[%s5287_s11 + $0x38] sm:$0x1] }
  0x78   : > { %v2127_v59 = vunpack.c.l.b16 %v1776_v53  ;;  %v2128_v62 = vunpack.c.l.b16 %v1786_v57  ;;  %v1793_v3 = vrot.slane %v1791_v54, 5  ;;  %v1799_v4 = vrot.slane %v1797_v55, 5  ;;  %v4554_v57 = vld [vmem:[%s5287_s11 + $0x40] sm:$0xf] }
  0x79   : > { %v1803_v5 = vrot.slane %v1801_v2, 4  ;;  %v1087_v7 = vsel %vm5473_vm7, %v4397_v58, %v1086_v51  ;;  %v1090_v8 = vsel %vm5473_vm7, %v1088_v60, %v1089_v63  ;;  %v1807_v0 = vshll.u32 %v4549_v6, 16  ;;  %v4553_v2 = vld [vmem:[%s5287_s11 + $0x3c] sm:$0xf]  ;;  %v5077_v63 = vld [vmem:[%s5287_s11 + $0x34] sm:$0xf] }
  0x7a   : > { %4525 = vmatmul.msk.bf16.vlgmr.msrb.gmra.mxu3 %vm657_vm4, %v4903_v15  ;;  %v2158_v9 = vpack.c.b16 %v2128_v62, %v2127_v59  ;;  %v1794_v10 = vor.u32 %v1793_v3, %v1790_v61  ;;  %v1188_v13 = vunpack.c.l.b16 %v1087_v7  ;;  %v1189_v14 = vunpack.c.l.b16 %v1090_v8  ;;  %v1023_v62 = vld [vmem:[%s5287_s11 + $0x30] sm:$0xe] }
  0x7b   : > { %v1804_v11 = vor.u32 %v1803_v5, %v1799_v4  ;;  %v1809_v17 = vrot.slane %v1807_v0, 5  ;;  %v1093_v23 = vrot.slane %v5450_v42, 5  ;;  %v1812_v30 = vshrl.u32 %v4550_v19, 16  ;;  %v5078_v0 = vld [vmem:[%s5287_s11 + $0x38] sm:$0x1] }
  0x7c   : > { %v1795_v15 = vrot.slane %v1794_v10, 4  ;;  %v1218_v28 = vpack.c.b16 %v1189_v14, %v1188_v13  ;;  %v1815_v31 = vshll.u32 %v4550_v19, 16  ;;  %v1821_v33 = vshll.u32 %v4551_v22, 16  ;;  %v4906_v13 = vld [vmem:[%s5287_s11 + $0x30] sm:$0xff] }
  0x7d   : > { %v1805_v16 = vrot.slane %v1804_v11, 4  ;;  %v1095_v37 = vrot.slane %v1093_v23, 4  ;;  %v1096_v42 = vrot.slane %v5454_v48, 5  ;;  %v1814_v39 = vrot.slane %v1812_v30, 4  ;;  %v4890_v48 = vld [vmem:[%s5287_s11 + $0x24] sm:$0xff] }
  0x7e   : > { %v1800_v24 = vsel %vm5299_vm3, %v1795_v15, %v1799_v4  ;;  %v1817_v40 = vrot.slane %v1815_v31, 5  ;;  %v1823_v41 = vrot.slane %v1821_v33, 5  ;;  %v1831_v53 = vshll.u32 %v4552_v45, 16  ;;  %v4891_v33 = vld [vmem:[%s5287_s11 + $0x30] sm:$0xff] }
  0x7f   : > { %4590 = vmatmul.msk.bf16.vlgmr.msrb.gmra.mxu0 %vm657_vm4, %v2157_v34  ;;  %v1810_v26 = vsel %vm5299_vm3, %v1805_v16, %v1809_v17  ;;  %v1825_v34 = vshrl.u32 %v4551_v22, 16  ;;  %v2129_v38 = vunpack.c.l.b16 %v1800_v24  ;;  %v1100_v61 = vrot.slane %v5077_v63, 5  ;;  %v4555_v22 = vld [vmem:[%s5287_s11 + $0x44] sm:$0x1] }
  0x80   : > { %4380 = vmatmul.msk.bf16.gmra.mxu1 %vm657_vm4, %v4888_v35  ;;  %v4398_v35 = vrot.slane %v1022_v29, 9  ;;  %v2130_v1 = vunpack.c.l.b16 %v1810_v26  ;;  %v1818_v51 = vor.u32 %v1817_v40, %v1814_v39  ;;  %v1833_v59 = vrot.slane %v1831_v53, 5  ;;  %v4556_v39 = vld [vmem:[%s5287_s11 + $0x48] sm:$0xf]  ;;  %v4557_v40 = vld [vmem:[%s5287_s11 + $0x4c] sm:$0xf] }
  0x81   : > { %v1827_v44 = vrot.slane %v1825_v34, 4  ;;  %v1836_v3 = vshrl.u32 %v4553_v2, 16  ;;  %v1839_v4 = vshll.u32 %v4553_v2, 16  ;;  %v1845_v5 = vshll.u32 %v4554_v57, 16  ;;  %v4907_v2 = vld [vmem:[%s5287_s11 + $0x3c] sm:$0xff] }
  0x82   : > { %v1094_v46 = vsel %vm5473_vm7, %v4398_v35, %v1093_v23  ;;  %v2159_v50 = vpack.c.b16 %v2130_v1, %v2129_v38  ;;  %v1819_v58 = vrot.slane %v1818_v51, 4  ;;  %v1849_v6 = vshrl.u32 %v4554_v57, 16 }
  0x83   : > { %v1828_v52 = vor.u32 %v1827_v44, %v1823_v41  ;;  %v1190_v54 = vunpack.c.l.b16 %v1094_v46  ;;  %v4399_v10 = vrot.slane %v1023_v62, 9  ;;  %v1102_v11 = vrot.slane %v1100_v61, 4 }
  0x84   : > { %v1824_v8 = vsel %vm5299_vm3, %v1819_v58, %v1823_v41  ;;  %v1838_v14 = vrot.slane %v1836_v3, 4  ;;  %v1841_v15 = vrot.slane %v1839_v4, 5  ;;  %v1847_v16 = vrot.slane %v1845_v5, 5  ;;  %v4558_v4 = vld [vmem:[%s5287_s11 + $0x50] sm:$0x1] }
  0x85   : > { %4413 = vmatmul.msk.bf16.gmra.mxu2 %vm657_vm4, %v1217_v49  ;;  %v1097_v49 = vsel %vm5473_vm7, %v1095_v37, %v1096_v42  ;;  %v1851_v17 = vrot.slane %v1849_v6, 4  ;;  %v1101_v23 = vsel %vm5473_vm7, %v4399_v10, %v1100_v61  ;;  %v1855_v30 = vshll.u32 %v4555_v22, 16 }
  0x86   : > { %v1191_v55 = vunpack.c.l.b16 %v1097_v49  ;;  %v1842_v26 = vor.u32 %v1841_v15, %v1838_v14  ;;  %v1860_v51 = vshrl.u32 %v4556_v39, 16  ;;  %v1869_v53 = vshll.u32 %v4557_v40, 16 }
  0x87   : > { %v1852_v29 = vor.u32 %v1851_v17, %v1847_v16  ;;  %v1857_v1 = vrot.slane %v1855_v30, 5 }
  0x88   : > { %v1219_v60 = vpack.c.b16 %v1191_v55, %v1190_v54  ;;  %v1843_v42 = vrot.slane %v1842_v26, 4  ;;  %v1873_v54 = vshrl.u32 %v4557_v40, 16  ;;  %v1871_v62 = vrot.slane %v1869_v53, 5 }
  0x89   : > { %v1853_v38 = vrot.slane %v1852_v29, 4  ;;  %v1114_v26 = vrot.slane %v5371_v47, 5 }
  0x8a   : > { %4526 = vmatmul.msk.bf16.gmra.mxu3 %vm657_vm4, %v4904_v43  ;;  %v1829_v43 = vrot.slane %v1828_v52, 4  ;;  %v1848_v45 = vsel %vm5299_vm3, %v1843_v42, %v1847_v16  ;;  %v1863_v52 = vshll.u32 %v4556_v39, 16  ;;  %v1875_v3 = vrot.slane %v1873_v54, 4  ;;  %v4561_v54 = vld [vmem:[%s5287_s11 + $0x5c] sm:$0x1] }
  0x8b   : > { %v1858_v46 = vsel %vm5299_vm3, %v1853_v38, %v1857_v1  ;;  %v2133_v55 = vunpack.c.l.b16 %v1848_v45  ;;  %v4908_v1 = vld [vmem:[%s5287_s11 + $0x48] sm:$0xff]  ;;  %v1116_v40 = vrot.slane %v1114_v26, 4 }
  0x8c   : > { %v2134_v57 = vunpack.c.l.b16 %v1858_v46  ;;  %v1865_v61 = vrot.slane %v1863_v52, 5  ;;  %v1876_v10 = vor.u32 %v1875_v3, %v1871_v62 }
  0x8e   : > { %v1877_v16 = vrot.slane %v1876_v10, 4 }
  0x8f   : > { %4591 = vmatmul.msk.bf16.gmra.mxu0 %vm657_vm4, %v2158_v9  ;;  %v1834_v9 = vsel %vm5299_vm3, %v1829_v43, %v1833_v59 }
  0x90   : > { %4381 = vmatmul.msk.bf16.gmra.mxu1 %vm657_vm4, %v4889_v12  ;;  %v1103_v12 = vrot.slane %v5078_v0, 5  ;;  %v2132_v19 = vunpack.c.l.b16 %v1834_v9 }
  0x92   : > { %v1104_v24 = vsel %vm5473_vm7, %v1102_v11, %v1103_v12  ;;  %v1879_v11 = vshll.u32 %v4558_v4, 16  ;;  %v4892_v12 = vld [vmem:[%s5287_s11 + $0x3c] sm:$0xff] }
  0x93   : > { %v1193_v35 = vunpack.c.l.b16 %v1104_v24  ;;  %v4560_v24 = vld [vmem:[%s5287_s11 + $0x58] sm:$0xf]  ;;  %v4562_v4 = vld [vmem:[%s5287_s11 + $0x60] sm:$0xf] }
  0x94   : > { %v1881_v17 = vrot.slane %v1879_v11, 5  ;;  %v1897_v42 = vshrl.u32 %v4560_v24, 16 }
  0x95   : > { %4414 = vmatmul.msk.bf16.gmra.mxu2 %vm657_vm4, %v1218_v28  ;;  %v2131_v28 = vunpack.c.l.b16 %v1824_v8  ;;  %v2161_v8 = vpack.c.b16 %v2134_v57, %v2133_v55 }
  0x96   : > { %v1882_v30 = vsel %vm5299_vm3, %v1877_v16, %v1881_v17  ;;  %v1899_v52 = vrot.slane %v1897_v42, 4 }
  0x97   : > { %v2160_v31 = vpack.c.b16 %v2132_v19, %v2131_v28  ;;  %v2136_v46 = vunpack.c.l.b16 %v1882_v30 }
  0x9a   : > { %4527 = vmatmul.msk.bf16.gmra.mxu3 %vm657_vm4, %v4905_v32  ;;  %v1192_v32 = vunpack.c.l.b16 %v1101_v23  ;;  %v4559_v23 = vld [vmem:[%s5287_s11 + $0x54] sm:$0xf] }
  0x9c   : > { %v1220_v44 = vpack.c.b16 %v1193_v35, %v1192_v32  ;;  %v1887_v32 = vshll.u32 %v4559_v23, 16  ;;  %v1893_v35 = vshll.u32 %v4560_v24, 16 }
  0x9f   : > { %4592 = vmatmul.msk.bf16.gmra.mxu0 %vm657_vm4, %v2159_v50  ;;  %v1107_v50 = vrot.slane %v5327_v20, 5  ;;  %v1862_v20 = vrot.slane %v1860_v51, 4  ;;  %v1895_v51 = vrot.slane %v1893_v35, 5  ;;  %v1124_v35 = vrot.slane %v5422_v27, 5 }
  0xa0   : > { %4382 = vmatmul.msk.bf16.gmra.mxu1 %vm657_vm4, %v4890_v48  ;;  %v1024_v48 = vld [vmem:[%s5287_s11 + $0x3c] sm:$0xe] }
  0xa1   : > { %v4400_v43 = vrot.slane %v1024_v48, 9  ;;  %v1109_v59 = vrot.slane %v1107_v50, 4  ;;  %v1889_v48 = vrot.slane %v1887_v32, 5 }
  0xa3   : > { %v1108_v5 = vsel %vm5473_vm7, %v4400_v43, %v1107_v50  ;;  %v4893_v43 = vld [vmem:[%s5287_s11 + $0x48] sm:$0xff] }
  0xa5   : > { %v5568_v7 = vpop.f32.mrf.mxu1  ;;  %4415 = vmatmul.msk.bf16.gmra.mxu2 %vm657_vm4, %v1219_v60  ;;  %v1110_v60 = vrot.slane %v5332_v25, 5  ;;  %v1866_v25 = vor.u32 %v1865_v61, %v1862_v20  ;;  %v1903_v20 = vshll.u32 %v4561_v54, 16  ;;  %v4894_v54 = vld [vmem:[%s5287_s11 + $0x54] sm:$0xff] }
  0xa7   : > { %v1111_v6 = vsel %vm5473_vm7, %v1109_v59, %v1110_v60  ;;  %v1867_v15 = vrot.slane %v1866_v25, 4  ;;  %v1900_v60 = vor.u32 %v1899_v52, %v1895_v51  ;;  %v1905_v10 = vrot.slane %v1903_v20, 5 }
  0xa8   : > { %v1195_v14 = vunpack.c.l.b16 %v1111_v6 }
  0xa9   : > { %v1872_v29 = vsel %vm5299_vm3, %v1867_v15, %v1871_v62  ;;  %v1901_v25 = vrot.slane %v1900_v60, 4  ;;  %v1121_v15 = vrot.slane %v5417_v21, 5 }
  0xaa   : > { %4528 = vmatmul.msk.bf16.gmra.mxu3 %vm657_vm4, %v4906_v13  ;;  %v1194_v13 = vunpack.c.l.b16 %v1108_v5  ;;  %v2135_v45 = vunpack.c.l.b16 %v1872_v29  ;;  %v4563_v5 = vld [vmem:[%s5287_s11 + $0x64] sm:$0xf] }
  0xab   : > { %v1921_v16 = vshrl.u32 %v4563_v5, 16  ;;  %v1906_v24 = vsel %vm5299_vm3, %v1901_v25, %v1905_v10  ;;  %v1123_v32 = vrot.slane %v1121_v15, 4  ;;  %v5079_v10 = vld [vmem:[%s5287_s11 + $0x64] sm:$0xf] }
  0xac   : > { %v1221_v19 = vpack.c.b16 %v1195_v14, %v1194_v13  ;;  %v2162_v57 = vpack.c.b16 %v2136_v46, %v2135_v45  ;;  %v1911_v13 = vshll.u32 %v4562_v4, 16  ;;  %v1917_v14 = vshll.u32 %v4563_v5, 16 }
  0xad   : > { %v5584_v34 = vpop.f32.mrf.mxu1  ;;  %v1923_v42 = vrot.slane %v1921_v16, 4 }
  0xae   : > { %v1913_v30 = vrot.slane %v1911_v13, 5  ;;  %v1027_v13 = vld [vmem:[%s5287_s11 + $0x60] sm:$0xe] }
  0xaf   : > { %v5586_v37 = vpop.f32.mrf.mxu2  ;;  %4593 = vmatmul.msk.bf16.gmra.mxu0 %vm657_vm4, %v2160_v31  ;;  %v1025_v31 = vld [vmem:[%s5287_s11 + $0x48] sm:$0xe] }
  0xb0   : > { %4383 = vmatmul.msk.bf16.gmra.mxu1 %vm657_vm4, %v4891_v33  ;;  %v1884_v33 = vshrl.u32 %v4559_v23, 16  ;;  %v4401_v47 = vrot.slane %v1025_v31, 9  ;;  %v1919_v31 = vrot.slane %v1917_v14, 5 }
  0xb2   : > { %v5592_v41 = vpop.f32.mrf.mxu0  ;;  %v1886_v50 = vrot.slane %v1884_v33, 4  ;;  %v4909_v33 = vld [vmem:[%s5287_s11 + $0x54] sm:$0xff]  ;;  %v1924_v27 = vor.u32 %v1923_v42, %v1919_v31 }
  0xb3   : > { %v5598_v49 = vpop.f32.mrf.mxu3 }
  0xb4   : > { %v1890_v59 = vor.u32 %v1889_v48, %v1886_v50  ;;  %v1125_v48 = vsel %vm5473_vm7, %v1123_v32, %v1124_v35  ;;  %v1925_v60 = vrot.slane %v1924_v27, 4 }
  0xb5   : > { %4416 = vmatmul.msk.bf16.gmra.mxu2 %vm657_vm4, %v1220_v44  ;;  %v1117_v44 = vrot.slane %v5376_v56, 5 }
  0xb7   : > { %v5604_v58 = vpop.f32.mrf.mxu1  ;;  %v5607_v63 = vpop.f32.mrf.mxu2  ;;  %v1118_v56 = vsel %vm5473_vm7, %v1116_v40, %v1117_v44  ;;  %v4564_v40 = vld [vmem:[%s5287_s11 + $0x68] sm:$0x1] }
  0xb8   : > { %v1197_v62 = vunpack.c.l.b16 %v1118_v56 }
  0xba   : > { %4529 = vmatmul.msk.bf16.gmra.mxu3 %vm657_vm4, %v4907_v2  ;;  %v5615_v9 = vpop.f32.mrf.mxu0  ;;  %v1115_v2 = vsel %vm5473_vm7, %v4401_v47, %v1114_v26  ;;  %v2138_v47 = vunpack.c.l.b16 %v1906_v24 }
  0xbb   : > { %v5617_v0 = vpop.f32.mrf.mxu3  ;;  %v1196_v61 = vunpack.c.l.b16 %v1115_v2 }
  0xbd   : > { %v1222_v11 = vpack.c.b16 %v1197_v62, %v1196_v61  ;;  %v4565_v61 = vld [vmem:[%s5287_s11 + $0x6c] sm:$0xf]  ;;  %v4566_v62 = vld [vmem:[%s5287_s11 + $0x70] sm:$0xf] }
  0xbe   : > { %v1932_v14 = vshrl.u32 %v4565_v61, 16  ;;  %v1941_v16 = vshll.u32 %v4566_v62, 16 }
  0xbf   : > { %4594 = vmatmul.msk.bf16.gmra.mxu0 %vm657_vm4, %v2161_v8  ;;  %v5621_v28 = vpop.f32.mrf.mxu1  ;;  %v1891_v8 = vrot.slane %v1890_v59, 4 }
  0xc0   : > { %4384 = vmatmul.msk.bf16.gmra.mxu1 %vm657_vm4, %v4892_v12  ;;  %v1908_v12 = vshrl.u32 %v4562_v4, 16  ;;  %v1934_v35 = vrot.slane %v1932_v14, 4  ;;  %v4569_v14 = vld [vmem:[%s5287_s11 + $0x7c] sm:$0xf] }
  0xc1   : > { %v1896_v23 = vsel %vm5299_vm3, %v1891_v8, %v1895_v51  ;;  %v1927_v51 = vshll.u32 %v4564_v40, 16 }
  0xc2   : > { %v5624_v22 = vpop.f32.mrf.mxu2  ;;  %v1910_v29 = vrot.slane %v1908_v12, 4 }
  0xc3   : > { %v1929_v20 = vrot.slane %v1927_v51, 5 }
  0xc4   : > { %v1914_v46 = vor.u32 %v1913_v30, %v1910_v29  ;;  %v4910_v30 = vld [vmem:[%s5287_s11 + $0x60] sm:$0xff] }
  0xc5   : > { %4417 = vmatmul.msk.bf16.gmra.mxu2 %vm657_vm4, %v1221_v19  ;;  %v1026_v19 = vld [vmem:[%s5287_s11 + $0x54] sm:$0xe]  ;;  %v1930_v25 = vsel %vm5299_vm3, %v1925_v60, %v1929_v20 }
  0xc6   : > { %v5634_v38 = vpop.f32.mrf.mxu0  ;;  %v4402_v21 = vrot.slane %v1026_v19, 9  ;;  %v1915_v59 = vrot.slane %v1914_v46, 4  ;;  %v1945_v19 = vshrl.u32 %v4566_v62, 16  ;;  %v4567_v46 = vld [vmem:[%s5287_s11 + $0x74] sm:$0x1] }
  0xc7   : > { %v5638_v39 = vpop.f32.mrf.mxu3 }
  0xc8   : > { %v1122_v50 = vsel %vm5473_vm7, %v4402_v21, %v1121_v15  ;;  %v1920_v8 = vsel %vm5299_vm3, %v1915_v59, %v1919_v31  ;;  %v1935_v15 = vshll.u32 %v4565_v61, 16  ;;  %v4403_v21 = vrot.slane %v1027_v13, 9  ;;  %v4568_v13 = vld [vmem:[%s5287_s11 + $0x78] sm:$0xf] }
  0xc9   : > { %v5641_v53 = vpop.f32.mrf.mxu1  ;;  %v1198_v56 = vunpack.c.l.b16 %v1122_v50  ;;  %v2139_v31 = vunpack.c.l.b16 %v1920_v8 }
  0xca   : > { %4530 = vmatmul.msk.bf16.gmra.mxu3 %vm657_vm4, %v4908_v1  ;;  %v5645_v55 = vpop.f32.mrf.mxu2  ;;  %v2137_v1 = vunpack.c.l.b16 %v1896_v23  ;;  %v5080_v23 = vld [vmem:[%s5287_s11 + $0x68] sm:$0x1]  ;;  %v1937_v42 = vrot.slane %v1935_v15, 5  ;;  %v5081_v15 = vld [vmem:[%s5287_s11 + $0x70] sm:$0xf] }
  0xcb   : > { %v1131_v24 = vrot.slane %v5080_v23, 5  ;;  %v1028_v23 = vld [vmem:[%s5287_s11 + $0x6c] sm:$0xe] }
  0xcc   : > { %v2163_v52 = vpack.c.b16 %v2138_v47, %v2137_v1  ;;  %v1943_v1 = vrot.slane %v1941_v16, 5  ;;  %v1947_v47 = vrot.slane %v1945_v19, 4  ;;  %v1938_v51 = vor.u32 %v1937_v42, %v1934_v35  ;;  %v5082_v42 = vld [vmem:[%s5287_s11 + $0x74] sm:$0x1] }
  0xcd   : > { %v1135_v16 = vrot.slane %v5081_v15, 5 }
  0xce   : > { %v5652_v3 = vpop.f32.mrf.mxu0 }
  0xcf   : > { %4595 = vmatmul.msk.bf16.gmra.mxu0 %vm657_vm4, %v2162_v57  ;;  %v5657_v6 = vpop.f32.mrf.mxu3  ;;  %v1199_v57 = vunpack.c.l.b16 %v1125_v48 }
  0xd0   : > { %4385 = vmatmul.msk.bf16.gmra.mxu1 %vm657_vm4, %v4893_v43 }
  0xd1   : > { %v5661_v17 = vpop.f32.mrf.mxu1  ;;  %v1223_v4 = vpack.c.b16 %v1199_v57, %v1198_v56  ;;  %v4895_v57 = vld [vmem:[%s5287_s11 + $0x60] sm:$0xff] }
  0xd5   : > { %v5668_v26 = vpop.f32.mrf.mxu2  ;;  %4418 = vmatmul.msk.bf16.gmra.mxu2 %vm657_vm4, %v1222_v11  ;;  %v1128_v11 = vrot.slane %v5079_v10, 5 }
  0xd7   : > { %v1130_v32 = vrot.slane %v1128_v11, 4  ;;  %v1129_v50 = vsel %vm5473_vm7, %v4403_v21, %v1128_v11  ;;  %v1969_v21 = vshrl.u32 %v4569_v14, 16 }
  0xd8   : > { %v5674_v44 = vpop.f32.mrf.mxu0  ;;  %v1200_v20 = vunpack.c.l.b16 %v1129_v50  ;;  %v4404_v50 = vrot.slane %v1028_v23, 9 }
  0xd9   : > { %v5676_v45 = vpop.f32.mrf.mxu3  ;;  %v1132_v48 = vsel %vm5473_vm7, %v1130_v32, %v1131_v24 }
  0xda   : > { %4531 = vmatmul.msk.bf16.gmra.mxu3 %vm657_vm4, %v4909_v33  ;;  %v2140_v33 = vunpack.c.l.b16 %v1930_v25  ;;  %v1201_v61 = vunpack.c.l.b16 %v1132_v48  ;;  %v1137_v48 = vrot.slane %v1135_v16, 4 }
  0xdc   : > { %v2164_v27 = vpack.c.b16 %v2140_v33, %v2139_v31  ;;  %v1224_v11 = vpack.c.b16 %v1201_v61, %v1200_v20  ;;  %v1959_v31 = vshll.u32 %v4568_v13, 16  ;;  %v1965_v33 = vshll.u32 %v4569_v14, 16 }
  0xdd   : > { %v5684_v2 = vpop.f32.mrf.mxu1  ;;  %v5686_v43 = vpop.f32.mrf.mxu2  ;;  %v1971_v20 = vrot.slane %v1969_v21, 4 }
  0xdf   : > { %4596 = vmatmul.msk.bf16.gmra.mxu0 %vm657_vm4, %v2163_v52  ;;  %v1948_v52 = vor.u32 %v1947_v47, %v1943_v1  ;;  %v1138_v47 = vrot.slane %v5082_v42, 5 }
  0xe0   : > { %4386 = vmatmul.msk.bf16.gmra.mxu1 %vm657_vm4, %v4894_v54  ;;  %v5692_v5 = vpop.f32.mrf.mxu0  ;;  %v1951_v54 = vshll.u32 %v4567_v46, 16  ;;  %v4911_v46 = vld [vmem:[%s5287_s11 + $0x6c] sm:$0xff] }
  0xe1   : > { %v5699_v12 = vpop.f32.mrf.mxu3  ;;  %v1949_v8 = vrot.slane %v1948_v52, 4 }
  0xe2   : > { %v1953_v25 = vrot.slane %v1951_v54, 5 }
  0xe5   : > { %4419 = vmatmul.msk.bf16.gmra.mxu2 %vm657_vm4, %v1223_v4  ;;  %v5704_v29 = vpop.f32.mrf.mxu1  ;;  %v1939_v4 = vrot.slane %v1938_v51, 4 }
  0xe7   : > { %v1944_v19 = vsel %vm5299_vm3, %v1939_v4, %v1943_v1  ;;  %v4570_v4 = vld [vmem:[%s5287_s11 + $0x80] sm:$0x1] }
  0xe8   : > { %v5707_v40 = vpop.f32.mrf.mxu2 }
  0xea   : > { %4532 = vmatmul.msk.bf16.gmra.mxu3 %vm657_vm4, %v4910_v30  ;;  %v1956_v30 = vshrl.u32 %v4568_v13, 16  ;;  %v4896_v13 = vld [vmem:[%s5287_s11 + $0x6c] sm:$0xff] }
  0xec   : > { %v5715_v56 = vpop.f32.mrf.mxu0  ;;  %v1958_v54 = vrot.slane %v1956_v30, 4 }
  0xed   : > { %v5718_v59 = vpop.f32.mrf.mxu3  ;;  %v939_v60 = vpop.f32.mrf.mxu1 }
  0xee   : > { %v940_v62 = vadd.f32 %v939_v60, %v5592_v41  ;;  %v1954_v41 = vsel %vm5299_vm3, %v1949_v8, %v1953_v25  ;;  %v1967_v60 = vrot.slane %v1965_v33, 5  ;;  %v1136_v8 = vsel %vm5473_vm7, %v4404_v50, %v1135_v16 }
  0xef   : > { %4597 = vmatmul.msk.bf16.gmra.mxu0 %vm657_vm4, %v2164_v27  ;;  %v2141_v27 = vunpack.c.l.b16 %v1944_v19  ;;  %v2142_v51 = vunpack.c.l.b16 %v1954_v41  ;;  %v1975_v19 = vshll.u32 %v4570_v4, 16 }
  0xf0   : > { %v5722_v10 = vpop.f32.mrf.mxu2  ;;  %4387 = vmatmul.msk.bf16.gmra.mxu1 %vm657_vm4, %v4895_v57  ;;  %v1961_v57 = vrot.slane %v1959_v31, 5  ;;  %v1972_v15 = vor.u32 %v1971_v20, %v1967_v60 }
  0xf1   : > { %v2165_v25 = vpack.c.b16 %v2142_v51, %v2141_v27  ;;  %v1977_v42 = vrot.slane %v1975_v19, 5  ;;  %v4572_v27 = vld [vmem:[%s5287_s11 + $0x88] sm:$0xf]  ;;  %v5083_v51 = vld [vmem:[%s5287_s11 + $0x7c] sm:$0xf] }
  0xf2   : > { %v1962_v14 = vor.u32 %v1961_v57, %v1958_v54  ;;  %v1029_v54 = vld [vmem:[%s5287_s11 + $0x78] sm:$0xe] }
  0xf4   : > { %v5733_v24 = vpop.f32.mrf.mxu0  ;;  %v1963_v21 = vrot.slane %v1962_v14, 4 }
  0xf5   : > { %v5735_v32 = vpop.f32.mrf.mxu3  ;;  %4420 = vmatmul.msk.bf16.gmra.mxu2 %vm657_vm4, %v1224_v11  ;;  %v941_v35 = vpop.f32.mrf.mxu1 }
  0xf6   : > { %v942_v1 = vadd.f32 %v941_v35, %v5615_v9  ;;  %v1139_v9 = vsel %vm5473_vm7, %v1137_v48, %v1138_v47  ;;  %v1973_v35 = vrot.slane %v1972_v15, 4  ;;  %v4571_v47 = vld [vmem:[%s5287_s11 + $0x84] sm:$0xf]  ;;  %v4912_v15 = vld [vmem:[%s5287_s11 + $0x78] sm:$0xff] }
  0xf7   : > { %v1203_v30 = vunpack.c.l.b16 %v1139_v9  ;;  %v1983_v57 = vshll.u32 %v4571_v47, 16  ;;  %v1993_v9 = vshrl.u32 %v4572_v27, 16 }
  0xf8   : > { %v1292_v52 = vpop.f32.mrf.mxu2  ;;  %v1978_v4 = vsel %vm5299_vm3, %v1973_v35, %v1977_v42 }
  0xf9   : > { %v1372_v61 = vadd.f32 %v1292_v52, %v940_v62  ;;  %v1202_v62 = vunpack.c.l.b16 %v1136_v8  ;;  %v1142_v52 = vrot.slane %v5083_v51, 5  ;;  %v1989_v8 = vshll.u32 %v4572_v27, 16 }
  0xfa   : > { %4533 = vmatmul.msk.bf16.gmra.mxu3 %vm657_vm4, %v4911_v46  ;;  %v1995_v35 = vrot.slane %v1993_v9, 4 }
  0xfb   : > { %v1225_v48 = vpack.c.b16 %v1203_v30, %v1202_v62 }
  0xfc   : > { %v2233_v11 = vpop.f32.mrf.mxu0 }
  0xfd   : > { %v1579_v41 = vpop.f32.mrf.mxu3  ;;  %v944_v23 = vpop.f32.mrf.mxu1 }
  0xfe   : > { %v1659_v31 = vadd.f32 %v1579_v41, %v1372_v61  ;;  %v945_v16 = vadd.f32 %v944_v23, %v5634_v38  ;;  %v1980_v38 = vshrl.u32 %v4571_v47, 16  ;;  %v1968_v61 = vsel %vm5299_vm3, %v1963_v21, %v1967_v60 }
  0xff   : > { %4598 = vmatmul.msk.bf16.gmra.mxu0 %vm657_vm4, %v2165_v25  ;;  %v5084_v25 = vld [vmem:[%s5287_s11 + $0x80] sm:$0x1]  ;;  %v4405_v41 = vrot.slane %v1029_v54, 9  ;;  %v1144_v23 = vrot.slane %v1142_v52, 4  ;;  %v2143_v62 = vunpack.c.l.b16 %v1968_v61  ;;  %v2144_v60 = vunpack.c.l.b16 %v1978_v4 }
 0x100   : > { %v1294_v33 = vpop.f32.mrf.mxu2  ;;  %4388 = vmatmul.msk.bf16.gmra.mxu1 %vm657_vm4, %v4896_v13  ;;  %v5752_v46 = vadd.f32 %v2233_v11, %v1659_v31  ;;  %v1145_v11 = vrot.slane %v5084_v25, 5  ;;  %v1982_v30 = vrot.slane %v1980_v38, 4  ;;  %v1985_v31 = vrot.slane %v1983_v57, 5  ;;  %v4897_v38 = vld [vmem:[%s5287_s11 + $0x78] sm:$0xff] }
 0x101   : > { %v1373_v50 = vadd.f32 %v1294_v33, %v942_v1  ;;  %v1991_v21 = vrot.slane %v1989_v8, 5  ;;  %v2166_v27 = vpack.c.b16 %v2144_v60, %v2143_v62  ;;  %v4575_v62 = vld [vmem:[%s5287_s11 + $0x94] sm:$0xf]  ;;  %v5085_v60 = vld [vmem:[%s5287_s11 + $0x88] sm:$0xf] }
 0x102   : > { %v1986_v51 = vor.u32 %v1985_v31, %v1982_v30  ;;  %v1149_v30 = vrot.slane %v5085_v60, 5  ;;  %v1030_v31 = vld [vmem:[%s5287_s11 + $0x84] sm:$0xe] }
 0x103   : > { %v1996_v57 = vor.u32 %v1995_v35, %v1991_v21 }
 0x104   : > { %v2235_v20 = vpop.f32.mrf.mxu0  ;;  %v1987_v25 = vrot.slane %v1986_v51, 4 }
 0x105   : > { %v1581_v1 = vpop.f32.mrf.mxu3  ;;  %4421 = vmatmul.msk.bf16.gmra.mxu2 %vm657_vm4, %v1225_v48  ;;  %v946_v13 = vpop.f32.mrf.mxu1  ;;  %v4573_v48 = vld [vmem:[%s5287_s11 + $0x8c] sm:$0x1] }
 0x106   : > { %v1660_v14 = vadd.f32 %v1581_v1, %v1373_v50  ;;  %v947_v19 = vadd.f32 %v946_v13, %v5652_v3  ;;  %v1143_v50 = vsel %vm5473_vm7, %v4405_v41, %v1142_v52  ;;  %v1146_v3 = vsel %vm5473_vm7, %v1144_v23, %v1145_v11 }
 0x107   : > { %v1999_v61 = vshll.u32 %v4573_v48, 16  ;;  %v1205_v8 = vunpack.c.l.b16 %v1146_v3  ;;  %v1997_v1 = vrot.slane %v1996_v57, 4  ;;  %v2017_v3 = vshrl.u32 %v4575_v62, 16  ;;  %v4913_v57 = vld [vmem:[%s5287_s11 + $0x84] sm:$0xff] }
 0x108   : > { %v1297_v33 = vpop.f32.mrf.mxu2  ;;  %v5765_v42 = vadd.f32 %v2235_v20, %v1660_v14  ;;  %v4574_v14 = vld [vmem:[%s5287_s11 + $0x90] sm:$0xf] }
 0x109   : > { %v1374_v47 = vadd.f32 %v1297_v33, %v945_v16  ;;  %v1204_v16 = vunpack.c.l.b16 %v1143_v50  ;;  %v2001_v13 = vrot.slane %v1999_v61, 5  ;;  %v2004_v33 = vshrl.u32 %v4574_v14, 16 }
 0x10a   : > { %4534 = vmatmul.msk.bf16.gmra.mxu3 %vm657_vm4, %v4912_v15  ;;  %v2007_v48 = vshll.u32 %v4574_v14, 16  ;;  %v2013_v50 = vshll.u32 %v4575_v62, 16  ;;  %v4406_v61 = vrot.slane %v1030_v31, 9 }
 0x10b   : > { %v1226_v23 = vpack.c.b16 %v1205_v8, %v1204_v16  ;;  %v2006_v8 = vrot.slane %v2004_v33, 4 }
 0x10c   : > { %v2238_v54 = vpop.f32.mrf.mxu0 }
 0x10d   : > { %v1584_v4 = vpop.f32.mrf.mxu3  ;;  %v949_v20 = vpop.f32.mrf.mxu1 }
 0x10e   : > { %v1661_v9 = vadd.f32 %v1584_v4, %v1374_v47  ;;  %v950_v52 = vadd.f32 %v949_v20, %v5674_v44  ;;  %v1992_v44 = vsel %vm5299_vm3, %v1987_v25, %v1991_v21  ;;  %v2002_v47 = vsel %vm5299_vm3, %v1997_v1, %v2001_v13 }
 0x10f   : > { %4599 = vmatmul.msk.bf16.gmra.mxu0 %vm657_vm4, %v2166_v27  ;;  %v5086_v27 = vld [vmem:[%s5287_s11 + $0x8c] sm:$0x1]  ;;  %v1151_v4 = vrot.slane %v1149_v30, 4  ;;  %v2145_v20 = vunpack.c.l.b16 %v1992_v44  ;;  %v2146_v16 = vunpack.c.l.b16 %v2002_v47  ;;  %v2009_v25 = vrot.slane %v2007_v48, 5  ;;  %v4898_v44 = vld [vmem:[%s5287_s11 + $0x84] sm:$0xff] }
 0x110   : > { %v1299_v11 = vpop.f32.mrf.mxu2  ;;  %4389 = vmatmul.msk.bf16.gmra.mxu1 %vm657_vm4, %v4897_v38  ;;  %v5778_v15 = vadd.f32 %v2238_v54, %v1661_v9  ;;  %v1152_v51 = vrot.slane %v5086_v27, 5  ;;  %v2019_v1 = vrot.slane %v2017_v3, 4 }
 0x111   : > { %v1375_v41 = vadd.f32 %v1299_v11, %v947_v19  ;;  %v2015_v11 = vrot.slane %v2013_v50, 5  ;;  %v2167_v62 = vpack.c.b16 %v2146_v16, %v2145_v20  ;;  %v2010_v31 = vor.u32 %v2009_v25, %v2006_v8  ;;  %v4578_v20 = vld [vmem:[%s5287_s11 + $0xa0] sm:$0xf]  ;;  %v5087_v16 = vld [vmem:[%s5287_s11 + $0x94] sm:$0xf] }
 0x112   : > { %v1156_v8 = vrot.slane %v5087_v16, 5 }
 0x113   : > { %v2020_v33 = vor.u32 %v2019_v1, %v2015_v11 }
 0x114   : > { %v2240_v35 = vpop.f32.mrf.mxu0 }
 0x115   : > { %v1586_v19 = vpop.f32.mrf.mxu3  ;;  %4422 = vmatmul.msk.bf16.gmra.mxu2 %vm657_vm4, %v1226_v23  ;;  %v951_v54 = vpop.f32.mrf.mxu1  ;;  %v4576_v23 = vld [vmem:[%s5287_s11 + $0x98] sm:$0x1] }
 0x116   : > { %v1662_v38 = vadd.f32 %v1586_v19, %v1375_v41  ;;  %v952_v21 = vadd.f32 %v951_v54, %v5692_v5  ;;  %v1150_v41 = vsel %vm5473_vm7, %v4406_v61, %v1149_v30  ;;  %v1153_v5 = vsel %vm5473_vm7, %v1151_v4, %v1152_v51 }
 0x117   : > { %v2023_v47 = vshll.u32 %v4576_v23, 16  ;;  %v1207_v50 = vunpack.c.l.b16 %v1153_v5  ;;  %v2011_v51 = vrot.slane %v2010_v31, 4  ;;  %v2021_v19 = vrot.slane %v2020_v33, 4  ;;  %v4914_v33 = vld [vmem:[%s5287_s11 + $0x90] sm:$0xff] }
 0x118   : > { %v1302_v9 = vpop.f32.mrf.mxu2  ;;  %v5791_v13 = vadd.f32 %v2240_v35, %v1662_v38  ;;  %v4577_v38 = vld [vmem:[%s5287_s11 + $0x9c] sm:$0xf]  ;;  %v2041_v5 = vshrl.u32 %v4578_v20, 16 }
 0x119   : > { %v1376_v14 = vadd.f32 %v1302_v9, %v950_v52  ;;  %v1206_v52 = vunpack.c.l.b16 %v1150_v41  ;;  %v2025_v54 = vrot.slane %v2023_v47, 5  ;;  %v1031_v9 = vld [vmem:[%s5287_s11 + $0x90] sm:$0xe]  ;;  %v2031_v25 = vshll.u32 %v4577_v38, 16 }
 0x11a   : > { %4535 = vmatmul.msk.bf16.gmra.mxu3 %vm657_vm4, %v4913_v57  ;;  %v2037_v41 = vshll.u32 %v4578_v20, 16 }
 0x11b   : > { %v1227_v4 = vpack.c.b16 %v1207_v50, %v1206_v52  ;;  %v2026_v23 = vsel %vm5299_vm3, %v2021_v19, %v2025_v54  ;;  %v2043_v19 = vrot.slane %v2041_v5, 4 }
 0x11c   : > { %v2243_v60 = vpop.f32.mrf.mxu0 }
 0x11d   : > { %v1589_v48 = vpop.f32.mrf.mxu3  ;;  %v954_v35 = vpop.f32.mrf.mxu1 }
 0x11e   : > { %v1663_v3 = vadd.f32 %v1589_v48, %v1376_v14  ;;  %v955_v30 = vadd.f32 %v954_v35, %v5715_v56  ;;  %v2028_v56 = vshrl.u32 %v4577_v38, 16  ;;  %v2016_v14 = vsel %vm5299_vm3, %v2011_v51, %v2015_v11 }
 0x11f   : > { %4600 = vmatmul.msk.bf16.gmra.mxu0 %vm657_vm4, %v2167_v62  ;;  %v5088_v62 = vld [vmem:[%s5287_s11 + $0x98] sm:$0x1]  ;;  %v4407_v48 = vrot.slane %v1031_v9, 9  ;;  %v1158_v35 = vrot.slane %v1156_v8, 4  ;;  %v2147_v52 = vunpack.c.l.b16 %v2016_v14  ;;  %v2148_v11 = vunpack.c.l.b16 %v2026_v23 }
 0x120   : > { %v1304_v27 = vpop.f32.mrf.mxu2  ;;  %4390 = vmatmul.msk.bf16.gmra.mxu1 %vm657_vm4, %v4898_v44  ;;  %v5804_v57 = vadd.f32 %v2243_v60, %v1663_v3  ;;  %v1159_v60 = vrot.slane %v5088_v62, 5  ;;  %v2030_v50 = vrot.slane %v2028_v56, 4  ;;  %v2033_v3 = vrot.slane %v2031_v25, 5  ;;  %v4899_v56 = vld [vmem:[%s5287_s11 + $0x90] sm:$0xff] }
 0x121   : > { %v1377_v61 = vadd.f32 %v1304_v27, %v952_v21  ;;  %v2039_v51 = vrot.slane %v2037_v41, 5  ;;  %v2168_v20 = vpack.c.b16 %v2148_v11, %v2147_v52  ;;  %v4581_v11 = vld [vmem:[%s5287_s11 + $0xac] sm:$0xf] }
 0x122   : > { %v2034_v16 = vor.u32 %v2033_v3, %v2030_v50  ;;  %v1032_v50 = vld [vmem:[%s5287_s11 + $0x9c] sm:$0xe] }
 0x123   : > { %v2044_v25 = vor.u32 %v2043_v19, %v2039_v51 }
 0x124   : > { %v2245_v1 = vpop.f32.mrf.mxu0 }
 0x125   : > { %v1591_v21 = vpop.f32.mrf.mxu3  ;;  %4423 = vmatmul.msk.bf16.gmra.mxu2 %vm657_vm4, %v1227_v4  ;;  %v956_v44 = vpop.f32.mrf.mxu1  ;;  %v4579_v4 = vld [vmem:[%s5287_s11 + $0xa4] sm:$0x1] }
 0x126   : > { %v1664_v31 = vadd.f32 %v1591_v21, %v1377_v61  ;;  %v957_v47 = vadd.f32 %v956_v44, %v5733_v24  ;;  %v1157_v61 = vsel %vm5473_vm7, %v4407_v48, %v1156_v8  ;;  %v1160_v24 = vsel %vm5473_vm7, %v1158_v35, %v1159_v60  ;;  %v4580_v44 = vld [vmem:[%s5287_s11 + $0xa8] sm:$0xf]  ;;  %v5089_v35 = vld [vmem:[%s5287_s11 + $0xa0] sm:$0xf] }
 0x127   : > { %v2047_v14 = vshll.u32 %v4579_v4, 16  ;;  %v1209_v41 = vunpack.c.l.b16 %v1160_v24  ;;  %v2035_v8 = vrot.slane %v2034_v16, 4  ;;  %v2045_v60 = vrot.slane %v2044_v25, 4 }
 0x128   : > { %v1307_v27 = vpop.f32.mrf.mxu2  ;;  %v5817_v54 = vadd.f32 %v2245_v1, %v1664_v31  ;;  %v1163_v52 = vrot.slane %v5089_v35, 5  ;;  %v2055_v19 = vshll.u32 %v4580_v44, 16  ;;  %v2065_v24 = vshrl.u32 %v4581_v11, 16 }
 0x129   : > { %v1378_v38 = vadd.f32 %v1307_v27, %v955_v30  ;;  %v1208_v30 = vunpack.c.l.b16 %v1157_v61  ;;  %v2049_v21 = vrot.slane %v2047_v14, 5  ;;  %v2040_v3 = vsel %vm5299_vm3, %v2035_v8, %v2039_v51 }
 0x12a   : > { %4536 = vmatmul.msk.bf16.gmra.mxu3 %vm657_vm4, %v4914_v33  ;;  %v2052_v27 = vshrl.u32 %v4580_v44, 16  ;;  %v2061_v61 = vshll.u32 %v4581_v11, 16  ;;  %v1165_v25 = vrot.slane %v1163_v52, 4  ;;  %v2149_v51 = vunpack.c.l.b16 %v2040_v3  ;;  %v4582_v11 = vld [vmem:[%s5287_s11 + $0xb0] sm:$0x1]  ;;  %v4900_v3 = vld [vmem:[%s5287_s11 + $0x9c] sm:$0xff] }
 0x12b   : > { %v1228_v48 = vpack.c.b16 %v1209_v41, %v1208_v30  ;;  %v2050_v4 = vsel %vm5299_vm3, %v2045_v60, %v2049_v21  ;;  %v2057_v8 = vrot.slane %v2055_v19, 5  ;;  %v2067_v21 = vrot.slane %v2065_v24, 4 }
 0x12c   : > { %v2248_v9 = vpop.f32.mrf.mxu0  ;;  %v2150_v41 = vunpack.c.l.b16 %v2050_v4  ;;  %v2063_v60 = vrot.slane %v2061_v61, 5  ;;  %v2071_v4 = vshll.u32 %v4582_v11, 16 }
 0x12d   : > { %v1594_v1 = vpop.f32.mrf.mxu3  ;;  %v959_v23 = vpop.f32.mrf.mxu1 }
 0x12e   : > { %v1665_v5 = vadd.f32 %v1594_v1, %v1378_v38  ;;  %v4915_v1 = vld [vmem:[%s5287_s11 + $0x9c] sm:$0xff]  ;;  %v960_v30 = vadd.f32 %v959_v23, %v5568_v7  ;;  %v2169_v7 = vpack.c.b16 %v2150_v41, %v2149_v51  ;;  %v2073_v51 = vrot.slane %v2071_v4, 5 }
 0x12f   : > { %4601 = vmatmul.msk.bf16.gmra.mxu0 %vm657_vm4, %v2168_v20  ;;  %v5090_v20 = vld [vmem:[%s5287_s11 + $0xa4] sm:$0x1] }
 0x130   : > { %v1309_v62 = vpop.f32.mrf.mxu2  ;;  %4391 = vmatmul.msk.bf16.gmra.mxu1 %vm657_vm4, %v4899_v56  ;;  %v5829_v31 = vadd.f32 %v2248_v9, %v1665_v5  ;;  %v1166_v16 = vrot.slane %v5090_v20, 5  ;;  %v4408_v56 = vrot.slane %v1032_v50, 9  ;;  %v2054_v5 = vrot.slane %v2052_v27, 4 }
 0x131   : > { %v1379_v33 = vadd.f32 %v1309_v62, %v957_v47 }
 0x132   : > { %v2058_v23 = vor.u32 %v2057_v8, %v2054_v5 }
 0x134   : > { %v2250_v38 = vpop.f32.mrf.mxu0 }
 0x135   : > { %v1596_v47 = vpop.f32.mrf.mxu3  ;;  %4424 = vmatmul.msk.bf16.gmra.mxu2 %vm657_vm4, %v1228_v48  ;;  %v961_v9 = vpop.f32.mrf.mxu1  ;;  %v1164_v48 = vsel %vm5473_vm7, %v4408_v56, %v1163_v52  ;;  %v4583_v52 = vld [vmem:[%s5287_s11 + $0xb4] sm:$0xf]  ;;  %v2059_v56 = vrot.slane %v2058_v23, 4 }
 0x136   : > { %v1666_v14 = vadd.f32 %v1596_v47, %v1379_v33  ;;  %v1167_v33 = vsel %vm5473_vm7, %v1165_v25, %v1166_v16  ;;  %v1210_v27 = vunpack.c.l.b16 %v1164_v48  ;;  %v4584_v47 = vld [vmem:[%s5287_s11 + $0xb8] sm:$0xf]  ;;  %v962_v16 = vadd.f32 %v961_v9, %v5584_v34 }
 0x137   : > { %v1211_v19 = vunpack.c.l.b16 %v1167_v33  ;;  %v2076_v5 = vshrl.u32 %v4583_v52, 16  ;;  %v2079_v8 = vshll.u32 %v4583_v52, 16  ;;  %v2089_v48 = vshrl.u32 %v4584_v47, 16  ;;  %v1033_v33 = vld [vmem:[%s5287_s11 + $0xa8] sm:$0xe] }
 0x138   : > { %v1312_v62 = vpop.f32.mrf.mxu2  ;;  %v5842_v44 = vadd.f32 %v2250_v38, %v1666_v14  ;;  %v2068_v38 = vor.u32 %v2067_v21, %v2063_v60  ;;  %v5091_v21 = vld [vmem:[%s5287_s11 + $0xac] sm:$0xf]  ;;  %v2064_v9 = vsel %vm5299_vm3, %v2059_v56, %v2063_v60 }
 0x139   : > { %v1380_v35 = vadd.f32 %v1312_v62, %v960_v30  ;;  %v1229_v14 = vpack.c.b16 %v1211_v19, %v1210_v27  ;;  %v2085_v62 = vshll.u32 %v4584_v47, 16  ;;  %v2078_v27 = vrot.slane %v2076_v5, 4 }
 0x13a   : > { %4537 = vmatmul.msk.bf16.gmra.mxu3 %vm657_vm4, %v4915_v1  ;;  %v2069_v1 = vrot.slane %v2068_v38, 4  ;;  %v2081_v19 = vrot.slane %v2079_v8, 5  ;;  %v2091_v47 = vrot.slane %v2089_v48, 4  ;;  %v4901_v48 = vld [vmem:[%s5287_s11 + $0xa8] sm:$0xff] }
 0x13b   : > { %v2087_v38 = vrot.slane %v2085_v62, 5 }
 0x13c   : > { %v2253_v50 = vpop.f32.mrf.mxu0  ;;  %v2074_v11 = vsel %vm5299_vm3, %v2069_v1, %v2073_v51 }
 0x13d   : > { %v1599_v61 = vpop.f32.mrf.mxu3  ;;  %v964_v24 = vpop.f32.mrf.mxu1  ;;  %v2152_v56 = vunpack.c.l.b16 %v2074_v11  ;;  %v2092_v8 = vor.u32 %v2091_v47, %v2087_v38 }
 0x13e   : > { %v1667_v20 = vadd.f32 %v1599_v61, %v1380_v35  ;;  %v1170_v35 = vrot.slane %v5091_v21, 5  ;;  %v4916_v61 = vld [vmem:[%s5287_s11 + $0xa8] sm:$0xff]  ;;  %v965_v60 = vadd.f32 %v964_v24, %v5604_v58 }
 0x13f   : > { %4602 = vmatmul.msk.bf16.gmra.mxu0 %vm657_vm4, %v2169_v7  ;;  %v5092_v7 = vld [vmem:[%s5287_s11 + $0xb0] sm:$0x1] }
 0x140   : > { %v1314_v25 = vpop.f32.mrf.mxu2  ;;  %4392 = vmatmul.msk.bf16.gmra.mxu1 %vm657_vm4, %v4900_v3  ;;  %v5856_v30 = vadd.f32 %v2253_v50, %v1667_v20  ;;  %v1173_v23 = vrot.slane %v5092_v7, 5  ;;  %v4409_v20 = vrot.slane %v1033_v33, 9  ;;  %v1172_v52 = vrot.slane %v1170_v35, 4 }
 0x141   : > { %v1381_v41 = vadd.f32 %v1314_v25, %v962_v16  ;;  %v2151_v16 = vunpack.c.l.b16 %v2064_v9  ;;  %v4585_v25 = vld [vmem:[%s5287_s11 + $0xbc] sm:$0x1] }
 0x142   : > { %v1174_v5 = vsel %vm5473_vm7, %v1172_v52, %v1173_v23  ;;  %v2095_v58 = vshll.u32 %v4585_v25, 16  ;;  %v4587_v52 = vld [vmem:[%s5287_s11 + $0xc4] sm:$0xf] }
 0x143   : > { %v2170_v24 = vpack.c.b16 %v2152_v56, %v2151_v16  ;;  %v1213_v11 = vunpack.c.l.b16 %v1174_v5  ;;  %v1034_v16 = vld [vmem:[%s5287_s11 + $0xb4] sm:$0xe]  ;;  %v5094_v56 = vld [vmem:[%s5287_s11 + $0xb8] sm:$0xf]  ;;  %v2113_v5 = vshrl.u32 %v4587_v52, 16 }
 0x144   : > { %v2255_v34 = vpop.f32.mrf.mxu0  ;;  %v1177_v25 = vrot.slane %v5094_v56, 5 }
 0x145   : > { %v1601_v50 = vpop.f32.mrf.mxu3  ;;  %4425 = vmatmul.msk.bf16.gmra.mxu2 %vm657_vm4, %v1229_v14  ;;  %v966_v3 = vpop.f32.mrf.mxu1  ;;  %v2082_v14 = vor.u32 %v2081_v19, %v2078_v27  ;;  %v2097_v27 = vrot.slane %v2095_v58, 5  ;;  %v4586_v19 = vld [vmem:[%s5287_s11 + $0xc0] sm:$0xf]  ;;  %v5095_v58 = vld [vmem:[%s5287_s11 + $0x14] sm:$0x1] }
 0x146   : > { %v1668_v4 = vadd.f32 %v1601_v50, %v1381_v41  ;;  %v1171_v41 = vsel %vm5473_vm7, %v4409_v20, %v1170_v35  ;;  %v2093_v35 = vrot.slane %v2092_v8, 4  ;;  %v967_v23 = vadd.f32 %v966_v3, %v5621_v28 }
 0x147   : > { %v1212_v9 = vunpack.c.l.b16 %v1171_v41  ;;  %v2083_v50 = vrot.slane %v2082_v14, 4  ;;  %v2100_v3 = vshrl.u32 %v4586_v19, 16  ;;  %v2103_v14 = vshll.u32 %v4586_v19, 16  ;;  %v4917_v19 = vld [vmem:[%s5287_s11 + $0xb4] sm:$0xff] }
 0x148   : > { %v1317_v1 = vpop.f32.mrf.mxu2  ;;  %v5869_v51 = vadd.f32 %v2255_v34, %v1668_v4  ;;  %v5093_v4 = vld [vmem:[%s5287_s11 + $0x10] sm:$0xf]  ;;  %v2098_v28 = vsel %vm5299_vm3, %v2093_v35, %v2097_v27  ;;  %v2109_v41 = vshll.u32 %v4587_v52, 16  ;;  %v1179_v35 = vrot.slane %v1177_v25, 4  ;;  %v4606_v27 = vld [vmem:[%s5287_s11 + $0xc] sm:$0xe] }
 0x149   : > { %v1382_v21 = vadd.f32 %v1317_v1, %v965_v60  ;;  %v1230_v60 = vpack.c.b16 %v1213_v11, %v1212_v9  ;;  %v5096_v9 = vld [vmem:[%s5287_s11 + $0xbc] sm:$0x1]  ;;  %v4622_v52 = vrot.slane %v4606_v27, 9 }
 0x14a   : > { %4538 = vmatmul.msk.bf16.gmra.mxu3 %vm657_vm4, %v4916_v61  ;;  %v2411_v61 = vrot.slane %v5093_v4, 5  ;;  %v2102_v4 = vrot.slane %v2100_v3, 4 }
 0x14c   : > { %v2258_v62 = vpop.f32.mrf.mxu0  ;;  %v2413_v8 = vrot.slane %v2411_v61, 4 }
 0x14d   : > { %v1604_v33 = vpop.f32.mrf.mxu3  ;;  %v969_v34 = vpop.f32.mrf.mxu1 }
 0x14e   : > { %v1669_v7 = vadd.f32 %v1604_v33, %v1382_v21  ;;  %v2088_v21 = vsel %vm5299_vm3, %v2083_v50, %v2087_v38  ;;  %v4410_v33 = vrot.slane %v1034_v16, 9  ;;  %v970_v56 = vadd.f32 %v969_v34, %v5641_v53 }
 0x14f   : > { %4603 = vmatmul.msk.bf16.gmra.mxu0 %vm657_vm4, %v2170_v24  ;;  %v2414_v24 = vrot.slane %v5095_v58, 5  ;;  %v2153_v38 = vunpack.c.l.b16 %v2088_v21  ;;  %v2111_v16 = vrot.slane %v2109_v41, 5  ;;  %v2115_v58 = vrot.slane %v2113_v5, 4  ;;  %v4588_v21 = vld [vmem:[%s5287_s11 + $0xc8] sm:$0x1] }
 0x150   : > { %v1319_v20 = vpop.f32.mrf.mxu2  ;;  %4393 = vmatmul.msk.bf16.gmra.mxu1 %vm657_vm4, %v4901_v48  ;;  %v5885_v1 = vadd.f32 %v2258_v62, %v1669_v7  ;;  %v1180_v62 = vrot.slane %v5096_v9, 5  ;;  %v2154_v7 = vunpack.c.l.b16 %v2098_v28  ;;  %v2412_v28 = vsel %vm5473_vm7, %v4622_v52, %v2411_v61  ;;  %v4768_v41 = vld [vmem:[%s5287_s11 + $0x18] sm:$0xf] }
 0x151   : > { %v1383_v47 = vadd.f32 %v1319_v20, %v967_v23  ;;  %v2105_v20 = vrot.slane %v2103_v14, 5  ;;  %v2523_v53 = vunpack.c.l.b16 %v2412_v28  ;;  %v2119_v27 = vshll.u32 %v4588_v21, 16 }
 0x152   : > { %v1181_v14 = vsel %vm5473_vm7, %v1179_v35, %v1180_v62  ;;  %v2171_v5 = vpack.c.b16 %v2154_v7, %v2153_v38  ;;  %v3079_v62 = vshrl.u32 %v4768_v41, 16  ;;  %v3082_v35 = vshll.u32 %v4768_v41, 16 }
 0x154   : > { %v2260_v48 = vpop.f32.mrf.mxu0  ;;  %v3081_v21 = vrot.slane %v3079_v62, 4 }
 0x155   : > { %v1606_v11 = vpop.f32.mrf.mxu3  ;;  %4426 = vmatmul.msk.bf16.gmra.mxu2 %vm657_vm4, %v1230_v60  ;;  %v971_v50 = vpop.f32.mrf.mxu1  ;;  %v1178_v60 = vsel %vm5473_vm7, %v4410_v33, %v1177_v25  ;;  %v5909_v25 = vld [vmem:[%s5287_s11 + $0x1c] sm:$0xf]  ;;  %v2116_v33 = vor.u32 %v2115_v58, %v2111_v16 }
 0x156   : > { %v1670_v23 = vadd.f32 %v1606_v11, %v1383_v47  ;;  %v2415_v47 = vsel %vm5473_vm7, %v2413_v8, %v2414_v24  ;;  %v2106_v11 = vor.u32 %v2105_v20, %v2102_v4  ;;  %v4902_v24 = vld [vmem:[%s5287_s11 + $0xb4] sm:$0xff]  ;;  %v3092_v38 = vshrl.u32 %v5909_v25, 16 }
 0x157   : > { %v2524_v34 = vunpack.c.l.b16 %v2415_v47  ;;  %v972_v4 = vadd.f32 %v971_v50, %v5661_v17 }
 0x158   : > { %v1322_v9 = vpop.f32.mrf.mxu2  ;;  %v5913_v52 = vadd.f32 %v2260_v48, %v1670_v23  ;;  %v2107_v48 = vrot.slane %v2106_v11, 4  ;;  %v2117_v23 = vrot.slane %v2116_v33, 4  ;;  %v3094_v41 = vrot.slane %v3092_v38, 4 }
 0x159   : > { %v1384_v3 = vadd.f32 %v1322_v9, %v970_v56  ;;  %v5911_v61 = vpack.c.b16 %v2524_v34, %v2523_v53  ;;  %v1214_v56 = vunpack.c.l.b16 %v1178_v60  ;;  %v1215_v9 = vunpack.c.l.b16 %v1181_v14 }
 0x15a   : > { %4539 = vmatmul.msk.bf16.gmra.mxu3 %vm657_vm4, %v4917_v19  ;;  %6685 = vst [vmem:[#allocation5_spill] sm:$0xff] %v5913_v52  ;;  %v3088_v19 = vshll.u32 %v5909_v25, 16  ;;  %v2121_v60 = vrot.slane %v2119_v27, 5  ;;  %v3084_v14 = vrot.slane %v3082_v35, 5  ;;  %v2112_v17 = vsel %vm5299_vm3, %v2107_v48, %v2111_v16  ;;  %v4833_v48 = vld [vmem:[%s5287_s11 + $0x18] sm:$0xe] }
 0x15b   : > { %v1231_v58 = vpack.c.b16 %v1215_v9, %v1214_v56  ;;  %v4918_v9 = vld [vmem:[%s5287_s11 + $0xc0] sm:$0xff]  ;;  %v2155_v16 = vunpack.c.l.b16 %v2112_v17 }
 0x15c   : > { %v2263_v8 = vpop.f32.mrf.mxu0  ;;  %v3090_v34 = vrot.slane %v3088_v19, 5  ;;  %v2122_v50 = vsel %vm5299_vm3, %v2117_v23, %v2121_v60  ;;  %v3085_v27 = vor.u32 %v3084_v14, %v3081_v21  ;;  %v4771_v23 = vld [vmem:[%s5287_s11 + $0x24] sm:$0xf]  ;;  %v5939_v60 = vld [vmem:[%s5287_s11 + $0x28] sm:$0xf] }
 0x15d   : > { %v1609_v28 = vpop.f32.mrf.mxu3  ;;  %v974_v47 = vpop.f32.mrf.mxu1  ;;  %v2156_v35 = vunpack.c.l.b16 %v2122_v50 }
 0x15e   : > { %v1671_v7 = vadd.f32 %v1609_v28, %v1384_v3  ;;  %v5924_v3 = vld [vmem:[%s5287_s11 + $0x20] sm:$0x1]  ;;  %v975_v62 = vadd.f32 %v974_v47, %v5684_v2  ;;  %v3086_v38 = vrot.slane %v3085_v27, 4  ;;  %v5097_v47 = vld [vmem:[%s5287_s11 + $0x1c] sm:$0xf] }
 0x15f   : > { %4604 = vmatmul.msk.bf16.gmra.mxu0 %vm657_vm4, %v2171_v5  ;;  %v2418_v14 = vrot.slane %v5097_v47, 5  ;;  %v4607_v27 = vld [vmem:[%s5287_s11 + $0x18] sm:$0xe] }
 0x160   : > { %v1324_v20 = vpop.f32.mrf.mxu2  ;;  %4394 = vmatmul.msk.bf16.gmra.mxu1 %vm657_vm4, %v4902_v24  ;;  %v5921_v52 = vadd.f32 %v2263_v8, %v1671_v7  ;;  %v3095_v24 = vor.u32 %v3094_v41, %v3090_v34  ;;  %v3098_v8 = vshll.u32 %v5924_v3, 16  ;;  %v3091_v17 = vsel %vm5299_vm3, %v3086_v38, %v3090_v34 }
 0x161   : > { %v1385_v53 = vadd.f32 %v1324_v20, %v972_v4  ;;  %v2172_v20 = vpack.c.b16 %v2156_v35, %v2155_v16  ;;  %v3753_v34 = vrot.slane %v5924_v3, 5  ;;  %v5098_v16 = vld [vmem:[%s5287_s11 + $0x20] sm:$0x1]  ;;  %v4623_v38 = vrot.slane %v4607_v27, 9 }
 0x162   : > { %v3096_v7 = vrot.slane %v3095_v24, 4  ;;  %v3100_v4 = vrot.slane %v3098_v8, 5  ;;  %v3103_v24 = vshrl.u32 %v4771_v23, 16  ;;  %v3106_v8 = vshll.u32 %v4771_v23, 16 }
 0x163   : > { %v2421_v35 = vrot.slane %v5098_v16, 5  ;;  %v2419_v27 = vsel %vm5473_vm7, %v4623_v38, %v2418_v14  ;;  %v4774_v38 = vld [vmem:[%s5287_s11 + $0x30] sm:$0xf] }
 0x164   : > { %v2265_v5 = vpop.f32.mrf.mxu0  ;;  %v3101_v50 = vsel %vm5299_vm3, %v3096_v7, %v3100_v4  ;;  %v2420_v7 = vrot.slane %v2418_v14, 4  ;;  %v3108_v3 = vrot.slane %v3106_v8, 5 }
 0x165   : > { %v1611_v11 = vpop.f32.mrf.mxu3  ;;  %4427 = vmatmul.msk.bf16.gmra.mxu2 %vm657_vm4, %v1231_v58  ;;  %v976_v33 = vpop.f32.mrf.mxu1  ;;  %v3750_v58 = vrot.slane %v5909_v25, 5  ;;  %v3465_v23 = vunpack.c.l.b16 %v3101_v50 }
 0x166   : > { %v1672_v56 = vadd.f32 %v1611_v11, %v1385_v53  ;;  %v4849_v11 = vrot.slane %v4833_v48, 9  ;;  %v4919_v48 = vld [vmem:[%s5287_s11 + $0x18] sm:$0xff]  ;;  %v2422_v50 = vsel %vm5473_vm7, %v2420_v7, %v2421_v35  ;;  %v5979_v7 = vld [vmem:[%s5287_s11 + $0x34] sm:$0xf] }
 0x168   : > { %v1327_v28 = vpop.f32.mrf.mxu2  ;;  %v5941_v21 = vadd.f32 %v2265_v5, %v1672_v56  ;;  %v3112_v5 = vshll.u32 %v5939_v60, 16  ;;  %v3116_v56 = vshrl.u32 %v5939_v60, 16 }
 0x169   : > { %v1386_v19 = vadd.f32 %v1327_v28, %v975_v62  ;;  %v3752_v62 = vrot.slane %v3750_v58, 4 }
 0x16a   : > { %4540 = vmatmul.msk.bf16.gmra.mxu3 %vm657_vm4, %v4918_v9  ;;  %v977_v9 = vadd.f32 %v976_v33, %v5704_v29  ;;  %v3105_v33 = vrot.slane %v3103_v24, 4  ;;  %v5962_v47 = vrot.slane %v3112_v5, 5 }
 0x16c   : > { %v2268_v2 = vpop.f32.mrf.mxu0  ;;  %v3109_v5 = vor.u32 %v3108_v3, %v3105_v33  ;;  %v4834_v33 = vld [vmem:[%s5287_s11 + $0x24] sm:$0xe] }
 0x16d   : > { %v1614_v53 = vpop.f32.mrf.mxu3  ;;  %v979_v41 = vpop.f32.mrf.mxu1 }
 0x16e   : > { %v1673_v25 = vadd.f32 %v1614_v53, %v1386_v19  ;;  %v3464_v19 = vunpack.c.l.b16 %v3091_v17  ;;  %v3118_v53 = vrot.slane %v3116_v56, 4  ;;  %v980_v14 = vadd.f32 %v979_v41, %v5586_v37 }
 0x16f   : > { %4605 = vmatmul.msk.bf16.gmra.mxu0 %vm657_vm4, %v2172_v20  ;;  %v3751_v20 = vsel %vm5473_vm7, %v4849_v11, %v3750_v58  ;;  %v3757_v37 = vrot.slane %v5939_v60, 5 }
 0x170   : > { %v1329_v28 = vpop.f32.mrf.mxu2  ;;  %4639 = vmatmul.msk.bf16.vlgmr.msra.gmra.mxu1 %vm657_vm4, %v5911_v61  ;;  %v5960_v29 = vadd.f32 %v2268_v2, %v1673_v25  ;;  %v3754_v61 = vsel %vm5473_vm7, %v3752_v62, %v3753_v34  ;;  %v3496_v2 = vpack.c.b16 %v3465_v23, %v3464_v19  ;;  %v3862_v11 = vunpack.c.l.b16 %v3751_v20 }
 0x171   : > { %v1387_v4 = vadd.f32 %v1329_v28, %v977_v9  ;;  %v5971_v9 = vld [vmem:[%s5287_s11 + $0x2c] sm:$0x1]  ;;  %v3863_v8 = vunpack.c.l.b16 %v3754_v61  ;;  %v3119_v56 = vor.u32 %v3118_v53, %v5962_v47  ;;  %v2525_v62 = vunpack.c.l.b16 %v2419_v27 }
 0x172   : > { %v2526_v34 = vunpack.c.l.b16 %v2422_v50  ;;  %v3122_v16 = vshll.u32 %v5971_v9, 16  ;;  %v3127_v53 = vshrl.u32 %v4774_v38, 16  ;;  %v3130_v61 = vshll.u32 %v4774_v38, 16 }
 0x173   : > { %v3894_v19 = vpack.c.b16 %v3863_v8, %v3862_v11  ;;  %v3136_v27 = vshll.u32 %v5979_v7, 16  ;;  %v3140_v50 = vshrl.u32 %v5979_v7, 16  ;;  %v5099_v11 = vld [vmem:[%s5287_s11 + $0x28] sm:$0xf]  ;;  %v3760_v60 = vrot.slane %v5971_v9, 5 }
 0x174   : > { %v2270_v17 = vpop.f32.mrf.mxu0  ;;  %v2556_v23 = vpack.c.b16 %v2526_v34, %v2525_v62  ;;  %v3124_v20 = vrot.slane %v3122_v16, 5  ;;  %v2425_v8 = vrot.slane %v5099_v11, 5  ;;  %v4850_v62 = vrot.slane %v4834_v33, 9  ;;  %v4920_v11 = vld [vmem:[%s5287_s11 + $0x24] sm:$0xff] }
 0x175   : > { %v1616_v58 = vpop.f32.mrf.mxu3  ;;  %4752 = vmatmul.msk.bf16.vlgmr.msra.gmra.mxu2 %vm657_vm4, %v4919_v48  ;;  %v981_v24 = vpop.f32.mrf.mxu1  ;;  %v3120_v48 = vrot.slane %v3119_v56, 4  ;;  %v3132_v33 = vrot.slane %v3130_v61, 5  ;;  %v6000_v9 = vrot.slane %v3136_v27, 5 }
 0x176   : > { %v1674_v25 = vadd.f32 %v1616_v58, %v1387_v4  ;;  %v3110_v4 = vrot.slane %v3109_v5, 4  ;;  %v5100_v5 = vld [vmem:[%s5287_s11 + $0x2c] sm:$0x1] }
 0x177   : > { %v2428_v56 = vrot.slane %v5100_v5, 5  ;;  %v3125_v16 = vsel %vm5299_vm3, %v3120_v48, %v3124_v20  ;;  %v3758_v20 = vsel %vm5473_vm7, %v4850_v62, %v3757_v37 }
 0x178   : > { %v1332_v35 = vpop.f32.mrf.mxu2  ;;  %v5984_v41 = vadd.f32 %v2270_v17, %v1674_v25  ;;  %v4608_v17 = vld [vmem:[%s5287_s11 + $0x24] sm:$0xe]  ;;  %v982_v25 = vadd.f32 %v981_v24, %v5607_v63  ;;  %v3115_v34 = vsel %vm5299_vm3, %v3110_v4, %v5962_v47  ;;  %v2427_v24 = vrot.slane %v2425_v8, 4 }
 0x179   : > { %v1388_v28 = vadd.f32 %v1332_v35, %v980_v14  ;;  %v3759_v35 = vrot.slane %v3757_v37, 4  ;;  %v4624_v63 = vrot.slane %v4608_v17, 9  ;;  %v3466_v47 = vunpack.c.l.b16 %v3115_v34 }
 0x17a   : > { %4817 = vmatmul.msk.bf16.vlgmr.msra.gmra.mxu3 %vm657_vm4, %v3496_v2  ;;  %6686 = vst [vmem:[#allocation6_spill] sm:$0xff] %v5984_v41  ;;  %v3467_v4 = vunpack.c.l.b16 %v3125_v16  ;;  %v6006_v41 = vld [vmem:[%s5287_s11 + $0x38] sm:$0x1] }
 0x17b   : > { %v3146_v37 = vshll.u32 %v6006_v41, 16 }
 0x17c   : > { %v2273_v3 = vpop.f32.mrf.mxu0  ;;  %v3497_v17 = vpack.c.b16 %v3467_v4, %v3466_v47  ;;  %v5101_v4 = vld [vmem:[%s5287_s11 + $0x34] sm:$0xf] }
 0x17d   : > { %v1619_v58 = vpop.f32.mrf.mxu3  ;;  %v984_v2 = vpop.f32.mrf.mxu1 }
 0x17e   : > { %v1675_v14 = vadd.f32 %v1619_v58, %v1388_v28  ;;  %v3129_v28 = vrot.slane %v3127_v53, 4  ;;  %v3142_v58 = vrot.slane %v3140_v50, 4  ;;  %v2429_v50 = vsel %vm5473_vm7, %v2427_v24, %v2428_v56  ;;  %v6025_v24 = vld [vmem:[%s5287_s11 + $0x40] sm:$0xf] }
 0x17f   : > { %4866 = vmatmul.msk.bf16.vlgmr.msra.gmra.mxu0 %vm657_vm4, %v3894_v19 }
 0x180   : > { %v1334_v38 = vpop.f32.mrf.mxu2  ;;  %4640 = vmatmul.msk.bf16.gmra.mxu1 %vm657_vm4, %v2556_v23  ;;  %v6003_v5 = vadd.f32 %v2273_v3, %v1675_v14  ;;  %v3761_v23 = vsel %vm5473_vm7, %v3759_v35, %v3760_v60  ;;  %v3133_v53 = vor.u32 %v3132_v33, %v3129_v28  ;;  %v2426_v3 = vsel %vm5473_vm7, %v4624_v63, %v2425_v8 }
 0x181   : > { %v1389_v19 = vadd.f32 %v1334_v38, %v982_v25  ;;  %v3143_v14 = vor.u32 %v3142_v58, %v6000_v9  ;;  %v985_v60 = vadd.f32 %v984_v2, %v5624_v22  ;;  %v3864_v25 = vunpack.c.l.b16 %v3758_v20  ;;  %v4835_v58 = vld [vmem:[%s5287_s11 + $0x30] sm:$0xe] }
 0x182   : > { %v3865_v34 = vunpack.c.l.b16 %v3761_v23  ;;  %v2527_v35 = vunpack.c.l.b16 %v2426_v3  ;;  %v2528_v8 = vunpack.c.l.b16 %v2429_v50  ;;  %v3134_v28 = vrot.slane %v3133_v53, 4 }
 0x183   : > { %v3144_v56 = vrot.slane %v3143_v14, 4  ;;  %v3148_v33 = vrot.slane %v3146_v37, 5  ;;  %v3764_v63 = vrot.slane %v5979_v7, 5  ;;  %v2432_v20 = vrot.slane %v5101_v4, 5  ;;  %v4609_v7 = vld [vmem:[%s5287_s11 + $0x30] sm:$0xe] }
 0x184   : > { %v2275_v48 = vpop.f32.mrf.mxu0  ;;  %v2557_v47 = vpack.c.b16 %v2528_v8, %v2527_v35  ;;  %v4851_v50 = vrot.slane %v4835_v58, 9 }
 0x185   : > { %v1621_v61 = vpop.f32.mrf.mxu3  ;;  %4753 = vmatmul.msk.bf16.gmra.mxu2 %vm657_vm4, %v4920_v11  ;;  %v986_v27 = vpop.f32.mrf.mxu1  ;;  %v4777_v11 = vld [vmem:[%s5287_s11 + $0x3c] sm:$0xf]  ;;  %v3149_v3 = vsel %vm5299_vm3, %v3144_v56, %v3148_v33  ;;  %v4921_v33 = vld [vmem:[%s5287_s11 + $0x30] sm:$0xff] }
 0x186   : > { %v1676_v62 = vadd.f32 %v1621_v61, %v1389_v19  ;;  %v3895_v19 = vpack.c.b16 %v3865_v34, %v3864_v25  ;;  %v3139_v61 = vsel %vm5299_vm3, %v3134_v28, %v6000_v9  ;;  %v3151_v14 = vshrl.u32 %v4777_v11, 16  ;;  %v5102_v34 = vld [vmem:[%s5287_s11 + $0x38] sm:$0x1] }
 0x187   : > { %v3766_v25 = vrot.slane %v3764_v63, 4  ;;  %v3767_v9 = vrot.slane %v6006_v41, 5  ;;  %v3468_v8 = vunpack.c.l.b16 %v3139_v61  ;;  %v2434_v28 = vrot.slane %v2432_v20, 4 }
 0x188   : > { %v1337_v16 = vpop.f32.mrf.mxu2  ;;  %v6027_v22 = vadd.f32 %v2275_v48, %v1676_v62  ;;  %v3154_v48 = vshll.u32 %v4777_v11, 16  ;;  %v3160_v62 = vshll.u32 %v6025_v24, 16  ;;  %v3469_v58 = vunpack.c.l.b16 %v3149_v3 }
 0x189   : > { %v1390_v38 = vadd.f32 %v1337_v16, %v985_v60  ;;  %v987_v60 = vadd.f32 %v986_v27, %v5645_v55  ;;  %v2435_v16 = vrot.slane %v5102_v34, 5  ;;  %v3765_v11 = vsel %vm5473_vm7, %v4851_v50, %v3764_v63 }
 0x18a   : > { %4818 = vmatmul.msk.bf16.gmra.mxu3 %vm657_vm4, %v3497_v17  ;;  %v3164_v17 = vshrl.u32 %v6025_v24, 16  ;;  %v3153_v55 = vrot.slane %v3151_v14, 4  ;;  %v3156_v27 = vrot.slane %v3154_v48, 5  ;;  %v6048_v41 = vrot.slane %v3160_v62, 5 }
 0x18b   : > { %v2436_v3 = vsel %vm5473_vm7, %v2434_v28, %v2435_v16  ;;  %v3866_v50 = vunpack.c.l.b16 %v3765_v11  ;;  %v4836_v11 = vld [vmem:[%s5287_s11 + $0x3c] sm:$0xe] }
 0x18c   : > { %v2278_v2 = vpop.f32.mrf.mxu0  ;;  %v3166_v4 = vrot.slane %v3164_v17, 4  ;;  %v3157_v62 = vor.u32 %v3156_v27, %v3153_v55 }
 0x18d   : > { %v1624_v23 = vpop.f32.mrf.mxu3  ;;  %v989_v53 = vpop.f32.mrf.mxu1 }
 0x18e   : > { %v1677_v37 = vadd.f32 %v1624_v23, %v1390_v38  ;;  %v4625_v38 = vrot.slane %v4609_v7, 9  ;;  %v6057_v7 = vld [vmem:[%s5287_s11 + $0x44] sm:$0x1]  ;;  %v3167_v17 = vor.u32 %v3166_v4, %v6048_v41  ;;  %v3158_v28 = vrot.slane %v3157_v62, 4 }
 0x18f   : > { %4867 = vmatmul.msk.bf16.gmra.mxu0 %vm657_vm4, %v3895_v19 }
 0x190   : > { %v1339_v35 = vpop.f32.mrf.mxu2  ;;  %4641 = vmatmul.msk.bf16.gmra.mxu1 %vm657_vm4, %v2557_v47  ;;  %v6046_v19 = vadd.f32 %v2278_v2, %v1677_v37  ;;  %v3768_v47 = vsel %vm5473_vm7, %v3766_v25, %v3767_v9  ;;  %v2433_v61 = vsel %vm5473_vm7, %v4625_v38, %v2432_v20  ;;  %v3498_v2 = vpack.c.b16 %v3469_v58, %v3468_v8  ;;  %v6065_v38 = vld [vmem:[%s5287_s11 + $0x4c] sm:$0xf] }
 0x191   : > { %v1391_v56 = vadd.f32 %v1339_v35, %v987_v60  ;;  %v3867_v48 = vunpack.c.l.b16 %v3768_v47  ;;  %v990_v20 = vadd.f32 %v989_v53, %v5668_v26  ;;  %v2529_v60 = vunpack.c.l.b16 %v2433_v61  ;;  %v4780_v35 = vld [vmem:[%s5287_s11 + $0x48] sm:$0xf] }
 0x192   : > { %v2530_v25 = vunpack.c.l.b16 %v2436_v3  ;;  %v3170_v9 = vshll.u32 %v6057_v7, 16  ;;  %v3771_v26 = vrot.slane %v6025_v24, 5  ;;  %v3175_v27 = vshrl.u32 %v4780_v35, 16 }
 0x193   : > { %v3896_v8 = vpack.c.b16 %v3867_v48, %v3866_v50  ;;  %v3178_v4 = vshll.u32 %v4780_v35, 16  ;;  %v3184_v47 = vshll.u32 %v6065_v38, 16  ;;  %v3188_v61 = vshrl.u32 %v6065_v38, 16  ;;  %v5104_v48 = vld [vmem:[%s5287_s11 + $0x44] sm:$0x1] }
 0x194   : > { %v2280_v23 = vpop.f32.mrf.mxu0  ;;  %v3172_v58 = vrot.slane %v3170_v9, 5  ;;  %v2442_v62 = vrot.slane %v5104_v48, 5  ;;  %v3774_v24 = vrot.slane %v6057_v7, 5  ;;  %v3773_v9 = vrot.slane %v3771_v26, 4  ;;  %v6092_v48 = vld [vmem:[%s5287_s11 + $0x50] sm:$0x1] }
 0x195   : > { %v1626_v63 = vpop.f32.mrf.mxu3  ;;  %4754 = vmatmul.msk.bf16.gmra.mxu2 %vm657_vm4, %v4921_v33  ;;  %v991_v14 = vpop.f32.mrf.mxu1  ;;  %v2558_v33 = vpack.c.b16 %v2530_v25, %v2529_v60  ;;  %v3163_v60 = vsel %vm5299_vm3, %v3158_v28, %v6048_v41  ;;  %v3180_v35 = vrot.slane %v3178_v4, 5  ;;  %v6086_v7 = vrot.slane %v3184_v47, 5 }
 0x196   : > { %v1678_v37 = vadd.f32 %v1626_v63, %v1391_v56  ;;  %v3168_v56 = vrot.slane %v3167_v17, 4  ;;  %v3470_v41 = vunpack.c.l.b16 %v3163_v60 }
 0x198   : > { %v1342_v34 = vpop.f32.mrf.mxu2  ;;  %v6070_v53 = vadd.f32 %v2280_v23, %v1678_v37  ;;  %v4610_v23 = vld [vmem:[%s5287_s11 + $0x3c] sm:$0xe]  ;;  %v992_v37 = vadd.f32 %v991_v14, %v5686_v43  ;;  %v3173_v25 = vsel %vm5299_vm3, %v3168_v56, %v3172_v58 }
 0x199   : > { %v1392_v16 = vadd.f32 %v1342_v34, %v990_v20  ;;  %v4852_v20 = vrot.slane %v4836_v11, 9  ;;  %v3190_v11 = vrot.slane %v3188_v61, 4  ;;  %v4626_v43 = vrot.slane %v4610_v23, 9 }
 0x19a   : > { %4819 = vmatmul.msk.bf16.gmra.mxu3 %vm657_vm4, %v3498_v2  ;;  %v5103_v2 = vld [vmem:[%s5287_s11 + $0x40] sm:$0xf]  ;;  %v3471_v28 = vunpack.c.l.b16 %v3173_v25 }
 0x19b   : > { %v2439_v50 = vrot.slane %v5103_v2, 5  ;;  %v3772_v58 = vsel %vm5473_vm7, %v4852_v20, %v3771_v26  ;;  %v3194_v26 = vshll.u32 %v6092_v48, 16 }
 0x19c   : > { %v2283_v55 = vpop.f32.mrf.mxu0  ;;  %v3499_v23 = vpack.c.b16 %v3471_v28, %v3470_v41  ;;  %v5105_v28 = vld [vmem:[%s5287_s11 + $0x4c] sm:$0xf] }
 0x19d   : > { %v1629_v3 = vpop.f32.mrf.mxu3  ;;  %v994_v63 = vpop.f32.mrf.mxu1  ;;  %v2441_v14 = vrot.slane %v2439_v50, 4 }
 0x19e   : > { %v1679_v17 = vadd.f32 %v1629_v3, %v1392_v16  ;;  %v3177_v16 = vrot.slane %v3175_v27, 4  ;;  %v4922_v3 = vld [vmem:[%s5287_s11 + $0x3c] sm:$0xff] }
 0x19f   : > { %4868 = vmatmul.msk.bf16.gmra.mxu0 %vm657_vm4, %v3896_v8  ;;  %v2443_v61 = vsel %vm5473_vm7, %v2441_v14, %v2442_v62  ;;  %v6111_v14 = vld [vmem:[%s5287_s11 + $0x58] sm:$0xf] }
 0x1a0   : > { %v1344_v34 = vpop.f32.mrf.mxu2  ;;  %4642 = vmatmul.msk.bf16.gmra.mxu1 %vm657_vm4, %v2558_v33  ;;  %v6089_v2 = vadd.f32 %v2283_v55, %v1679_v17  ;;  %v3775_v33 = vsel %vm5473_vm7, %v3773_v9, %v3774_v24  ;;  %v3181_v27 = vor.u32 %v3180_v35, %v3177_v16  ;;  %v2440_v55 = vsel %vm5473_vm7, %v4626_v43, %v2439_v50 }
 0x1a1   : > { %v1393_v8 = vadd.f32 %v1344_v34, %v992_v37  ;;  %v3191_v17 = vor.u32 %v3190_v11, %v6086_v7  ;;  %v995_v24 = vadd.f32 %v994_v63, %v5707_v40  ;;  %v3868_v37 = vunpack.c.l.b16 %v3772_v58  ;;  %v4837_v11 = vld [vmem:[%s5287_s11 + $0x48] sm:$0xe] }
 0x1a2   : > { %v3869_v60 = vunpack.c.l.b16 %v3775_v33  ;;  %v2531_v9 = vunpack.c.l.b16 %v2440_v55  ;;  %v2532_v50 = vunpack.c.l.b16 %v2443_v61  ;;  %v3182_v16 = vrot.slane %v3181_v27, 4 }
 0x1a3   : > { %v3192_v62 = vrot.slane %v3191_v17, 4  ;;  %v3196_v35 = vrot.slane %v3194_v26, 5  ;;  %v3778_v43 = vrot.slane %v6065_v38, 5  ;;  %v2446_v58 = vrot.slane %v5105_v28, 5  ;;  %v4611_v38 = vld [vmem:[%s5287_s11 + $0x48] sm:$0xe] }
 0x1a4   : > { %v2285_v56 = vpop.f32.mrf.mxu0  ;;  %v2559_v41 = vpack.c.b16 %v2532_v50, %v2531_v9  ;;  %v4853_v61 = vrot.slane %v4837_v11, 9 }
 0x1a5   : > { %v1631_v4 = vpop.f32.mrf.mxu3  ;;  %4755 = vmatmul.msk.bf16.gmra.mxu2 %vm657_vm4, %v4922_v3  ;;  %v996_v47 = vpop.f32.mrf.mxu1  ;;  %v4783_v3 = vld [vmem:[%s5287_s11 + $0x54] sm:$0xf]  ;;  %v3197_v55 = vsel %vm5299_vm3, %v3192_v62, %v3196_v35  ;;  %v4923_v35 = vld [vmem:[%s5287_s11 + $0x48] sm:$0xff] }
 0x1a6   : > { %v1680_v20 = vadd.f32 %v1631_v4, %v1393_v8  ;;  %v3897_v8 = vpack.c.b16 %v3869_v60, %v3868_v37  ;;  %v3187_v4 = vsel %vm5299_vm3, %v3182_v16, %v6086_v7  ;;  %v3199_v17 = vshrl.u32 %v4783_v3, 16  ;;  %v5106_v60 = vld [vmem:[%s5287_s11 + $0x50] sm:$0x1] }
 0x1a7   : > { %v3780_v37 = vrot.slane %v3778_v43, 4  ;;  %v3781_v7 = vrot.slane %v6092_v48, 5  ;;  %v3472_v50 = vunpack.c.l.b16 %v3187_v4  ;;  %v2448_v16 = vrot.slane %v2446_v58, 4 }
 0x1a8   : > { %v1347_v25 = vpop.f32.mrf.mxu2  ;;  %v6113_v40 = vadd.f32 %v2285_v56, %v1680_v20  ;;  %v3202_v56 = vshll.u32 %v4783_v3, 16  ;;  %v3208_v20 = vshll.u32 %v6111_v14, 16  ;;  %v3473_v11 = vunpack.c.l.b16 %v3197_v55 }
 0x1a9   : > { %v1394_v34 = vadd.f32 %v1347_v25, %v995_v24  ;;  %v997_v24 = vadd.f32 %v996_v47, %v5722_v10  ;;  %v2449_v25 = vrot.slane %v5106_v60, 5  ;;  %v3779_v3 = vsel %vm5473_vm7, %v4853_v61, %v3778_v43 }
 0x1aa   : > { %4820 = vmatmul.msk.bf16.gmra.mxu3 %vm657_vm4, %v3499_v23  ;;  %v3212_v23 = vshrl.u32 %v6111_v14, 16  ;;  %v3201_v10 = vrot.slane %v3199_v17, 4  ;;  %v3204_v47 = vrot.slane %v3202_v56, 5  ;;  %v6134_v48 = vrot.slane %v3208_v20, 5 }
 0x1ab   : > { %v2450_v55 = vsel %vm5473_vm7, %v2448_v16, %v2449_v25  ;;  %v3870_v61 = vunpack.c.l.b16 %v3779_v3  ;;  %v4838_v3 = vld [vmem:[%s5287_s11 + $0x54] sm:$0xe] }
 0x1ac   : > { %v2288_v63 = vpop.f32.mrf.mxu0  ;;  %v3214_v28 = vrot.slane %v3212_v23, 4  ;;  %v3205_v20 = vor.u32 %v3204_v47, %v3201_v10 }
 0x1ad   : > { %v1634_v33 = vpop.f32.mrf.mxu3  ;;  %v999_v27 = vpop.f32.mrf.mxu1 }
 0x1ae   : > { %v1681_v26 = vadd.f32 %v1634_v33, %v1394_v34  ;;  %v4627_v34 = vrot.slane %v4611_v38, 9  ;;  %v6143_v38 = vld [vmem:[%s5287_s11 + $0x5c] sm:$0x1]  ;;  %v3215_v23 = vor.u32 %v3214_v28, %v6134_v48  ;;  %v3206_v16 = vrot.slane %v3205_v20, 4 }
 0x1af   : > { %4869 = vmatmul.msk.bf16.gmra.mxu0 %vm657_vm4, %v3897_v8 }
 0x1b0   : > { %v1349_v9 = vpop.f32.mrf.mxu2  ;;  %4643 = vmatmul.msk.bf16.gmra.mxu1 %vm657_vm4, %v2559_v41  ;;  %v6132_v8 = vadd.f32 %v2288_v63, %v1681_v26  ;;  %v3782_v41 = vsel %vm5473_vm7, %v3780_v37, %v3781_v7  ;;  %v2447_v4 = vsel %vm5473_vm7, %v4627_v34, %v2446_v58  ;;  %v3500_v63 = vpack.c.b16 %v3473_v11, %v3472_v50  ;;  %v6151_v34 = vld [vmem:[%s5287_s11 + $0x64] sm:$0xf] }
 0x1b1   : > { %v1395_v62 = vadd.f32 %v1349_v9, %v997_v24  ;;  %v3871_v56 = vunpack.c.l.b16 %v3782_v41  ;;  %v1000_v58 = vadd.f32 %v999_v27, %v5598_v49  ;;  %v2533_v24 = vunpack.c.l.b16 %v2447_v4  ;;  %v4786_v9 = vld [vmem:[%s5287_s11 + $0x60] sm:$0xf] }
 0x1b2   : > { %v2534_v37 = vunpack.c.l.b16 %v2450_v55  ;;  %v3218_v7 = vshll.u32 %v6143_v38, 16  ;;  %v3785_v49 = vrot.slane %v6111_v14, 5  ;;  %v3223_v47 = vshrl.u32 %v4786_v9, 16 }
 0x1b3   : > { %v3898_v50 = vpack.c.b16 %v3871_v56, %v3870_v61  ;;  %v3226_v28 = vshll.u32 %v4786_v9, 16  ;;  %v3232_v41 = vshll.u32 %v6151_v34, 16  ;;  %v3236_v4 = vshrl.u32 %v6151_v34, 16  ;;  %v5108_v56 = vld [vmem:[%s5287_s11 + $0x5c] sm:$0x1] }
 0x1b4   : > { %v2290_v33 = vpop.f32.mrf.mxu0  ;;  %v3220_v11 = vrot.slane %v3218_v7, 5  ;;  %v2456_v20 = vrot.slane %v5108_v56, 5  ;;  %v3788_v14 = vrot.slane %v6143_v38, 5  ;;  %v3787_v7 = vrot.slane %v3785_v49, 4  ;;  %v6178_v56 = vld [vmem:[%s5287_s11 + $0x68] sm:$0x1] }
 0x1b5   : > { %v1636_v43 = vpop.f32.mrf.mxu3  ;;  %4756 = vmatmul.msk.bf16.gmra.mxu2 %vm657_vm4, %v4923_v35  ;;  %v1001_v17 = vpop.f32.mrf.mxu1  ;;  %v2560_v35 = vpack.c.b16 %v2534_v37, %v2533_v24  ;;  %v3211_v24 = vsel %vm5299_vm3, %v3206_v16, %v6134_v48  ;;  %v3228_v9 = vrot.slane %v3226_v28, 5  ;;  %v6172_v38 = vrot.slane %v3232_v41, 5 }
 0x1b6   : > { %v1682_v26 = vadd.f32 %v1636_v43, %v1395_v62  ;;  %v3216_v62 = vrot.slane %v3215_v23, 4  ;;  %v3474_v48 = vunpack.c.l.b16 %v3211_v24 }
 0x1b8   : > { %v1352_v60 = vpop.f32.mrf.mxu2  ;;  %v6156_v27 = vadd.f32 %v2290_v33, %v1682_v26  ;;  %v4612_v33 = vld [vmem:[%s5287_s11 + $0x54] sm:$0xe]  ;;  %v1002_v26 = vadd.f32 %v1001_v17, %v5617_v0  ;;  %v3221_v37 = vsel %vm5299_vm3, %v3216_v62, %v3220_v11 }
 0x1b9   : > { %v1396_v25 = vadd.f32 %v1352_v60, %v1000_v58  ;;  %v4854_v58 = vrot.slane %v4838_v3, 9  ;;  %v3238_v3 = vrot.slane %v3236_v4, 4  ;;  %v4628_v0 = vrot.slane %v4612_v33, 9 }
 0x1ba   : > { %4821 = vmatmul.msk.bf16.gmra.mxu3 %vm657_vm4, %v3500_v63  ;;  %v5107_v63 = vld [vmem:[%s5287_s11 + $0x58] sm:$0xf]  ;;  %v3475_v16 = vunpack.c.l.b16 %v3221_v37 }
 0x1bb   : > { %v2453_v61 = vrot.slane %v5107_v63, 5  ;;  %v3786_v11 = vsel %vm5473_vm7, %v4854_v58, %v3785_v49  ;;  %v3242_v49 = vshll.u32 %v6178_v56, 16 }
 0x1bc   : > { %v2293_v10 = vpop.f32.mrf.mxu0  ;;  %v3501_v33 = vpack.c.b16 %v3475_v16, %v3474_v48 }
 0x1bd   : > { %v1639_v55 = vpop.f32.mrf.mxu3  ;;  %v1004_v43 = vpop.f32.mrf.mxu1  ;;  %v2455_v17 = vrot.slane %v2453_v61, 4 }
 0x1be   : > { %v1683_v23 = vadd.f32 %v1639_v55, %v1396_v25  ;;  %v3225_v25 = vrot.slane %v3223_v47, 4  ;;  %v4924_v55 = vld [vmem:[%s5287_s11 + $0x54] sm:$0xff] }
 0x1bf   : > { %4870 = vmatmul.msk.bf16.gmra.mxu0 %vm657_vm4, %v3898_v50  ;;  %v2457_v4 = vsel %vm5473_vm7, %v2455_v17, %v2456_v20  ;;  %v3244_v20 = vrot.slane %v3242_v49, 5  ;;  %v6197_v17 = vld [vmem:[%s5287_s11 + $0x70] sm:$0xf]  ;;  %v4613_v49 = vld [vmem:[%s5287_s11 + $0x60] sm:$0xe] }
 0x1c0   : > { %v1354_v60 = vpop.f32.mrf.mxu2  ;;  %4644 = vmatmul.msk.bf16.gmra.mxu1 %vm657_vm4, %v2560_v35  ;;  %v6175_v63 = vadd.f32 %v2293_v10, %v1683_v23  ;;  %v3789_v35 = vsel %vm5473_vm7, %v3787_v7, %v3788_v14  ;;  %v3229_v47 = vor.u32 %v3228_v9, %v3225_v25  ;;  %v2454_v10 = vsel %vm5473_vm7, %v4628_v0, %v2453_v61 }
 0x1c1   : > { %v1397_v50 = vadd.f32 %v1354_v60, %v1002_v26  ;;  %v3239_v23 = vor.u32 %v3238_v3, %v6172_v38  ;;  %v1005_v14 = vadd.f32 %v1004_v43, %v5638_v39  ;;  %v3872_v26 = vunpack.c.l.b16 %v3786_v11  ;;  %v4789_v3 = vld [vmem:[%s5287_s11 + $0x6c] sm:$0xf] }
 0x1c2   : > { %v3873_v24 = vunpack.c.l.b16 %v3789_v35  ;;  %v2535_v7 = vunpack.c.l.b16 %v2454_v10  ;;  %v2536_v60 = vunpack.c.l.b16 %v2457_v4  ;;  %v3230_v25 = vrot.slane %v3229_v47, 4  ;;  %v5109_v10 = vld [vmem:[%s5287_s11 + $0x64] sm:$0xf] }
 0x1c3   : > { %v3240_v9 = vrot.slane %v3239_v23, 4  ;;  %v3792_v0 = vrot.slane %v6151_v34, 5  ;;  %v2460_v4 = vrot.slane %v5109_v10, 5  ;;  %v3247_v34 = vshrl.u32 %v4789_v3, 16 }
 0x1c4   : > { %v2295_v62 = vpop.f32.mrf.mxu0  ;;  %v2561_v48 = vpack.c.b16 %v2536_v60, %v2535_v7  ;;  %v3235_v47 = vsel %vm5299_vm3, %v3230_v25, %v6172_v38  ;;  %v3795_v38 = vrot.slane %v6178_v56, 5 }
 0x1c5   : > { %v1641_v28 = vpop.f32.mrf.mxu3  ;;  %4757 = vmatmul.msk.bf16.gmra.mxu2 %vm657_vm4, %v4924_v55  ;;  %v1006_v41 = vpop.f32.mrf.mxu1  ;;  %v4839_v55 = vld [vmem:[%s5287_s11 + $0x60] sm:$0xe]  ;;  %v3476_v60 = vunpack.c.l.b16 %v3235_v47  ;;  %v6225_v47 = vld [vmem:[%s5287_s11 + $0x74] sm:$0x1] }
 0x1c6   : > { %v1684_v58 = vadd.f32 %v1641_v28, %v1397_v50  ;;  %v3899_v50 = vpack.c.b16 %v3873_v24, %v3872_v26  ;;  %v4855_v16 = vrot.slane %v4839_v55, 9  ;;  %v3245_v28 = vsel %vm5299_vm3, %v3240_v9, %v3244_v20  ;;  %v5110_v24 = vld [vmem:[%s5287_s11 + $0x68] sm:$0x1]  ;;  %v4925_v20 = vld [vmem:[%s5287_s11 + $0x60] sm:$0xff] }
 0x1c7   : > { %v3794_v26 = vrot.slane %v3792_v0, 4  ;;  %v4629_v55 = vrot.slane %v4613_v49, 9 }
 0x1c8   : > { %v1357_v37 = vpop.f32.mrf.mxu2  ;;  %v6199_v39 = vadd.f32 %v2295_v62, %v1684_v58  ;;  %v3250_v62 = vshll.u32 %v4789_v3, 16  ;;  %v3256_v58 = vshll.u32 %v6197_v17, 16  ;;  %v3793_v25 = vsel %vm5473_vm7, %v4855_v16, %v3792_v0 }
 0x1c9   : > { %v1398_v61 = vadd.f32 %v1357_v37, %v1005_v14  ;;  %v1007_v14 = vadd.f32 %v1006_v41, %v5657_v6  ;;  %v2463_v37 = vrot.slane %v5110_v24, 5  ;;  %v2462_v3 = vrot.slane %v2460_v4, 4 }
 0x1ca   : > { %4822 = vmatmul.msk.bf16.gmra.mxu3 %vm657_vm4, %v3501_v33  ;;  %v3260_v33 = vshrl.u32 %v6197_v17, 16  ;;  %v3249_v6 = vrot.slane %v3247_v34, 4  ;;  %v3252_v41 = vrot.slane %v3250_v62, 5  ;;  %v6220_v56 = vrot.slane %v3256_v58, 5 }
 0x1cb   : > { %v3796_v10 = vsel %vm5473_vm7, %v3794_v26, %v3795_v38  ;;  %v3874_v16 = vunpack.c.l.b16 %v3793_v25  ;;  %v2461_v34 = vsel %vm5473_vm7, %v4629_v55, %v2460_v4  ;;  %v3266_v26 = vshll.u32 %v6225_v47, 16  ;;  %v6237_v25 = vld [vmem:[%s5287_s11 + $0x7c] sm:$0xf]  ;;  %v4840_v55 = vld [vmem:[%s5287_s11 + $0x6c] sm:$0xe] }
 0x1cc   : > { %v2298_v43 = vpop.f32.mrf.mxu0  ;;  %v3875_v62 = vunpack.c.l.b16 %v3796_v10  ;;  %v3253_v58 = vor.u32 %v3252_v41, %v3249_v6  ;;  %v2537_v24 = vunpack.c.l.b16 %v2461_v34  ;;  %v3280_v10 = vshll.u32 %v6237_v25, 16 }
 0x1cd   : > { %v1644_v11 = vpop.f32.mrf.mxu3  ;;  %v1009_v35 = vpop.f32.mrf.mxu1 }
 0x1ce   : > { %v1685_v23 = vadd.f32 %v1644_v11, %v1398_v61  ;;  %v3477_v61 = vunpack.c.l.b16 %v3245_v28  ;;  %v3262_v11 = vrot.slane %v3260_v33, 4  ;;  %v3900_v4 = vpack.c.b16 %v3875_v62, %v3874_v16  ;;  %v4614_v16 = vld [vmem:[%s5287_s11 + $0x6c] sm:$0xe] }
 0x1cf   : > { %4871 = vmatmul.msk.bf16.gmra.mxu0 %vm657_vm4, %v3899_v50 }
 0x1d0   : > { %v1359_v7 = vpop.f32.mrf.mxu2  ;;  %4645 = vmatmul.msk.bf16.gmra.mxu1 %vm657_vm4, %v2561_v48  ;;  %v6218_v50 = vadd.f32 %v2298_v43, %v1685_v23  ;;  %v3502_v0 = vpack.c.b16 %v3477_v61, %v3476_v60  ;;  %v2464_v23 = vsel %vm5473_vm7, %v2462_v3, %v2463_v37  ;;  %v3263_v33 = vor.u32 %v3262_v11, %v6220_v56  ;;  %v4792_v60 = vld [vmem:[%s5287_s11 + $0x78] sm:$0xf] }
 0x1d1   : > { %v1399_v9 = vadd.f32 %v1359_v7, %v1007_v14  ;;  %v1010_v14 = vadd.f32 %v1009_v35, %v5676_v45  ;;  %v2538_v7 = vunpack.c.l.b16 %v2464_v23  ;;  %v3254_v37 = vrot.slane %v3253_v58, 4  ;;  %v5111_v23 = vld [vmem:[%s5287_s11 + $0x70] sm:$0xf] }
 0x1d2   : > { %v3799_v45 = vrot.slane %v6197_v17, 5  ;;  %v3271_v35 = vshrl.u32 %v4792_v60, 16  ;;  %v3274_v11 = vshll.u32 %v4792_v60, 16  ;;  %v2467_v62 = vrot.slane %v5111_v23, 5 }
 0x1d3   : > { %v2562_v41 = vpack.c.b16 %v2538_v7, %v2537_v24  ;;  %v3259_v17 = vsel %vm5299_vm3, %v3254_v37, %v6220_v56  ;;  %v4630_v7 = vrot.slane %v4614_v16, 9  ;;  %v3282_v56 = vrot.slane %v3280_v10, 5 }
 0x1d4   : > { %v2300_v48 = vpop.f32.mrf.mxu0  ;;  %v3276_v60 = vrot.slane %v3274_v11, 5 }
 0x1d5   : > { %v1646_v28 = vpop.f32.mrf.mxu3  ;;  %4758 = vmatmul.msk.bf16.gmra.mxu2 %vm657_vm4, %v4925_v20  ;;  %v1011_v43 = vpop.f32.mrf.mxu1  ;;  %v3268_v20 = vrot.slane %v3266_v26, 5  ;;  %v3801_v26 = vrot.slane %v3799_v45, 4 }
 0x1d6   : > { %v1686_v49 = vadd.f32 %v1646_v28, %v1399_v9  ;;  %v3264_v9 = vrot.slane %v3263_v33, 4  ;;  %v3284_v28 = vshrl.u32 %v6237_v25, 16  ;;  %v1012_v33 = vadd.f32 %v1011_v43, %v5699_v12 }
 0x1d7   : > { %v3478_v12 = vunpack.c.l.b16 %v3259_v17 }
 0x1d8   : > { %v1362_v38 = vpop.f32.mrf.mxu2  ;;  %v6242_v3 = vadd.f32 %v2300_v48, %v1686_v49  ;;  %v4856_v48 = vrot.slane %v4840_v55, 9  ;;  %v3802_v49 = vrot.slane %v6225_v47, 5  ;;  %v4926_v55 = vld [vmem:[%s5287_s11 + $0x6c] sm:$0xff]  ;;  %v2469_v47 = vrot.slane %v2467_v62, 4 }
 0x1d9   : > { %v1400_v61 = vadd.f32 %v1362_v38, %v1010_v14  ;;  %v3269_v14 = vsel %vm5299_vm3, %v3264_v9, %v3268_v20  ;;  %v3273_v38 = vrot.slane %v3271_v35, 4  ;;  %v6262_v9 = vld [vmem:[%s5287_s11 + $0x80] sm:$0x1] }
 0x1da   : > { %4823 = vmatmul.msk.bf16.gmra.mxu3 %vm657_vm4, %v3502_v0  ;;  %v3479_v43 = vunpack.c.l.b16 %v3269_v14  ;;  %v3800_v35 = vsel %vm5473_vm7, %v4856_v48, %v3799_v45  ;;  %v3290_v17 = vshll.u32 %v6262_v9, 16 }
 0x1db   : > { %v3277_v11 = vor.u32 %v3276_v60, %v3273_v38 }
 0x1dc   : > { %v2303_v6 = vpop.f32.mrf.mxu0  ;;  %v3503_v48 = vpack.c.b16 %v3479_v43, %v3478_v12  ;;  %v3806_v12 = vrot.slane %v6237_v25, 5 }
 0x1dd   : > { %v1649_v0 = vpop.f32.mrf.mxu3  ;;  %v1014_v34 = vpop.f32.mrf.mxu1 }
 0x1de   : > { %v1687_v58 = vadd.f32 %v1649_v0, %v1400_v61  ;;  %v3286_v61 = vrot.slane %v3284_v28, 4  ;;  %v5112_v0 = vld [vmem:[%s5287_s11 + $0x74] sm:$0x1] }
 0x1df   : > { %4872 = vmatmul.msk.bf16.gmra.mxu0 %vm657_vm4, %v3900_v4  ;;  %v2470_v4 = vrot.slane %v5112_v0, 5 }
 0x1e0   : > { %v1364_v24 = vpop.f32.mrf.mxu2  ;;  %4646 = vmatmul.msk.bf16.gmra.mxu1 %vm657_vm4, %v2562_v41  ;;  %v6259_v23 = vadd.f32 %v2303_v6, %v1687_v58  ;;  %v3803_v41 = vsel %vm5473_vm7, %v3801_v26, %v3802_v49  ;;  %v2468_v6 = vsel %vm5473_vm7, %v4630_v7, %v2467_v62  ;;  %v3287_v58 = vor.u32 %v3286_v61, %v3282_v56  ;;  %v4795_v61 = vld [vmem:[%s5287_s11 + $0x84] sm:$0xf] }
 0x1e1   : > { %v1401_v37 = vadd.f32 %v1364_v24, %v1012_v33  ;;  %v2471_v16 = vsel %vm5473_vm7, %v2469_v47, %v2470_v4  ;;  %v1015_v49 = vadd.f32 %v1014_v34, %v5718_v59  ;;  %v3876_v33 = vunpack.c.l.b16 %v3800_v35  ;;  %v4841_v4 = vld [vmem:[%s5287_s11 + $0x78] sm:$0xe] }
 0x1e2   : > { %v3877_v14 = vunpack.c.l.b16 %v3803_v41  ;;  %v2539_v38 = vunpack.c.l.b16 %v2468_v6  ;;  %v2540_v24 = vunpack.c.l.b16 %v2471_v16  ;;  %v3278_v62 = vrot.slane %v3277_v11, 4  ;;  %v5113_v6 = vld [vmem:[%s5287_s11 + $0x7c] sm:$0xf] }
 0x1e3   : > { %v3288_v7 = vrot.slane %v3287_v58, 4  ;;  %v2474_v16 = vrot.slane %v5113_v6, 5  ;;  %v3295_v58 = vshrl.u32 %v4795_v61, 16 }
 0x1e4   : > { %v2305_v20 = vpop.f32.mrf.mxu0  ;;  %v3901_v47 = vpack.c.b16 %v3877_v14, %v3876_v33  ;;  %v2563_v34 = vpack.c.b16 %v2540_v24, %v2539_v38  ;;  %v3283_v41 = vsel %vm5299_vm3, %v3278_v62, %v3282_v56  ;;  %v4857_v56 = vrot.slane %v4841_v4, 9  ;;  %v4927_v62 = vld [vmem:[%s5287_s11 + $0x78] sm:$0xff] }
 0x1e5   : > { %v1651_v10 = vpop.f32.mrf.mxu3  ;;  %4759 = vmatmul.msk.bf16.gmra.mxu2 %vm657_vm4, %v4926_v55  ;;  %v1016_v28 = vpop.f32.mrf.mxu1  ;;  %v3292_v55 = vrot.slane %v3290_v17, 5  ;;  %v3298_v17 = vshll.u32 %v4795_v61, 16  ;;  %v3480_v14 = vunpack.c.l.b16 %v3283_v41  ;;  %v3808_v38 = vrot.slane %v3806_v12, 4 }
 0x1e6   : > { %v1688_v45 = vadd.f32 %v1651_v10, %v1401_v37  ;;  %v6278_v37 = vld [vmem:[%s5287_s11 + $0x88] sm:$0xf]  ;;  %v4615_v10 = vld [vmem:[%s5287_s11 + $0x78] sm:$0xe] }
 0x1e7   : > { %v3293_v11 = vsel %vm5299_vm3, %v3288_v7, %v3292_v55  ;;  %v3308_v25 = vshrl.u32 %v6278_v37, 16  ;;  %v4631_v24 = vrot.slane %v4615_v10, 9  ;;  %v2476_v7 = vrot.slane %v2474_v16, 4  ;;  %v5114_v55 = vld [vmem:[%s5287_s11 + $0x80] sm:$0x1] }
 0x1e8   : > { %v1367_v26 = vpop.f32.mrf.mxu2  ;;  %v6280_v0 = vadd.f32 %v2305_v20, %v1688_v45  ;;  %v3304_v45 = vshll.u32 %v6278_v37, 16  ;;  %v2477_v61 = vrot.slane %v5114_v55, 5  ;;  %v4798_v55 = vld [vmem:[%s5287_s11 + $0x90] sm:$0xf] }
 0x1e9   : > { %v1402_v60 = vadd.f32 %v1367_v26, %v1015_v49  ;;  %v3809_v49 = vrot.slane %v6262_v9, 5  ;;  %v3481_v26 = vunpack.c.l.b16 %v3293_v11  ;;  %v3310_v4 = vrot.slane %v3308_v25, 4  ;;  %v6301_v9 = vld [vmem:[%s5287_s11 + $0x8c] sm:$0x1] }
 0x1ea   : > { %4824 = vmatmul.msk.bf16.gmra.mxu3 %vm657_vm4, %v3503_v48  ;;  %v1017_v48 = vadd.f32 %v1016_v28, %v5735_v32  ;;  %v3300_v32 = vrot.slane %v3298_v17, 5  ;;  %v3306_v28 = vrot.slane %v3304_v45, 5 }
 0x1eb   : > { %v3810_v41 = vsel %vm5473_vm7, %v3808_v38, %v3809_v49  ;;  %v3504_v10 = vpack.c.b16 %v3481_v26, %v3480_v14 }
 0x1ec   : > { %v2308_v59 = vpop.f32.mrf.mxu0  ;;  %v3311_v45 = vor.u32 %v3310_v4, %v3306_v28 }
 0x1ed   : > { %v1654_v43 = vpop.f32.mrf.mxu3  ;;  %v2631_v35 = vpop.f32.mrf.mxu1 }
 0x1ee   : > { %v1689_v20 = vadd.f32 %v1654_v43, %v1402_v60  ;;  %v2711_v26 = vadd.f32 %v2631_v35, %v5752_v46  ;;  %v3312_v38 = vrot.slane %v3311_v45, 4 }
 0x1ef   : > { %4873 = vmatmul.msk.bf16.gmra.mxu0 %vm657_vm4, %v3901_v47  ;;  %v3297_v47 = vrot.slane %v3295_v58, 4  ;;  %v2478_v58 = vsel %vm5473_vm7, %v2476_v7, %v2477_v61  ;;  %v3813_v7 = vrot.slane %v6278_v37, 5 }
 0x1f0   : > { %v1369_v33 = vpop.f32.mrf.mxu2  ;;  %4647 = vmatmul.msk.bf16.gmra.mxu1 %vm657_vm4, %v2563_v34  ;;  %v6298_v43 = vadd.f32 %v2308_v59, %v1689_v20  ;;  %v3807_v34 = vsel %vm5473_vm7, %v4857_v56, %v3806_v12  ;;  %v2475_v59 = vsel %vm5473_vm7, %v4631_v24, %v2474_v16  ;;  %v3314_v12 = vshll.u32 %v6301_v9, 16 }
 0x1f1   : > { %v1403_v60 = vadd.f32 %v1369_v33, %v1017_v48  ;;  %v3301_v17 = vor.u32 %v3300_v32, %v3297_v47  ;;  %v3878_v25 = vunpack.c.l.b16 %v3807_v34  ;;  %v3879_v56 = vunpack.c.l.b16 %v3810_v41  ;;  %v5115_v34 = vld [vmem:[%s5287_s11 + $0x88] sm:$0xf] }
 0x1f2   : > { %v2541_v33 = vunpack.c.l.b16 %v2475_v59  ;;  %v2542_v14 = vunpack.c.l.b16 %v2478_v58  ;;  %v3316_v24 = vrot.slane %v3314_v12, 5  ;;  %v2481_v41 = vrot.slane %v5115_v34, 5  ;;  %v4616_v58 = vld [vmem:[%s5287_s11 + $0x84] sm:$0xe] }
 0x1f3   : > { %v3302_v16 = vrot.slane %v3301_v17, 4  ;;  %v3816_v59 = vrot.slane %v6301_v9, 5  ;;  %v3322_v17 = vshll.u32 %v4798_v55, 16  ;;  %v3815_v12 = vrot.slane %v3813_v7, 4 }
 0x1f4   : > { %v2310_v6 = vpop.f32.mrf.mxu0  ;;  %v2564_v4 = vpack.c.b16 %v2542_v14, %v2541_v33  ;;  %v2483_v33 = vrot.slane %v2481_v41, 4  ;;  %v5116_v14 = vld [vmem:[%s5287_s11 + $0x8c] sm:$0x1] }
 0x1f5   : > { %v1656_v11 = vpop.f32.mrf.mxu3  ;;  %4760 = vmatmul.msk.bf16.gmra.mxu2 %vm657_vm4, %v4927_v62  ;;  %v2633_v48 = vpop.f32.mrf.mxu1  ;;  %v3902_v62 = vpack.c.b16 %v3879_v56, %v3878_v25  ;;  %v3307_v37 = vsel %vm5299_vm3, %v3302_v16, %v3306_v28  ;;  %v4632_v28 = vrot.slane %v4616_v58, 9  ;;  %v4928_v16 = vld [vmem:[%s5287_s11 + $0x84] sm:$0xff] }
 0x1f6   : > { %v1690_v20 = vadd.f32 %v1656_v11, %v1403_v60  ;;  %v4842_v60 = vld [vmem:[%s5287_s11 + $0x84] sm:$0xe]  ;;  %v6322_v11 = vld [vmem:[%s5287_s11 + $0x94] sm:$0xf]  ;;  %v2712_v45 = vadd.f32 %v2633_v48, %v5765_v42 }
 0x1f7   : > { %v3328_v25 = vshll.u32 %v6322_v11, 16  ;;  %v3332_v9 = vshrl.u32 %v6322_v11, 16 }
 0x1f8   : > { %v2918_v49 = vpop.f32.mrf.mxu2  ;;  %v6318_v61 = vadd.f32 %v2310_v6, %v1690_v20  ;;  %v3317_v6 = vsel %vm5299_vm3, %v3312_v38, %v3316_v24  ;;  %v3319_v20 = vshrl.u32 %v4798_v55, 16  ;;  %v3482_v38 = vunpack.c.l.b16 %v3307_v37  ;;  %v6353_v37 = vld [vmem:[%s5287_s11 + $0x98] sm:$0x1] }
 0x1f9   : > { %v2998_v32 = vadd.f32 %v2918_v49, %v2711_v26  ;;  %v2484_v26 = vrot.slane %v5116_v14, 5  ;;  %v3483_v48 = vunpack.c.l.b16 %v3317_v6  ;;  %v3817_v55 = vsel %vm5473_vm7, %v3815_v12, %v3816_v59 }
 0x1fa   : > { %4825 = vmatmul.msk.bf16.gmra.mxu3 %vm657_vm4, %v3504_v10  ;;  %v4858_v10 = vrot.slane %v4842_v60, 9  ;;  %v3321_v60 = vrot.slane %v3319_v20, 4 }
 0x1fc   : > { %v3970_v47 = vpop.f32.mrf.mxu0  ;;  %v3814_v24 = vsel %vm5473_vm7, %v4858_v10, %v3813_v7  ;;  %v2482_v7 = vsel %vm5473_vm7, %v4632_v28, %v2481_v41  ;;  %v2485_v10 = vsel %vm5473_vm7, %v2483_v33, %v2484_v26 }
 0x1fd   : > { %v3572_v46 = vpop.f32.mrf.mxu3  ;;  %v2636_v35 = vpop.f32.mrf.mxu1  ;;  %v3880_v59 = vunpack.c.l.b16 %v3814_v24  ;;  %v2544_v41 = vunpack.c.l.b16 %v2485_v10  ;;  %v4801_v24 = vld [vmem:[%s5287_s11 + $0x9c] sm:$0xf] }
 0x1fe   : > { %v3652_v56 = vadd.f32 %v3572_v46, %v2998_v32  ;;  %v6341_v32 = vrot.slane %v3328_v25, 5  ;;  %v6346_v46 = vld [vmem:[%s6677_s2] ss:$0 sm:$0xff]  ;;  %v2543_v25 = vunpack.c.l.b16 %v2482_v7  ;;  %v2713_v26 = vadd.f32 %v2636_v35, %v5778_v15 }
 0x1ff   : > { %4874 = vmatmul.msk.bf16.gmra.mxu0 %vm657_vm4, %v3902_v62  ;;  %v3324_v62 = vrot.slane %v3322_v17, 5  ;;  %v3505_v17 = vpack.c.b16 %v3483_v48, %v3482_v38 }
 0x200   : > { %v2920_v49 = vpop.f32.mrf.mxu2  ;;  %4648 = vmatmul.msk.bf16.gmra.mxu1 %vm657_vm4, %v2564_v4  ;;  %v3334_v4 = vrot.slane %v3332_v9, 4  ;;  %v4050_v34 = vadd.f32 %v3970_v47, %v3652_v56  ;;  %v3338_v56 = vshll.u32 %v6353_v37, 16  ;;  %v2565_v48 = vpack.c.b16 %v2544_v41, %v2543_v25 }
 0x201   : > { %v2999_v42 = vadd.f32 %v2920_v49, %v2712_v45  ;;  %v3881_v45 = vunpack.c.l.b16 %v3817_v55  ;;  %v3325_v12 = vor.u32 %v3324_v62, %v3321_v60  ;;  %v4843_v55 = vld [vmem:[%s5287_s11 + $0x90] sm:$0xe] }
 0x202   : > { %v3335_v9 = vor.u32 %v3334_v4, %v6341_v32  ;;  %v4086_v49 = vadd.f32 %v6346_v46, %v4050_v34  ;;  %v3340_v62 = vrot.slane %v3338_v56, 5  ;;  %v3820_v4 = vrot.slane %v6322_v11, 5 }
 0x203   : > { %v3326_v38 = vrot.slane %v3325_v12, 4  ;;  %v3823_v11 = vrot.slane %v6353_v37, 5 }
 0x204   : > { %v3972_v58 = vpop.f32.mrf.mxu0  ;;  %v3336_v60 = vrot.slane %v3335_v9, 4  ;;  %v4118_v34 = vmax.f32 %v4086_v49, 0.0  ;;  %v4859_v9 = vrot.slane %v4843_v55, 9 }
 0x205   : > { %v3574_v6 = vpop.f32.mrf.mxu3  ;;  %4761 = vmatmul.msk.bf16.gmra.mxu2 %vm657_vm4, %v4928_v16  ;;  %v2638_v47 = vpop.f32.mrf.mxu1  ;;  %v3903_v16 = vpack.c.b16 %v3881_v45, %v3880_v59  ;;  %v3346_v45 = vshll.u32 %v4801_v24, 16  ;;  %v3331_v49 = vsel %vm5299_vm3, %v3326_v38, %v6341_v32 }
 0x206   : > { %v3653_v20 = vadd.f32 %v3574_v6, %v2999_v42  ;;  %v6369_v42 = vld [vmem:[%s5287_s11 + $0xa0] sm:$0xf]  ;;  %v5117_v6 = vld [vmem:[%s5287_s11 + $0x94] sm:$0xf]  ;;  %v2714_v56 = vadd.f32 %v2638_v47, %v5791_v13  ;;  %v5118_v13 = vld [vmem:[%s5287_s11 + $0x98] sm:$0x1] }
 0x207   : > { %v2488_v15 = vrot.slane %v5117_v6, 5  ;;  %v3352_v12 = vshll.u32 %v6369_v42, 16  ;;  %v3356_v25 = vshrl.u32 %v6369_v42, 16  ;;  %v2491_v47 = vrot.slane %v5118_v13, 5  ;;  %v6397_v6 = vld [vmem:[%s5287_s11 + $0xa4] sm:$0x1] }
 0x208   : > { %v4051_v28 = vadd.f32 %v3972_v58, %v3653_v20  ;;  %v2923_v33 = vpop.f32.mrf.mxu2  ;;  %v4617_v20 = vld [vmem:[%s5287_s11 + $0x90] sm:$0xe]  ;;  %v3348_v32 = vrot.slane %v3346_v45, 5 }
 0x209   : > { %v3000_v10 = vadd.f32 %v2923_v33, %v2713_v26  ;;  %v3822_v33 = vrot.slane %v3820_v4, 4  ;;  %v4633_v37 = vrot.slane %v4617_v20, 9  ;;  %v6392_v38 = vrot.slane %v3352_v12, 5 }
 0x20a   : > { %v4087_v14 = vadd.f32 %v6346_v46, %v4051_v28  ;;  %4826 = vmatmul.msk.bf16.gmra.mxu3 %vm657_vm4, %v3505_v17  ;;  %v3343_v17 = vshrl.u32 %v4801_v24, 16  ;;  %v3341_v28 = vsel %vm5299_vm3, %v3336_v60, %v3340_v62  ;;  %v4929_v24 = vld [vmem:[%s5287_s11 + $0x90] sm:$0xff]  ;;  %v3358_v60 = vrot.slane %v3356_v25, 4 }
 0x20b   : > { %v3824_v20 = vsel %vm5473_vm7, %v3822_v33, %v3823_v11 }
 0x20c   : > { %v4119_v58 = vmax.f32 %v4087_v14, 0.0  ;;  %v3975_v7 = vpop.f32.mrf.mxu0  ;;  %v3345_v55 = vrot.slane %v3343_v17, 4  ;;  %v2489_v17 = vsel %vm5473_vm7, %v4633_v37, %v2488_v15  ;;  %v4804_v37 = vld [vmem:[%s5287_s11 + $0xa8] sm:$0xf] }
 0x20d   : > { %v3577_v35 = vpop.f32.mrf.mxu3  ;;  %v2641_v59 = vpop.f32.mrf.mxu1 }
 0x20e   : > { %v4939_v41 = vpack.c.bf16 %v4119_v58, %v4118_v34  ;;  %v3654_v14 = vadd.f32 %v3577_v35, %v3000_v10  ;;  %v3484_v34 = vunpack.c.l.b16 %v3331_v49  ;;  %v3485_v58 = vunpack.c.l.b16 %v3341_v28 }
 0x20f   : > { %4875 = vmatmul.msk.bf16.gmra.mxu0 %vm657_vm4, %v3903_v16  ;;  %v2490_v16 = vrot.slane %v2488_v15, 4  ;;  %v3821_v10 = vsel %vm5473_vm7, %v4859_v9, %v3820_v4  ;;  %v3359_v4 = vor.u32 %v3358_v60, %v6392_v38  ;;  %v3883_v49 = vunpack.c.l.b16 %v3824_v20 }
 0x210   : > { %4940 = vst [vmem:[%s6386_s6] sm:$0xff] %v4939_v41   ;;  %v2925_v26 = vpop.f32.mrf.mxu2  ;;  %4649 = vmatmul.msk.bf16.gmra.mxu1 %vm657_vm4, %v2565_v48  ;;  %v4052_v35 = vadd.f32 %v3975_v7, %v3654_v14  ;;  %v3349_v41 = vor.u32 %v3348_v32, %v3345_v55  ;;  %v3506_v7 = vpack.c.b16 %v3485_v58, %v3484_v34  ;;  %v3882_v11 = vunpack.c.l.b16 %v3821_v10  ;;  %v4844_v32 = vld [vmem:[%s5287_s11 + $0x9c] sm:$0xe] }
 0x211   : > { %v3001_v62 = vadd.f32 %v2925_v26, %v2714_v56  ;;  %v2492_v45 = vsel %vm5473_vm7, %v2490_v16, %v2491_v47  ;;  %v3362_v56 = vshll.u32 %v6397_v6, 16  ;;  %v2545_v15 = vunpack.c.l.b16 %v2489_v17 }
 0x212   : > { %v2546_v28 = vunpack.c.l.b16 %v2492_v45  ;;  %v4088_v33 = vadd.f32 %v6346_v46, %v4052_v35  ;;  %v3350_v16 = vrot.slane %v3349_v41, 4  ;;  %v3360_v13 = vrot.slane %v3359_v4, 4 }
 0x213   : > { %v3364_v55 = vrot.slane %v3362_v56, 5  ;;  %v3827_v60 = vrot.slane %v6369_v42, 5  ;;  %v3904_v34 = vpack.c.b16 %v3883_v49, %v3882_v11  ;;  %v3367_v10 = vshrl.u32 %v4804_v37, 16 }
 0x214   : > { %v3977_v48 = vpop.f32.mrf.mxu0  ;;  %v2566_v58 = vpack.c.b16 %v2546_v28, %v2545_v15  ;;  %v3370_v35 = vshll.u32 %v4804_v37, 16  ;;  %v4860_v4 = vrot.slane %v4844_v32, 9  ;;  %v3355_v11 = vsel %vm5299_vm3, %v3350_v16, %v6392_v38 }
 0x215   : > { %v3579_v12 = vpop.f32.mrf.mxu3  ;;  %4762 = vmatmul.msk.bf16.gmra.mxu2 %vm657_vm4, %v4929_v24  ;;  %v2643_v25 = vpop.f32.mrf.mxu1  ;;  %v2715_v24 = vadd.f32 %v2641_v59, %v5804_v57  ;;  %v3365_v49 = vsel %vm5299_vm3, %v3360_v13, %v3364_v55  ;;  %v3829_v15 = vrot.slane %v3827_v60, 4  ;;  %v4930_v13 = vld [vmem:[%s5287_s11 + $0x9c] sm:$0xff] }
 0x216   : > { %v3655_v9 = vadd.f32 %v3579_v12, %v3001_v62  ;;  %v6416_v62 = vld [vmem:[%s5287_s11 + $0xac] sm:$0xf]  ;;  %v5119_v12 = vld [vmem:[%s5287_s11 + $0xa0] sm:$0xf]  ;;  %v2716_v28 = vadd.f32 %v2643_v25, %v5817_v54  ;;  %v3487_v54 = vunpack.c.l.b16 %v3365_v49  ;;  %v6435_v25 = vld [vmem:[%s5287_s11 + $0xb0] sm:$0x1] }
 0x217   : > { %v2495_v41 = vrot.slane %v5119_v12, 5  ;;  %v3380_v42 = vshrl.u32 %v6416_v62, 16 }
 0x218   : > { %v4053_v14 = vadd.f32 %v3977_v48, %v3655_v9  ;;  %v2928_v26 = vpop.f32.mrf.mxu2  ;;  %v4120_v48 = vmax.f32 %v4088_v33, 0.0  ;;  %v4618_v9 = vld [vmem:[%s5287_s11 + $0x9c] sm:$0xe]  ;;  %v3830_v33 = vrot.slane %v6397_v6, 5  ;;  %v3828_v6 = vsel %vm5473_vm7, %v4860_v4, %v3827_v60 }
 0x219   : > { %v3002_v45 = vadd.f32 %v2928_v26, %v2715_v24  ;;  %v3372_v26 = vrot.slane %v3370_v35, 5  ;;  %v4634_v38 = vrot.slane %v4618_v9, 9  ;;  %v2497_v16 = vrot.slane %v2495_v41, 4  ;;  %v5120_v24 = vld [vmem:[%s5287_s11 + $0xa4] sm:$0x1] }
 0x21a   : > { %v4089_v47 = vadd.f32 %v6346_v46, %v4053_v14  ;;  %4827 = vmatmul.msk.bf16.gmra.mxu3 %vm657_vm4, %v3506_v7  ;;  %v3376_v7 = vshll.u32 %v6416_v62, 16  ;;  %v3369_v14 = vrot.slane %v3367_v10, 4  ;;  %v2498_v32 = vrot.slane %v5120_v24, 5 }
 0x21b   : > { %v2496_v12 = vsel %vm5473_vm7, %v4634_v38, %v2495_v41  ;;  %v3386_v60 = vshll.u32 %v6435_v25, 16  ;;  %v3834_v38 = vrot.slane %v6416_v62, 5 }
 0x21c   : > { %v4121_v20 = vmax.f32 %v4089_v47, 0.0  ;;  %v3980_v17 = vpop.f32.mrf.mxu0  ;;  %v3378_v55 = vrot.slane %v3376_v7, 5  ;;  %v3373_v10 = vor.u32 %v3372_v26, %v3369_v14  ;;  %v2547_v49 = vunpack.c.l.b16 %v2496_v12  ;;  %v4845_v26 = vld [vmem:[%s5287_s11 + $0xa8] sm:$0xe] }
 0x21d   : > { %v3582_v57 = vpop.f32.mrf.mxu3  ;;  %v2646_v59 = vpop.f32.mrf.mxu1 }
 0x21e   : > { %v4944_v56 = vpack.c.bf16 %v4121_v20, %v4120_v48  ;;  %v3656_v37 = vadd.f32 %v3582_v57, %v3002_v45  ;;  %v3382_v48 = vrot.slane %v3380_v42, 4  ;;  %v3486_v20 = vunpack.c.l.b16 %v3355_v11 }
 0x21f   : > { %4876 = vmatmul.msk.bf16.gmra.mxu0 %vm657_vm4, %v3904_v34  ;;  %v2499_v57 = vsel %vm5473_vm7, %v2497_v16, %v2498_v32  ;;  %v2717_v24 = vadd.f32 %v2646_v59, %v5829_v31  ;;  %v4807_v32 = vld [vmem:[%s5287_s11 + $0xb4] sm:$0xf] }
 0x220   : > { %5016 = vst [vmem:[%s6386_s6 + $0x8] sm:$0xff] %v4944_v56   ;;  %v2930_v47 = vpop.f32.mrf.mxu2  ;;  %4650 = vmatmul.msk.bf16.gmra.mxu1 %vm657_vm4, %v2566_v58  ;;  %v4054_v35 = vadd.f32 %v3980_v17, %v3656_v37  ;;  %v3831_v58 = vsel %vm5473_vm7, %v3829_v15, %v3830_v33  ;;  %v3383_v42 = vor.u32 %v3382_v48, %v3378_v55  ;;  %v3884_v56 = vunpack.c.l.b16 %v3828_v6 }
 0x221   : > { %v3003_v34 = vadd.f32 %v2930_v47, %v2716_v28  ;;  %v3507_v17 = vpack.c.b16 %v3487_v54, %v3486_v20  ;;  %v3885_v11 = vunpack.c.l.b16 %v3831_v58  ;;  %v2548_v15 = vunpack.c.l.b16 %v2499_v57  ;;  %v6457_v54 = vld [vmem:[%s5287_s11 + $0xb8] sm:$0xf] }
 0x222   : > { %v3374_v28 = vrot.slane %v3373_v10, 4  ;;  %v4090_v41 = vadd.f32 %v6346_v46, %v4054_v35  ;;  %v3384_v37 = vrot.slane %v3383_v42, 4  ;;  %v3388_v47 = vrot.slane %v3386_v60, 5 }
 0x223   : > { %v2567_v48 = vpack.c.b16 %v2548_v15, %v2547_v49  ;;  %v4861_v20 = vrot.slane %v4845_v26, 9  ;;  %v3836_v57 = vrot.slane %v3834_v38, 4  ;;  %v3391_v42 = vshrl.u32 %v4807_v32, 16 }
 0x224   : > { %v3982_v45 = vpop.f32.mrf.mxu0  ;;  %v4122_v6 = vmax.f32 %v4090_v41, 0.0  ;;  %v3389_v12 = vsel %vm5299_vm3, %v3384_v37, %v3388_v47 }
 0x225   : > { %v3584_v9 = vpop.f32.mrf.mxu3  ;;  %4763 = vmatmul.msk.bf16.gmra.mxu2 %vm657_vm4, %v4930_v13  ;;  %v2648_v7 = vpop.f32.mrf.mxu1  ;;  %v3905_v13 = vpack.c.b16 %v3885_v11, %v3884_v56  ;;  %v3404_v56 = vshrl.u32 %v6457_v54, 16  ;;  %v3489_v37 = vunpack.c.l.b16 %v3389_v12  ;;  %v3835_v47 = vsel %vm5473_vm7, %v4861_v20, %v3834_v38 }
 0x226   : > { %v3657_v4 = vadd.f32 %v3584_v9, %v3003_v34  ;;  %v3379_v34 = vsel %vm5299_vm3, %v3374_v28, %v3378_v55  ;;  %v4619_v9 = vld [vmem:[%s5287_s11 + $0xa8] sm:$0xe]  ;;  %v3394_v55 = vshll.u32 %v4807_v32, 16  ;;  %v2718_v11 = vadd.f32 %v2648_v7, %v5842_v44 }
 0x227   : > { %v3488_v49 = vunpack.c.l.b16 %v3379_v34  ;;  %v4635_v41 = vrot.slane %v4619_v9, 9  ;;  %v6479_v34 = vld [vmem:[%s5287_s11 + $0xbc] sm:$0x1]  ;;  %v3886_v20 = vunpack.c.l.b16 %v3835_v47 }
 0x228   : > { %v4055_v33 = vadd.f32 %v3982_v45, %v3657_v4  ;;  %v2933_v14 = vpop.f32.mrf.mxu2  ;;  %v5121_v45 = vld [vmem:[%s5287_s11 + $0xac] sm:$0xf]  ;;  %v3837_v4 = vrot.slane %v6435_v25, 5 }
 0x229   : > { %v3004_v62 = vadd.f32 %v2933_v14, %v2717_v24  ;;  %v2502_v58 = vrot.slane %v5121_v45, 5  ;;  %v5122_v14 = vld [vmem:[%s5287_s11 + $0xb0] sm:$0x1]  ;;  %v4931_v25 = vld [vmem:[%s5287_s11 + $0xa8] sm:$0xff]  ;;  %v3396_v24 = vrot.slane %v3394_v55, 5  ;;  %v3508_v9 = vpack.c.b16 %v3489_v37, %v3488_v49 }
 0x22a   : > { %v4091_v16 = vadd.f32 %v6346_v46, %v4055_v33  ;;  %4828 = vmatmul.msk.bf16.gmra.mxu3 %vm657_vm4, %v3507_v17  ;;  %v3400_v17 = vshll.u32 %v6457_v54, 16  ;;  %v2505_v26 = vrot.slane %v5122_v14, 5  ;;  %v3838_v44 = vsel %vm5473_vm7, %v3836_v57, %v3837_v4 }
 0x22b   : > { %v2504_v33 = vrot.slane %v2502_v58, 4  ;;  %v3887_v45 = vunpack.c.l.b16 %v3838_v44  ;;  %v3841_v37 = vrot.slane %v6457_v54, 5 }
 0x22c   : > { %v4123_v10 = vmax.f32 %v4091_v16, 0.0  ;;  %v3985_v35 = vpop.f32.mrf.mxu0  ;;  %v3393_v16 = vrot.slane %v3391_v42, 4  ;;  %v6476_v7 = vrot.slane %v3400_v17, 5  ;;  %v3410_v42 = vshll.u32 %v6479_v34, 16 }
 0x22d   : > { %v3587_v31 = vpop.f32.mrf.mxu3  ;;  %v2651_v59 = vpop.f32.mrf.mxu1 }
 0x22e   : > { %v4949_v60 = vpack.c.bf16 %v4123_v10, %v4122_v6  ;;  %v3658_v15 = vadd.f32 %v3587_v31, %v3004_v62  ;;  %v2503_v10 = vsel %vm5473_vm7, %v4635_v41, %v2502_v58  ;;  %v2506_v62 = vsel %vm5473_vm7, %v2504_v33, %v2505_v26 }
 0x22f   : > { %4877 = vmatmul.msk.bf16.gmra.mxu0 %vm657_vm4, %v3905_v13  ;;  %v3406_v13 = vrot.slane %v3404_v56, 4  ;;  %v3397_v12 = vor.u32 %v3396_v24, %v3393_v16  ;;  %v2549_v58 = vunpack.c.l.b16 %v2503_v10  ;;  %v2550_v55 = vunpack.c.l.b16 %v2506_v62  ;;  %v4810_v56 = vld [vmem:[%s5287_s11 + $0xc0] sm:$0xf] }
 0x230   : > { %5017 = vst [vmem:[%s6386_s6 + $0x10] sm:$0xff] %v4949_v60   ;;  %v2935_v28 = vpop.f32.mrf.mxu2  ;;  %4651 = vmatmul.msk.bf16.gmra.mxu1 %vm657_vm4, %v2567_v48  ;;  %v4056_v48 = vadd.f32 %v3985_v35, %v3658_v15  ;;  %v2719_v49 = vadd.f32 %v2651_v59, %v5856_v30  ;;  %v3412_v14 = vrot.slane %v3410_v42, 5  ;;  %v3415_v47 = vshrl.u32 %v4810_v56, 16 }
 0x231   : > { %v3005_v32 = vadd.f32 %v2935_v28, %v2718_v11  ;;  %v3407_v35 = vor.u32 %v3406_v13, %v6476_v7  ;;  %v3906_v11 = vpack.c.b16 %v3887_v45, %v3886_v20  ;;  %v3398_v15 = vrot.slane %v3397_v12, 4  ;;  %v6491_v28 = vld [vmem:[%s5287_s11 + $0xc4] sm:$0xf]  ;;  %v4620_v45 = vld [vmem:[%s5287_s11 + $0xb4] sm:$0xe] }
 0x232   : > { %v4092_v60 = vadd.f32 %v6346_v46, %v4056_v48  ;;  %v2568_v26 = vpack.c.b16 %v2550_v55, %v2549_v58  ;;  %v3418_v16 = vshll.u32 %v4810_v56, 16  ;;  %v3424_v48 = vshll.u32 %v6491_v28, 16 }
 0x233   : > { %v3408_v33 = vrot.slane %v3407_v35, 4  ;;  %v3428_v62 = vshrl.u32 %v6491_v28, 16  ;;  %v3403_v54 = vsel %vm5299_vm3, %v3398_v15, %v6476_v7  ;;  %v3417_v35 = vrot.slane %v3415_v47, 4 }
 0x234   : > { %v3987_v6 = vpop.f32.mrf.mxu0  ;;  %v4124_v24 = vmax.f32 %v4092_v60, 0.0  ;;  %v3420_v7 = vrot.slane %v3418_v16, 5  ;;  %v6512_v60 = vrot.slane %v3424_v48, 5 }
 0x235   : > { %v3589_v38 = vpop.f32.mrf.mxu3  ;;  %4764 = vmatmul.msk.bf16.gmra.mxu2 %vm657_vm4, %v4931_v25  ;;  %v2653_v31 = vpop.f32.mrf.mxu1  ;;  %v4846_v25 = vld [vmem:[%s5287_s11 + $0xb4] sm:$0xe]  ;;  %v3413_v12 = vsel %vm5299_vm3, %v3408_v33, %v3412_v14  ;;  %v6517_v14 = vld [vmem:[%s5287_s11 + $0xc8] sm:$0x1] }
 0x236   : > { %v3659_v57 = vadd.f32 %v3589_v38, %v3005_v32  ;;  %v4862_v20 = vrot.slane %v4846_v25, 9  ;;  %v2720_v58 = vadd.f32 %v2653_v31, %v5869_v51  ;;  %v3491_v33 = vunpack.c.l.b16 %v3413_v12 }
 0x238   : > { %v4057_v4 = vadd.f32 %v3987_v6, %v3659_v57  ;;  %v2938_v17 = vpop.f32.mrf.mxu2  ;;  %v5123_v6 = vld [vmem:[%s5287_s11 + $0xb8] sm:$0xf]  ;;  %v3843_v57 = vrot.slane %v3841_v37, 4  ;;  %v3842_v51 = vsel %vm5473_vm7, %v4862_v20, %v3841_v37  ;;  %v3434_v37 = vshll.u32 %v6517_v14, 16 }
 0x239   : > { %v3006_v13 = vadd.f32 %v2938_v17, %v2719_v49  ;;  %v2509_v10 = vrot.slane %v5123_v6, 5  ;;  %v4636_v17 = vrot.slane %v4620_v45, 9  ;;  %v3888_v6 = vunpack.c.l.b16 %v3842_v51 }
 0x23a   : > { %v4093_v41 = vadd.f32 %v6346_v46, %v4057_v4  ;;  %4829 = vmatmul.msk.bf16.gmra.mxu3 %vm657_vm4, %v3508_v9  ;;  %v3844_v9 = vrot.slane %v6479_v34, 5  ;;  %v4932_v4 = vld [vmem:[%s5287_s11 + $0xb4] sm:$0xff]  ;;  %v3490_v34 = vunpack.c.l.b16 %v3403_v54 }
 0x23b   : > { %v2511_v56 = vrot.slane %v2509_v10, 4 }
 0x23c   : > { %v4125_v32 = vmax.f32 %v4093_v41, 0.0  ;;  %v3990_v44 = vpop.f32.mrf.mxu0  ;;  %v3430_v41 = vrot.slane %v3428_v62, 4  ;;  %v3845_v31 = vsel %vm5473_vm7, %v3843_v57, %v3844_v9 }
 0x23d   : > { %v3592_v30 = vpop.f32.mrf.mxu3  ;;  %v2656_v59 = vpop.f32.mrf.mxu1  ;;  %v3889_v62 = vunpack.c.l.b16 %v3845_v31 }
 0x23e   : > { %v4954_v38 = vpack.c.bf16 %v4125_v32, %v4124_v24  ;;  %v3660_v42 = vadd.f32 %v3592_v30, %v3006_v13  ;;  %v2510_v24 = vsel %vm5473_vm7, %v4636_v17, %v2509_v10  ;;  %v3421_v13 = vor.u32 %v3420_v7, %v3417_v35 }
 0x23f   : > { %4878 = vmatmul.msk.bf16.gmra.mxu0 %vm657_vm4, %v3906_v11  ;;  %v5124_v11 = vld [vmem:[%s5287_s11 + $0xbc] sm:$0x1]  ;;  %v3509_v30 = vpack.c.b16 %v3491_v33, %v3490_v34  ;;  %v2551_v45 = vunpack.c.l.b16 %v2510_v24  ;;  %v2721_v35 = vadd.f32 %v2656_v59, %v5885_v1  ;;  %v3907_v7 = vpack.c.b16 %v3889_v62, %v3888_v6  ;;  %v4621_v24 = vld [vmem:[%s5287_s11 + $0xc0] sm:$0xe] }
 0x240   : > { %5018 = vst [vmem:[%s6386_s6 + $0x18] sm:$0xff] %v4954_v38   ;;  %v2940_v55 = vpop.f32.mrf.mxu2  ;;  %4652 = vmatmul.msk.bf16.gmra.mxu1 %vm657_vm4, %v2568_v26  ;;  %v2512_v15 = vrot.slane %v5124_v11, 5  ;;  %v4058_v25 = vadd.f32 %v3990_v44, %v3660_v42  ;;  %v3431_v44 = vor.u32 %v3430_v41, %v6512_v60  ;;  %v3422_v12 = vrot.slane %v3421_v13, 4  ;;  %v4813_v41 = vld [vmem:[%s5287_s11 + $0xcc] sm:$0xf]  ;;  %v4933_v62 = vld [vmem:[%s5287_s11 + $0xc0] sm:$0xff] }
 0x241   : > { %v3007_v49 = vadd.f32 %v2940_v55, %v2720_v58  ;;  %v3436_v42 = vrot.slane %v3434_v37, 5  ;;  %v4847_v58 = vld [vmem:[%s5287_s11 + $0xc0] sm:$0xe]  ;;  %v3848_v55 = vrot.slane %v6491_v28, 5  ;;  %v3442_v13 = vshll.u32 %v4813_v41, 16 }
 0x242   : > { %v2513_v32 = vsel %vm5473_vm7, %v2511_v56, %v2512_v15  ;;  %v4094_v38 = vadd.f32 %v6346_v46, %v4058_v25  ;;  %v3432_v57 = vrot.slane %v3431_v44, 4  ;;  %v3427_v59 = vsel %vm5299_vm3, %v3422_v12, %v6512_v60  ;;  %v5125_v25 = vld [vmem:[%s5287_s11 + $0xc4] sm:$0xf] }
 0x243   : > { %v2552_v10 = vunpack.c.l.b16 %v2513_v32  ;;  %v4863_v33 = vrot.slane %v4847_v58, 9  ;;  %v2516_v28 = vrot.slane %v5125_v25, 5  ;;  %v3850_v31 = vrot.slane %v3848_v55, 4 }
 0x244   : > { %v3992_v47 = vpop.f32.mrf.mxu0  ;;  %v3437_v51 = vsel %vm5299_vm3, %v3432_v57, %v3436_v42  ;;  %v3439_v32 = vshrl.u32 %v4813_v41, 16 }
 0x245   : > { %v3594_v26 = vpop.f32.mrf.mxu3  ;;  %4765 = vmatmul.msk.bf16.gmra.mxu2 %vm657_vm4, %v4932_v4  ;;  %v2658_v16 = vpop.f32.mrf.mxu1  ;;  %v4126_v4 = vmax.f32 %v4094_v38, 0.0  ;;  %v2569_v15 = vpack.c.b16 %v2552_v10, %v2551_v45  ;;  %v4637_v38 = vrot.slane %v4621_v24, 9  ;;  %v3493_v12 = vunpack.c.l.b16 %v3437_v51 }
 0x246   : > { %v3661_v48 = vadd.f32 %v3594_v26, %v3007_v49  ;;  %v6538_v49 = vld [vmem:[%s5287_s11 + $0xd0] sm:$0xf]  ;;  %v3851_v26 = vrot.slane %v6517_v14, 5  ;;  %v3492_v14 = vunpack.c.l.b16 %v3427_v59  ;;  %v3849_v57 = vsel %vm5473_vm7, %v4863_v33, %v3848_v55 }
 0x247   : > { %v3448_v44 = vshll.u32 %v6538_v49, 16  ;;  %v3452_v60 = vshrl.u32 %v6538_v49, 16  ;;  %v2517_v41 = vsel %vm5473_vm7, %v4637_v38, %v2516_v28  ;;  %v3890_v33 = vunpack.c.l.b16 %v3849_v57 }
 0x248   : > { %v4059_v54 = vadd.f32 %v3992_v47, %v3661_v48  ;;  %v2943_v20 = vpop.f32.mrf.mxu2  ;;  %v3510_v59 = vpack.c.b16 %v3493_v12, %v3492_v14 }
 0x249   : > { %v3008_v11 = vadd.f32 %v2943_v20, %v2721_v35  ;;  %v5126_v20 = vld [vmem:[%s5287_s11 + $0xc8] sm:$0x1]  ;;  %v3441_v35 = vrot.slane %v3439_v32, 4  ;;  %v3450_v42 = vrot.slane %v3448_v44, 5  ;;  %v3454_v58 = vrot.slane %v3452_v60, 4 }
 0x24a   : > { %v4095_v9 = vadd.f32 %v6346_v46, %v4059_v54  ;;  %4830 = vmatmul.msk.bf16.gmra.mxu3 %vm657_vm4, %v3509_v30  ;;  %v6687_v30 = vld [vmem:[#allocation5_spill] sm:$0xff]  ;;  %v2518_v54 = vrot.slane %v2516_v28, 4  ;;  %v2519_v45 = vrot.slane %v5126_v20, 5  ;;  %v2553_v32 = vunpack.c.l.b16 %v2517_v41 }
 0x24b   : > { %v2722_v37 = vadd.f32 %v2658_v16, %v6687_v30  ;;  %v3444_v16 = vrot.slane %v3442_v13, 5  ;;  %v3455_v51 = vor.u32 %v3454_v58, %v3450_v42 }
 0x24c   : > { %v4127_v17 = vmax.f32 %v4095_v9, 0.0  ;;  %v3995_v56 = vpop.f32.mrf.mxu0  ;;  %v3852_v9 = vsel %vm5473_vm7, %v3850_v31, %v3851_v26  ;;  %v2520_v55 = vsel %vm5473_vm7, %v2518_v54, %v2519_v45  ;;  %v4848_v45 = vld [vmem:[%s5287_s11 + $0xcc] sm:$0xe] }
 0x24d   : > { %v3597_v34 = vpop.f32.mrf.mxu3  ;;  %v2661_v1 = vpop.f32.mrf.mxu1  ;;  %v3891_v25 = vunpack.c.l.b16 %v3852_v9  ;;  %v2554_v13 = vunpack.c.l.b16 %v2520_v55  ;;  %v3456_v30 = vrot.slane %v3455_v51, 4  ;;  %v4864_v9 = vrot.slane %v4848_v45, 9 }
 0x24e   : > { %v4959_v47 = vpack.c.bf16 %v4127_v17, %v4126_v4  ;;  %v3662_v48 = vadd.f32 %v3597_v34, %v3008_v11  ;;  %v4815_v17 = vld [vmem:[%s5287_s11 + $0xd4] sm:$0x1]  ;;  %v2723_v28 = vadd.f32 %v2661_v1, %v5921_v52 }
 0x24f   : > { %4879 = vmatmul.msk.bf16.gmra.mxu0 %vm657_vm4, %v3907_v7  ;;  %v3458_v31 = vshll.u32 %v4815_v17, 16  ;;  %v3908_v60 = vpack.c.b16 %v3891_v25, %v3890_v33  ;;  %v2570_v20 = vpack.c.b16 %v2554_v13, %v2553_v32 }
 0x250   : > { %5019 = vst [vmem:[%s6386_s6 + $0x20] sm:$0xff] %v4959_v47   ;;  %v2945_v6 = vpop.f32.mrf.mxu2  ;;  %4653 = vmatmul.msk.bf16.gmra.mxu1 %vm657_vm4, %v2569_v15  ;;  %v4060_v7 = vadd.f32 %v3995_v56, %v3662_v48  ;;  %v3445_v47 = vor.u32 %v3444_v16, %v3441_v35 }
 0x251   : > { %v3009_v10 = vadd.f32 %v2945_v6, %v2722_v37  ;;  %v3460_v37 = vrot.slane %v3458_v31, 5  ;;  %v3855_v6 = vrot.slane %v6538_v49, 5 }
 0x252   : > { %v4096_v56 = vadd.f32 %v6346_v46, %v4060_v7  ;;  %v3446_v48 = vrot.slane %v3445_v47, 4  ;;  %v3858_v7 = vrot.slane %v4815_v17, 5 }
 0x253   : > { %v3461_v1 = vsel %vm5299_vm3, %v3456_v30, %v3460_v37  ;;  %v3857_v58 = vrot.slane %v3855_v6, 4  ;;  %v3856_v36 = vsel %vm5473_vm7, %v4864_v9, %v3855_v6  ;;  %v6688_v6 = vld [vmem:[#allocation6_spill] sm:$0xff] }
 0x254   : > { %v3997_v4 = vpop.f32.mrf.mxu0  ;;  %v3451_v52 = vsel %vm5299_vm3, %v3446_v48, %v3450_v42  ;;  %v3495_v55 = vunpack.c.l.b16 %v3461_v1  ;;  %v3892_v47 = vunpack.c.l.b16 %v3856_v36 }
 0x255   : > { %v3599_v11 = vpop.f32.mrf.mxu3  ;;  %4766 = vmatmul.msk.bf16.gmra.mxu2 %vm657_vm4, %v4933_v62  ;;  %v2663_v15 = vpop.f32.mrf.mxu1  ;;  %v4128_v62 = vmax.f32 %v4096_v56, 0.0  ;;  %v3494_v41 = vunpack.c.l.b16 %v3451_v52  ;;  %v3859_v42 = vsel %vm5473_vm7, %v3857_v58, %v3858_v7 }
 0x256   : > { %v3663_v34 = vadd.f32 %v3599_v11, %v3009_v10  ;;  %v2724_v35 = vadd.f32 %v2663_v15, %v5941_v21  ;;  %v3893_v17 = vunpack.c.l.b16 %v3859_v42 }
 0x257   : > { %v3511_v25 = vpack.c.b16 %v3495_v55, %v3494_v41 }
 0x258   : > { %v4061_v26 = vadd.f32 %v3997_v4, %v3663_v34  ;;  %v2948_v24 = vpop.f32.mrf.mxu2  ;;  %v4934_v4 = vld [vmem:[%s5287_s11 + $0xcc] sm:$0xff]  ;;  %v3909_v18 = vpack.c.b16 %v3893_v17, %v3892_v47 }
 0x259   : > { %v3010_v54 = vadd.f32 %v2948_v24, %v2723_v28 }
 0x25a   : > { %v4097_v44 = vadd.f32 %v6346_v46, %v4061_v26  ;;  %4831 = vmatmul.msk.bf16.gmra.mxu3 %vm657_vm4, %v3510_v59 }
 0x25c   : > { %v4129_v14 = vmax.f32 %v4097_v44, 0.0  ;;  %v4000_v38 = vpop.f32.mrf.mxu0 }
 0x25d   : > { %v3602_v10 = vpop.f32.mrf.mxu3  ;;  %v2666_v12 = vpop.f32.mrf.mxu1 }
 0x25e   : > { %v4964_v57 = vpack.c.bf16 %v4129_v14, %v4128_v62  ;;  %v3664_v49 = vadd.f32 %v3602_v10, %v3010_v54  ;;  %v2725_v24 = vadd.f32 %v2666_v12, %v5960_v29 }
 0x25f   : > { %4880 = vmatmul.msk.bf16.gmra.mxu0 %vm657_vm4, %v3908_v60 }
 0x260   : > { %5020 = vst [vmem:[%s6386_s6 + $0x28] sm:$0xff] %v4964_v57   ;;  %v2950_v16 = vpop.f32.mrf.mxu2  ;;  %4654 = vmatmul.msk.bf16.gmra.mxu1 %vm657_vm4, %v2570_v20  ;;  %v4062_v34 = vadd.f32 %v4000_v38, %v3664_v49 }
 0x261   : > { %v3011_v11 = vadd.f32 %v2950_v16, %v2724_v35 }
 0x262   : > { %v4098_v51 = vadd.f32 %v6346_v46, %v4062_v34 }
 0x264   : > { %v4002_v59 = vpop.f32.mrf.mxu0  ;;  %v4130_v32 = vmax.f32 %v4098_v51, 0.0 }
 0x265   : > { %v3604_v33 = vpop.f32.mrf.mxu3  ;;  %4767 = vmatmul.msk.bf16.gmra.mxu2 %vm657_vm4, %v4934_v4  ;;  %v2668_v21 = vpop.f32.mrf.mxu1 }
 0x266   : > { %v3665_v15 = vadd.f32 %v3604_v33, %v3011_v11  ;;  %v2726_v62 = vadd.f32 %v2668_v21, %v6688_v6 }
 0x268   : > { %v4063_v31 = vadd.f32 %v4002_v59, %v3665_v15  ;;  %v2953_v56 = vpop.f32.mrf.mxu2 }
 0x269   : > { %v3012_v28 = vadd.f32 %v2953_v56, %v2725_v24 }
 0x26a   : > { %v4099_v26 = vadd.f32 %v6346_v46, %v4063_v31  ;;  %4832 = vmatmul.msk.bf16.gmra.mxu3 %vm657_vm4, %v3511_v25 }
 0x26c   : > { %v4131_v13 = vmax.f32 %v4099_v26, 0.0  ;;  %v4005_v44 = vpop.f32.mrf.mxu0 }
 0x26d   : > { %v3607_v60 = vpop.f32.mrf.mxu3  ;;  %v2671_v48 = vpop.f32.mrf.mxu1 }
 0x26e   : > { %v4969_v30 = vpack.c.bf16 %v4131_v13, %v4130_v32  ;;  %v3666_v37 = vadd.f32 %v3607_v60, %v3012_v28  ;;  %v2727_v9 = vadd.f32 %v2671_v48, %v6003_v5 }
 0x26f   : > { %4881 = vmatmul.msk.bf16.gmra.mxu0 %vm657_vm4, %v3909_v18 }
 0x270   : > { %5021 = vst [vmem:[%s6386_s6 + $0x30] sm:$0xff] %v4969_v30   ;;  %v2955_v14 = vpop.f32.mrf.mxu2  ;;  %v4064_v54 = vadd.f32 %v4005_v44, %v3666_v37 }
 0x271   : > { %v3013_v38 = vadd.f32 %v2955_v14, %v2726_v62 }
 0x272   : > { %v4100_v12 = vadd.f32 %v6346_v46, %v4064_v54 }
 0x274   : > { %v4007_v29 = vpop.f32.mrf.mxu0  ;;  %v4132_v49 = vmax.f32 %v4100_v12, 0.0 }
 0x275   : > { %v3609_v20 = vpop.f32.mrf.mxu3  ;;  %v2673_v45 = vpop.f32.mrf.mxu1 }
 0x276   : > { %v3667_v10 = vadd.f32 %v3609_v20, %v3013_v38  ;;  %v2728_v55 = vadd.f32 %v2673_v45, %v6027_v22 }
 0x278   : > { %v4065_v57 = vadd.f32 %v4007_v29, %v3667_v10  ;;  %v2958_v52 = vpop.f32.mrf.mxu2 }
 0x279   : > { %v3014_v58 = vadd.f32 %v2958_v52, %v2727_v9 }
 0x27a   : > { %v4101_v1 = vadd.f32 %v6346_v46, %v4065_v57 }
 0x27c   : > { %v4133_v35 = vmax.f32 %v4101_v1, 0.0  ;;  %v4010_v16 = vpop.f32.mrf.mxu0 }
 0x27d   : > { %v3612_v7 = vpop.f32.mrf.mxu3  ;;  %v2676_v4 = vpop.f32.mrf.mxu1 }
 0x27e   : > { %v4974_v11 = vpack.c.bf16 %v4133_v35, %v4132_v49  ;;  %v3668_v41 = vadd.f32 %v3612_v7, %v3014_v58  ;;  %v2729_v51 = vadd.f32 %v2676_v4, %v6046_v19 }
 0x280   : > { %5022 = vst [vmem:[%s6386_s6 + $0x38] sm:$0xff] %v4974_v11   ;;  %v2960_v34 = vpop.f32.mrf.mxu2  ;;  %v4066_v36 = vadd.f32 %v4010_v16, %v3668_v41 }
 0x281   : > { %v3015_v59 = vadd.f32 %v2960_v34, %v2728_v55 }
 0x282   : > { %v4102_v5 = vadd.f32 %v6346_v46, %v4066_v36 }
 0x284   : > { %v4012_v42 = vpop.f32.mrf.mxu0  ;;  %v4134_v31 = vmax.f32 %v4102_v5, 0.0 }
 0x285   : > { %v3614_v33 = vpop.f32.mrf.mxu3  ;;  %v2678_v21 = vpop.f32.mrf.mxu1 }
 0x286   : > { %v3669_v15 = vadd.f32 %v3614_v33, %v3015_v59  ;;  %v2730_v44 = vadd.f32 %v2678_v21, %v6070_v53 }
 0x288   : > { %v4067_v25 = vadd.f32 %v4012_v42, %v3669_v15  ;;  %v2963_v47 = vpop.f32.mrf.mxu2 }
 0x289   : > { %v3016_v22 = vadd.f32 %v2963_v47, %v2729_v51 }
 0x28a   : > { %v4103_v17 = vadd.f32 %v6346_v46, %v4067_v25 }
 0x28c   : > { %v4135_v56 = vmax.f32 %v4103_v17, 0.0  ;;  %v4015_v26 = vpop.f32.mrf.mxu0 }
 0x28d   : > { %v3617_v24 = vpop.f32.mrf.mxu3  ;;  %v2681_v18 = vpop.f32.mrf.mxu1 }
 0x28e   : > { %v4979_v32 = vpack.c.bf16 %v4135_v56, %v4134_v31  ;;  %v3670_v13 = vadd.f32 %v3617_v24, %v3016_v22  ;;  %v2731_v29 = vadd.f32 %v2681_v18, %v6089_v2 }
 0x290   : > { %5023 = vst [vmem:[%s6386_s6 + $0x40] sm:$0xff] %v4979_v32   ;;  %v2965_v28 = vpop.f32.mrf.mxu2  ;;  %v4068_v48 = vadd.f32 %v4015_v26, %v3670_v13 }
 0x291   : > { %v3017_v60 = vadd.f32 %v2965_v28, %v2730_v44 }
 0x292   : > { %v4104_v19 = vadd.f32 %v6346_v46, %v4068_v48 }
 0x294   : > { %v4017_v30 = vpop.f32.mrf.mxu0  ;;  %v4136_v20 = vmax.f32 %v4104_v19, 0.0 }
 0x295   : > { %v3619_v37 = vpop.f32.mrf.mxu3  ;;  %v2683_v6 = vpop.f32.mrf.mxu1 }
 0x296   : > { %v3671_v62 = vadd.f32 %v3619_v37, %v3017_v60  ;;  %v2732_v9 = vadd.f32 %v2683_v6, %v6113_v40 }
 0x298   : > { %v4069_v14 = vadd.f32 %v4017_v30, %v3671_v62  ;;  %v2968_v38 = vpop.f32.mrf.mxu2 }
 0x299   : > { %v3018_v53 = vadd.f32 %v2968_v38, %v2731_v29 }
 0x29a   : > { %v4105_v54 = vadd.f32 %v6346_v46, %v4069_v14 }
 0x29c   : > { %v4137_v45 = vmax.f32 %v4105_v54, 0.0  ;;  %v4020_v10 = vpop.f32.mrf.mxu0 }
 0x29d   : > { %v3622_v12 = vpop.f32.mrf.mxu3  ;;  %v2686_v57 = vpop.f32.mrf.mxu1 }
 0x29e   : > { %v4984_v52 = vpack.c.bf16 %v4137_v45, %v4136_v20  ;;  %v3672_v1 = vadd.f32 %v3622_v12, %v3018_v53  ;;  %v2733_v59 = vadd.f32 %v2686_v57, %v6132_v8  ;;  %v6616_v8 = vld [vmem:[%s6677_s2] ss:$0 sm:$0xff] }
 0x2a0   : > { %5024 = vst [vmem:[%s6386_s6 + $0x48] sm:$0xff] %v4984_v52   ;;  %v2970_v49 = vpop.f32.mrf.mxu2  ;;  %v4070_v16 = vadd.f32 %v4020_v10, %v3672_v1 }
 0x2a1   : > { %v3019_v35 = vadd.f32 %v2970_v49, %v2732_v9 }
 0x2a2   : > { %v4106_v2 = vadd.f32 %v6346_v46, %v4070_v16 }
 0x2a4   : > { %v4022_v58 = vpop.f32.mrf.mxu0  ;;  %v4138_v36 = vmax.f32 %v4106_v2, 0.0 }
 0x2a5   : > { %v3624_v7 = vpop.f32.mrf.mxu3  ;;  %v2688_v4 = vpop.f32.mrf.mxu1 }
 0x2a6   : > { %v3673_v11 = vadd.f32 %v3624_v7, %v3019_v35  ;;  %v2734_v47 = vadd.f32 %v2688_v4, %v6156_v27 }
 0x2a8   : > { %v4071_v41 = vadd.f32 %v4022_v58, %v3673_v11  ;;  %v2973_v55 = vpop.f32.mrf.mxu2 }
 0x2a9   : > { %v3020_v40 = vadd.f32 %v2973_v55, %v2733_v59 }
 0x2aa   : > { %v4107_v34 = vadd.f32 %v6346_v46, %v4071_v41 }
 0x2ac   : > { %v4139_v42 = vmax.f32 %v4107_v34, 0.0  ;;  %v4025_v33 = vpop.f32.mrf.mxu0 }
 0x2ad   : > { %v3627_v21 = vpop.f32.mrf.mxu3  ;;  %v2691_v15 = vpop.f32.mrf.mxu1 }
 0x2ae   : > { %v4989_v5 = vpack.c.bf16 %v4139_v42, %v4138_v36  ;;  %v3674_v25 = vadd.f32 %v3627_v21, %v3020_v40  ;;  %v2735_v27 = vadd.f32 %v2691_v15, %v6175_v63 }
 0x2b0   : > { %5025 = vst [vmem:[%s6386_s6 + $0x50] sm:$0xff] %v4989_v5   ;;  %v2975_v17 = vpop.f32.mrf.mxu2  ;;  %v4072_v31 = vadd.f32 %v4025_v33, %v3674_v25 }
 0x2b1   : > { %v3021_v51 = vadd.f32 %v2975_v17, %v2734_v47 }
 0x2b2   : > { %v4108_v24 = vadd.f32 %v6616_v8, %v4072_v31 }
 0x2b4   : > { %v4027_v56 = vpop.f32.mrf.mxu0  ;;  %v4140_v44 = vmax.f32 %v4108_v24, 0.0 }
 0x2b5   : > { %v3629_v26 = vpop.f32.mrf.mxu3  ;;  %v2693_v46 = vpop.f32.mrf.mxu1 }
 0x2b6   : > { %v3675_v22 = vadd.f32 %v3629_v26, %v3021_v51  ;;  %v2736_v19 = vadd.f32 %v2693_v46, %v6199_v39 }
 0x2b8   : > { %v4073_v18 = vadd.f32 %v4027_v56, %v3675_v22  ;;  %v2978_v32 = vpop.f32.mrf.mxu2 }
 0x2b9   : > { %v3022_v48 = vadd.f32 %v2978_v32, %v2735_v27 }
 0x2ba   : > { %v4109_v13 = vadd.f32 %v6616_v8, %v4073_v18 }
 0x2bc   : > { %v4141_v28 = vmax.f32 %v4109_v13, 0.0  ;;  %v4030_v60 = vpop.f32.mrf.mxu0 }
 0x2bd   : > { %v3632_v30 = vpop.f32.mrf.mxu3  ;;  %v2696_v37 = vpop.f32.mrf.mxu1 }
 0x2be   : > { %v4994_v6 = vpack.c.bf16 %v4141_v28, %v4140_v44  ;;  %v3676_v62 = vadd.f32 %v3632_v30, %v3022_v48  ;;  %v2737_v52 = vadd.f32 %v2696_v37, %v6218_v50 }
 0x2c0   : > { %5026 = vst [vmem:[%s6386_s6 + $0x58] sm:$0xff] %v4994_v6   ;;  %v2980_v14 = vpop.f32.mrf.mxu2  ;;  %v4074_v54 = vadd.f32 %v4030_v60, %v3676_v62 }
 0x2c1   : > { %v3023_v38 = vadd.f32 %v2980_v14, %v2736_v19 }
 0x2c2   : > { %v4110_v63 = vadd.f32 %v6616_v8, %v4074_v54 }
 0x2c4   : > { %v4032_v29 = vpop.f32.mrf.mxu0  ;;  %v4142_v1 = vmax.f32 %v4110_v63, 0.0 }
 0x2c5   : > { %v3634_v20 = vpop.f32.mrf.mxu3  ;;  %v2698_v45 = vpop.f32.mrf.mxu1 }
 0x2c6   : > { %v3677_v10 = vadd.f32 %v3634_v20, %v3023_v38  ;;  %v2738_v4 = vadd.f32 %v2698_v45, %v6242_v3 }
 0x2c8   : > { %v4075_v53 = vadd.f32 %v4032_v29, %v3677_v10  ;;  %v2983_v12 = vpop.f32.mrf.mxu2 }
 0x2c9   : > { %v3024_v39 = vadd.f32 %v2983_v12, %v2737_v52 }
 0x2ca   : > { %v4111_v57 = vadd.f32 %v6616_v8, %v4075_v53 }
 0x2cc   : > { %v4143_v9 = vmax.f32 %v4111_v57, 0.0  ;;  %v4035_v49 = vpop.f32.mrf.mxu0 }
 0x2cd   : > { %v3637_v35 = vpop.f32.mrf.mxu3  ;;  %v2701_v58 = vpop.f32.mrf.mxu1 }
 0x2ce   : > { %v4999_v16 = vpack.c.bf16 %v4143_v9, %v4142_v1  ;;  %v3678_v7 = vadd.f32 %v3637_v35, %v3024_v39  ;;  %v2739_v21 = vadd.f32 %v2701_v58, %v6259_v23 }
 0x2d0   : > { %5027 = vst [vmem:[%s6386_s6 + $0x60] sm:$0xff] %v4999_v16   ;;  %v2985_v11 = vpop.f32.mrf.mxu2  ;;  %v4076_v41 = vadd.f32 %v4035_v49, %v3678_v7 }
 0x2d1   : > { %v3025_v2 = vadd.f32 %v2985_v11, %v2738_v4 }
 0x2d2   : > { %v4112_v50 = vadd.f32 %v6616_v8, %v4076_v41 }
 0x2d4   : > { %v4037_v55 = vpop.f32.mrf.mxu0  ;;  %v4144_v15 = vmax.f32 %v4112_v50, 0.0 }
 0x2d5   : > { %v3639_v34 = vpop.f32.mrf.mxu3  ;;  %v2703_v33 = vpop.f32.mrf.mxu1 }
 0x2d6   : > { %v3679_v59 = vadd.f32 %v3639_v34, %v3025_v2  ;;  %v2740_v31 = vadd.f32 %v2703_v33, %v6280_v0 }
 0x2d8   : > { %v4077_v36 = vadd.f32 %v4037_v55, %v3679_v59  ;;  %v2988_v42 = vpop.f32.mrf.mxu2 }
 0x2d9   : > { %v3026_v3 = vadd.f32 %v2988_v42, %v2739_v21 }
 0x2da   : > { %v4113_v40 = vadd.f32 %v6616_v8, %v4077_v36 }
 0x2dc   : > { %v4145_v5 = vmax.f32 %v4113_v40, 0.0  ;;  %v4040_v25 = vpop.f32.mrf.mxu0 }
 0x2dd   : > { %v3642_v47 = vpop.f32.mrf.mxu3  ;;  %v2706_v46 = vpop.f32.mrf.mxu1 }
 0x2de   : > { %v5004_v17 = vpack.c.bf16 %v4145_v5, %v4144_v15  ;;  %v3680_v51 = vadd.f32 %v3642_v47, %v3026_v3  ;;  %v2741_v28 = vadd.f32 %v2706_v46, %v6298_v43 }
 0x2e0   : > { %5028 = vst [vmem:[%s6386_s6 + $0x68] sm:$0xff] %v5004_v17   ;;  %v2990_v56 = vpop.f32.mrf.mxu2  ;;  %v4078_v22 = vadd.f32 %v4040_v25, %v3680_v51 }
 0x2e1   : > { %v3027_v26 = vadd.f32 %v2990_v56, %v2740_v31 }
 0x2e2   : > { %v4114_v23 = vadd.f32 %v6616_v8, %v4078_v22 }
 0x2e4   : > { %v4042_v24 = vpop.f32.mrf.mxu0  ;;  %v4146_v60 = vmax.f32 %v4114_v23, 0.0 }
 0x2e5   : > { %v3644_v18 = vpop.f32.mrf.mxu3  ;;  %v2708_v30 = vpop.f32.mrf.mxu1 }
 0x2e6   : > { %v3681_v32 = vadd.f32 %v3644_v18, %v3027_v26  ;;  %v2742_v14 = vadd.f32 %v2708_v30, %v6318_v61 }
 0x2e8   : > { %v4079_v13 = vadd.f32 %v4042_v24, %v3681_v32  ;;  %v2993_v27 = vpop.f32.mrf.mxu2 }
 0x2e9   : > { %v3028_v0 = vadd.f32 %v2993_v27, %v2741_v28 }
 0x2ea   : > { %v4115_v44 = vadd.f32 %v6616_v8, %v4079_v13 }
 0x2ec   : > { %v4147_v48 = vmax.f32 %v4115_v44, 0.0  ;;  %v4045_v37 = vpop.f32.mrf.mxu0 }
 0x2ed   : > { %v3647_v6 = vpop.f32.mrf.mxu3 }
 0x2ee   : > { %v5009_v62 = vpack.c.bf16 %v4147_v48, %v4146_v60  ;;  %v3682_v19 = vadd.f32 %v3647_v6, %v3028_v0 }
 0x2f0   : > { %5029 = vst [vmem:[%s6386_s6 + $0x70] sm:$0xff] %v5009_v62   ;;  %v2995_v38 = vpop.f32.mrf.mxu2  ;;  %v4080_v29 = vadd.f32 %v4045_v37, %v3682_v19 }
 0x2f1   : > { %v3029_v54 = vadd.f32 %v2995_v38, %v2742_v14 }
 0x2f2   : > { %v4116_v10 = vadd.f32 %v6616_v8, %v4080_v29 }
 0x2f4   : > { %v4047_v45 = vpop.f32.mrf.mxu0  ;;  %v4148_v61 = vmax.f32 %v4116_v10, 0.0 }
 0x2f5   : > { %v3649_v20 = vpop.f32.mrf.mxu3 }
 0x2f6   : > { %v3683_v43 = vadd.f32 %v3649_v20, %v3029_v54 }
 0x2f8   : > { %v4081_v63 = vadd.f32 %v4047_v45, %v3683_v43 }
 0x2fa   : > { %v4117_v53 = vadd.f32 %v6616_v8, %v4081_v63 }
 0x2fc   : > { %v4149_v12 = vmax.f32 %v4117_v53, 0.0 }
 0x2fe   : > { %v5014_v57 = vpack.c.bf16 %v4149_v12, %v4148_v61 }
 0x300   : > { %5030 = vst [vmem:[%s6386_s6 + $0x78] sm:$0xff] %v5014_v57  }
 0x301   : > { %5155 = shalt.err (!%p5152_p3)
}
 0x302   : > { %s5192_s4 = smov 64   ;;  %s5193_s5 = smov 4  }
 0x303   : > { %5035 = dma.vmem_to_hbm [thread:$0]  (%p5252_p5), %s4228_s19, 2048, %s4230_s20, %s4215_s16, %s5192_s4, %s5192_s4, %s5193_s5  }
 0x304 PF: > { %p5041_p4 = scmp.ge.s32.totalorder %s5190_s15, 2  ;;  %s4244_s6 = sand.u32 1, %s5178_s12  }
 0x305   : > { %s4245_s7 = scalar_lea.sflag [#allocation3], %s4244_s6 }
 0x306   : > { %p5038_p7 = pnand %p5041_p4, %p5256_p6 }
 0x308   : > { %p5039_p8 = pneg %p5038_p7 }
 0x30a   : > { %5173 = dma.done.wait (%p5039_p8), %s4245_s7, 2048  }
 0x30b   : > { %5175 = vsyncadd (%p5039_p8), %s4245_s7, 4294965248  ;;  %p13_p9 = scmp.ge.s32.totalorder %s5239_s18, 4   ;;  %s6689_s12 = smov %s5182_s13 }
 0x30c   : > { %s6690_s13 = smov %s5186_s14  ;;  %s6691_s14 = smov %s5250_s21 }
 0x30d   : > { %s6692_s15 = smov %s5239_s18  ;;  %15 = sbr.rel (!%p13_p9) target bundleno = 3 (0x3), region = 77 }
 0x312   :  { %4251 = vsyncpa [#allocation3], 1 }
 0x313   :  { %4253 = vsyncpa [#allocation3 + $0x1], 1 }

</bundles_post_ra>
